<compile_context>
chip_gen: v5e
topology: v5e:2x2
jax: 0.10.0
libtpu: 0.0.40
codegen_flags: <defaults>
</compile_context>

<pallas_src>
import functools

import jax
import jax.numpy as jnp
from jax import lax
from jax.experimental import pallas as pl
from jax.experimental.pallas import tpu as pltpu


def _window_max(v, length, shift):
    """max over offsets d=0..length-1 of `shift(v, d)` via log-doubling.

    `shift(a, s)` must return `a` displaced by s steps in the window direction
    with out-of-bounds positions replaced by -inf.  Uses ~log2(length) maxima.
    """
    w = v
    span = 1
    while span < length:
        step = min(span, length - span)
        w = jnp.maximum(w, shift(w, step))
        span += step
    return w


def _sppcsp_kernel(col_ref, x_ref, wpre_ref, wshort_ref, wpost_ref, wmerge_ref,
                   bpre_ref, bshort_ref, bpost_ref, bmerge_ref, o_ref,
                   *, H, W, kernel_sizes):
    """One batch element per grid step.

    col_ref    : (H*W, 1) int32   column index of each flat spatial position
    x_ref      : (1, H*W, Cin)    bf16, channels-last, flattened spatial
    wpre_ref   : (Cin, Cp)        bf16 BN-folded 1x1 weights (pre_conv)
    wshort_ref : (Cin, Cp)        bf16 BN-folded 1x1 weights (short_conv)
    wpost_ref  : (4, Cp, Cp)      bf16 post_conv weights, split per branch
    wmerge_ref : (2, Cp, Cop)     bf16 merge_conv weights, split per branch
    b*_ref     : (1, C)           f32 BN-folded biases
    o_ref      : (1, H*W, Cop)    f32 output
    """
    HW = H * W
    x = x_ref[0]                                    # (H*W, Cin) bf16
    col = col_ref[...]                              # (H*W, 1)   int32
    flat = lax.broadcasted_iota(jnp.int32, (HW, 1), 0)
    NEG = jnp.float32(-jnp.inf)

    def mm(a, w):
        return jnp.dot(a.astype(jnp.bfloat16), w,
                       preferred_element_type=jnp.float32)

    def silu(a):
        # a * sigmoid(a); exp and approx-reciprocal both ride the EUP slot.
        return a * pl.reciprocal(1.0 + jnp.exp(-a), approx=True)

    # --- shifted reads with -inf out-of-bounds, all via XLU sublane rolls ----
    def sh_h_fwd(v, s):   # v at column +s within the same row, else -inf
        r = pltpu.roll(v, shift=HW - s, axis=0)
        return jnp.where(col < (W - s), r, NEG)

    def sh_h_bwd(v, s):   # v at column -s within the same row, else -inf
        r = pltpu.roll(v, shift=s, axis=0)
        return jnp.where(col >= s, r, NEG)

    def sh_v_fwd(v, s):   # v at row +s within the image, else -inf
        r = pltpu.roll(v, shift=HW - s * W, axis=0)
        return jnp.where(flat < (HW - s * W), r, NEG)

    def sh_v_bwd(v, s):   # v at row -s within the image, else -inf
        r = pltpu.roll(v, shift=s * W, axis=0)
        return jnp.where(flat >= s * W, r, NEG)

    def maxpool_same(a, k):
        """Stride-1 'same' k x k max pool on the flat (H*W, C) slab.

        Separable; each centered 1-D window is the union of a forward and a
        backward anchored window of size k//2+1 (both include the center), each
        built with log-doubling.  PyTorch's implicit -inf padding is reproduced
        exactly by the per-shift masks.
        """
        n = k // 2 + 1
        h = jnp.maximum(_window_max(a, n, sh_h_fwd),
                        _window_max(a, n, sh_h_bwd))
        return jnp.maximum(_window_max(h, n, sh_v_fwd),
                           _window_max(h, n, sh_v_bwd))

    # pre_conv branch: 1x1 conv (BN folded) + SiLU.
    pre = silu(mm(x, wpre_ref[...]) + bpre_ref[...])          # (H*W, Cp) f32

    # post_conv over concat([pre, p1, p2, p3]) as 4 blocked matmuls, interleaved
    # with the chained pools (keeps peak live intermediates low and overlaps
    # MXU matmuls with VPU/XLU pooling).
    acc = mm(pre, wpost_ref[0])
    p = maxpool_same(pre, kernel_sizes[0])
    acc = acc + mm(p, wpost_ref[1])
    p = maxpool_same(p, kernel_sizes[1])
    acc = acc + mm(p, wpost_ref[2])
    p = maxpool_same(p, kernel_sizes[2])
    acc = acc + mm(p, wpost_ref[3])
    y1 = silu(acc + bpost_ref[...])                           # (H*W, Cp)

    # short_conv branch, computed late so it is not live through the pooling
    # phase; its matmul overlaps the tail of the last pool.
    y2 = silu(mm(x, wshort_ref[...]) + bshort_ref[...])       # (H*W, Cp)

    # merge_conv over concat([y1, y2]) as 2 blocked matmuls.
    out = silu(mm(y1, wmerge_ref[0]) + mm(y2, wmerge_ref[1]) + bmerge_ref[...])
    o_ref[0] = out.astype(o_ref.dtype)


def sppcsp_tiny_conv_pallas(x_nchw, params, out_channels, kernel_sizes=(5, 9, 13)):
    """x_nchw: (N, Cin, H, W) float32. Returns (N, out_channels, H, W) float32."""
    (wpre, wshort, wpost, wmerge, bpre, bshort, bpost, bmerge) = params
    N, Cin, H, W = x_nchw.shape
    HW = H * W
    Cp = wpre.shape[1]        # padded neck channels (multiple of 128)
    Cop = wmerge.shape[-1]    # padded out channels  (multiple of 128)

    # NCHW -> channels-last flat spatial, bf16 (halves input HBM traffic and
    # feeds the MXU directly).  Kept only because the module spec is NCHW.
    x = jnp.transpose(x_nchw, (0, 2, 3, 1)).reshape(N, HW, Cin)
    x = x.astype(jnp.bfloat16)

    # Column index of each flat spatial position (drives the pooling edge masks).
    col = (jnp.arange(HW, dtype=jnp.int32) % W).reshape(HW, 1)

    kernel = functools.partial(
        _sppcsp_kernel, H=H, W=W, kernel_sizes=tuple(kernel_sizes))

    out = pl.pallas_call(
        kernel,
        out_shape=jax.ShapeDtypeStruct((N, HW, Cop), jnp.float32),
        grid_spec=pltpu.PrefetchScalarGridSpec(
            num_scalar_prefetch=0,
            grid=(N,),
            in_specs=[
                pl.BlockSpec((HW, 1), lambda n: (0, 0)),        # col
                pl.BlockSpec((1, HW, Cin), lambda n: (n, 0, 0)),  # x
                pl.BlockSpec((Cin, Cp), lambda n: (0, 0)),        # wpre
                pl.BlockSpec((Cin, Cp), lambda n: (0, 0)),        # wshort
                pl.BlockSpec((4, Cp, Cp), lambda n: (0, 0, 0)),   # wpost
                pl.BlockSpec((2, Cp, Cop), lambda n: (0, 0, 0)),  # wmerge
                pl.BlockSpec((1, Cp), lambda n: (0, 0)),          # bpre
                pl.BlockSpec((1, Cp), lambda n: (0, 0)),          # bshort
                pl.BlockSpec((1, Cp), lambda n: (0, 0)),          # bpost
                pl.BlockSpec((1, Cop), lambda n: (0, 0)),         # bmerge
            ],
            out_specs=pl.BlockSpec((1, HW, Cop), lambda n: (n, 0, 0)),
        ),
        compiler_params=pltpu.CompilerParams(
            dimension_semantics=("parallel",),
            vmem_limit_bytes=48 * 1024 * 1024),
    )(col, x, wpre, wshort, wpost, wmerge, bpre, bshort, bpost, bmerge)

    # (N, H*W, Cop) -> slice real channels -> (N, Cout, H, W)
    out = out[:, :, :out_channels].reshape(N, H, W, out_channels)
    return jnp.transpose(out, (0, 3, 1, 2))


# ----------------------------- parameter glue --------------------------------

def _fold_bn(p, eps):
    """Fold eval-mode BatchNorm into a bias-free 1x1 conv; (Cin,Cout) W, (Cout,) b."""
    scale = p["gamma"] / jnp.sqrt(p["var"] + eps)
    w_io = jnp.transpose(p["w"][:, :, 0, 0], (1, 0)) * scale[None, :]
    bias = p["beta"] - p["mean"] * scale
    return w_io, bias


def _round_up(n, m):
    return -(-n // m) * m


def make_raw_params(key, in_channels, out_channels, expand=0.5, eps=1e-3):
    """Deterministic synthetic torch-style parameters (eval-mode BN stats)."""
    neck = int(2 * out_channels * expand)
    conv_defs = [("pre", in_channels, neck),
                 ("short", in_channels, neck),
                 ("post", 4 * neck, neck),
                 ("merge", 2 * neck, out_channels)]
    raw = {"eps": eps, "neck": neck}
    for kkey, (name, ci, co) in zip(jax.random.split(key, len(conv_defs)), conv_defs):
        k0, k1, k2, k3, k4 = jax.random.split(kkey, 5)
        raw[name] = dict(
            w=0.1 * jax.random.normal(k0, (co, ci, 1, 1), jnp.float32),  # OIHW
            gamma=1.0 + 0.1 * jax.random.normal(k1, (co,), jnp.float32),
            beta=0.1 * jax.random.normal(k2, (co,), jnp.float32),
            mean=0.1 * jax.random.normal(k3, (co,), jnp.float32),
            var=jax.random.uniform(k4, (co,), jnp.float32, minval=0.5, maxval=1.5))
    return raw


def pack_params(raw, out_channels):
    """Fold BN, zero-pad neck/out channels to multiples of 128 (lane-dense),
    split the concat convs into per-branch blocks, cast matmul weights to bf16."""
    eps = raw["eps"]
    neck = raw["neck"]
    cp = max(128, _round_up(neck, 128))
    cop = max(128, _round_up(out_channels, 128))
    dn = cp - neck
    do = cop - out_channels

    wpre, bpre = _fold_bn(raw["pre"], eps)        # (Cin, neck), (neck,)
    wshort, bshort = _fold_bn(raw["short"], eps)
    wpost, bpost = _fold_bn(raw["post"], eps)     # (4*neck, neck), (neck,)
    wmerge, bmerge = _fold_bn(raw["merge"], eps)  # (2*neck, out), (out,)

    wpre = jnp.pad(wpre, ((0, 0), (0, dn)))
    wshort = jnp.pad(wshort, ((0, 0), (0, dn)))
    wpost = jnp.pad(wpost.reshape(4, neck, neck), ((0, 0), (0, dn), (0, dn)))
    wmerge = jnp.pad(wmerge.reshape(2, neck, out_channels),
                     ((0, 0), (0, dn), (0, do)))
    bpre = jnp.pad(bpre, (0, dn))
    bshort = jnp.pad(bshort, (0, dn))
    bpost = jnp.pad(bpost, (0, dn))
    bmerge = jnp.pad(bmerge, (0, do))

    bf = jnp.bfloat16
    return (wpre.astype(bf), wshort.astype(bf), wpost.astype(bf), wmerge.astype(bf),
            bpre[None, :], bshort[None, :], bpost[None, :], bmerge[None, :])


# ------------------------------- reference -----------------------------------

def sppcsp_reference(x_nchw, raw, kernel_sizes=(5, 9, 13)):
    """Pure-JAX f32 reference mirroring the torch module (eval-mode BN)."""
    eps = raw["eps"]

    def conv_bn_silu(x, p):
        dn = lax.conv_dimension_numbers(x.shape, p["w"].shape, ("NCHW", "OIHW", "NCHW"))
        y = lax.conv_general_dilated(x, p["w"], (1, 1), ((0, 0), (0, 0)),
                                     dimension_numbers=dn)
        sh = (1, -1, 1, 1)
        y = (y - p["mean"].reshape(sh)) / jnp.sqrt(p["var"].reshape(sh) + eps) \
            * p["gamma"].reshape(sh) + p["beta"].reshape(sh)
        return y * jax.nn.sigmoid(y)

    def maxpool_same(x, k):
        pad = k // 2
        return lax.reduce_window(
            x, -jnp.inf, lax.max,
            window_dimensions=(1, 1, k, k), window_strides=(1, 1, 1, 1),
            padding=((0, 0), (0, 0), (pad, pad), (pad, pad)))

    pre = conv_bn_silu(x_nchw, raw["pre"])
    feats = [pre]
    for k in kernel_sizes:
        feats.append(maxpool_same(feats[-1], k))
    feats = jnp.concatenate(feats, axis=1)
    y1 = conv_bn_silu(feats, raw["post"])
    y2 = conv_bn_silu(x_nchw, raw["short"])
    y = jnp.concatenate([y1, y2], axis=1)
    return conv_bn_silu(y, raw["merge"])


if __name__ == "__main__":
    N, Cin, Cout, H, W = 2, 4, 8, 16, 16
    key = jax.random.PRNGKey(0)
    kx, kp = jax.random.split(key)
    x = jax.random.normal(kx, (N, Cin, H, W), jnp.float32)

    raw = make_raw_params(kp, Cin, Cout)
    params = pack_params(raw, Cout)

    out = sppcsp_tiny_conv_pallas(x, params, Cout)
    out = jax.block_until_ready(out)

    ref = sppcsp_reference(x, raw)
    assert out.shape == (N, Cout, H, W)
    err = jnp.abs(out - ref)
    tol = 2e-2 + 2e-2 * jnp.abs(ref)   # bf16 MXU operands + approx reciprocal
    ok = bool(jnp.all(err <= tol))
    assert ok, f"mismatch vs reference: max_abs_err={float(jnp.max(err))}"
    print("KERNEL_OK")
</pallas_src>

<mosaic_0001>
module attributes {stable_mosaic.version = 11 : i64} {
  func.func @_sppcsp_kernel(%arg0: i32, %arg1: memref<256x1xi32, #tpu.memory_space<vmem>>, %arg2: memref<1x256x4xbf16, #tpu.memory_space<vmem>>, %arg3: memref<4x128xbf16, #tpu.memory_space<vmem>>, %arg4: memref<4x128xbf16, #tpu.memory_space<vmem>>, %arg5: memref<4x128x128xbf16, #tpu.memory_space<vmem>>, %arg6: memref<2x128x128xbf16, #tpu.memory_space<vmem>>, %arg7: memref<1x128xf32, #tpu.memory_space<vmem>>, %arg8: memref<1x128xf32, #tpu.memory_space<vmem>>, %arg9: memref<1x128xf32, #tpu.memory_space<vmem>>, %arg10: memref<1x128xf32, #tpu.memory_space<vmem>>, %arg11: memref<1x256x128xf32, #tpu.memory_space<vmem>>) attributes {dimension_semantics = [#tpu.dimension_semantics<parallel>], iteration_bounds = array<i64: 2>, scalar_prefetch = 0 : i64, scratch_operands = 0 : i64, tpu.core_type = #tpu.core_type<tc>, window_params = [{pipeline_mode = #tpu.pipeline_mode<synchronous>, transform_indices = @transform_0, window_bounds = array<i64: 256, 1>}, {transform_indices = @transform_1, window_bounds = array<i64: 1, 256, 4>}, {pipeline_mode = #tpu.pipeline_mode<synchronous>, transform_indices = @transform_2, window_bounds = array<i64: 4, 128>}, {pipeline_mode = #tpu.pipeline_mode<synchronous>, transform_indices = @transform_3, window_bounds = array<i64: 4, 128>}, {pipeline_mode = #tpu.pipeline_mode<synchronous>, transform_indices = @transform_4, window_bounds = array<i64: 4, 128, 128>}, {pipeline_mode = #tpu.pipeline_mode<synchronous>, transform_indices = @transform_5, window_bounds = array<i64: 2, 128, 128>}, {pipeline_mode = #tpu.pipeline_mode<synchronous>, transform_indices = @transform_6, window_bounds = array<i64: 1, 128>}, {pipeline_mode = #tpu.pipeline_mode<synchronous>, transform_indices = @transform_7, window_bounds = array<i64: 1, 128>}, {pipeline_mode = #tpu.pipeline_mode<synchronous>, transform_indices = @transform_8, window_bounds = array<i64: 1, 128>}, {pipeline_mode = #tpu.pipeline_mode<synchronous>, transform_indices = @transform_9, window_bounds = array<i64: 1, 128>}, {transform_indices = @transform_10, window_bounds = array<i64: 1, 256, 128>}]} {
    %c0 = arith.constant 0 : index
    %c0_0 = arith.constant 0 : index
    %c0_1 = arith.constant 0 : index
    %0 = vector.load %arg2[%c0, %c0_0, %c0_1] : memref<1x256x4xbf16, #tpu.memory_space<vmem>>, vector<1x256x4xbf16>
    %1 = vector.shape_cast %0 : vector<1x256x4xbf16> to vector<256x4xbf16>
    %c0_2 = arith.constant 0 : index
    %c0_3 = arith.constant 0 : index
    %2 = vector.load %arg1[%c0_2, %c0_3] : memref<256x1xi32, #tpu.memory_space<vmem>>, vector<256x1xi32>
    %3 = tpu.iota {dimensions = array<i32: 0>} : vector<256x1xi32>
    %c0_4 = arith.constant 0 : index
    %c0_5 = arith.constant 0 : index
    %4 = vector.load %arg3[%c0_4, %c0_5] : memref<4x128xbf16, #tpu.memory_space<vmem>>, vector<4x128xbf16>
    %cst = arith.constant dense<0.000000e+00> : vector<256x128xf32>
    %5 = tpu.matmul %1, %4, %cst {dimension_numbers = #tpu.dot_dimension_numbers<[1], [0], [0], [1], [0, 0, 1, 1], [], []>} : vector<256x4xbf16>, vector<4x128xbf16>, vector<256x128xf32> -> vector<256x128xf32>
    %c0_6 = arith.constant 0 : index
    %c0_7 = arith.constant 0 : index
    %6 = vector.load %arg7[%c0_6, %c0_7] : memref<1x128xf32, #tpu.memory_space<vmem>>, vector<1x128xf32>
    %7 = vector.broadcast %6 : vector<1x128xf32> to vector<256x128xf32>
    %8 = arith.addf %5, %7 : vector<256x128xf32>
    %cst_8 = arith.constant 0.000000e+00 : f32
    %9 = vector.broadcast %cst_8 : f32 to vector<256x128xf32>
    %10 = arith.subf %9, %8 : vector<256x128xf32>
    %11 = math.exp %10 : vector<256x128xf32>
    %cst_9 = arith.constant 1.000000e+00 : f32
    %12 = vector.broadcast %cst_9 : f32 to vector<256x128xf32>
    %13 = arith.addf %12, %11 : vector<256x128xf32>
    %14 = tpu.reciprocal %13 {approx = true} : vector<256x128xf32> -> vector<256x128xf32>
    %15 = arith.mulf %8, %14 : vector<256x128xf32>
    %c0_10 = arith.constant 0 : index
    %c0_11 = arith.constant 0 : index
    %c0_12 = arith.constant 0 : index
    %16 = vector.load %arg5[%c0_10, %c0_11, %c0_12] : memref<4x128x128xbf16, #tpu.memory_space<vmem>>, vector<1x128x128xbf16>
    %17 = vector.shape_cast %16 : vector<1x128x128xbf16> to vector<128x128xbf16>
    %18 = arith.truncf %15 : vector<256x128xf32> to vector<256x128xbf16>
    %cst_13 = arith.constant dense<0.000000e+00> : vector<256x128xf32>
    %19 = tpu.matmul %18, %17, %cst_13 {dimension_numbers = #tpu.dot_dimension_numbers<[1], [0], [0], [1], [0, 0, 1, 1], [], []>} : vector<256x128xbf16>, vector<128x128xbf16>, vector<256x128xf32> -> vector<256x128xf32>
    %c255_i32 = arith.constant 255 : i32
    %20 = tpu.dynamic_rotate %15 by %c255_i32 dim 0 : vector<256x128xf32>, i32 -> vector<256x128xf32>
    %c15_i32 = arith.constant 15 : i32
    %21 = vector.broadcast %c15_i32 : i32 to vector<256x1xi32>
    %22 = arith.cmpi slt, %2, %21 : vector<256x1xi32>
    %cst_14 = arith.constant 0xFF800000 : f32
    %23 = vector.shape_cast %22 : vector<256x1xi1> to vector<256x1xi1>
    %24 = vector.broadcast %23 : vector<256x1xi1> to vector<256x128xi1>
    %25 = vector.broadcast %cst_14 : f32 to vector<256x128xf32>
    %26 = arith.select %24, %20, %25 : vector<256x128xi1>, vector<256x128xf32>
    %27 = arith.maximumf %15, %26 : vector<256x128xf32>
    %c255_i32_15 = arith.constant 255 : i32
    %28 = tpu.dynamic_rotate %27 by %c255_i32_15 dim 0 : vector<256x128xf32>, i32 -> vector<256x128xf32>
    %c15_i32_16 = arith.constant 15 : i32
    %29 = vector.broadcast %c15_i32_16 : i32 to vector<256x1xi32>
    %30 = arith.cmpi slt, %2, %29 : vector<256x1xi32>
    %cst_17 = arith.constant 0xFF800000 : f32
    %31 = vector.shape_cast %30 : vector<256x1xi1> to vector<256x1xi1>
    %32 = vector.broadcast %31 : vector<256x1xi1> to vector<256x128xi1>
    %33 = vector.broadcast %cst_17 : f32 to vector<256x128xf32>
    %34 = arith.select %32, %28, %33 : vector<256x128xi1>, vector<256x128xf32>
    %35 = arith.maximumf %27, %34 : vector<256x128xf32>
    %c1_i32 = arith.constant 1 : i32
    %36 = tpu.dynamic_rotate %15 by %c1_i32 dim 0 : vector<256x128xf32>, i32 -> vector<256x128xf32>
    %c1_i32_18 = arith.constant 1 : i32
    %37 = vector.broadcast %c1_i32_18 : i32 to vector<256x1xi32>
    %38 = arith.cmpi sge, %2, %37 : vector<256x1xi32>
    %cst_19 = arith.constant 0xFF800000 : f32
    %39 = vector.shape_cast %38 : vector<256x1xi1> to vector<256x1xi1>
    %40 = vector.broadcast %39 : vector<256x1xi1> to vector<256x128xi1>
    %41 = vector.broadcast %cst_19 : f32 to vector<256x128xf32>
    %42 = arith.select %40, %36, %41 : vector<256x128xi1>, vector<256x128xf32>
    %43 = arith.maximumf %15, %42 : vector<256x128xf32>
    %c1_i32_20 = arith.constant 1 : i32
    %44 = tpu.dynamic_rotate %43 by %c1_i32_20 dim 0 : vector<256x128xf32>, i32 -> vector<256x128xf32>
    %c1_i32_21 = arith.constant 1 : i32
    %45 = vector.broadcast %c1_i32_21 : i32 to vector<256x1xi32>
    %46 = arith.cmpi sge, %2, %45 : vector<256x1xi32>
    %cst_22 = arith.constant 0xFF800000 : f32
    %47 = vector.shape_cast %46 : vector<256x1xi1> to vector<256x1xi1>
    %48 = vector.broadcast %47 : vector<256x1xi1> to vector<256x128xi1>
    %49 = vector.broadcast %cst_22 : f32 to vector<256x128xf32>
    %50 = arith.select %48, %44, %49 : vector<256x128xi1>, vector<256x128xf32>
    %51 = arith.maximumf %43, %50 : vector<256x128xf32>
    %52 = arith.maximumf %35, %51 : vector<256x128xf32>
    %c240_i32 = arith.constant 240 : i32
    %53 = tpu.dynamic_rotate %52 by %c240_i32 dim 0 : vector<256x128xf32>, i32 -> vector<256x128xf32>
    %c240_i32_23 = arith.constant 240 : i32
    %54 = vector.broadcast %c240_i32_23 : i32 to vector<256x1xi32>
    %55 = arith.cmpi slt, %3, %54 : vector<256x1xi32>
    %cst_24 = arith.constant 0xFF800000 : f32
    %56 = vector.shape_cast %55 : vector<256x1xi1> to vector<256x1xi1>
    %57 = vector.broadcast %56 : vector<256x1xi1> to vector<256x128xi1>
    %58 = vector.broadcast %cst_24 : f32 to vector<256x128xf32>
    %59 = arith.select %57, %53, %58 : vector<256x128xi1>, vector<256x128xf32>
    %60 = arith.maximumf %52, %59 : vector<256x128xf32>
    %c240_i32_25 = arith.constant 240 : i32
    %61 = tpu.dynamic_rotate %60 by %c240_i32_25 dim 0 : vector<256x128xf32>, i32 -> vector<256x128xf32>
    %c240_i32_26 = arith.constant 240 : i32
    %62 = vector.broadcast %c240_i32_26 : i32 to vector<256x1xi32>
    %63 = arith.cmpi slt, %3, %62 : vector<256x1xi32>
    %cst_27 = arith.constant 0xFF800000 : f32
    %64 = vector.shape_cast %63 : vector<256x1xi1> to vector<256x1xi1>
    %65 = vector.broadcast %64 : vector<256x1xi1> to vector<256x128xi1>
    %66 = vector.broadcast %cst_27 : f32 to vector<256x128xf32>
    %67 = arith.select %65, %61, %66 : vector<256x128xi1>, vector<256x128xf32>
    %68 = arith.maximumf %60, %67 : vector<256x128xf32>
    %c16_i32 = arith.constant 16 : i32
    %69 = tpu.dynamic_rotate %52 by %c16_i32 dim 0 : vector<256x128xf32>, i32 -> vector<256x128xf32>
    %c16_i32_28 = arith.constant 16 : i32
    %70 = vector.broadcast %c16_i32_28 : i32 to vector<256x1xi32>
    %71 = arith.cmpi sge, %3, %70 : vector<256x1xi32>
    %cst_29 = arith.constant 0xFF800000 : f32
    %72 = vector.shape_cast %71 : vector<256x1xi1> to vector<256x1xi1>
    %73 = vector.broadcast %72 : vector<256x1xi1> to vector<256x128xi1>
    %74 = vector.broadcast %cst_29 : f32 to vector<256x128xf32>
    %75 = arith.select %73, %69, %74 : vector<256x128xi1>, vector<256x128xf32>
    %76 = arith.maximumf %52, %75 : vector<256x128xf32>
    %c16_i32_30 = arith.constant 16 : i32
    %77 = tpu.dynamic_rotate %76 by %c16_i32_30 dim 0 : vector<256x128xf32>, i32 -> vector<256x128xf32>
    %c16_i32_31 = arith.constant 16 : i32
    %78 = vector.broadcast %c16_i32_31 : i32 to vector<256x1xi32>
    %79 = arith.cmpi sge, %3, %78 : vector<256x1xi32>
    %cst_32 = arith.constant 0xFF800000 : f32
    %80 = vector.shape_cast %79 : vector<256x1xi1> to vector<256x1xi1>
    %81 = vector.broadcast %80 : vector<256x1xi1> to vector<256x128xi1>
    %82 = vector.broadcast %cst_32 : f32 to vector<256x128xf32>
    %83 = arith.select %81, %77, %82 : vector<256x128xi1>, vector<256x128xf32>
    %84 = arith.maximumf %76, %83 : vector<256x128xf32>
    %85 = arith.maximumf %68, %84 : vector<256x128xf32>
    %c1 = arith.constant 1 : index
    %c0_33 = arith.constant 0 : index
    %c0_34 = arith.constant 0 : index
    %86 = vector.load %arg5[%c1, %c0_33, %c0_34] : memref<4x128x128xbf16, #tpu.memory_space<vmem>>, vector<1x128x128xbf16>
    %87 = vector.shape_cast %86 : vector<1x128x128xbf16> to vector<128x128xbf16>
    %88 = arith.truncf %85 : vector<256x128xf32> to vector<256x128xbf16>
    %cst_35 = arith.constant dense<0.000000e+00> : vector<256x128xf32>
    %89 = tpu.matmul %88, %87, %cst_35 {dimension_numbers = #tpu.dot_dimension_numbers<[1], [0], [0], [1], [0, 0, 1, 1], [], []>} : vector<256x128xbf16>, vector<128x128xbf16>, vector<256x128xf32> -> vector<256x128xf32>
    %90 = arith.addf %19, %89 : vector<256x128xf32>
    %c255_i32_36 = arith.constant 255 : i32
    %91 = tpu.dynamic_rotate %85 by %c255_i32_36 dim 0 : vector<256x128xf32>, i32 -> vector<256x128xf32>
    %c15_i32_37 = arith.constant 15 : i32
    %92 = vector.broadcast %c15_i32_37 : i32 to vector<256x1xi32>
    %93 = arith.cmpi slt, %2, %92 : vector<256x1xi32>
    %cst_38 = arith.constant 0xFF800000 : f32
    %94 = vector.shape_cast %93 : vector<256x1xi1> to vector<256x1xi1>
    %95 = vector.broadcast %94 : vector<256x1xi1> to vector<256x128xi1>
    %96 = vector.broadcast %cst_38 : f32 to vector<256x128xf32>
    %97 = arith.select %95, %91, %96 : vector<256x128xi1>, vector<256x128xf32>
    %98 = arith.maximumf %85, %97 : vector<256x128xf32>
    %c254_i32 = arith.constant 254 : i32
    %99 = tpu.dynamic_rotate %98 by %c254_i32 dim 0 : vector<256x128xf32>, i32 -> vector<256x128xf32>
    %c14_i32 = arith.constant 14 : i32
    %100 = vector.broadcast %c14_i32 : i32 to vector<256x1xi32>
    %101 = arith.cmpi slt, %2, %100 : vector<256x1xi32>
    %cst_39 = arith.constant 0xFF800000 : f32
    %102 = vector.shape_cast %101 : vector<256x1xi1> to vector<256x1xi1>
    %103 = vector.broadcast %102 : vector<256x1xi1> to vector<256x128xi1>
    %104 = vector.broadcast %cst_39 : f32 to vector<256x128xf32>
    %105 = arith.select %103, %99, %104 : vector<256x128xi1>, vector<256x128xf32>
    %106 = arith.maximumf %98, %105 : vector<256x128xf32>
    %c255_i32_40 = arith.constant 255 : i32
    %107 = tpu.dynamic_rotate %106 by %c255_i32_40 dim 0 : vector<256x128xf32>, i32 -> vector<256x128xf32>
    %c15_i32_41 = arith.constant 15 : i32
    %108 = vector.broadcast %c15_i32_41 : i32 to vector<256x1xi32>
    %109 = arith.cmpi slt, %2, %108 : vector<256x1xi32>
    %cst_42 = arith.constant 0xFF800000 : f32
    %110 = vector.shape_cast %109 : vector<256x1xi1> to vector<256x1xi1>
    %111 = vector.broadcast %110 : vector<256x1xi1> to vector<256x128xi1>
    %112 = vector.broadcast %cst_42 : f32 to vector<256x128xf32>
    %113 = arith.select %111, %107, %112 : vector<256x128xi1>, vector<256x128xf32>
    %114 = arith.maximumf %106, %113 : vector<256x128xf32>
    %c1_i32_43 = arith.constant 1 : i32
    %115 = tpu.dynamic_rotate %85 by %c1_i32_43 dim 0 : vector<256x128xf32>, i32 -> vector<256x128xf32>
    %c1_i32_44 = arith.constant 1 : i32
    %116 = vector.broadcast %c1_i32_44 : i32 to vector<256x1xi32>
    %117 = arith.cmpi sge, %2, %116 : vector<256x1xi32>
    %cst_45 = arith.constant 0xFF800000 : f32
    %118 = vector.shape_cast %117 : vector<256x1xi1> to vector<256x1xi1>
    %119 = vector.broadcast %118 : vector<256x1xi1> to vector<256x128xi1>
    %120 = vector.broadcast %cst_45 : f32 to vector<256x128xf32>
    %121 = arith.select %119, %115, %120 : vector<256x128xi1>, vector<256x128xf32>
    %122 = arith.maximumf %85, %121 : vector<256x128xf32>
    %c2_i32 = arith.constant 2 : i32
    %123 = tpu.dynamic_rotate %122 by %c2_i32 dim 0 : vector<256x128xf32>, i32 -> vector<256x128xf32>
    %c2_i32_46 = arith.constant 2 : i32
    %124 = vector.broadcast %c2_i32_46 : i32 to vector<256x1xi32>
    %125 = arith.cmpi sge, %2, %124 : vector<256x1xi32>
    %cst_47 = arith.constant 0xFF800000 : f32
    %126 = vector.shape_cast %125 : vector<256x1xi1> to vector<256x1xi1>
    %127 = vector.broadcast %126 : vector<256x1xi1> to vector<256x128xi1>
    %128 = vector.broadcast %cst_47 : f32 to vector<256x128xf32>
    %129 = arith.select %127, %123, %128 : vector<256x128xi1>, vector<256x128xf32>
    %130 = arith.maximumf %122, %129 : vector<256x128xf32>
    %c1_i32_48 = arith.constant 1 : i32
    %131 = tpu.dynamic_rotate %130 by %c1_i32_48 dim 0 : vector<256x128xf32>, i32 -> vector<256x128xf32>
    %c1_i32_49 = arith.constant 1 : i32
    %132 = vector.broadcast %c1_i32_49 : i32 to vector<256x1xi32>
    %133 = arith.cmpi sge, %2, %132 : vector<256x1xi32>
    %cst_50 = arith.constant 0xFF800000 : f32
    %134 = vector.shape_cast %133 : vector<256x1xi1> to vector<256x1xi1>
    %135 = vector.broadcast %134 : vector<256x1xi1> to vector<256x128xi1>
    %136 = vector.broadcast %cst_50 : f32 to vector<256x128xf32>
    %137 = arith.select %135, %131, %136 : vector<256x128xi1>, vector<256x128xf32>
    %138 = arith.maximumf %130, %137 : vector<256x128xf32>
    %139 = arith.maximumf %114, %138 : vector<256x128xf32>
    %c240_i32_51 = arith.constant 240 : i32
    %140 = tpu.dynamic_rotate %139 by %c240_i32_51 dim 0 : vector<256x128xf32>, i32 -> vector<256x128xf32>
    %c240_i32_52 = arith.constant 240 : i32
    %141 = vector.broadcast %c240_i32_52 : i32 to vector<256x1xi32>
    %142 = arith.cmpi slt, %3, %141 : vector<256x1xi32>
    %cst_53 = arith.constant 0xFF800000 : f32
    %143 = vector.shape_cast %142 : vector<256x1xi1> to vector<256x1xi1>
    %144 = vector.broadcast %143 : vector<256x1xi1> to vector<256x128xi1>
    %145 = vector.broadcast %cst_53 : f32 to vector<256x128xf32>
    %146 = arith.select %144, %140, %145 : vector<256x128xi1>, vector<256x128xf32>
    %147 = arith.maximumf %139, %146 : vector<256x128xf32>
    %c224_i32 = arith.constant 224 : i32
    %148 = tpu.dynamic_rotate %147 by %c224_i32 dim 0 : vector<256x128xf32>, i32 -> vector<256x128xf32>
    %c224_i32_54 = arith.constant 224 : i32
    %149 = vector.broadcast %c224_i32_54 : i32 to vector<256x1xi32>
    %150 = arith.cmpi slt, %3, %149 : vector<256x1xi32>
    %cst_55 = arith.constant 0xFF800000 : f32
    %151 = vector.shape_cast %150 : vector<256x1xi1> to vector<256x1xi1>
    %152 = vector.broadcast %151 : vector<256x1xi1> to vector<256x128xi1>
    %153 = vector.broadcast %cst_55 : f32 to vector<256x128xf32>
    %154 = arith.select %152, %148, %153 : vector<256x128xi1>, vector<256x128xf32>
    %155 = arith.maximumf %147, %154 : vector<256x128xf32>
    %c240_i32_56 = arith.constant 240 : i32
    %156 = tpu.dynamic_rotate %155 by %c240_i32_56 dim 0 : vector<256x128xf32>, i32 -> vector<256x128xf32>
    %c240_i32_57 = arith.constant 240 : i32
    %157 = vector.broadcast %c240_i32_57 : i32 to vector<256x1xi32>
    %158 = arith.cmpi slt, %3, %157 : vector<256x1xi32>
    %cst_58 = arith.constant 0xFF800000 : f32
    %159 = vector.shape_cast %158 : vector<256x1xi1> to vector<256x1xi1>
    %160 = vector.broadcast %159 : vector<256x1xi1> to vector<256x128xi1>
    %161 = vector.broadcast %cst_58 : f32 to vector<256x128xf32>
    %162 = arith.select %160, %156, %161 : vector<256x128xi1>, vector<256x128xf32>
    %163 = arith.maximumf %155, %162 : vector<256x128xf32>
    %c16_i32_59 = arith.constant 16 : i32
    %164 = tpu.dynamic_rotate %139 by %c16_i32_59 dim 0 : vector<256x128xf32>, i32 -> vector<256x128xf32>
    %c16_i32_60 = arith.constant 16 : i32
    %165 = vector.broadcast %c16_i32_60 : i32 to vector<256x1xi32>
    %166 = arith.cmpi sge, %3, %165 : vector<256x1xi32>
    %cst_61 = arith.constant 0xFF800000 : f32
    %167 = vector.shape_cast %166 : vector<256x1xi1> to vector<256x1xi1>
    %168 = vector.broadcast %167 : vector<256x1xi1> to vector<256x128xi1>
    %169 = vector.broadcast %cst_61 : f32 to vector<256x128xf32>
    %170 = arith.select %168, %164, %169 : vector<256x128xi1>, vector<256x128xf32>
    %171 = arith.maximumf %139, %170 : vector<256x128xf32>
    %c32_i32 = arith.constant 32 : i32
    %172 = tpu.dynamic_rotate %171 by %c32_i32 dim 0 : vector<256x128xf32>, i32 -> vector<256x128xf32>
    %c32_i32_62 = arith.constant 32 : i32
    %173 = vector.broadcast %c32_i32_62 : i32 to vector<256x1xi32>
    %174 = arith.cmpi sge, %3, %173 : vector<256x1xi32>
    %cst_63 = arith.constant 0xFF800000 : f32
    %175 = vector.shape_cast %174 : vector<256x1xi1> to vector<256x1xi1>
    %176 = vector.broadcast %175 : vector<256x1xi1> to vector<256x128xi1>
    %177 = vector.broadcast %cst_63 : f32 to vector<256x128xf32>
    %178 = arith.select %176, %172, %177 : vector<256x128xi1>, vector<256x128xf32>
    %179 = arith.maximumf %171, %178 : vector<256x128xf32>
    %c16_i32_64 = arith.constant 16 : i32
    %180 = tpu.dynamic_rotate %179 by %c16_i32_64 dim 0 : vector<256x128xf32>, i32 -> vector<256x128xf32>
    %c16_i32_65 = arith.constant 16 : i32
    %181 = vector.broadcast %c16_i32_65 : i32 to vector<256x1xi32>
    %182 = arith.cmpi sge, %3, %181 : vector<256x1xi32>
    %cst_66 = arith.constant 0xFF800000 : f32
    %183 = vector.shape_cast %182 : vector<256x1xi1> to vector<256x1xi1>
    %184 = vector.broadcast %183 : vector<256x1xi1> to vector<256x128xi1>
    %185 = vector.broadcast %cst_66 : f32 to vector<256x128xf32>
    %186 = arith.select %184, %180, %185 : vector<256x128xi1>, vector<256x128xf32>
    %187 = arith.maximumf %179, %186 : vector<256x128xf32>
    %188 = arith.maximumf %163, %187 : vector<256x128xf32>
    %c2 = arith.constant 2 : index
    %c0_67 = arith.constant 0 : index
    %c0_68 = arith.constant 0 : index
    %189 = vector.load %arg5[%c2, %c0_67, %c0_68] : memref<4x128x128xbf16, #tpu.memory_space<vmem>>, vector<1x128x128xbf16>
    %190 = vector.shape_cast %189 : vector<1x128x128xbf16> to vector<128x128xbf16>
    %191 = arith.truncf %188 : vector<256x128xf32> to vector<256x128xbf16>
    %cst_69 = arith.constant dense<0.000000e+00> : vector<256x128xf32>
    %192 = tpu.matmul %191, %190, %cst_69 {dimension_numbers = #tpu.dot_dimension_numbers<[1], [0], [0], [1], [0, 0, 1, 1], [], []>} : vector<256x128xbf16>, vector<128x128xbf16>, vector<256x128xf32> -> vector<256x128xf32>
    %193 = arith.addf %90, %192 : vector<256x128xf32>
    %c255_i32_70 = arith.constant 255 : i32
    %194 = tpu.dynamic_rotate %188 by %c255_i32_70 dim 0 : vector<256x128xf32>, i32 -> vector<256x128xf32>
    %c15_i32_71 = arith.constant 15 : i32
    %195 = vector.broadcast %c15_i32_71 : i32 to vector<256x1xi32>
    %196 = arith.cmpi slt, %2, %195 : vector<256x1xi32>
    %cst_72 = arith.constant 0xFF800000 : f32
    %197 = vector.shape_cast %196 : vector<256x1xi1> to vector<256x1xi1>
    %198 = vector.broadcast %197 : vector<256x1xi1> to vector<256x128xi1>
    %199 = vector.broadcast %cst_72 : f32 to vector<256x128xf32>
    %200 = arith.select %198, %194, %199 : vector<256x128xi1>, vector<256x128xf32>
    %201 = arith.maximumf %188, %200 : vector<256x128xf32>
    %c254_i32_73 = arith.constant 254 : i32
    %202 = tpu.dynamic_rotate %201 by %c254_i32_73 dim 0 : vector<256x128xf32>, i32 -> vector<256x128xf32>
    %c14_i32_74 = arith.constant 14 : i32
    %203 = vector.broadcast %c14_i32_74 : i32 to vector<256x1xi32>
    %204 = arith.cmpi slt, %2, %203 : vector<256x1xi32>
    %cst_75 = arith.constant 0xFF800000 : f32
    %205 = vector.shape_cast %204 : vector<256x1xi1> to vector<256x1xi1>
    %206 = vector.broadcast %205 : vector<256x1xi1> to vector<256x128xi1>
    %207 = vector.broadcast %cst_75 : f32 to vector<256x128xf32>
    %208 = arith.select %206, %202, %207 : vector<256x128xi1>, vector<256x128xf32>
    %209 = arith.maximumf %201, %208 : vector<256x128xf32>
    %c253_i32 = arith.constant 253 : i32
    %210 = tpu.dynamic_rotate %209 by %c253_i32 dim 0 : vector<256x128xf32>, i32 -> vector<256x128xf32>
    %c13_i32 = arith.constant 13 : i32
    %211 = vector.broadcast %c13_i32 : i32 to vector<256x1xi32>
    %212 = arith.cmpi slt, %2, %211 : vector<256x1xi32>
    %cst_76 = arith.constant 0xFF800000 : f32
    %213 = vector.shape_cast %212 : vector<256x1xi1> to vector<256x1xi1>
    %214 = vector.broadcast %213 : vector<256x1xi1> to vector<256x128xi1>
    %215 = vector.broadcast %cst_76 : f32 to vector<256x128xf32>
    %216 = arith.select %214, %210, %215 : vector<256x128xi1>, vector<256x128xf32>
    %217 = arith.maximumf %209, %216 : vector<256x128xf32>
    %c1_i32_77 = arith.constant 1 : i32
    %218 = tpu.dynamic_rotate %188 by %c1_i32_77 dim 0 : vector<256x128xf32>, i32 -> vector<256x128xf32>
    %c1_i32_78 = arith.constant 1 : i32
    %219 = vector.broadcast %c1_i32_78 : i32 to vector<256x1xi32>
    %220 = arith.cmpi sge, %2, %219 : vector<256x1xi32>
    %cst_79 = arith.constant 0xFF800000 : f32
    %221 = vector.shape_cast %220 : vector<256x1xi1> to vector<256x1xi1>
    %222 = vector.broadcast %221 : vector<256x1xi1> to vector<256x128xi1>
    %223 = vector.broadcast %cst_79 : f32 to vector<256x128xf32>
    %224 = arith.select %222, %218, %223 : vector<256x128xi1>, vector<256x128xf32>
    %225 = arith.maximumf %188, %224 : vector<256x128xf32>
    %c2_i32_80 = arith.constant 2 : i32
    %226 = tpu.dynamic_rotate %225 by %c2_i32_80 dim 0 : vector<256x128xf32>, i32 -> vector<256x128xf32>
    %c2_i32_81 = arith.constant 2 : i32
    %227 = vector.broadcast %c2_i32_81 : i32 to vector<256x1xi32>
    %228 = arith.cmpi sge, %2, %227 : vector<256x1xi32>
    %cst_82 = arith.constant 0xFF800000 : f32
    %229 = vector.shape_cast %228 : vector<256x1xi1> to vector<256x1xi1>
    %230 = vector.broadcast %229 : vector<256x1xi1> to vector<256x128xi1>
    %231 = vector.broadcast %cst_82 : f32 to vector<256x128xf32>
    %232 = arith.select %230, %226, %231 : vector<256x128xi1>, vector<256x128xf32>
    %233 = arith.maximumf %225, %232 : vector<256x128xf32>
    %c3_i32 = arith.constant 3 : i32
    %234 = tpu.dynamic_rotate %233 by %c3_i32 dim 0 : vector<256x128xf32>, i32 -> vector<256x128xf32>
    %c3_i32_83 = arith.constant 3 : i32
    %235 = vector.broadcast %c3_i32_83 : i32 to vector<256x1xi32>
    %236 = arith.cmpi sge, %2, %235 : vector<256x1xi32>
    %cst_84 = arith.constant 0xFF800000 : f32
    %237 = vector.shape_cast %236 : vector<256x1xi1> to vector<256x1xi1>
    %238 = vector.broadcast %237 : vector<256x1xi1> to vector<256x128xi1>
    %239 = vector.broadcast %cst_84 : f32 to vector<256x128xf32>
    %240 = arith.select %238, %234, %239 : vector<256x128xi1>, vector<256x128xf32>
    %241 = arith.maximumf %233, %240 : vector<256x128xf32>
    %242 = arith.maximumf %217, %241 : vector<256x128xf32>
    %c240_i32_85 = arith.constant 240 : i32
    %243 = tpu.dynamic_rotate %242 by %c240_i32_85 dim 0 : vector<256x128xf32>, i32 -> vector<256x128xf32>
    %c240_i32_86 = arith.constant 240 : i32
    %244 = vector.broadcast %c240_i32_86 : i32 to vector<256x1xi32>
    %245 = arith.cmpi slt, %3, %244 : vector<256x1xi32>
    %cst_87 = arith.constant 0xFF800000 : f32
    %246 = vector.shape_cast %245 : vector<256x1xi1> to vector<256x1xi1>
    %247 = vector.broadcast %246 : vector<256x1xi1> to vector<256x128xi1>
    %248 = vector.broadcast %cst_87 : f32 to vector<256x128xf32>
    %249 = arith.select %247, %243, %248 : vector<256x128xi1>, vector<256x128xf32>
    %250 = arith.maximumf %242, %249 : vector<256x128xf32>
    %c224_i32_88 = arith.constant 224 : i32
    %251 = tpu.dynamic_rotate %250 by %c224_i32_88 dim 0 : vector<256x128xf32>, i32 -> vector<256x128xf32>
    %c224_i32_89 = arith.constant 224 : i32
    %252 = vector.broadcast %c224_i32_89 : i32 to vector<256x1xi32>
    %253 = arith.cmpi slt, %3, %252 : vector<256x1xi32>
    %cst_90 = arith.constant 0xFF800000 : f32
    %254 = vector.shape_cast %253 : vector<256x1xi1> to vector<256x1xi1>
    %255 = vector.broadcast %254 : vector<256x1xi1> to vector<256x128xi1>
    %256 = vector.broadcast %cst_90 : f32 to vector<256x128xf32>
    %257 = arith.select %255, %251, %256 : vector<256x128xi1>, vector<256x128xf32>
    %258 = arith.maximumf %250, %257 : vector<256x128xf32>
    %c208_i32 = arith.constant 208 : i32
    %259 = tpu.dynamic_rotate %258 by %c208_i32 dim 0 : vector<256x128xf32>, i32 -> vector<256x128xf32>
    %c208_i32_91 = arith.constant 208 : i32
    %260 = vector.broadcast %c208_i32_91 : i32 to vector<256x1xi32>
    %261 = arith.cmpi slt, %3, %260 : vector<256x1xi32>
    %cst_92 = arith.constant 0xFF800000 : f32
    %262 = vector.shape_cast %261 : vector<256x1xi1> to vector<256x1xi1>
    %263 = vector.broadcast %262 : vector<256x1xi1> to vector<256x128xi1>
    %264 = vector.broadcast %cst_92 : f32 to vector<256x128xf32>
    %265 = arith.select %263, %259, %264 : vector<256x128xi1>, vector<256x128xf32>
    %266 = arith.maximumf %258, %265 : vector<256x128xf32>
    %c16_i32_93 = arith.constant 16 : i32
    %267 = tpu.dynamic_rotate %242 by %c16_i32_93 dim 0 : vector<256x128xf32>, i32 -> vector<256x128xf32>
    %c16_i32_94 = arith.constant 16 : i32
    %268 = vector.broadcast %c16_i32_94 : i32 to vector<256x1xi32>
    %269 = arith.cmpi sge, %3, %268 : vector<256x1xi32>
    %cst_95 = arith.constant 0xFF800000 : f32
    %270 = vector.shape_cast %269 : vector<256x1xi1> to vector<256x1xi1>
    %271 = vector.broadcast %270 : vector<256x1xi1> to vector<256x128xi1>
    %272 = vector.broadcast %cst_95 : f32 to vector<256x128xf32>
    %273 = arith.select %271, %267, %272 : vector<256x128xi1>, vector<256x128xf32>
    %274 = arith.maximumf %242, %273 : vector<256x128xf32>
    %c32_i32_96 = arith.constant 32 : i32
    %275 = tpu.dynamic_rotate %274 by %c32_i32_96 dim 0 : vector<256x128xf32>, i32 -> vector<256x128xf32>
    %c32_i32_97 = arith.constant 32 : i32
    %276 = vector.broadcast %c32_i32_97 : i32 to vector<256x1xi32>
    %277 = arith.cmpi sge, %3, %276 : vector<256x1xi32>
    %cst_98 = arith.constant 0xFF800000 : f32
    %278 = vector.shape_cast %277 : vector<256x1xi1> to vector<256x1xi1>
    %279 = vector.broadcast %278 : vector<256x1xi1> to vector<256x128xi1>
    %280 = vector.broadcast %cst_98 : f32 to vector<256x128xf32>
    %281 = arith.select %279, %275, %280 : vector<256x128xi1>, vector<256x128xf32>
    %282 = arith.maximumf %274, %281 : vector<256x128xf32>
    %c48_i32 = arith.constant 48 : i32
    %283 = tpu.dynamic_rotate %282 by %c48_i32 dim 0 : vector<256x128xf32>, i32 -> vector<256x128xf32>
    %c48_i32_99 = arith.constant 48 : i32
    %284 = vector.broadcast %c48_i32_99 : i32 to vector<256x1xi32>
    %285 = arith.cmpi sge, %3, %284 : vector<256x1xi32>
    %cst_100 = arith.constant 0xFF800000 : f32
    %286 = vector.shape_cast %285 : vector<256x1xi1> to vector<256x1xi1>
    %287 = vector.broadcast %286 : vector<256x1xi1> to vector<256x128xi1>
    %288 = vector.broadcast %cst_100 : f32 to vector<256x128xf32>
    %289 = arith.select %287, %283, %288 : vector<256x128xi1>, vector<256x128xf32>
    %290 = arith.maximumf %282, %289 : vector<256x128xf32>
    %291 = arith.maximumf %266, %290 : vector<256x128xf32>
    %c3 = arith.constant 3 : index
    %c0_101 = arith.constant 0 : index
    %c0_102 = arith.constant 0 : index
    %292 = vector.load %arg5[%c3, %c0_101, %c0_102] : memref<4x128x128xbf16, #tpu.memory_space<vmem>>, vector<1x128x128xbf16>
    %293 = vector.shape_cast %292 : vector<1x128x128xbf16> to vector<128x128xbf16>
    %294 = arith.truncf %291 : vector<256x128xf32> to vector<256x128xbf16>
    %cst_103 = arith.constant dense<0.000000e+00> : vector<256x128xf32>
    %295 = tpu.matmul %294, %293, %cst_103 {dimension_numbers = #tpu.dot_dimension_numbers<[1], [0], [0], [1], [0, 0, 1, 1], [], []>} : vector<256x128xbf16>, vector<128x128xbf16>, vector<256x128xf32> -> vector<256x128xf32>
    %296 = arith.addf %193, %295 : vector<256x128xf32>
    %c0_104 = arith.constant 0 : index
    %c0_105 = arith.constant 0 : index
    %297 = vector.load %arg9[%c0_104, %c0_105] : memref<1x128xf32, #tpu.memory_space<vmem>>, vector<1x128xf32>
    %298 = vector.broadcast %297 : vector<1x128xf32> to vector<256x128xf32>
    %299 = arith.addf %296, %298 : vector<256x128xf32>
    %cst_106 = arith.constant 0.000000e+00 : f32
    %300 = vector.broadcast %cst_106 : f32 to vector<256x128xf32>
    %301 = arith.subf %300, %299 : vector<256x128xf32>
    %302 = math.exp %301 : vector<256x128xf32>
    %cst_107 = arith.constant 1.000000e+00 : f32
    %303 = vector.broadcast %cst_107 : f32 to vector<256x128xf32>
    %304 = arith.addf %303, %302 : vector<256x128xf32>
    %305 = tpu.reciprocal %304 {approx = true} : vector<256x128xf32> -> vector<256x128xf32>
    %306 = arith.mulf %299, %305 : vector<256x128xf32>
    %c0_108 = arith.constant 0 : index
    %c0_109 = arith.constant 0 : index
    %307 = vector.load %arg4[%c0_108, %c0_109] : memref<4x128xbf16, #tpu.memory_space<vmem>>, vector<4x128xbf16>
    %cst_110 = arith.constant dense<0.000000e+00> : vector<256x128xf32>
    %308 = tpu.matmul %1, %307, %cst_110 {dimension_numbers = #tpu.dot_dimension_numbers<[1], [0], [0], [1], [0, 0, 1, 1], [], []>} : vector<256x4xbf16>, vector<4x128xbf16>, vector<256x128xf32> -> vector<256x128xf32>
    %c0_111 = arith.constant 0 : index
    %c0_112 = arith.constant 0 : index
    %309 = vector.load %arg8[%c0_111, %c0_112] : memref<1x128xf32, #tpu.memory_space<vmem>>, vector<1x128xf32>
    %310 = vector.broadcast %309 : vector<1x128xf32> to vector<256x128xf32>
    %311 = arith.addf %308, %310 : vector<256x128xf32>
    %cst_113 = arith.constant 0.000000e+00 : f32
    %312 = vector.broadcast %cst_113 : f32 to vector<256x128xf32>
    %313 = arith.subf %312, %311 : vector<256x128xf32>
    %314 = math.exp %313 : vector<256x128xf32>
    %cst_114 = arith.constant 1.000000e+00 : f32
    %315 = vector.broadcast %cst_114 : f32 to vector<256x128xf32>
    %316 = arith.addf %315, %314 : vector<256x128xf32>
    %317 = tpu.reciprocal %316 {approx = true} : vector<256x128xf32> -> vector<256x128xf32>
    %318 = arith.mulf %311, %317 : vector<256x128xf32>
    %c0_115 = arith.constant 0 : index
    %c0_116 = arith.constant 0 : index
    %c0_117 = arith.constant 0 : index
    %319 = vector.load %arg6[%c0_115, %c0_116, %c0_117] : memref<2x128x128xbf16, #tpu.memory_space<vmem>>, vector<1x128x128xbf16>
    %320 = vector.shape_cast %319 : vector<1x128x128xbf16> to vector<128x128xbf16>
    %321 = arith.truncf %306 : vector<256x128xf32> to vector<256x128xbf16>
    %cst_118 = arith.constant dense<0.000000e+00> : vector<256x128xf32>
    %322 = tpu.matmul %321, %320, %cst_118 {dimension_numbers = #tpu.dot_dimension_numbers<[1], [0], [0], [1], [0, 0, 1, 1], [], []>} : vector<256x128xbf16>, vector<128x128xbf16>, vector<256x128xf32> -> vector<256x128xf32>
    %c1_119 = arith.constant 1 : index
    %c0_120 = arith.constant 0 : index
    %c0_121 = arith.constant 0 : index
    %323 = vector.load %arg6[%c1_119, %c0_120, %c0_121] : memref<2x128x128xbf16, #tpu.memory_space<vmem>>, vector<1x128x128xbf16>
    %324 = vector.shape_cast %323 : vector<1x128x128xbf16> to vector<128x128xbf16>
    %325 = arith.truncf %318 : vector<256x128xf32> to vector<256x128xbf16>
    %cst_122 = arith.constant dense<0.000000e+00> : vector<256x128xf32>
    %326 = tpu.matmul %325, %324, %cst_122 {dimension_numbers = #tpu.dot_dimension_numbers<[1], [0], [0], [1], [0, 0, 1, 1], [], []>} : vector<256x128xbf16>, vector<128x128xbf16>, vector<256x128xf32> -> vector<256x128xf32>
    %327 = arith.addf %322, %326 : vector<256x128xf32>
    %c0_123 = arith.constant 0 : index
    %c0_124 = arith.constant 0 : index
    %328 = vector.load %arg10[%c0_123, %c0_124] : memref<1x128xf32, #tpu.memory_space<vmem>>, vector<1x128xf32>
    %329 = vector.broadcast %328 : vector<1x128xf32> to vector<256x128xf32>
    %330 = arith.addf %327, %329 : vector<256x128xf32>
    %cst_125 = arith.constant 0.000000e+00 : f32
    %331 = vector.broadcast %cst_125 : f32 to vector<256x128xf32>
    %332 = arith.subf %331, %330 : vector<256x128xf32>
    %333 = math.exp %332 : vector<256x128xf32>
    %cst_126 = arith.constant 1.000000e+00 : f32
    %334 = vector.broadcast %cst_126 : f32 to vector<256x128xf32>
    %335 = arith.addf %334, %333 : vector<256x128xf32>
    %336 = tpu.reciprocal %335 {approx = true} : vector<256x128xf32> -> vector<256x128xf32>
    %337 = arith.mulf %330, %336 : vector<256x128xf32>
    %c0_127 = arith.constant 0 : index
    %c0_128 = arith.constant 0 : index
    %c0_129 = arith.constant 0 : index
    %338 = vector.load %arg11[%c0_127, %c0_128, %c0_129] : memref<1x256x128xf32, #tpu.memory_space<vmem>>, vector<1x256x128xf32>
    %339 = vector.shape_cast %338 : vector<1x256x128xf32> to vector<256x128xf32>
    %340 = vector.shape_cast %337 : vector<256x128xf32> to vector<1x256x128xf32>
    tpu.vector_store %arg11[%c0_127, %c0_128, %c0_129], %340 {strides = array<i32>} : memref<1x256x128xf32, #tpu.memory_space<vmem>>, vector<1x256x128xf32>,
    return
  }
  func.func @transform_0(%arg0: i32) -> (i32, i32) {
    %c0_i32 = arith.constant 0 : i32
    %c0_i32_0 = arith.constant 0 : i32
    %c0_i32_1 = arith.constant 0 : i32
    return %c0_i32, %c0_i32_0 : i32, i32
  }
  func.func @transform_1(%arg0: i32) -> (i32, i32, i32) {
    %c0_i32 = arith.constant 0 : i32
    %c0_i32_0 = arith.constant 0 : i32
    %c0_i32_1 = arith.constant 0 : i32
    return %arg0, %c0_i32, %c0_i32_0 : i32, i32, i32
  }
  func.func @transform_2(%arg0: i32) -> (i32, i32) {
    %c0_i32 = arith.constant 0 : i32
    %c0_i32_0 = arith.constant 0 : i32
    %c0_i32_1 = arith.constant 0 : i32
    return %c0_i32, %c0_i32_0 : i32, i32
  }
  func.func @transform_3(%arg0: i32) -> (i32, i32) {
    %c0_i32 = arith.constant 0 : i32
    %c0_i32_0 = arith.constant 0 : i32
    %c0_i32_1 = arith.constant 0 : i32
    return %c0_i32, %c0_i32_0 : i32, i32
  }
  func.func @transform_4(%arg0: i32) -> (i32, i32, i32) {
    %c0_i32 = arith.constant 0 : i32
    %c0_i32_0 = arith.constant 0 : i32
    %c0_i32_1 = arith.constant 0 : i32
    %c0_i32_2 = arith.constant 0 : i32
    return %c0_i32, %c0_i32_0, %c0_i32_1 : i32, i32, i32
  }
  func.func @transform_5(%arg0: i32) -> (i32, i32, i32) {
    %c0_i32 = arith.constant 0 : i32
    %c0_i32_0 = arith.constant 0 : i32
    %c0_i32_1 = arith.constant 0 : i32
    %c0_i32_2 = arith.constant 0 : i32
    return %c0_i32, %c0_i32_0, %c0_i32_1 : i32, i32, i32
  }
  func.func @transform_6(%arg0: i32) -> (i32, i32) {
    %c0_i32 = arith.constant 0 : i32
    %c0_i32_0 = arith.constant 0 : i32
    %c0_i32_1 = arith.constant 0 : i32
    return %c0_i32, %c0_i32_0 : i32, i32
  }
  func.func @transform_7(%arg0: i32) -> (i32, i32) {
    %c0_i32 = arith.constant 0 : i32
    %c0_i32_0 = arith.constant 0 : i32
    %c0_i32_1 = arith.constant 0 : i32
    return %c0_i32, %c0_i32_0 : i32, i32
  }
  func.func @transform_8(%arg0: i32) -> (i32, i32) {
    %c0_i32 = arith.constant 0 : i32
    %c0_i32_0 = arith.constant 0 : i32
    %c0_i32_1 = arith.constant 0 : i32
    return %c0_i32, %c0_i32_0 : i32, i32
  }
  func.func @transform_9(%arg0: i32) -> (i32, i32) {
    %c0_i32 = arith.constant 0 : i32
    %c0_i32_0 = arith.constant 0 : i32
    %c0_i32_1 = arith.constant 0 : i32
    return %c0_i32, %c0_i32_0 : i32, i32
  }
  func.func @transform_10(%arg0: i32) -> (i32, i32, i32) {
    %c0_i32 = arith.constant 0 : i32
    %c0_i32_0 = arith.constant 0 : i32
    %c0_i32_1 = arith.constant 0 : i32
    return %arg0, %c0_i32, %c0_i32_0 : i32, i32, i32
  }
}

</mosaic_0001>

<bundles_post_ra>
// kernel: tpu_custom_call.1
= control target key start
LH: loop header
LB: loop body
LE: loop exit
PB: predicated region body
PF: predicated region fallthrough
CT: control target
= control target key end

     0   :  { %15 = vsyncpa [#allocation3], 0  ;;  %s18085_s0 = inlined_call_operand.vmem [shape: s32[256,1], index: 0, kind: input, shape index: {}]   ;;  %s18086_s1 = inlined_call_operand.vmem [shape: bf16[2,256,4], index: 1, kind: input, shape index: {}]   ;;  %s18087_s2 = inlined_call_operand.vmem [shape: bf16[4,128], index: 2, kind: input, shape index: {}]   ;;  %s18088_s3 = inlined_call_operand.vmem [shape: bf16[4,128], index: 3, kind: input, shape index: {}]   ;;  %s18089_s4 = inlined_call_operand.vmem [shape: bf16[4,128,128], index: 4, kind: input, shape index: {}]   ;;  %s18090_s5 = inlined_call_operand.vmem [shape: bf16[2,128,128], index: 5, kind: input, shape index: {}]   ;;  %s18091_s6 = inlined_call_operand.vmem [shape: f32[1,128], index: 6, kind: input, shape index: {}]   ;;  %s18092_s7 = inlined_call_operand.vmem [shape: f32[1,128], index: 7, kind: input, shape index: {}]   ;;  %s18093_s8 = inlined_call_operand.vmem [shape: f32[1,128], index: 8, kind: input, shape index: {}]   ;;  %s18094_s9 = inlined_call_operand.vmem [shape: f32[1,128], index: 9, kind: input, shape index: {}]   ;;  %s18095_s10 = inlined_call_operand.hbm [shape: f32[2,256,128], index: 10, kind: output, shape index: {}]  }
   0x1   :  { %17 = vsyncpa [#allocation3 + $0x1], 0  ;;  %s9004_s13 = smov 0   ;;  %s9006_s14 = smov 0  }
   0x2   :  { %s9008_s15 = smov 0   ;;  %s9010_s16 = smov 0  }
   0x3 LB: > { %s9025_s17 = sadd.s32 4294967295, %s8944_s16   ;;  %s7810_s18 = sadd.s32 4294967294, %s8944_s16   ;;  %s8944_s16 = sphi %s9010_s16, %s20746_s16   ;;  %s8940_s15 = sphi %s9008_s15, %s20745_s15   ;;  %s8936_s14 = sphi %s9006_s14, %s20744_s14   ;;  %s8932_s13 = sphi %s9004_s13, %s20743_s13  }
   0x4   : > { %s9029_s19 = sadd.s32 1, %s8944_s16   ;;  %s245_s20 = sadd.s32 1, %s8940_s15 }
   0x5   : > { %s242_s21 = ssub.s32 %s8944_s16, %s9029_s19  ;;  %p255_p0 = scmp.ne.s32.totalorder %s8940_s15, %s8936_s14 }
   0x6   : > { %p243_p1 = scmp.eq.s32.totalorder %s242_s21, 0  ;;  %p256_p2 = scmp.eq.s32.totalorder %s9025_s17, 1 }
   0x7   : > { %p261_p3 = scmp.ne.s32.totalorder %s8936_s14, %s8932_s13  ;;  %p262_p4 = scmp.eq.s32.totalorder %s7810_s18, 1 }
   0x8   : > { %s9040_s22 = scalar_select %p243_p1, %s8940_s15, %s245_s20  }
   0x9   : > { %p9042_p5 = por %p256_p2, %p255_p0  ;;  %p9046_p6 = por %p262_p4, %p261_p3 }
   0xa   : > { %p7813_p7 = scmp.ge.s32.totalorder %s8944_s16, 1  ;;  %p315_p8 = scmp.lt.s32.totalorder %s8944_s16, 3 }
   0xc   : > { %p316_p9 = pnand %p7813_p7, %p315_p8 }
   0xe   : > { %319 = sbr.rel (%p316_p9) target bundleno = 1766 (0x6e6), region = 60 }
  0x13   : > { %v9055_v0 = vld [vmem:[%s18085_s0 + $0x20] sm:$0xff]  ;;  %v9060_v1 = vld [vmem:[%s18085_s0 + $0x10] sm:$0xff]  ;;  %vm18120_vm0 = vcmask 1041408   ;;  %p353_p10 = scmp.lt.s32.totalorder %s9025_s17, 1  ;;  %v18097_v3 = vmov 0   ;;  %v9085_v9 = vld [vmem:[%s18085_s0 + $0x28] sm:$0xff] }
  0x14   : > { %v9065_v2 = vld [vmem:[%s18085_s0] sm:$0xff]  ;;  %8284 = vset.pattern.permute.xlu2 %v18097_v3  ;;  %8283 = vset.pattern.permute.xlu1 %v18097_v3  ;;  %vm976_vm1 = vcmp.lt.s32.totalorder %v9055_v0, 15  ;;  %vm974_vm2 = vcmp.lt.s32.totalorder %v9060_v1, 15  ;;  %v9090_v10 = vld [vmem:[%s18085_s0 + $0x18] sm:$0xff]  ;;  %v9095_v11 = vld [vmem:[%s18085_s0 + $0x8] sm:$0xff]  ;;  %vm18160_vm4 = vcmask 31744  }
  0x15   : > { %vm972_vm3 = vcmp.lt.s32.totalorder %v9065_v2, 15  ;;  %v456_v4 = vld [vmem:[%s18087_s2] sm:$0x3]  ;;  %8282 = vset.pattern.permute.xlu0 %v18097_v3  ;;  %v1008_v5 = vsel %vm976_vm1, 1, %v18097_v3  ;;  %v1006_v6 = vsel %vm974_vm2, 1, %v18097_v3  ;;  %s354_s18 = scalar_select %p353_p10, %s9025_s17, 1 }
  0x16   : > { %v1004_v7 = vsel %vm972_vm3, 1, %v18097_v3  ;;  %v592_v8 = vsel %vm18120_vm0, %v456_v4, 0  ;;  %1049 = vperm.xlu2 %8284, %v1008_v5   ;;  %1043 = vperm.xlu1 %8283, %v1006_v6   ;;  %vm977_vm5 = vcmp.lt.s32.totalorder %v9085_v9, 15  ;;  %vm975_vm6 = vcmp.lt.s32.totalorder %v9090_v10, 15  ;;  %v9113_v16 = vld [vmem:[%s18085_s0 + $0x40] sm:$0xff]  ;;  %v9118_v17 = vld [vmem:[%s18085_s0 + $0x38] sm:$0xff] }
  0x17   : > { %1037 = vperm.xlu0 %8282, %v1004_v7   ;;  %601 = vmatpush.bf16.msra.mxu0 %v592_v8  ;;  %s8174_s29 = sshll.u32 %s354_s18, 7  ;;  %vm973_vm7 = vcmp.lt.s32.totalorder %v9095_v11, 15  ;;  %v1009_v13 = vsel %vm977_vm5, 1, %v18097_v3  ;;  %v1007_v14 = vsel %vm975_vm6, 1, %v18097_v3  ;;  %v9123_v18 = vld [vmem:[%s18085_s0 + $0x30] sm:$0xff]  ;;  %vm980_vm8 = vcmp.lt.s32.totalorder %v9113_v16, 15 }
  0x18   : > { %s9100_s12 = scalar_lea.vmem %s18086_s1, %s8174_s29  ;;  %v1005_v15 = vsel %vm973_vm7, 1, %v18097_v3  ;;  %vm979_vm9 = vcmp.lt.s32.totalorder %v9118_v17, 15  ;;  %vm978_vm10 = vcmp.lt.s32.totalorder %v9123_v18, 15  ;;  %v1012_v19 = vsel %vm980_vm8, 1, %v18097_v3  ;;  %v9134_v22 = vld [vmem:[%s18085_s0 + $0x58] sm:$0xff]  ;;  %v9139_v23 = vld [vmem:[%s18085_s0 + $0x50] sm:$0xff] }
  0x19   : > { %v8175_v12 = vld [vmem:[%s9100_s12] sm:$0xff]  ;;  %v1011_v20 = vsel %vm979_vm9, 1, %v18097_v3  ;;  %v1010_v21 = vsel %vm978_vm10, 1, %v18097_v3  ;;  %v9144_v24 = vld [vmem:[%s18085_s0 + $0x48] sm:$0xff]  ;;  %vm983_vm11 = vcmp.lt.s32.totalorder %v9134_v22, 15  ;;  %vm982_vm12 = vcmp.lt.s32.totalorder %v9139_v23, 15 }
  0x1a   : > { %7881 = vmatmul.msk.bf16.vlgmr.msra.gmra.mxu0 %vm18160_vm4, %v8175_v12  ;;  %v8176_v25 = vld [vmem:[%s9100_s12 + $0x8] sm:$0xff]  ;;  %vm981_vm13 = vcmp.lt.s32.totalorder %v9144_v24, 15  ;;  %v1015_v26 = vsel %vm983_vm11, 1, %v18097_v3  ;;  %v1014_v27 = vsel %vm982_vm12, 1, %v18097_v3  ;;  %v9157_v29 = vld [vmem:[%s18085_s0 + $0x70] sm:$0xff]  ;;  %v9167_v31 = vld [vmem:[%s18085_s0 + $0x60] sm:$0xff] }
  0x1b   : > { %v1013_v28 = vsel %vm981_vm13, 1, %v18097_v3  ;;  %v9162_v30 = vld [vmem:[%s18085_s0 + $0x68] sm:$0xff]  ;;  %vm986_vm14 = vcmp.lt.s32.totalorder %v9157_v29, 15  ;;  %vm984_vm1 = vcmp.lt.s32.totalorder %v9167_v31, 15  ;;  %v9183_v36 = vld [vmem:[%s18085_s0 + $0x80] sm:$0xff]  ;;  %v9188_v37 = vld [vmem:[%s18085_s0 + $0x78] sm:$0xff] }
  0x1c   : > { %vm985_vm15 = vcmp.lt.s32.totalorder %v9162_v30, 15  ;;  %v1018_v32 = vsel %vm986_vm14, 1, %v18097_v3  ;;  %v1016_v34 = vsel %vm984_vm1, 1, %v18097_v3  ;;  %v9178_v35 = vld [vmem:[%s18085_s0 + $0x88] sm:$0xff]  ;;  %v8177_v38 = vld [vmem:[%s9100_s12 + $0x10] sm:$0xff]  ;;  %vm988_vm3 = vcmp.lt.s32.totalorder %v9183_v36, 15 }
  0x1d   : > { %v1017_v33 = vsel %vm985_vm15, 1, %v18097_v3  ;;  %vm989_vm2 = vcmp.lt.s32.totalorder %v9178_v35, 15  ;;  %vm987_vm5 = vcmp.lt.s32.totalorder %v9188_v37, 15  ;;  %v1020_v40 = vsel %vm988_vm3, 1, %v18097_v3  ;;  %v9201_v42 = vld [vmem:[%s18085_s0 + $0xa0] sm:$0xff]  ;;  %v9206_v43 = vld [vmem:[%s18085_s0 + $0x98] sm:$0xff] }
  0x1e   : > { %1052 = vperm.xlu2 %8284, %v1009_v13   ;;  %1046 = vperm.xlu1 %8283, %v1007_v14   ;;  %v1021_v39 = vsel %vm989_vm2, 1, %v18097_v3  ;;  %v1019_v41 = vsel %vm987_vm5, 1, %v18097_v3  ;;  %v9211_v44 = vld [vmem:[%s18085_s0 + $0x90] sm:$0xff]  ;;  %vm992_vm6 = vcmp.lt.s32.totalorder %v9201_v42, 15  ;;  %vm991_vm7 = vcmp.lt.s32.totalorder %v9206_v43, 15  ;;  %v9222_v48 = vld [vmem:[%s18085_s0 + $0xb8] sm:$0xff] }
  0x1f   : > { %1040 = vperm.xlu0 %8282, %v1005_v15   ;;  %vm990_vm8 = vcmp.lt.s32.totalorder %v9211_v44, 15  ;;  %v1024_v45 = vsel %vm992_vm6, 1, %v18097_v3  ;;  %v1023_v46 = vsel %vm991_vm7, 1, %v18097_v3  ;;  %v9227_v49 = vld [vmem:[%s18085_s0 + $0xb0] sm:$0xff]  ;;  %v9232_v50 = vld [vmem:[%s18085_s0 + $0xa8] sm:$0xff]  ;;  %v8178_v51 = vld [vmem:[%s9100_s12 + $0x18] sm:$0xff] }
  0x20   : > { %v1022_v47 = vsel %vm990_vm8, 1, %v18097_v3  ;;  %vm995_vm9 = vcmp.lt.s32.totalorder %v9222_v48, 15  ;;  %vm994_vm10 = vcmp.lt.s32.totalorder %v9227_v49, 15  ;;  %vm993_vm11 = vcmp.lt.s32.totalorder %v9232_v50, 15  ;;  %v9245_v55 = vld [vmem:[%s18085_s0 + $0xd0] sm:$0xff]  ;;  %v9250_v56 = vld [vmem:[%s18085_s0 + $0xc8] sm:$0xff] }
  0x21   : > { %v1027_v52 = vsel %vm995_vm9, 1, %v18097_v3  ;;  %v1026_v53 = vsel %vm994_vm10, 1, %v18097_v3  ;;  %v1025_v54 = vsel %vm993_vm11, 1, %v18097_v3  ;;  %v9255_v57 = vld [vmem:[%s18085_s0 + $0xc0] sm:$0xff]  ;;  %vm998_vm12 = vcmp.lt.s32.totalorder %v9245_v55, 15  ;;  %v9266_v61 = vld [vmem:[%s18085_s0 + $0xe8] sm:$0xff] }
  0x22   : > { %vm997_vm13 = vcmp.lt.s32.totalorder %v9250_v56, 15  ;;  %vm996_vm14 = vcmp.lt.s32.totalorder %v9255_v57, 15  ;;  %v1030_v58 = vsel %vm998_vm12, 1, %v18097_v3  ;;  %v9271_v62 = vld [vmem:[%s18085_s0 + $0xe0] sm:$0xff]  ;;  %v9276_v63 = vld [vmem:[%s18085_s0 + $0xd8] sm:$0xff]  ;;  %vm1001_vm15 = vcmp.lt.s32.totalorder %v9266_v61, 15 }
  0x23   : > { %v1029_v59 = vsel %vm997_vm13, 1, %v18097_v3  ;;  %v1028_v60 = vsel %vm996_vm14, 1, %v18097_v3  ;;  %v8179_v4 = vld [vmem:[%s9100_s12 + $0x20] sm:$0xff]  ;;  %vm1000_vm1 = vcmp.lt.s32.totalorder %v9271_v62, 15  ;;  %vm999_vm2 = vcmp.lt.s32.totalorder %v9276_v63, 15  ;;  %v9289_v8 = vld [vmem:[%s18085_s0 + $0xf8] sm:$0xff] }
  0x24   : > { %v1033_v5 = vsel %vm1001_vm15, 1, %v18097_v3  ;;  %v1032_v6 = vsel %vm1000_vm1, 1, %v18097_v3  ;;  %v1031_v7 = vsel %vm999_vm2, 1, %v18097_v3  ;;  %v9294_v12 = vld [vmem:[%s18085_s0 + $0xf0] sm:$0xff]  ;;  %vm1003_vm3 = vcmp.lt.s32.totalorder %v9289_v8, 15  ;;  %s350_s27 = sand.u32 1, %s8936_s14  }
  0x25   : > { %vm1421_vm5 = vcmp.ge.s32.totalorder %v9065_v2, 1  ;;  %vm1002_vm6 = vcmp.lt.s32.totalorder %v9294_v12, 15  ;;  %v1035_v13 = vsel %vm1003_vm3, 1, %v18097_v3  ;;  %vm1423_vm7 = vcmp.ge.s32.totalorder %v9060_v1, 1  ;;  %s7814_s28 = sshll.u32 %s350_s27, 8  ;;  %s8239_s18 = sshll.u32 %s9025_s17, 8 }
  0x26   : > { %1061 = vperm.xlu2 %8284, %v1012_v19   ;;  %1058 = vperm.xlu1 %8283, %v1011_v20   ;;  %v1453_v14 = vsel %vm1421_vm5, 1, %v18097_v3  ;;  %v1034_v15 = vsel %vm1002_vm6, 1, %v18097_v3  ;;  %v8180_v19 = vld [vmem:[%s9100_s12 + $0x28] sm:$0xff]  ;;  %vm1424_vm8 = vcmp.ge.s32.totalorder %v9090_v10, 1  ;;  %vm1422_vm9 = vcmp.ge.s32.totalorder %v9095_v11, 1  ;;  %s17915_s29 = scalar_lea.vmem [#allocation2], %s7814_s28  ;;  %s7744_s21 = scalar_lea.hbm %s18095_s10, %s8239_s18 }
  0x27   : > { %1055 = vperm.xlu0 %8282, %v1010_v21   ;;  %v1455_v20 = vsel %vm1423_vm7, 1, %v18097_v3  ;;  %v1456_v21 = vsel %vm1424_vm8, 1, %v18097_v3  ;;  %vm1426_vm10 = vcmp.ge.s32.totalorder %v9085_v9, 1  ;;  %vm1427_vm11 = vcmp.ge.s32.totalorder %v9123_v18, 1  ;;  %s7745_s25 = sshll.u32 %s17915_s29, 4  ;;  %s7747_s26 = sshll.u32 %s7744_s21, 4  ;;  %s7746_s25 = int_to_ptr.vmem [resolvable:$true] %s7745_s25  ;;  %s7748_s26 = int_to_ptr.hbm [resolvable:$true] %s7747_s26 }
  0x28   : > { %vm1425_vm12 = vcmp.ge.s32.totalorder %v9055_v0, 1  ;;  %vm1429_vm13 = vcmp.ge.s32.totalorder %v9113_v16, 1  ;;  %vm1430_vm14 = vcmp.ge.s32.totalorder %v9144_v24, 1  ;;  %vm1428_vm15 = vcmp.ge.s32.totalorder %v9118_v17, 1  ;;  %s7733_s28 = scalar_lea.sflag [#allocation3], %s350_s27  ;;  %s8896_s17 = sshra.s32 %s7748_s26, 4  ;;  %s8897_s17 = int_to_ptr.hbm [resolvable:$true] %s8896_s17 }
  0x29   : > { %vm1432_vm1 = vcmp.ge.s32.totalorder %v9134_v22, 1  ;;  %vm1433_vm2 = vcmp.ge.s32.totalorder %v9167_v31, 1  ;;  %vm1431_vm3 = vcmp.ge.s32.totalorder %v9139_v23, 1  ;;  %v8195_v31 = vld [vmem:[%s18089_s4 + $0x20] sm:$0xff]  ;;  %vm1434_vm5 = vcmp.ge.s32.totalorder %v9162_v30, 1  ;;  %s8898_s30 = scalar_lea.hbm %s8897_s17, 256  ;;  %p8903_p0 = scmp.lt.s32.totalorder %s8897_s17, %s18095_s10 }
  0x2a   : > { %7882 = vmatmul.msk.bf16.gmra.mxu0 %vm18160_vm4, %v8176_v25  ;;  %v1454_v25 = vsel %vm1422_vm9, 1, %v18097_v3  ;;  %vm1435_vm6 = vcmp.ge.s32.totalorder %v9157_v29, 1  ;;  %vm1452_vm7 = vcmp.ge.s32.totalorder %v9289_v8, 1  ;;  %v8193_v29 = vld [vmem:[%s18089_s4 + $0x10] sm:$0xff]  ;;  %vm1437_vm8 = vcmp.ge.s32.totalorder %v9183_v36, 1  ;;  %v8183_v36 = vld [vmem:[%s9100_s12 + $0x40] sm:$0xff]  ;;  %p8899_p11 = scmp.ne.s32.totalorder %s8897_s17, %s8898_s30 }
  0x2b   : > { %vm1438_vm9 = vcmp.ge.s32.totalorder %v9178_v35, 1  ;;  %v9386_v35 = vld [vmem:[%s18091_s6] ss:$0 sm:$0xff]  ;;  %s8902_s18 = scalar_lea.hbm %s18095_s10, 512 }
  0x2c   : > { %p8900_p12 = pnand %p8899_p11, %p9042_p5  ;;  %p8904_p1 = scmp.lt.s32.totalorder %s8902_s18, %s8898_s30 }
  0x2e   : > { %1070 = vperm.xlu2 %8284, %v1015_v26   ;;  %1067 = vperm.xlu1 %8283, %v1014_v27   ;;  %v1458_v27 = vsel %vm1426_vm10, 1, %v18097_v3  ;;  %vm1436_vm10 = vcmp.ge.s32.totalorder %v9188_v37, 1  ;;  %v8191_v37 = vld [vmem:[%s18089_s4] sm:$0xff]  ;;  %p8901_p13 = pneg %p8900_p12  ;;  %p8905_p2 = por %p8904_p1, %p8903_p0 }
  0x2f   : > { %1064 = vperm.xlu0 %8282, %v1013_v28   ;;  %v1459_v28 = vsel %vm1427_vm11, 1, %v18097_v3  ;;  %vm1440_vm11 = vcmp.ge.s32.totalorder %v9206_v43, 1 }
  0x30   : > { %p8906_p3 = pnand %p8905_p2, %p8901_p13 }
  0x36   : > { %1079 = vperm.xlu2 %8284, %v1018_v32   ;;  %1076 = vperm.xlu1 %8283, %v1017_v33   ;;  %v1457_v32 = vsel %vm1425_vm12, 1, %v18097_v3  ;;  %v8181_v33 = vld [vmem:[%s9100_s12 + $0x30] sm:$0xff]  ;;  %vm1441_vm12 = vcmp.ge.s32.totalorder %v9201_v42, 1 }
  0x37   : > { %1073 = vperm.xlu0 %8282, %v1016_v34  }
  0x3a   : > { %7883 = vmatmul.msk.bf16.gmra.mxu0 %vm18160_vm4, %v8177_v38  ;;  %v1461_v38 = vsel %vm1429_vm13, 1, %v18097_v3  ;;  %vm1439_vm13 = vcmp.ge.s32.totalorder %v9211_v44, 1 }
  0x3b   : > { %v1471_v43 = vsel %vm1439_vm13, 1, %v18097_v3  ;;  %vm2821_vm13 = vcmp.lt.s32.totalorder %v9055_v0, 14 }
  0x3e   : > { %1088 = vperm.xlu2 %8284, %v1021_v39   ;;  %1085 = vperm.xlu1 %8283, %v1020_v40   ;;  %v1462_v39 = vsel %vm1430_vm14, 1, %v18097_v3  ;;  %v8198_v40 = vld [vmem:[%s18089_s4 + $0x38] sm:$0xff]  ;;  %vm1443_vm14 = vcmp.ge.s32.totalorder %v9227_v49, 1 }
  0x3f   : > { %1082 = vperm.xlu0 %8282, %v1019_v41   ;;  %v1460_v41 = vsel %vm1428_vm15, 1, %v18097_v3  ;;  %2535 = vmatpush.bf16.msra.mxu2 %v8198_v40  ;;  %vm1444_vm15 = vcmp.ge.s32.totalorder %v9222_v48, 1  ;;  %v8184_v48 = vld [vmem:[%s9100_s12 + $0x48] sm:$0xff] }
  0x46   : > { %1097 = vperm.xlu2 %8284, %v1024_v45   ;;  %1094 = vperm.xlu1 %8283, %v1023_v46   ;;  %v8197_v45 = vld [vmem:[%s18089_s4 + $0x30] sm:$0xff] }
  0x47   : > { %1091 = vperm.xlu0 %8282, %v1022_v47   ;;  %2536 = vmatpush.bf16.msra.mxu2 %v8197_v45  ;;  %v1464_v47 = vsel %vm1432_vm1, 1, %v18097_v3  ;;  %vm1442_vm1 = vcmp.ge.s32.totalorder %v9232_v50, 1 }
  0x4a   : > { %7884 = vmatmul.msk.bf16.gmra.mxu0 %vm18160_vm4, %v8178_v51  ;;  %v1465_v51 = vsel %vm1433_vm2, 1, %v18097_v3  ;;  %vm1446_vm2 = vcmp.ge.s32.totalorder %v9250_v56, 1 }
  0x4e   : > { %1106 = vperm.xlu2 %8284, %v1027_v52   ;;  %1103 = vperm.xlu1 %8283, %v1026_v53   ;;  %v8196_v52 = vld [vmem:[%s18089_s4 + $0x28] sm:$0xff]  ;;  %v1463_v53 = vsel %vm1431_vm3, 1, %v18097_v3  ;;  %vm1447_vm3 = vcmp.ge.s32.totalorder %v9245_v55, 1 }
  0x4f   : > { %1100 = vperm.xlu0 %8282, %v1025_v54   ;;  %2537 = vmatpush.bf16.msra.mxu2 %v8196_v52  ;;  %v8182_v54 = vld [vmem:[%s9100_s12 + $0x38] sm:$0xff]  ;;  %v1475_v52 = vsel %vm1443_vm14, 1, %v18097_v3 }
  0x53   : > { %2538 = vmatpush.bf16.msra.mxu2 %v8195_v31  ;;  %v1474_v31 = vsel %vm1442_vm1, 1, %v18097_v3 }
  0x56   : > { %1115 = vperm.xlu2 %8284, %v1030_v58   ;;  %1112 = vperm.xlu1 %8283, %v1029_v59  }
  0x57   : > { %1109 = vperm.xlu0 %8282, %v1028_v60  }
  0x5a   : > { %7885 = vmatmul.msk.bf16.gmra.mxu0 %vm18160_vm4, %v8179_v4  ;;  %v1466_v4 = vsel %vm1434_vm5, 1, %v18097_v3  ;;  %vm1445_vm5 = vcmp.ge.s32.totalorder %v9255_v57, 1 }
  0x5b   : > { %v1477_v56 = vsel %vm1445_vm5, 1, %v18097_v3  ;;  %vm2824_vm5 = vcmp.lt.s32.totalorder %v9118_v17, 14 }
  0x5e   : > { %1124 = vperm.xlu2 %8284, %v1033_v5   ;;  %1121 = vperm.xlu1 %8283, %v1032_v6   ;;  %v1467_v5 = vsel %vm1435_vm6, 1, %v18097_v3  ;;  %v8194_v6 = vld [vmem:[%s18089_s4 + $0x18] sm:$0xff]  ;;  %vm1449_vm6 = vcmp.ge.s32.totalorder %v9271_v62, 1 }
  0x5f   : > { %1118 = vperm.xlu0 %8282, %v1031_v7   ;;  %v1484_v7 = vsel %vm1452_vm7, 1, %v18097_v3  ;;  %2539 = vmatpush.bf16.msra.mxu2 %v8194_v6  ;;  %vm1450_vm7 = vcmp.ge.s32.totalorder %v9266_v61, 1 }
  0x63   : > { %2540 = vmatpush.bf16.msra.mxu2 %v8193_v29 }
  0x66   : > { %1130 = vperm.xlu1 %8283, %v1035_v13   ;;  %1486 = vperm.xlu2 %8284, %v1453_v14  }
  0x67   : > { %1127 = vperm.xlu0 %8282, %v1034_v15   ;;  %v1469_v15 = vsel %vm1437_vm8, 1, %v18097_v3  ;;  %vm1448_vm8 = vcmp.ge.s32.totalorder %v9276_v63, 1  ;;  %v8185_v63 = vld [vmem:[%s9100_s12 + $0x50] sm:$0xff] }
  0x68   : > { %v1480_v62 = vsel %vm1448_vm8, 1, %v18097_v3 }
  0x6a   : > { %7886 = vmatmul.msk.bf16.gmra.mxu0 %vm18160_vm4, %v8180_v19  ;;  %v1470_v19 = vsel %vm1438_vm9, 1, %v18097_v3  ;;  %vm2817_vm9 = vcmp.lt.s32.totalorder %v9065_v2, 14 }
  0x6e   : > { %1492 = vperm.xlu1 %8283, %v1455_v20   ;;  %1495 = vperm.xlu2 %8284, %v1456_v21   ;;  %v8192_v20 = vld [vmem:[%s18089_s4 + $0x8] sm:$0xff]  ;;  %v1468_v21 = vsel %vm1436_vm10, 1, %v18097_v3  ;;  %vm2818_vm10 = vcmp.lt.s32.totalorder %v9095_v11, 14 }
  0x6f   : > { %1489 = vperm.xlu0 %8282, %v1454_v25   ;;  %2541 = vmatpush.bf16.msra.mxu2 %v8192_v20  ;;  %v1479_v20 = vsel %vm1447_vm3, 1, %v18097_v3  ;;  %vm2823_vm3 = vcmp.lt.s32.totalorder %v9123_v18, 14 }
  0x70   : > { %v9310_v26 = vpop.permute.xlu2 %1049 }
  0x71   : > { %18998 = vst [vmem:[#allocation5_spill] sm:$0xff] %v9310_v26 }
  0x73   : > { %2542 = vmatpush.bf16.msra.mxu2 %v8191_v37 }
  0x76   : > { %1501 = vperm.xlu1 %8283, %v1458_v27   ;;  %1504 = vperm.xlu2 %8284, %v1459_v28  }
  0x77   : > { %1498 = vperm.xlu0 %8282, %v1457_v32  }
  0x78   : > { %v9319_v34 = vpop.permute.xlu2 %1052 }
  0x79   : > { %18999 = vst [vmem:[#allocation6_spill] sm:$0xff] %v9319_v34 }
  0x7a   : > { %7887 = vmatmul.msk.bf16.gmra.mxu0 %vm18160_vm4, %v8181_v33 }
  0x7e   : > { %1510 = vperm.xlu1 %8283, %v1461_v38   ;;  %1513 = vperm.xlu2 %8284, %v1462_v39   ;;  %v1472_v38 = vsel %vm1440_vm11, 1, %v18097_v3  ;;  %v1473_v39 = vsel %vm1441_vm12, 1, %v18097_v3  ;;  %vm1451_vm11 = vcmp.ge.s32.totalorder %v9294_v12, 1  ;;  %vm2820_vm12 = vcmp.lt.s32.totalorder %v9090_v10, 14 }
  0x7f   : > { %1507 = vperm.xlu0 %8282, %v1460_v41  }
  0x80   : > { %v9334_v46 = vpop.permute.xlu2 %1061 }
  0x81   : > { %19000 = vst [vmem:[#allocation7_spill] sm:$0xff] %v9334_v46 }
  0x86   : > { %1519 = vperm.xlu1 %8283, %v1464_v47   ;;  %1522 = vperm.xlu2 %8284, %v1465_v51  }
  0x87   : > { %1516 = vperm.xlu0 %8282, %v1463_v53   ;;  %v1476_v53 = vsel %vm1444_vm15, 1, %v18097_v3  ;;  %vm2819_vm15 = vcmp.lt.s32.totalorder %v9060_v1, 14 }
  0x88   : > { %v9349_v58 = vpop.permute.xlu2 %1070  ;;  %v9351_v59 = vpop.permute.xlu1 %1043 }
  0x89   : > { %19001 = vst [vmem:[#allocation8_spill] sm:$0xff] %v9349_v58  ;;  %v9355_v60 = vpop.permute.xlu0 %1037 }
  0x8a   : > { %19002 = vst [vmem:[#allocation9_spill] sm:$0xff] %v9351_v59  ;;  %7888 = vmatmul.msk.bf16.gmra.mxu0 %vm18160_vm4, %v8182_v54 }
  0x8b   : > { %19003 = vst [vmem:[#allocation10_spill] sm:$0xff] %v9355_v60 }
  0x8e   : > { %1525 = vperm.xlu1 %8283, %v1466_v4   ;;  %1528 = vperm.xlu2 %8284, %v1467_v5  }
  0x8f   : > { %1579 = vperm.xlu0 %8282, %v1484_v7  }
  0x90   : > { %v9368_v30 = vpop.permute.xlu2 %1079  ;;  %v9370_v13 = vpop.permute.xlu1 %1046 }
  0x91   : > { %19004 = vst [vmem:[#allocation11_spill] sm:$0xff] %v9368_v30  ;;  %v9374_v14 = vpop.permute.xlu0 %1040 }
  0x92   : > { %19005 = vst [vmem:[#allocation12_spill] sm:$0xff] %v9370_v13  ;;  %vm18130_vm14 = vcmp.eq.s32.totalorder %v9374_v14, 1 }
  0x93   : > { %19006 = vst [vmem:[#allocation13_spill] sm:$0xff] %v9374_v14 }
  0x96   : > { %1534 = vperm.xlu1 %8283, %v1469_v15   ;;  %1537 = vperm.xlu2 %8284, %v1470_v19   ;;  %v1478_v19 = vsel %vm1446_vm2, 1, %v18097_v3 }
  0x97   : > { %1531 = vperm.xlu0 %8282, %v1468_v21   ;;  %v603_v32 = vpop.f32.mrf.mxu0 }
  0x98   : > { %v9392_v25 = vpop.permute.xlu2 %1088  ;;  %v9394_v27 = vpop.permute.xlu1 %1058  ;;  %v9402_v33 = vadd.f32 %v9386_v35, %v603_v32 }
  0x99   : > { %19007 = vst [vmem:[#allocation14_spill] sm:$0xff] %v9392_v25  ;;  %v9398_v28 = vpop.permute.xlu0 %1055 }
  0x9a   : > { %19008 = vst [vmem:[#allocation15_spill] sm:$0xff] %v9394_v27  ;;  %7889 = vmatmul.msk.bf16.gmra.mxu0 %vm18160_vm4, %v8183_v36  ;;  %v683_v40 = vsub.f32 0.0, %v9402_v33  ;;  %vm18323_vm0 = vcmp.eq.s32.totalorder %v9398_v28, 1 }
  0x9b   : > { %19009 = vst [vmem:[#allocation16_spill] sm:$0xff] %v9398_v28 }
  0x9c   : > { %v715_v42 = vmul.f32 1.442695, %v683_v40 }
  0x9e   : > { %1543 = vperm.xlu1 %8283, %v1472_v38   ;;  %1546 = vperm.xlu2 %8284, %v1473_v39   ;;  %8289 = vpow2.f32 %v715_v42  ;;  %v1482_v42 = vsel %vm1450_vm7, 1, %v18097_v3  ;;  %vm2822_vm7 = vcmp.lt.s32.totalorder %v9085_v9, 14 }
  0x9f   : > { %1540 = vperm.xlu0 %8282, %v1471_v43   ;;  %v605_v47 = vpop.f32.mrf.mxu0  ;;  %v1481_v43 = vsel %vm1449_vm6, 1, %v18097_v3  ;;  %vm18150_vm6 = vcmp.eq.s32.totalorder %v9351_v59, 1 }
  0xa0   : > { %v9409_v41 = vpop.permute.xlu2 %1097  ;;  %v9411_v44 = vpop.permute.xlu1 %1067  ;;  %v606_v51 = vadd.f32 %v9386_v35, %v605_v47 }
  0xa1   : > { %19010 = vst [vmem:[#allocation17_spill] sm:$0xff] %v9409_v41  ;;  %v9415_v45 = vpop.permute.xlu0 %1064 }
  0xa2   : > { %19011 = vst [vmem:[#allocation18_spill] sm:$0xff] %v9411_v44  ;;  %v684_v54 = vsub.f32 0.0, %v606_v51 }
  0xa3   : > { %19012 = vst [vmem:[#allocation19_spill] sm:$0xff] %v9415_v45 }
  0xa4   : > { %v717_v4 = vmul.f32 1.442695, %v684_v54  ;;  %v8290_v49 = vpop.eup %8289 }
  0xa5   : > { %v779_v15 = vadd.f32 1.0, %v8290_v49 }
  0xa6   : > { %1552 = vperm.xlu1 %8283, %v1475_v52   ;;  %1555 = vperm.xlu2 %8284, %v1476_v53   ;;  %8291 = vpow2.f32 %v717_v4 }
  0xa7   : > { %1549 = vperm.xlu0 %8282, %v1474_v31   ;;  %v608_v7 = vpop.f32.mrf.mxu0  ;;  %8293 = vrcp.f32 %v779_v15 }
  0xa8   : > { %v9423_v5 = vpop.permute.xlu2 %1106  ;;  %v9425_v50 = vpop.permute.xlu1 %1076  ;;  %v9433_v29 = vadd.f32 %v9386_v35, %v608_v7 }
  0xa9   : > { %19013 = vst [vmem:[#allocation20_spill] sm:$0xff] %v9423_v5  ;;  %v9429_v6 = vpop.permute.xlu0 %1073 }
  0xaa   : > { %19014 = vst [vmem:[#allocation21_spill] sm:$0xff] %v9425_v50  ;;  %7890 = vmatmul.msk.bf16.gmra.mxu0 %vm18160_vm4, %v8184_v48  ;;  %v685_v21 = vsub.f32 0.0, %v9433_v29 }
  0xab   : > { %19015 = vst [vmem:[#allocation22_spill] sm:$0xff] %v9429_v6 }
  0xac   : > { %v8292_v55 = vpop.eup %8291  ;;  %v719_v36 = vmul.f32 1.442695, %v685_v21  ;;  %v2849_v21 = vsel %vm2817_vm9, 1, %v18097_v3  ;;  %vm2826_vm9 = vcmp.lt.s32.totalorder %v9144_v24, 14 }
  0xad   : > { %v780_v57 = vadd.f32 1.0, %v8292_v55  ;;  %v8294_v52 = vpop.eup %8293 }
  0xae   : > { %1561 = vperm.xlu1 %8283, %v1478_v19   ;;  %1564 = vperm.xlu2 %8284, %v1479_v20   ;;  %8295 = vpow2.f32 %v719_v36  ;;  %v9459_v4 = vmul.f32 %v8294_v52, %v9402_v33  ;;  %v1483_v36 = vsel %vm1451_vm11, 1, %v18097_v3  ;;  %vm2825_vm11 = vcmp.lt.s32.totalorder %v9113_v16, 14 }
  0xaf   : > { %1558 = vperm.xlu0 %8282, %v1477_v56   ;;  %8297 = vrcp.f32 %v780_v57  ;;  %v610_v39 = vpop.f32.mrf.mxu0  ;;  %v2850_v56 = vsel %vm2818_vm10, 1, %v18097_v3  ;;  %vm2827_vm10 = vcmp.lt.s32.totalorder %v9139_v23, 14 }
  0xb0   : > { %v9440_v37 = vpop.permute.xlu2 %1115  ;;  %v9442_v32 = vpop.permute.xlu1 %1085  ;;  %v9450_v40 = vadd.f32 %v9386_v35, %v610_v39  ;;  %19019 = vst [vmem:[#allocation26_spill] sm:$0xff] %v9459_v4 }
  0xb1   : > { %19016 = vst [vmem:[#allocation23_spill] sm:$0xff] %v9440_v37  ;;  %v9446_v38 = vpop.permute.xlu0 %1082 }
  0xb2   : > { %19017 = vst [vmem:[#allocation24_spill] sm:$0xff] %v9442_v32  ;;  %v686_v47 = vsub.f32 0.0, %v9450_v40 }
  0xb3   : > { %19018 = vst [vmem:[#allocation25_spill] sm:$0xff] %v9446_v38 }
  0xb4   : > { %v8296_v61 = vpop.eup %8295  ;;  %v721_v53 = vmul.f32 1.442695, %v686_v47 }
  0xb5   : > { %v8298_v54 = vpop.eup %8297  ;;  %v781_v31 = vadd.f32 1.0, %v8296_v61 }
  0xb6   : > { %1570 = vperm.xlu1 %8283, %v1481_v43   ;;  %1573 = vperm.xlu2 %8284, %v1482_v42   ;;  %v9461_v48 = vmul.f32 %v8298_v54, %v606_v51  ;;  %8299 = vpow2.f32 %v721_v53  ;;  %v423_v51 = vlaneseq }
  0xb7   : > { %1567 = vperm.xlu0 %8282, %v1480_v62   ;;  %8301 = vrcp.f32 %v781_v31  ;;  %v613_v19 = vpop.f32.mrf.mxu0 }
  0xb8   : > { %19020 = vst [vmem:[#allocation27_spill] sm:$0xff] %v9461_v48  ;;  %v9463_v49 = vpop.permute.xlu2 %1124  ;;  %v9465_v7 = vpop.permute.xlu1 %1094  ;;  %v9472_v20 = vadd.f32 %v9386_v35, %v613_v19  ;;  %v891_v33 = vpack.c.bf16 %v9461_v48, %v9459_v4  ;;  %v9481_v43 = vshrl.u32 %v423_v51, 7  ;;  %v18096_v61 = vrot.slane %v9461_v48, 1 }
  0xb9   : > { %19021 = vst [vmem:[#allocation28_spill] sm:$0xff] %v9463_v49  ;;  %v9468_v15 = vpop.permute.xlu0 %1091  ;;  %v18100_v19 = vrot.slane %v9461_v48, 7  ;;  %v2853_v51 = vsel %vm2821_vm13, 1, %v18097_v3  ;;  %vm3395_vm13 = vcmp.ge.s32.totalorder %v9095_v11, 2 }
  0xba   : > { %19022 = vst [vmem:[#allocation29_spill] sm:$0xff] %v9465_v7  ;;  %7891 = vmatmul.msk.bf16.gmra.mxu0 %vm18160_vm4, %v8185_v63  ;;  %v687_v55 = vsub.f32 0.0, %v9472_v20  ;;  %2543 = vmatmul.bf16.vlgmr.msra.gmra.mxu2 %v891_v33  ;;  %vm939_vm1 = vcmp.lt.s32.totalorder %v9481_v43, 7  ;;  %v2852_v33 = vsel %vm2820_vm12, 1, %v18097_v3  ;;  %vm1388_vm2 = vcmp.lt.s32.totalorder %v9481_v43, 1 }
  0xbb   : > { %19023 = vst [vmem:[#allocation30_spill] sm:$0xff] %v9468_v15  ;;  %vm18162_vm12 = vcmp.eq.s32.totalorder %v9370_v13, 1 }
  0xbc   : > { %v8300_v57 = vpop.eup %8299  ;;  %v723_v12 = vmul.f32 1.442695, %v687_v55  ;;  %v2851_v55 = vsel %vm2819_vm15, 1, %v18097_v3  ;;  %v8186_v3 = vld [vmem:[%s9100_s12 + $0x58] sm:$0xff]  ;;  %vm3396_vm15 = vcmp.ge.s32.totalorder %v9060_v1, 2 }
  0xbd   : > { %v8302_v39 = vpop.eup %8301  ;;  %v782_v42 = vadd.f32 1.0, %v8300_v57 }
  0xbe   : > { %2882 = vperm.xlu1 %8283, %v2849_v21   ;;  %2885 = vperm.xlu2 %8284, %v2850_v56   ;;  %v9484_v47 = vmul.f32 %v8302_v39, %v9433_v29  ;;  %8303 = vpow2.f32 %v723_v12 }
  0xbf   : > { %1576 = vperm.xlu0 %8282, %v1483_v36   ;;  %8305 = vrcp.f32 %v782_v42  ;;  %v615_v54 = vpop.f32.mrf.mxu0 }
  0xc0   : > { %v9486_v62 = vpop.permute.xlu1 %1103  ;;  %v9488_v52 = vpop.permute.xlu2 %1486  ;;  %v909_v29 = vrot.slane %v9484_v47, 1  ;;  %v9499_v31 = vadd.f32 %v9386_v35, %v615_v54  ;;  %v1358_v63 = vrot.slane %v9484_v47, 7 }
  0xc1   : > { %19024 = vst [vmem:[#allocation31_spill] sm:$0xff] %v9486_v62  ;;  %v9494_v53 = vpop.permute.xlu0 %1100 }
  0xc2   : > { %19025 = vst [vmem:[#allocation32_spill] sm:$0xff] %v9488_v52  ;;  %v969_v21 = vsel %vm939_vm1, %v18096_v61, %v909_v29  ;;  %v688_v56 = vsub.f32 0.0, %v9499_v31  ;;  %v9517_v36 = vsel %vm1388_vm2, %v18100_v19, %v1358_v63 }
  0xc3   : > { %19026 = vst [vmem:[#allocation33_spill] sm:$0xff] %v9494_v53  ;;  %v1165_v57 = vsel %vm18130_vm14, %v969_v21, -inf }
  0xc4   : > { %v8304_v12 = vpop.eup %8303  ;;  %v9522_v39 = vmax.f32 %v9461_v48, %v1165_v57  ;;  %v725_v42 = vmul.f32 1.442695, %v688_v56 }
  0xc5   : > { %v8306_v54 = vpop.eup %8305  ;;  %v783_v61 = vadd.f32 1.0, %v8304_v12 }
  0xc6   : > { %19027 = vst [vmem:[#allocation34_spill] sm:$0xff] %v9522_v39  ;;  %2891 = vperm.xlu1 %8283, %v2852_v33   ;;  %2894 = vperm.xlu2 %8284, %v2853_v51   ;;  %v9526_v52 = vmul.f32 %v8306_v54, %v9450_v40  ;;  %8307 = vpow2.f32 %v725_v42 }
  0xc7   : > { %2888 = vperm.xlu0 %8282, %v2851_v55   ;;  %8309 = vrcp.f32 %v783_v61  ;;  %v618_v51 = vpop.f32.mrf.mxu0  ;;  %v19031_v61 = vmov 0  }
  0xc8   : > { %v9528_v19 = vpop.permute.xlu1 %1112  ;;  %v9530_v49 = vpop.permute.xlu2 %1495  ;;  %v910_v40 = vrot.slane %v9526_v52, 1  ;;  %v1359_v21 = vrot.slane %v9526_v52, 7  ;;  %v9542_v56 = vadd.f32 %v9386_v35, %v618_v51  ;;  %v892_v55 = vpack.c.bf16 %v9526_v52, %v9484_v47 }
  0xc9   : > { %19028 = vst [vmem:[#allocation35_spill] sm:$0xff] %v9528_v19  ;;  %v9535_v33 = vpop.permute.xlu0 %1109  ;;  %vm18136_vm8 = vcmp.eq.s32.totalorder %v9530_v49, 1  ;;  %v2855_v57 = vsel %vm2823_vm3, 1, %v19031_v61  ;;  %v2856_v12 = vsel %vm2824_vm5, 1, %v19031_v61  ;;  %v2854_v51 = vsel %vm2822_vm7, 1, %v19031_v61 }
  0xca   : > { %19029 = vst [vmem:[#allocation36_spill] sm:$0xff] %v9530_v49  ;;  %7892 = vmatmul.msk.bf16.gmra.mxu0 %vm18160_vm4, %v8186_v3  ;;  %v968_v42 = vsel %vm939_vm1, %v909_v29, %v910_v40  ;;  %v1417_v54 = vsel %vm1388_vm2, %v1358_v63, %v1359_v21  ;;  %v689_v37 = vsub.f32 0.0, %v9542_v56  ;;  %2548 = vmatmul.bf16.gmra.mxu2 %v892_v55  ;;  %v18108_v55 = vrot.slane %v9522_v39, 1 }
  0xcb   : > { %19030 = vst [vmem:[#allocation37_spill] sm:$0xff] %v9535_v33  ;;  %v1166_v3 = vsel %vm18150_vm6, %v968_v42, -inf  ;;  %v1616_v19 = vsel %vm18136_vm8, %v1417_v54, -inf  ;;  %vm3394_vm3 = vcmp.ge.s32.totalorder %v9065_v2, 2  ;;  %vm18161_vm5 = vcmp.eq.s32.totalorder %v9310_v26, 1 }
  0xcc   : > { %v8308_v33 = vpop.eup %8307  ;;  %v9560_v5 = vmax.f32 %v9484_v47, %v1166_v3  ;;  %v9563_v29 = vmax.f32 %v9526_v52, %v1616_v19  ;;  %v727_v62 = vmul.f32 1.442695, %v689_v37  ;;  %v2857_v3 = vsel %vm2825_vm11, 1, %v19031_v61 }
  0xcd   : > { %v8310_v63 = vpop.eup %8309  ;;  %v784_v53 = vadd.f32 1.0, %v8308_v33  ;;  %vm3398_vm7 = vcmp.ge.s32.totalorder %v9055_v0, 2  ;;  %v3428_v39 = vsel %vm3396_vm15, 1, %v19031_v61  ;;  %vm3397_vm11 = vcmp.ge.s32.totalorder %v9090_v10, 2 }
  0xce   : > { %2900 = vperm.xlu1 %8283, %v2855_v57   ;;  %2903 = vperm.xlu2 %8284, %v2856_v12   ;;  %v1230_v42 = vrot.slane %v9560_v5, 1  ;;  %v9571_v54 = vmul.f32 %v8310_v63, %v9472_v20  ;;  %8311 = vpow2.f32 %v727_v62  ;;  %v2858_v20 = vsel %vm2826_vm9, 1, %v19031_v61 }
  0xcf   : > { %2897 = vperm.xlu0 %8282, %v2854_v51   ;;  %8313 = vrcp.f32 %v784_v53  ;;  %v620_v33 = vpop.f32.mrf.mxu0  ;;  %v2859_v53 = vsel %vm2827_vm10, 1, %v19031_v61  ;;  %vm3399_vm9 = vcmp.ge.s32.totalorder %v9085_v9, 2  ;;  %vm18151_vm10 = vcmp.eq.s32.totalorder %v9319_v34, 1 }
  0xd0   : > { %v9573_v37 = vpop.permute.xlu1 %1121  ;;  %v1289_v57 = vsel %vm939_vm1, %v18108_v55, %v1230_v42  ;;  %v911_v12 = vrot.slane %v9571_v54, 1  ;;  %v9584_v51 = vadd.f32 %v9386_v35, %v620_v33  ;;  %v1360_v63 = vrot.slane %v9571_v54, 7 }
  0xd1   : > { %19032 = vst [vmem:[#allocation38_spill] sm:$0xff] %v9573_v37  ;;  %v9576_v19 = vpop.permute.xlu0 %1118  ;;  %v9589_v62 = vsel %vm18130_vm14, %v1289_v57, -inf  ;;  %v8187_v57 = vld [vmem:[%s9100_s12 + $0x60] sm:$0xff]  ;;  %vm3402_vm15 = vcmp.ge.s32.totalorder %v9113_v16, 2  ;;  %v19044_v13 = vrot.slane %v9563_v29, 7 }
  0xd2   : > { %19033 = vst [vmem:[#allocation39_spill] sm:$0xff] %v9576_v19  ;;  %v967_v55 = vsel %vm939_vm1, %v910_v40, %v911_v12  ;;  %v690_v14 = vsub.f32 0.0, %v9584_v51  ;;  %v9609_v37 = vsel %vm1388_vm2, %v1359_v21, %v1360_v63  ;;  %v3427_v21 = vsel %vm3395_vm13, 1, %v19031_v61 }
  0xd3   : > { %19034 = vst [vmem:[#allocation40_spill] sm:$0xff] %v9589_v62  ;;  %v1167_v23 = vsel %vm18162_vm12, %v967_v55, -inf  ;;  %vm3401_vm13 = vcmp.ge.s32.totalorder %v9118_v17, 2 }
  0xd4   : > { %v8312_v19 = vpop.eup %8311  ;;  %v9612_v33 = vmax.f32 %v9526_v52, %v1167_v23  ;;  %v729_v62 = vmul.f32 1.442695, %v690_v14  ;;  %v19035_v52 = vrot.slane %v9461_v48, 7  ;;  %v19036_v14 = vrot.slane %v9459_v4, 7 }
  0xd5   : > { %v8314_v40 = vpop.eup %8313  ;;  %v785_v55 = vadd.f32 1.0, %v8312_v19 }
  0xd6   : > { %2909 = vperm.xlu1 %8283, %v2858_v20   ;;  %2912 = vperm.xlu2 %8284, %v2859_v53   ;;  %v9627_v20 = vsel %vm1388_vm2, %v19036_v14, %v19035_v52  ;;  %v18116_v53 = vrot.slane %v9612_v33, 1  ;;  %v9631_v23 = vmul.f32 %v8314_v40, %v9499_v31  ;;  %8315 = vpow2.f32 %v729_v62 }
  0xd7   : > { %2906 = vperm.xlu0 %8282, %v2857_v3   ;;  %8317 = vrcp.f32 %v785_v55  ;;  %v623_v3 = vpop.f32.mrf.mxu0  ;;  %v3426_v52 = vsel %vm3394_vm3, 1, %v19031_v61  ;;  %vm3400_vm3 = vcmp.ge.s32.totalorder %v9123_v18, 2 }
  0xd8   : > { %v9633_v19 = vpop.permute.xlu1 %1130  ;;  %v1288_v31 = vsel %vm939_vm1, %v1230_v42, %v18116_v53  ;;  %v912_v62 = vrot.slane %v9631_v23, 1  ;;  %v1361_v40 = vrot.slane %v9631_v23, 7  ;;  %v9658_v2 = vadd.f32 %v9386_v35, %v623_v3 }
  0xd9   : > { %19037 = vst [vmem:[#allocation41_spill] sm:$0xff] %v9633_v19  ;;  %v9636_v11 = vpop.permute.xlu0 %1127  ;;  %v9655_v1 = vsel %vm18150_vm6, %v1288_v31, -inf  ;;  %v893_v55 = vpack.c.bf16 %v9631_v23, %v9571_v54  ;;  %v3430_v42 = vsel %vm3398_vm7, 1, %v19031_v61  ;;  %vm18401_vm6 = vcmp.eq.s32.totalorder %v9415_v45, 1 }
  0xda   : > { %19038 = vst [vmem:[#allocation42_spill] sm:$0xff] %v9636_v11  ;;  %7893 = vmatmul.msk.bf16.gmra.mxu0 %vm18160_vm4, %v8187_v57  ;;  %v9670_v53 = vsel %vm1388_vm2, %v1360_v63, %v1361_v40  ;;  %v966_v3 = vsel %vm939_vm1, %v911_v12, %v912_v62  ;;  %v691_v57 = vsub.f32 0.0, %v9658_v2  ;;  %v9681_v63 = vpop.permute.xlu2 %1504  ;;  %v3431_v12 = vsel %vm3399_vm9, 1, %v19031_v61 }
  0xdb   : > { %2553 = vmatmul.bf16.gmra.mxu2 %v893_v55  ;;  %v1168_v31 = vsel %vm18161_vm5, %v966_v3, -inf  ;;  %19039 = vst [vmem:[#allocation43_spill] sm:$0xff] %v9681_v63  ;;  %v3429_v55 = vsel %vm3397_vm11, 1, %v19031_v61  ;;  %vm18131_vm7 = vcmp.eq.s32.totalorder %v9681_v63, 1  ;;  %vm3425_vm11 = vcmp.ge.s32.totalorder %v9289_v8, 2 }
  0xdc   : > { %v8316_v0 = vpop.eup %8315  ;;  %v9690_v3 = vmax.f32 %v9571_v54, %v1168_v31  ;;  %v731_v14 = vmul.f32 1.442695, %v691_v57  ;;  %v9707_v31 = vsel %vm3402_vm15, 1, %v19031_v61 }
  0xdd   : > { %v8318_v59 = vpop.eup %8317  ;;  %v786_v11 = vadd.f32 1.0, %v8316_v0  ;;  %v19042_v0 = vrot.slane %v9612_v33, 1 }
  0xde   : > { %3462 = vperm.xlu1 %8283, %v3427_v21   ;;  %3465 = vperm.xlu2 %8284, %v3428_v39   ;;  %v9696_v39 = vsel %vm3401_vm13, 1, %v19031_v61  ;;  %v9699_v9 = vmul.f32 %v8318_v59, %v9542_v56  ;;  %v18122_v10 = vrot.slane %v9690_v3, 1  ;;  %vm2828_vm13 = vcmp.lt.s32.totalorder %v9134_v22, 14 }
  0xdf   : > { %3459 = vperm.xlu0 %8282, %v3426_v52   ;;  %v9712_v52 = vsel %vm3400_vm3, 1, %v19031_v61  ;;  %8319 = vrcp.f32 %v786_v11  ;;  %v625_v59 = vpop.f32.mrf.mxu0  ;;  %vm3403_vm3 = vcmp.ge.s32.totalorder %v9144_v24, 2 }
  0xe0   : > { %v9701_v21 = vpop.permute.xlu1 %1492  ;;  %v913_v16 = vrot.slane %v9699_v9, 1  ;;  %v18123_v56 = vrot.slane %v9699_v9, 7  ;;  %8321 = vpow2.f32 %v731_v14  ;;  %v9728_v57 = vadd.f32 %v9386_v35, %v625_v59 }
  0xe1   : > { %19040 = vst [vmem:[#allocation44_spill] sm:$0xff] %v9701_v21  ;;  %vm18137_vm9 = vcmp.eq.s32.totalorder %v9701_v21, 1  ;;  %v9715_v17 = vpop.permute.xlu0 %1489  ;;  %v1287_v19 = vsel %vm939_vm1, %v19042_v0, %v18122_v10 }
  0xe2   : > { %19041 = vst [vmem:[#allocation45_spill] sm:$0xff] %v9715_v17  ;;  %v1615_v18 = vsel %vm18137_vm9, %v9517_v36, -inf  ;;  %vm18163_vm15 = vcmp.eq.s32.totalorder %v9715_v17, 1  ;;  %v965_v14 = vsel %vm939_vm1, %v912_v62, %v913_v16  ;;  %v1295_v59 = vsel %vm18162_vm12, %v1287_v19, -inf }
  0xe3   : > { %v1647_v11 = vmax.f32 %v9484_v47, %v1615_v18  ;;  %v1414_v47 = vsel %vm1388_vm2, %v1361_v40, %v18123_v56  ;;  %v1614_v36 = vsel %vm18163_vm15, %v9627_v20, -inf  ;;  %v1169_v18 = vsel %vm18151_vm10, %v965_v14, -inf }
  0xe4   : > { %v1619_v0 = vsel %vm18131_vm7, %v1414_v47, -inf  ;;  %v9752_v10 = vmax.f32 %v9461_v48, %v1614_v36  ;;  %v692_v56 = vsub.f32 0.0, %v9728_v57  ;;  %v9759_v20 = vmax.f32 %v9631_v23, %v1169_v18 }
  0xe5   : > { %v1679_v62 = vrot.slane %v1647_v11, 7  ;;  %v9755_v40 = vmax.f32 %v9699_v9, %v1619_v0  ;;  %v1327_v19 = vmax.f32 %v9612_v33, %v1295_v59  ;;  %v8320_v14 = vpop.eup %8319  ;;  %v8188_v0 = vld [vmem:[%s9100_s12 + $0x68] sm:$0xff] }
  0xe6   : > { %19043 = vst [vmem:[#allocation46_spill] sm:$0xff] %v9752_v10  ;;  %3471 = vperm.xlu1 %8283, %v3430_v42   ;;  %3474 = vperm.xlu2 %8284, %v3431_v12   ;;  %v9771_v42 = vsel %vm3425_vm11, 1, %v19031_v61  ;;  %v8322_v12 = vpop.eup %8321  ;;  %v9775_v33 = vmul.f32 %v8320_v14, %v9584_v51  ;;  %v733_v18 = vmul.f32 1.442695, %v692_v56  ;;  %v19046_v17 = vrot.slane %v9752_v10, 7 }
  0xe7   : > { %v1737_v47 = vsel %vm1388_vm2, %v1679_v62, %v19044_v13  ;;  %3468 = vperm.xlu0 %8282, %v3429_v55   ;;  %v9784_v55 = vsel %vm2828_vm13, 1, %v19031_v61  ;;  %v787_v8 = vadd.f32 1.0, %v8322_v12  ;;  %v628_v56 = vpop.f32.mrf.mxu0  ;;  %vm18272_vm13 = vcmp.eq.s32.totalorder %v9394_v27, 1 }
  0xe8   : > { %v1744_v59 = vsel %vm18136_vm8, %v1737_v47, -inf  ;;  %v9779_v13 = vpop.permute.xlu1 %1501  ;;  %v1738_v51 = vsel %vm1388_vm2, %v19046_v17, %v1679_v62  ;;  %v914_v47 = vrot.slane %v9775_v33, 1  ;;  %8323 = vpow2.f32 %v733_v18 }
  0xe9   : > { %19045 = vst [vmem:[#allocation47_spill] sm:$0xff] %v9779_v13  ;;  %v1776_v36 = vmax.f32 %v9563_v29, %v1744_v59  ;;  %vm18134_vm11 = vcmp.eq.s32.totalorder %v9779_v13, 1  ;;  %v9792_v14 = vpop.permute.xlu0 %1498  ;;  %v1743_v22 = vsel %vm18137_vm9, %v1738_v51, -inf  ;;  %v18132_v59 = vrot.slane %v9755_v40, 7 }
  0xea   : > { %19047 = vst [vmem:[#allocation48_spill] sm:$0xff] %v9792_v14  ;;  %v1618_v12 = vsel %vm18134_vm11, %v9670_v53, -inf  ;;  %8325 = vrcp.f32 %v787_v8  ;;  %v1775_v49 = vmax.f32 %v1647_v11, %v1743_v22  ;;  %7894 = vmatmul.msk.bf16.gmra.mxu0 %vm18160_vm4, %v8188_v0  ;;  %v964_v62 = vsel %vm939_vm1, %v913_v16, %v914_v47 }
  0xeb   : > { %v1650_v17 = vmax.f32 %v9631_v23, %v1618_v12  ;;  %v1233_v51 = vrot.slane %v9759_v20, 1  ;;  %vm18135_vm14 = vcmp.eq.s32.totalorder %v9792_v14, 1  ;;  %v9808_v18 = vmax.f32 %v1327_v19, %v1776_v36 }
  0xec   : > { %v1170_v53 = vsel %vm18323_vm0, %v964_v62, -inf  ;;  %v19049_v11 = vmax.f32 %v9560_v5, %v9655_v1  ;;  %v1617_v8 = vsel %vm18135_vm14, %v9609_v37, -inf  ;;  %v19051_v22 = vrot.slane %v9690_v3, 1 }
  0xed   : > { %19048 = vst [vmem:[#allocation49_spill] sm:$0xff] %v9808_v18  ;;  %v1682_v0 = vrot.slane %v1650_v17, 7  ;;  %v9821_v16 = vmax.f32 %v9699_v9, %v1170_v53  ;;  %v1649_v36 = vmax.f32 %v9571_v54, %v1617_v8  ;;  %v9829_v12 = vadd.f32 %v9386_v35, %v628_v56 }
  0xee   : > { %v9815_v23 = vmax.f32 %v19049_v11, %v1775_v49  ;;  %v1286_v19 = vsel %vm939_vm1, %v19051_v22, %v1233_v51  ;;  %3480 = vperm.xlu1 %8283, %v9696_v39   ;;  %v894_v37 = vpack.c.bf16 %v9775_v33, %v9699_v9  ;;  %3483 = vperm.xlu2 %8284, %v9707_v31   ;;  %v3435_v54 = vsel %vm3403_vm3, 1, %v19031_v61  ;;  %v8324_v1 = vpop.eup %8323 }
  0xef   : > { %v1734_v5 = vsel %vm1388_vm2, %v1682_v0, %v18132_v59  ;;  %v1296_v49 = vsel %vm18161_vm5, %v1286_v19, -inf  ;;  %3477 = vperm.xlu0 %8282, %v9712_v52   ;;  %v18133_v39 = vrot.slane %v9821_v16, 1  ;;  %v1681_v53 = vrot.slane %v1649_v36, 7  ;;  %v630_v22 = vpop.f32.mrf.mxu0 }
  0xf0   : > { %19050 = vst [vmem:[#allocation50_spill] sm:$0xff] %v9815_v23  ;;  %v9848_v56 = vsel %vm18131_vm7, %v1734_v5, -inf  ;;  %v1328_v62 = vmax.f32 %v9690_v3, %v1296_v49  ;;  %v8326_v11 = vpop.eup %8325  ;;  %v788_v8 = vadd.f32 1.0, %v8324_v1  ;;  %v693_v52 = vsub.f32 0.0, %v9829_v12  ;;  %2558 = vmatmul.bf16.gmra.mxu2 %v894_v37 }
  0xf1   : > { %v1363_v24 = vrot.slane %v9775_v33, 7  ;;  %v9856_v19 = vmul.f32 %v8326_v11, %v9658_v2  ;;  %v1285_v3 = vsel %vm939_vm1, %v1233_v51, %v18133_v39  ;;  %v1735_v5 = vsel %vm1388_vm2, %v1681_v53, %v1682_v0  ;;  %v9874_v31 = vpop.permute.xlu0 %1507 }
  0xf2   : > { %v19052_v49 = vrot.slane %v9563_v29, 7  ;;  %8327 = vrcp.f32 %v788_v8  ;;  %v1297_v37 = vsel %vm18151_vm10, %v1285_v3, -inf  ;;  %v1746_v11 = vsel %vm18134_vm11, %v1735_v5, -inf  ;;  %19053 = vst [vmem:[#allocation51_spill] sm:$0xff] %v9874_v31  ;;  %v9879_v8 = vpop.permute.xlu1 %1510 }
  0xf3   : > { %vm18269_vm3 = vcmp.eq.s32.totalorder %v9334_v46, 1  ;;  %v915_v51 = vrot.slane %v9856_v19, 1  ;;  %v1329_v29 = vmax.f32 %v9759_v20, %v1297_v37  ;;  %19054 = vst [vmem:[#allocation52_spill] sm:$0xff] %v9879_v8  ;;  %v735_v3 = vmul.f32 1.442695, %v693_v52  ;;  %v9912_v37 = vpop.permute.xlu2 %1513 }
  0xf4   : > { %v1736_v1 = vsel %vm1388_vm2, %v19052_v49, %v1681_v53  ;;  %v1778_v53 = vmax.f32 %v1650_v17, %v1746_v11  ;;  %v1364_v49 = vrot.slane %v9856_v19, 7  ;;  %vm18189_vm7 = vcmp.eq.s32.totalorder %v9879_v8, 1  ;;  %19058 = vst [vmem:[#allocation55_spill] sm:$0xff] %v9912_v37 }
  0xf5   : > { %v1745_v2 = vsel %vm18135_vm14, %v1736_v1, -inf  ;;  %v19055_v5 = vrot.slane %v9699_v9, 7  ;;  %v963_v59 = vsel %vm939_vm1, %v914_v47, %v915_v51  ;;  %vm18184_vm11 = vcmp.eq.s32.totalorder %v9874_v31, 1  ;;  %v8189_v47 = vld [vmem:[%s9100_s12 + $0x70] sm:$0xff] }
  0xf6   : > { %v1777_v0 = vmax.f32 %v1649_v36, %v1745_v2  ;;  %v9889_v20 = vmax.f32 %v1329_v29, %v1778_v53  ;;  %3552 = vperm.xlu1 %8283, %v9771_v42   ;;  %v1171_v17 = vsel %vm18272_vm13, %v963_v59, -inf  ;;  %8329 = vpow2.f32 %v735_v3  ;;  %2915 = vperm.xlu2 %8284, %v9784_v55  }
  0xf7   : > { %v1413_v1 = vsel %vm1388_vm2, %v19055_v5, %v1363_v24  ;;  %v1412_v9 = vsel %vm1388_vm2, %v1363_v24, %v1364_v49  ;;  %3486 = vperm.xlu0 %8282, %v3435_v54   ;;  %v9925_v11 = vadd.f32 %v9386_v35, %v630_v22  ;;  %v633_v29 = vpop.f32.mrf.mxu0  ;;  %vm18178_vm14 = vcmp.eq.s32.totalorder %v9912_v37, 1 }
  0xf8   : > { %v1809_v39 = vmax.f32 %v1328_v62, %v1777_v0  ;;  %v1620_v36 = vsel %vm18184_vm11, %v1413_v1, -inf  ;;  %v9902_v62 = vmax.f32 %v9775_v33, %v1171_v17  ;;  %v1621_v59 = vsel %vm18189_vm7, %v1412_v9, -inf  ;;  %v8328_v24 = vpop.eup %8327  ;;  %v8802_v1 = vld [vmem:[%s18085_s0 + $0x58] sm:$0xff] }
  0xf9   : > { %v9915_v2 = vmax.f32 %v9856_v19, %v1621_v59  ;;  %v9918_v55 = vmax.f32 %v9775_v33, %v1620_v36  ;;  %v9922_v54 = vmax.f32 %v9808_v18, %v9889_v20  ;;  %v9930_v53 = vmul.f32 %v8328_v24, %v9728_v57  ;;  %v8801_v33 = vld [vmem:[%s18085_s0 + $0x50] sm:$0xff] }
  0xfa   : > { %v9905_v52 = vmax.f32 %v9815_v23, %v1809_v39  ;;  %v9908_v42 = vmax.f32 %v1809_v39, %v9815_v23  ;;  %v1235_v0 = vrot.slane %v9902_v62, 1  ;;  %vm3404_vm8 = vcmp.ge.s32.totalorder %v8801_v33, 2  ;;  %7895 = vmatmul.msk.bf16.gmra.mxu0 %vm18160_vm4, %v8189_v47  ;;  %v10085_v23 = vpop.permute.xlu1 %1519 }
  0xfb   : > { %19059 = vst [vmem:[#allocation56_spill] sm:$0xff] %v9922_v54  ;;  %v1685_v3 = vrot.slane %v9915_v2, 7  ;;  %v1684_v5 = vrot.slane %v9918_v55, 7  ;;  %v694_v22 = vsub.f32 0.0, %v9925_v11  ;;  %vm3405_vm9 = vcmp.ge.s32.totalorder %v8802_v1, 2 }
  0xfc   : > { %19056 = vst [vmem:[#allocation53_spill] sm:$0xff] %v9905_v52  ;;  %v19060_v57 = vrot.slane %v9821_v16, 1  ;;  %v9949_v59 = vadd.f32 %v9386_v35, %v633_v29  ;;  %v8330_v24 = vpop.eup %8329  ;;  %v19061_v13 = vrot.slane %v9755_v40, 7  ;;  %v19062_v36 = vrot.slane %v9930_v53, 1 }
  0xfd   : > { %19057 = vst [vmem:[#allocation54_spill] sm:$0xff] %v9908_v42  ;;  %v1732_v63 = vsel %vm1388_vm2, %v1684_v5, %v1685_v3  ;;  %v789_v21 = vadd.f32 1.0, %v8330_v24  ;;  %v3437_v33 = vsel %vm3405_vm9, 1, %v19031_v61  ;;  %vm18300_vm5 = vcmp.eq.s32.totalorder %v9349_v58, 1 }
  0xfe   : > { %v1284_v17 = vsel %vm939_vm1, %v19060_v57, %v1235_v0  ;;  %v1733_v14 = vsel %vm1388_vm2, %v19061_v13, %v1684_v5  ;;  %v737_v57 = vmul.f32 1.442695, %v694_v22  ;;  %v962_v29 = vsel %vm939_vm1, %v915_v51, %v19062_v36  ;;  %3492 = vperm.xlu2 %8284, %v3437_v33   ;;  %19071 = vst [vmem:[#allocation61_spill] sm:$0xff] %v10085_v23 }
  0xff   : > { %v1298_v47 = vsel %vm18323_vm0, %v1284_v17, -inf  ;;  %v1748_v17 = vsel %vm18184_vm11, %v1733_v14, -inf  ;;  %v1172_v34 = vsel %vm18269_vm3, %v962_v29, -inf  ;;  %v9970_v26 = vsel %vm18189_vm7, %v1732_v63, -inf }
 0x100   : > { %v1330_v9 = vmax.f32 %v9821_v16, %v1298_v47  ;;  %v1780_v13 = vmax.f32 %v9918_v55, %v1748_v17  ;;  %8331 = vpow2.f32 %v737_v57  ;;  %v9974_v16 = vmax.f32 %v9856_v19, %v1172_v34  ;;  %v8803_v47 = vld [vmem:[%s18085_s0 + $0x60] sm:$0xff] }
 0x101   : > { %v19063_v51 = vmax.f32 %v9755_v40, %v9848_v56  ;;  %8333 = vrcp.f32 %v789_v21  ;;  %v19064_v22 = vrot.slane %v9930_v53, 7  ;;  %v695_v55 = vsub.f32 0.0, %v9949_v59  ;;  %v635_v40 = vpop.f32.mrf.mxu0 }
 0x102   : > { %v895_v34 = vpack.c.bf16 %v9930_v53, %v9856_v19  ;;  %v3436_v36 = vsel %vm3404_vm8, 1, %v19031_v61  ;;  %v18153_v56 = vrot.slane %v9974_v16, 1  ;;  %vm2829_vm8 = vcmp.lt.s32.totalorder %v8803_v47, 14 }
 0x103   : > { %v9979_v5 = vmax.f32 %v1330_v9, %v19063_v51  ;;  %v1411_v63 = vsel %vm1388_vm2, %v1364_v49, %v19064_v22  ;;  %3489 = vperm.xlu1 %8283, %v3436_v36   ;;  %v739_v19 = vmul.f32 1.442695, %v695_v55  ;;  %v2861_v29 = vsel %vm2829_vm8, 1, %v19031_v61  ;;  %v10019_v51 = vpop.permute.xlu0 %1516 }
 0x104   : > { %v1622_v49 = vsel %vm18178_vm14, %v1411_v63, -inf  ;;  %2563 = vmatmul.bf16.gmra.mxu2 %v895_v34  ;;  %19066 = vst [vmem:[#allocation58_spill] sm:$0xff] %v10019_v51  ;;  %2918 = vperm.xlu0 %8282, %v2861_v29   ;;  %vm18183_vm9 = vcmp.eq.s32.totalorder %v10019_v51, 1  ;;  %v10025_v34 = vadd.f32 %v9386_v35, %v635_v40  ;;  %vm3406_vm10 = vcmp.ge.s32.totalorder %v8803_v47, 2  ;;  %v10053_v47 = vpop.permute.xlu2 %1522 }
 0x105   : > { %v9994_v21 = vmax.f32 %v1809_v39, %v9979_v5  ;;  %v9997_v9 = vmax.f32 %v9979_v5, %v1809_v39  ;;  %v10002_v24 = vmax.f32 %v9930_v53, %v1622_v49  ;;  %v1283_v39 = vsel %vm939_vm1, %v1235_v0, %v18153_v56  ;;  %19067 = vst [vmem:[#allocation59_spill] sm:$0xff] %v10053_v47 }
 0x106   : > { %v8332_v17 = vpop.eup %8331  ;;  %v1299_v1 = vsel %vm18272_vm13, %v1283_v39, -inf  ;;  %8335 = vpow2.f32 %v739_v19  ;;  %v10037_v19 = vld [vmem:[%s18085_s0 + $0x70] sm:$0xff]  ;;  %v696_v40 = vsub.f32 0.0, %v10025_v34  ;;  %v19070_v29 = vrot.slane %v9930_v53, 7 }
 0x107   : > { %19065 = vst [vmem:[#allocation57_spill] sm:$0xff] %v9994_v21  ;;  %v18152_v22 = vrot.slane %v10002_v24, 7  ;;  %v8334_v0 = vpop.eup %8333  ;;  %v1331_v63 = vmax.f32 %v9902_v62, %v1299_v1  ;;  %v790_v55 = vadd.f32 1.0, %v8332_v17  ;;  %vm2831_vm8 = vcmp.lt.s32.totalorder %v10037_v19, 14  ;;  %v8190_v62 = vld [vmem:[%s9100_s12 + $0x78] sm:$0xff] }
 0x108   : > { %v10028_v36 = vmul.f32 %v8334_v0, %v9829_v12  ;;  %v2863_v17 = vsel %vm2831_vm8, 1, %v19031_v61  ;;  %v741_v0 = vmul.f32 1.442695, %v696_v40 }
 0x109   : > { %v1731_v49 = vsel %vm1388_vm2, %v1685_v3, %v18152_v22  ;;  %v10041_v33 = vmax.f32 %v1331_v63, %v1780_v13  ;;  %8337 = vrcp.f32 %v790_v55  ;;  %v3438_v63 = vsel %vm3406_vm10, 1, %v19031_v61  ;;  %v8805_v22 = vld [vmem:[%s18085_s0 + $0x68] sm:$0xff]  ;;  %v638_v40 = vpop.f32.mrf.mxu0 }
 0x10a   : > { %v10045_v12 = vsel %vm18178_vm14, %v1731_v49, -inf  ;;  %v917_v3 = vrot.slane %v10028_v36, 1  ;;  %v1366_v39 = vrot.slane %v10028_v36, 7  ;;  %v19069_v49 = vrot.slane %v9930_v53, 1  ;;  %7896 = vmatmul.msk.bf16.gmra.mxu0 %vm18160_vm4, %v8190_v62  ;;  %3495 = vperm.xlu2 %8284, %v3438_v63  }
 0x10b   : > { %v10057_v13 = vmax.f32 %v9889_v20, %v10041_v33  ;;  %v10061_v1 = vmax.f32 %v10041_v33, %v9889_v20  ;;  %2924 = vperm.xlu1 %8283, %v2863_v17   ;;  %vm2830_vm8 = vcmp.lt.s32.totalorder %v8805_v22, 14  ;;  %8339 = vpow2.f32 %v741_v0 }
 0x10c   : > { %v8336_v55 = vpop.eup %8335  ;;  %v961_v57 = vsel %vm939_vm1, %v19069_v49, %v917_v3  ;;  %v1410_v14 = vsel %vm1388_vm2, %v19070_v29, %v1366_v39  ;;  %v2862_v62 = vsel %vm2830_vm8, 1, %v19031_v61  ;;  %vm18337_vm10 = vcmp.eq.s32.totalorder %v9411_v44, 1  ;;  %v10136_v51 = vpop.permute.xlu2 %1528 }
 0x10d   : > { %19068 = vst [vmem:[#allocation60_spill] sm:$0xff] %v10057_v13  ;;  %v1173_v17 = vsel %vm18401_vm6, %v961_v57, -inf  ;;  %v1623_v49 = vsel %vm18183_vm9, %v1410_v14, -inf  ;;  %v791_v52 = vadd.f32 1.0, %v8336_v55  ;;  %vm18181_vm4 = vcmp.eq.s32.totalorder %v10085_v23, 1  ;;  %2921 = vperm.xlu0 %8282, %v2862_v62   ;;  %v10103_v55 = vld [vmem:[%s18085_s0 + $0x78] sm:$0xff] }
 0x10e   : > { %v10083_v29 = vmax.f32 %v9930_v53, %v1173_v17  ;;  %v10088_v10 = vmax.f32 %v10028_v36, %v1623_v49  ;;  %v10094_v14 = vadd.f32 %v9386_v35, %v638_v40  ;;  %vm2832_vm8 = vcmp.lt.s32.totalorder %v10103_v55, 14  ;;  %v10111_v40 = vld [vmem:[%s18085_s0 + $0x80] sm:$0xff]  ;;  %19074 = vst [vmem:[#allocation62_spill] sm:$0xff] %v10136_v51 }
 0x10f   : > { %v8338_v57 = vpop.eup %8337  ;;  %8341 = vrcp.f32 %v791_v52  ;;  %v2864_v35 = vsel %vm2832_vm8, 1, %v19031_v61  ;;  %vm2833_vm12 = vcmp.lt.s32.totalorder %v10111_v40, 14  ;;  %vm3407_vm15 = vcmp.ge.s32.totalorder %v8805_v22, 2 }
 0x110   : > { %v1237_v53 = vrot.slane %v10083_v29, 1  ;;  %v854_v63 = vmul.f32 %v8338_v57, %v9925_v11  ;;  %v1687_v0 = vrot.slane %v10088_v10, 7  ;;  %v697_v52 = vsub.f32 0.0, %v10094_v14 }
 0x111   : > { %v19072_v11 = vrot.slane %v9974_v16, 1  ;;  %v19073_v57 = vrot.slane %v10002_v24, 7  ;;  %v8340_v41 = vpop.eup %8339  ;;  %vm18182_vm8 = vcmp.eq.s32.totalorder %v10053_v47, 1 }
 0x112   : > { %v918_v49 = vrot.slane %v854_v63, 1  ;;  %v1367_v62 = vrot.slane %v854_v63, 7  ;;  %v743_v31 = vmul.f32 1.442695, %v697_v52  ;;  %v896_v8 = vpack.c.bf16 %v854_v63, %v10028_v36 }
 0x113   : > { %v1282_v17 = vsel %vm939_vm1, %v19072_v11, %v1237_v53  ;;  %v1730_v56 = vsel %vm1388_vm2, %v19073_v57, %v1687_v0  ;;  %2927 = vperm.xlu1 %8283, %v2864_v35   ;;  %v792_v35 = vadd.f32 1.0, %v8340_v41  ;;  %v2865_v41 = vsel %vm2833_vm12, 1, %v19031_v61 }
 0x114   : > { %v1300_v54 = vsel %vm18269_vm3, %v1282_v17, -inf  ;;  %v10126_v37 = vsel %vm18183_vm9, %v1730_v56, -inf  ;;  %v960_v28 = vsel %vm939_vm1, %v917_v3, %v918_v49  ;;  %v1409_v57 = vsel %vm1388_vm2, %v1366_v39, %v1367_v62  ;;  %2568 = vmatmul.bf16.gmra.mxu2 %v896_v8  ;;  %2930 = vperm.xlu2 %8284, %v2865_v41  }
 0x115   : > { %v1332_v11 = vmax.f32 %v9974_v16, %v1300_v54  ;;  %v8342_v7 = vpop.eup %8341  ;;  %v1174_v56 = vsel %vm18337_vm10, %v960_v28, -inf  ;;  %v1624_v52 = vsel %vm18181_vm4, %v1409_v57, -inf  ;;  %8343 = vpow2.f32 %v743_v31  ;;  %v640_v28 = vpop.f32.mrf.mxu0 }
 0x116   : > { %v19075_v54 = vmax.f32 %v9915_v2, %v9970_v26  ;;  %v10148_v3 = vmax.f32 %v10028_v36, %v1174_v56  ;;  %v10150_v39 = vmax.f32 %v854_v63, %v1624_v52  ;;  %v10153_v17 = vmul.f32 %v8342_v7, %v9949_v59  ;;  %v10165_v59 = vpop.permute.xlu1 %1525  ;;  %v10170_v36 = vld [vmem:[%s18091_s6] ss:$0 sm:$0xff] }
 0x117   : > { %8345 = vrcp.f32 %v792_v35  ;;  %v3439_v26 = vsel %vm3407_vm15, 1, %v19031_v61  ;;  %19076 = vst [vmem:[#allocation63_spill] sm:$0xff] %v10165_v59  ;;  %v10173_v22 = vadd.f32 %v10170_v36, %v640_v28  ;;  %vm3409_vm12 = vcmp.ge.s32.totalorder %v10103_v55, 2  ;;  %v10221_v55 = vpop.permute.xlu2 %1537 }
 0x118   : > { %v10145_v16 = vmax.f32 %v1332_v11, %v19075_v54  ;;  %v1238_v31 = vrot.slane %v10148_v3, 1  ;;  %v1688_v8 = vrot.slane %v10150_v39, 7  ;;  %v919_v2 = vrot.slane %v10153_v17, 1  ;;  %3498 = vperm.xlu0 %8282, %v3439_v26   ;;  %19078 = vst [vmem:[#allocation64_spill] sm:$0xff] %v10221_v55 }
 0x119   : > { %v1368_v7 = vrot.slane %v10153_v17, 7  ;;  %vm18495_vm15 = vcmp.eq.s32.totalorder %v9429_v6, 1  ;;  %vm18188_vm14 = vcmp.eq.s32.totalorder %v10165_v59, 1  ;;  %vm18219_vm9 = vcmp.eq.s32.totalorder %v10136_v51, 1 }
 0x11a   : > { %v1281_v11 = vsel %vm939_vm1, %v1237_v53, %v1238_v31  ;;  %v1729_v57 = vsel %vm1388_vm2, %v1687_v0, %v1688_v8  ;;  %v959_v56 = vsel %vm939_vm1, %v918_v49, %v919_v2 }
 0x11b   : > { %v1408_v52 = vsel %vm1388_vm2, %v1367_v62, %v1368_v7  ;;  %v8344_v35 = vpop.eup %8343  ;;  %v1301_v54 = vsel %vm18401_vm6, %v1281_v11, -inf  ;;  %v10190_v28 = vsel %vm18181_vm4, %v1729_v57, -inf  ;;  %v1175_v53 = vsel %vm18300_vm5, %v959_v56, -inf }
 0x11c   : > { %v1625_v0 = vsel %vm18182_vm8, %v1408_v52, -inf  ;;  %v1333_v49 = vmax.f32 %v10083_v29, %v1301_v54  ;;  %v10199_v41 = vmax.f32 %v854_v63, %v1175_v53  ;;  %v793_v23 = vadd.f32 1.0, %v8344_v35  ;;  %v8809_v29 = vld [vmem:[%s18085_s0 + $0x88] sm:$0xff] }
 0x11d   : > { %v10202_v26 = vmax.f32 %v10153_v17, %v1625_v0  ;;  %v8346_v11 = vpop.eup %8345  ;;  %v698_v57 = vsub.f32 0.0, %v10173_v22  ;;  %v3441_v56 = vsel %vm3409_vm12, 1, %v19031_v61  ;;  %vm2834_vm4 = vcmp.lt.s32.totalorder %v8809_v29, 14 }
 0x11e   : > { %v19077_v63 = vmax.f32 %v10002_v24, %v10045_v12  ;;  %v1239_v54 = vrot.slane %v10199_v41, 1  ;;  %v10219_v53 = vmul.f32 %v8346_v11, %v10025_v34  ;;  %3504 = vperm.xlu1 %8283, %v3441_v56   ;;  %8347 = vrcp.f32 %v793_v23  ;;  %v643_v11 = vpop.f32.mrf.mxu0 }
 0x11f   : > { %v1689_v35 = vrot.slane %v10202_v26, 7  ;;  %v745_v0 = vmul.f32 1.442695, %v698_v57  ;;  %v2866_v62 = vsel %vm2834_vm4, 1, %v19031_v61  ;;  %vm3408_vm12 = vcmp.ge.s32.totalorder %v10037_v19, 2 }
 0x120   : > { %v10214_v52 = vmax.f32 %v1333_v49, %v19077_v63  ;;  %v1280_v24 = vsel %vm939_vm1, %v1238_v31, %v1239_v54  ;;  %v920_v49 = vrot.slane %v10219_v53, 1  ;;  %v1369_v34 = vrot.slane %v10219_v53, 7  ;;  %2933 = vperm.xlu2 %8284, %v2866_v62  }
 0x121   : > { %v1728_v12 = vsel %vm1388_vm2, %v1688_v8, %v1689_v35  ;;  %v1302_v23 = vsel %vm18337_vm10, %v1280_v24, -inf  ;;  %8349 = vpow2.f32 %v745_v0  ;;  %v3440_v19 = vsel %vm3408_vm12, 1, %v19031_v61 }
 0x122   : > { %v10235_v57 = vsel %vm18182_vm8, %v1728_v12, -inf  ;;  %v1334_v31 = vmax.f32 %v10148_v3, %v1302_v23  ;;  %v958_v56 = vsel %vm939_vm1, %v919_v2, %v920_v49  ;;  %v1407_v62 = vsel %vm1388_vm2, %v1368_v7, %v1369_v34  ;;  %3501 = vperm.xlu0 %8282, %v3440_v19   ;;  %v10255_v12 = vpop.permute.xlu0 %1579 }
 0x123   : > { %v1176_v63 = vsel %vm18495_vm15, %v958_v56, -inf  ;;  %v1626_v0 = vsel %vm18188_vm14, %v1407_v62, -inf  ;;  %vm18273_vm4 = vcmp.eq.s32.totalorder %v9425_v50, 1  ;;  %v19079_v3 = vmax.f32 %v10088_v10, %v10126_v37  ;;  %19080 = vst [vmem:[#allocation65_spill] sm:$0xff] %v10255_v12 }
 0x124   : > { %v10258_v2 = vmax.f32 %v10153_v17, %v1176_v63  ;;  %v10261_v7 = vmax.f32 %v10219_v53, %v1626_v0  ;;  %v8348_v23 = vpop.eup %8347  ;;  %v10264_v19 = vadd.f32 %v10170_v36, %v643_v11  ;;  %v897_v56 = vpack.c.bf16 %v10219_v53, %v10153_v17 }
 0x125   : > { %v10253_v24 = vmax.f32 %v1334_v31, %v19079_v3  ;;  %vm3410_vm12 = vcmp.ge.s32.totalorder %v10111_v40, 2  ;;  %vm3411_vm8 = vcmp.ge.s32.totalorder %v8809_v29, 2  ;;  %v10272_v31 = vmul.f32 %v8348_v23, %v10094_v14  ;;  %v10281_v40 = vld [vmem:[%s18085_s0 + $0x90] sm:$0xff]  ;;  %v10290_v23 = vpop.permute.xlu2 %1546 }
 0x126   : > { %v1240_v10 = vrot.slane %v10258_v2, 1  ;;  %v1690_v37 = vrot.slane %v10261_v7, 7  ;;  %v3442_v62 = vsel %vm3410_vm12, 1, %v19031_v61  ;;  %v699_v11 = vsub.f32 0.0, %v10264_v19  ;;  %2573 = vmatmul.bf16.gmra.mxu2 %v897_v56  ;;  %19081 = vst [vmem:[#allocation66_spill] sm:$0xff] %v10290_v23  ;;  %v645_v59 = vpop.f32.mrf.mxu0 }
 0x127   : > { %v8350_v63 = vpop.eup %8349  ;;  %3507 = vperm.xlu1 %8283, %v3442_v62   ;;  %v3443_v17 = vsel %vm3411_vm8, 1, %v19031_v61  ;;  %vm2835_vm11 = vcmp.lt.s32.totalorder %v10281_v40, 14  ;;  %v18191_v0 = vrot.slane %v10272_v31, 1  ;;  %v18190_v3 = vrot.slane %v10272_v31, 7 }
 0x128   : > { %v1279_v14 = vsel %vm939_vm1, %v1239_v54, %v1240_v10  ;;  %v1727_v29 = vsel %vm1388_vm2, %v1689_v35, %v1690_v37  ;;  %3510 = vperm.xlu2 %8284, %v3443_v17   ;;  %v794_v8 = vadd.f32 1.0, %v8350_v63  ;;  %v747_v12 = vmul.f32 1.442695, %v699_v11 }
 0x129   : > { %v1303_v56 = vsel %vm18300_vm5, %v1279_v14, -inf  ;;  %v10296_v62 = vsel %vm18188_vm14, %v1727_v29, -inf  ;;  %v957_v17 = vsel %vm939_vm1, %v920_v49, %v18191_v0  ;;  %v1406_v14 = vsel %vm1388_vm2, %v1369_v34, %v18190_v3 }
 0x12a   : > { %v1335_v54 = vmax.f32 %v10199_v41, %v1303_v56  ;;  %v1177_v63 = vsel %vm18273_vm4, %v957_v17, -inf  ;;  %v1627_v41 = vsel %vm18219_vm9, %v1406_v14, -inf  ;;  %8351 = vrcp.f32 %v794_v8  ;;  %v10328_v56 = vld [vmem:[%s18085_s0 + $0xa0] sm:$0xff]  ;;  %v10337_v8 = vpop.permute.xlu0 %1531 }
 0x12b   : > { %v2867_v11 = vsel %vm2835_vm11, 1, %v19031_v61  ;;  %v10317_v29 = vmax.f32 %v10219_v53, %v1177_v63  ;;  %v10320_v49 = vmax.f32 %v10272_v31, %v1627_v41  ;;  %8353 = vpow2.f32 %v747_v12  ;;  %19082 = vst [vmem:[#allocation67_spill] sm:$0xff] %v10328_v56  ;;  %v10334_v53 = vld [vmem:[%s18085_s0 + $0xa8] sm:$0xff]  ;;  %v10344_v63 = vpop.permute.xlu1 %1534 }
 0x12c   : > { %2936 = vperm.xlu0 %8282, %v2867_v11   ;;  %v10323_v34 = vadd.f32 %v10170_v36, %v645_v59  ;;  %vm2837_vm8 = vcmp.lt.s32.totalorder %v10328_v56, 14  ;;  %19083 = vst [vmem:[#allocation68_spill] sm:$0xff] %v10334_v53  ;;  %vm2838_vm11 = vcmp.lt.s32.totalorder %v10334_v53, 14  ;;  %vm18233_vm12 = vcmp.eq.s32.totalorder %v9368_v30, 1  ;;  %v10351_v11 = vld [vmem:[%s18085_s0 + $0x98] sm:$0xff] }
 0x12d   : > { %19084 = vst [vmem:[#allocation69_spill] sm:$0xff] %v10337_v8  ;;  %v18196_v12 = vrot.slane %v10317_v29, 1  ;;  %v18197_v59 = vrot.slane %v10320_v49, 7  ;;  %v2869_v17 = vsel %vm2837_vm8, 1, %v19031_v61  ;;  %v2870_v14 = vsel %vm2838_vm11, 1, %v19031_v61 }
 0x12e   : > { %19085 = vst [vmem:[#allocation70_spill] sm:$0xff] %v10344_v63  ;;  %vm18220_vm14 = vcmp.eq.s32.totalorder %v10337_v8, 1  ;;  %v700_v41 = vsub.f32 0.0, %v10323_v34  ;;  %vm2836_vm7 = vcmp.lt.s32.totalorder %v10351_v11, 14  ;;  %v19086_v0 = vmax.f32 %v10150_v39, %v10190_v28  ;;  %v648_v39 = vpop.f32.mrf.mxu0 }
 0x12f   : > { %2942 = vperm.xlu1 %8283, %v2869_v17   ;;  %v1278_v35 = vsel %vm939_vm1, %v1240_v10, %v18196_v12  ;;  %v1726_v3 = vsel %vm1388_vm2, %v1690_v37, %v18197_v59  ;;  %v2868_v17 = vsel %vm2836_vm7, 1, %v19031_v61  ;;  %v10376_v37 = vmax.f32 %v10041_v33, %v10214_v52 }
 0x130   : > { %2945 = vperm.xlu2 %8284, %v2870_v14   ;;  %v10366_v47 = vmax.f32 %v1335_v54, %v19086_v0  ;;  %v8352_v56 = vpop.eup %8351  ;;  %v1304_v53 = vsel %vm18495_vm15, %v1278_v35, -inf  ;;  %v10372_v10 = vsel %vm18219_vm9, %v1726_v3, -inf  ;;  %v749_v12 = vmul.f32 1.442695, %v700_v41  ;;  %v10388_v3 = vpop.permute.xlu2 %1555 }
 0x131   : > { %19087 = vst [vmem:[#allocation71_spill] sm:$0xff] %v10376_v37  ;;  %v8354_v14 = vpop.eup %8353  ;;  %v1336_v59 = vmax.f32 %v10258_v2, %v1304_v53  ;;  %v10382_v28 = vmul.f32 %v8352_v56, %v10173_v22  ;;  %v10386_v0 = vmax.f32 %v10145_v16, %v10253_v24  ;;  %v19089_v53 = vmax.f32 %v10202_v26, %v10235_v57 }
 0x132   : > { %19088 = vst [vmem:[#allocation72_spill] sm:$0xff] %v10388_v3  ;;  %v795_v54 = vadd.f32 1.0, %v8354_v14  ;;  %8355 = vpow2.f32 %v749_v12  ;;  %v10392_v35 = vmax.f32 %v10214_v52, %v10366_v47  ;;  %v10405_v12 = vmax.f32 %v9889_v20, %v9808_v18 }
 0x133   : > { %v10399_v22 = vmax.f32 %v1336_v59, %v19089_v53  ;;  %v922_v56 = vrot.slane %v10382_v28, 1  ;;  %v1371_v41 = vrot.slane %v10382_v28, 7  ;;  %v10411_v2 = vmax.f32 %v10145_v16, %v9979_v5  ;;  %v10449_v6 = vpop.permute.xlu1 %1543 }
 0x134   : > { %2939 = vperm.xlu0 %8282, %v2868_v17   ;;  %19090 = vst [vmem:[#allocation73_spill] sm:$0xff] %v10405_v12  ;;  %8357 = vrcp.f32 %v795_v54  ;;  %v2036_v14 = vmax.f32 %v10376_v37, %v10392_v35  ;;  %v10415_v26 = vmax.f32 %v10214_v52, %v10041_v33  ;;  %v19091_v57 = vrot.slane %v10272_v31, 1 }
 0x135   : > { %v19092_v20 = vrot.slane %v10272_v31, 7  ;;  %v10427_v54 = vmax.f32 %v10253_v24, %v10399_v22  ;;  %v2260_v53 = vmax.f32 %v10061_v1, %v10405_v12  ;;  %19094 = vst [vmem:[#allocation75_spill] sm:$0xff] %v10449_v6  ;;  %v19097_v44 = vrot.slane %v10317_v29, 1 }
 0x136   : > { %v956_v59 = vsel %vm939_vm1, %v19091_v57, %v922_v56  ;;  %v2261_v57 = vmax.f32 %v10411_v2, %v9997_v9  ;;  %v19098_v23 = vrot.slane %v10320_v49, 7  ;;  %vm18258_vm7 = vcmp.eq.s32.totalorder %v9446_v38, 1 }
 0x137   : > { %v1405_v17 = vsel %vm1388_vm2, %v19092_v20, %v1371_v41  ;;  %v1178_v33 = vsel %vm18233_vm12, %v956_v59, -inf  ;;  %v2037_v12 = vmax.f32 %v10386_v0, %v10427_v54  ;;  %v10447_v51 = vmax.f32 %v2036_v14, %v2260_v53 }
 0x138   : > { %v1628_v37 = vsel %vm18220_vm14, %v1405_v17, -inf  ;;  %v10440_v13 = vmax.f32 %v10272_v31, %v1178_v33  ;;  %v8356_v59 = vpop.eup %8355  ;;  %v10452_v17 = vadd.f32 %v10170_v36, %v648_v39  ;;  %v10456_v20 = vmax.f32 %v9979_v5, %v10145_v16 }
 0x139   : > { %v10443_v18 = vmax.f32 %v10382_v28, %v1628_v37  ;;  %19093 = vst [vmem:[#allocation74_spill] sm:$0xff] %v10447_v51  ;;  %v796_v3 = vadd.f32 1.0, %v8356_v59  ;;  %v10460_v58 = vmax.f32 %v2037_v12, %v2261_v57  ;;  %v10478_v59 = vpop.permute.xlu2 %1564  ;;  %vm18231_vm11 = vcmp.eq.s32.totalorder %v10344_v63, 1 }
 0x13a   : > { %19095 = vst [vmem:[#allocation76_spill] sm:$0xff] %v10456_v20  ;;  %v1242_v33 = vrot.slane %v10440_v13, 1  ;;  %v8358_v45 = vpop.eup %8357  ;;  %v701_v14 = vsub.f32 0.0, %v10452_v17  ;;  %v10554_v8 = vmax.f32 %v10253_v24, %v10145_v16 }
 0x13b   : > { %v1692_v37 = vrot.slane %v10443_v18, 7  ;;  %19096 = vst [vmem:[#allocation77_spill] sm:$0xff] %v10460_v58  ;;  %v10476_v57 = vmul.f32 %v8358_v45, %v10264_v19  ;;  %8359 = vrcp.f32 %v796_v3  ;;  %v898_v19 = vpack.c.bf16 %v10382_v28, %v10272_v31  ;;  %v10497_v3 = vld [vmem:[%s18085_s0 + $0xb8] sm:$0xff] }
 0x13c   : > { %v1277_v5 = vsel %vm939_vm1, %v19097_v44, %v1242_v33  ;;  %19099 = vst [vmem:[#allocation78_spill] sm:$0xff] %v10478_v59  ;;  %v751_v21 = vmul.f32 1.442695, %v701_v14  ;;  %vm2840_vm8 = vcmp.lt.s32.totalorder %v10497_v3, 14 }
 0x13d   : > { %v1725_v12 = vsel %vm1388_vm2, %v19098_v23, %v1692_v37  ;;  %v1305_v53 = vsel %vm18273_vm4, %v1277_v5, -inf  ;;  %v923_v23 = vrot.slane %v10476_v57, 1  ;;  %v1372_v45 = vrot.slane %v10476_v57, 7  ;;  %19100 = vst [vmem:[#allocation79_spill] sm:$0xff] %v10497_v3  ;;  %2578 = vmatmul.bf16.gmra.mxu2 %v898_v19 }
 0x13e   : > { %v10484_v39 = vsel %vm18220_vm14, %v1725_v12, -inf  ;;  %v1337_v44 = vmax.f32 %v10317_v29, %v1305_v53  ;;  %8361 = vpow2.f32 %v751_v21  ;;  %v19101_v21 = vmax.f32 %v10261_v7, %v10296_v62  ;;  %v10528_v62 = vld [vmem:[%s18085_s0 + $0xc0] sm:$0xff] }
 0x13f   : > { %v955_v29 = vsel %vm939_vm1, %v922_v56, %v923_v23  ;;  %v1404_v14 = vsel %vm1388_vm2, %v1371_v41, %v1372_v45  ;;  %v2872_v12 = vsel %vm2840_vm8, 1, %v19031_v61  ;;  %vm2841_vm9 = vcmp.lt.s32.totalorder %v10528_v62, 14 }
 0x140   : > { %v10508_v53 = vmax.f32 %v1337_v44, %v19101_v21  ;;  %v1179_v31 = vsel %vm18258_vm7, %v955_v29, -inf  ;;  %v1629_v5 = vsel %vm18231_vm11, %v1404_v14, -inf  ;;  %2951 = vperm.xlu1 %8283, %v2872_v12   ;;  %vm18277_vm8 = vcmp.eq.s32.totalorder %v9442_v32, 1  ;;  %v10532_v44 = vpop.permute.xlu1 %1552  ;;  %v10541_v29 = vld [vmem:[%s18085_s0 + $0xb0] sm:$0xff] }
 0x141   : > { %v8360_v48 = vpop.eup %8359  ;;  %v10516_v56 = vmax.f32 %v10382_v28, %v1179_v31  ;;  %v10519_v41 = vmax.f32 %v10476_v57, %v1629_v5  ;;  %19102 = vst [vmem:[#allocation80_spill] sm:$0xff] %v10532_v44  ;;  %v2873_v19 = vsel %vm2841_vm9, 1, %v19031_v61  ;;  %vm2839_vm14 = vcmp.lt.s32.totalorder %v10541_v29, 14  ;;  %v10565_v3 = vpop.permute.xlu2 %1573 }
 0x142   : > { %v10523_v7 = vmax.f32 %v10366_v47, %v10508_v53  ;;  %v10535_v28 = vmul.f32 %v8360_v48, %v10323_v34  ;;  %2954 = vperm.xlu2 %8284, %v2873_v19   ;;  %v2871_v48 = vsel %vm2839_vm14, 1, %v19031_v61  ;;  %vm18232_vm9 = vcmp.eq.s32.totalorder %v10221_v55, 1  ;;  %19105 = vst [vmem:[#allocation82_spill] sm:$0xff] %v10565_v3 }
 0x143   : > { %v1243_v14 = vrot.slane %v10516_v56, 1  ;;  %v1693_v21 = vrot.slane %v10519_v41, 7  ;;  %2948 = vperm.xlu0 %8282, %v2871_v48   ;;  %v19103_v19 = vmax.f32 %v10415_v26, %v10061_v1 }
 0x144   : > { %v2038_v31 = vmax.f32 %v10392_v35, %v10523_v7  ;;  %v8362_v34 = vpop.eup %8361  ;;  %v924_v5 = vrot.slane %v10535_v28, 1  ;;  %v1373_v12 = vrot.slane %v10535_v28, 7 }
 0x145   : > { %v1276_v50 = vsel %vm939_vm1, %v1242_v33, %v1243_v14  ;;  %v1724_v35 = vsel %vm1388_vm2, %v1692_v37, %v1693_v21  ;;  %v797_v44 = vadd.f32 1.0, %v8362_v34 }
 0x146   : > { %v10563_v59 = vmax.f32 %v2038_v31, %v19103_v19  ;;  %v1306_v48 = vsel %vm18233_vm12, %v1276_v50, -inf  ;;  %v10571_v16 = vsel %vm18231_vm11, %v1724_v35, -inf  ;;  %v954_v33 = vsel %vm939_vm1, %v923_v23, %v924_v5  ;;  %v10584_v19 = vpop.permute.xlu0 %1540 }
 0x147   : > { %v1403_v37 = vsel %vm1388_vm2, %v1372_v45, %v1373_v12  ;;  %v1338_v1 = vmax.f32 %v10440_v13, %v1306_v48  ;;  %v1180_v34 = vsel %vm18277_vm8, %v954_v33, -inf  ;;  %19106 = vst [vmem:[#allocation83_spill] sm:$0xff] %v10584_v19  ;;  %8363 = vrcp.f32 %v797_v44 }
 0x148   : > { %19104 = vst [vmem:[#allocation81_spill] sm:$0xff] %v10563_v59  ;;  %v1630_v50 = vsel %vm18232_vm9, %v1403_v37, -inf  ;;  %v10587_v35 = vmax.f32 %v10476_v57, %v1180_v34  ;;  %v19107_v13 = vmax.f32 %v10320_v49, %v10372_v10  ;;  %v10599_v48 = vmax.f32 %v10366_v47, %v10214_v52 }
 0x149   : > { %v10590_v23 = vmax.f32 %v10535_v28, %v1630_v50  ;;  %v10603_v33 = vmax.f32 %v10399_v22, %v10253_v24  ;;  %v2263_v37 = vmax.f32 %v10554_v8, %v10411_v2  ;;  %v10654_v3 = vpop.permute.xlu2 %2885  ;;  %vm18254_vm12 = vcmp.eq.s32.totalorder %v10584_v19, 1 }
 0x14a   : > { %v10595_v45 = vmax.f32 %v1338_v1, %v19107_v13  ;;  %v18228_v34 = vrot.slane %v10587_v35, 1  ;;  %v2264_v24 = vmax.f32 %v10599_v48, %v10415_v26  ;;  %v10621_v1 = vpop.permute.xlu1 %1561  ;;  %19113 = vst [vmem:[#allocation89_spill] sm:$0xff] %v10654_v3  ;;  %v10697_v13 = vld [vmem:[%s18085_s0 + $0xc8] sm:$0xff]  ;;  %v2631_v19 = vrot.slane %v10447_v51, 1 }
 0x14b   : > { %19109 = vst [vmem:[#allocation85_spill] sm:$0xff] %v10603_v33  ;;  %v18229_v44 = vrot.slane %v10590_v23, 7  ;;  %v19129_v32 = vrot.slane %v10563_v59, 1 }
 0x14c   : > { %19108 = vst [vmem:[#allocation84_spill] sm:$0xff] %v10595_v45  ;;  %v10613_v10 = vmax.f32 %v10399_v22, %v10595_v45  ;;  %v10617_v52 = vmax.f32 %v10595_v45, %v10399_v22  ;;  %v1275_v2 = vsel %vm939_vm1, %v1243_v14, %v18228_v34  ;;  %v650_v22 = vpop.f32.mrf.mxu0 }
 0x14d   : > { %19111 = vst [vmem:[#allocation87_spill] sm:$0xff] %v10621_v1  ;;  %v1723_v50 = vsel %vm1388_vm2, %v1693_v21, %v18229_v44  ;;  %v1307_v31 = vsel %vm18258_vm7, %v1275_v2, -inf  ;;  %v8364_v34 = vpop.eup %8363  ;;  %vm2784_vm7 = vcmp.lt.s32.totalorder %v9481_v43, 6 }
 0x14e   : > { %19110 = vst [vmem:[#allocation86_spill] sm:$0xff] %v10617_v52  ;;  %v10637_v26 = vsel %vm18232_vm9, %v1723_v50, -inf  ;;  %v2039_v49 = vmax.f32 %v10427_v54, %v10613_v10  ;;  %v1339_v21 = vmax.f32 %v10516_v56, %v1307_v31  ;;  %v10647_v44 = vmul.f32 %v8364_v34, %v10452_v17  ;;  %v10664_v56 = vld [vmem:[%s18085_s0 + $0xd0] sm:$0xff]  ;;  %v10670_v17 = vld [vmem:[%s18085_s0 + $0xd8] sm:$0xff]  ;;  %v10677_v31 = vpop.permute.xlu0 %1549 }
 0x14f   : > { %v10652_v50 = vadd.f32 %v10170_v36, %v650_v22  ;;  %v19114_v54 = vmax.f32 %v10443_v18, %v10484_v39  ;;  %vm2843_vm14 = vcmp.lt.s32.totalorder %v10664_v56, 14  ;;  %vm2844_vm11 = vcmp.lt.s32.totalorder %v10670_v17, 14  ;;  %19115 = vst [vmem:[#allocation90_spill] sm:$0xff] %v10677_v31 }
 0x150   : > { %v10649_v2 = vmax.f32 %v2039_v49, %v2263_v37  ;;  %vm18342_vm9 = vcmp.eq.s32.totalorder %v9392_v25, 1  ;;  %v18235_v18 = vrot.slane %v10647_v44, 1  ;;  %v18236_v39 = vrot.slane %v10647_v44, 7 }
 0x151   : > { %v10659_v14 = vmax.f32 %v1339_v21, %v19114_v54  ;;  %v702_v34 = vsub.f32 0.0, %v10652_v50  ;;  %v2875_v49 = vsel %vm2843_vm14, 1, %v19031_v61  ;;  %v2876_v54 = vsel %vm2844_vm11, 1, %v19031_v61 }
 0x152   : > { %19112 = vst [vmem:[#allocation88_spill] sm:$0xff] %v10649_v2  ;;  %v953_v22 = vsel %vm939_vm1, %v924_v5, %v18235_v18  ;;  %v1402_v21 = vsel %vm1388_vm2, %v1373_v12, %v18236_v39  ;;  %2960 = vperm.xlu1 %8283, %v2875_v49   ;;  %vm2842_vm14 = vcmp.lt.s32.totalorder %v10697_v13, 14  ;;  %2963 = vperm.xlu2 %8284, %v2876_v54   ;;  %v10713_v30 = vpop.permute.xlu1 %1570  ;;  %v3208_v25 = vrot.slane %v10447_v51, 7 }
 0x153   : > { %v10681_v37 = vmax.f32 %v10508_v53, %v10659_v14  ;;  %v1181_v3 = vsel %vm18342_vm9, %v953_v22, -inf  ;;  %v1631_v5 = vsel %vm18254_vm12, %v1402_v21, -inf  ;;  %v753_v39 = vmul.f32 1.442695, %v702_v34  ;;  %19116 = vst [vmem:[#allocation91_spill] sm:$0xff] %v10713_v30  ;;  %v10727_v34 = vld [vmem:[%s18085_s0 + $0xe8] sm:$0xff] }
 0x154   : > { %v10707_v12 = vmax.f32 %v10535_v28, %v1181_v3  ;;  %v10710_v49 = vmax.f32 %v10647_v44, %v1631_v5  ;;  %v2874_v63 = vsel %vm2842_vm14, 1, %v19031_v61  ;;  %v653_v55 = vpop.f32.mrf.mxu0  ;;  %v899_v54 = vpack.c.bf16 %v10535_v28, %v10476_v57  ;;  %19118 = vst [vmem:[#allocation93_spill] sm:$0xff] %v10727_v34  ;;  %v10750_v5 = vpop.permute.xlu2 %2894 }
 0x155   : > { %v2040_v18 = vmax.f32 %v10523_v7, %v10681_v37  ;;  %2957 = vperm.xlu0 %8282, %v2874_v63   ;;  %8365 = vpow2.f32 %v753_v39  ;;  %v10720_v3 = vadd.f32 %v10170_v36, %v653_v55  ;;  %vm2846_vm11 = vcmp.lt.s32.totalorder %v10727_v34, 14  ;;  %v10733_v63 = vld [vmem:[%s18085_s0 + $0xf0] sm:$0xff]  ;;  %19122 = vst [vmem:[#allocation95_spill] sm:$0xff] %v10750_v5 }
 0x156   : > { %v18246_v21 = vrot.slane %v10707_v12, 1  ;;  %v18247_v7 = vrot.slane %v10710_v49, 7  ;;  %19119 = vst [vmem:[#allocation94_spill] sm:$0xff] %v10733_v63  ;;  %vm2847_vm14 = vcmp.lt.s32.totalorder %v10733_v63, 14  ;;  %v19120_v55 = vrot.slane %v10587_v35, 1  ;;  %2583 = vmatmul.bf16.gmra.mxu2 %v899_v54  ;;  %v10763_v5 = vpop.permute.xlu0 %1558 }
 0x157   : > { %v10715_v22 = vmax.f32 %v2040_v18, %v2264_v24  ;;  %v19121_v28 = vrot.slane %v10590_v23, 7  ;;  %v703_v18 = vsub.f32 0.0, %v10720_v3  ;;  %v2878_v39 = vsel %vm2846_vm11, 1, %v19031_v61  ;;  %19123 = vst [vmem:[#allocation96_spill] sm:$0xff] %v10763_v5 }
 0x158   : > { %v1274_v57 = vsel %vm939_vm1, %v19120_v55, %v18246_v21  ;;  %v2879_v21 = vsel %vm2847_vm14, 1, %v19031_v61  ;;  %v2632_v30 = vrot.slane %v10460_v58, 1  ;;  %vm3412_vm14 = vcmp.ge.s32.totalorder %v10281_v40, 2 }
 0x159   : > { %19117 = vst [vmem:[#allocation92_spill] sm:$0xff] %v10715_v22  ;;  %v1722_v24 = vsel %vm1388_vm2, %v19121_v28, %v18247_v7  ;;  %v1308_v38 = vsel %vm18277_vm8, %v1274_v57, -inf  ;;  %v755_v1 = vmul.f32 1.442695, %v703_v18  ;;  %v10769_v57 = vld [vmem:[%s18085_s0 + $0xe0] sm:$0xff]  ;;  %v19127_v18 = vmax.f32 %v10519_v41, %v10571_v16 }
 0x15a   : > { %v10757_v55 = vsel %vm18254_vm12, %v1722_v24, -inf  ;;  %v1340_v28 = vmax.f32 %v10587_v35, %v1308_v38  ;;  %2969 = vperm.xlu1 %8283, %v2878_v39   ;;  %2972 = vperm.xlu2 %8284, %v2879_v21   ;;  %vm2845_vm11 = vcmp.lt.s32.totalorder %v10769_v57, 14  ;;  %v19124_v38 = vmax.f32 %v9997_v9, %v9908_v42 }
 0x15b   : > { %v19125_v35 = vmax.f32 %v10456_v20, %v10386_v0  ;;  %v8366_v24 = vpop.eup %8365  ;;  %8367 = vpow2.f32 %v755_v1  ;;  %v2877_v39 = vsel %vm2845_vm11, 1, %v19031_v61  ;;  %v2678_v9 = vsel %vm939_vm1, %v2632_v30, %v19129_v32  ;;  %v10800_v1 = vpop.permute.xlu1 %2882 }
 0x15c   : > { %v10783_v21 = vmax.f32 %v1340_v28, %v19127_v18  ;;  %v655_v7 = vpop.f32.mrf.mxu0  ;;  %v798_v0 = vadd.f32 1.0, %v8366_v24  ;;  %v2679_v16 = vsel %vm939_vm1, %v2631_v19, %v2632_v30  ;;  %19131 = vst [vmem:[#allocation100_spill] sm:$0xff] %v10800_v1  ;;  %vm3413_vm11 = vcmp.ge.s32.totalorder %v10351_v11, 2  ;;  %v8823_v30 = vld [vmem:[%s18085_s0 + $0xf8] sm:$0xff] }
 0x15d   : > { %v10778_v54 = vmax.f32 %v19125_v35, %v19124_v38  ;;  %2966 = vperm.xlu0 %8282, %v2877_v39   ;;  %v10796_v41 = vadd.f32 %v10170_v36, %v655_v7  ;;  %v2696_v32 = vsel %vm18269_vm3, %v2678_v9, -inf  ;;  %v3444_v7 = vsel %vm3412_vm14, 1, %v19031_v61 }
 0x15e   : > { %19128 = vst [vmem:[#allocation98_spill] sm:$0xff] %v10783_v21  ;;  %v10793_v38 = vmax.f32 %v10595_v45, %v10783_v21  ;;  %8369 = vrcp.f32 %v798_v0  ;;  %v3445_v24 = vsel %vm3413_vm11, 1, %v19031_v61  ;;  %vm2848_vm12 = vcmp.lt.s32.totalorder %v8823_v30, 14  ;;  %v10822_v0 = vpop.permute.xlu2 %2903  ;;  %v10830_v42 = vpop.permute.xlu0 %1567 }
 0x15f   : > { %19126 = vst [vmem:[#allocation97_spill] sm:$0xff] %v10778_v54  ;;  %v704_v35 = vsub.f32 0.0, %v10796_v41  ;;  %v2695_v11 = vsel %vm18272_vm13, %v2679_v16, -inf  ;;  %v19132_v18 = vmax.f32 %v10603_v33, %v10554_v8  ;;  %v2880_v9 = vsel %vm2848_vm12, 1, %v19031_v61 }
 0x160   : > { %19130 = vst [vmem:[#allocation99_spill] sm:$0xff] %v10793_v38  ;;  %v2041_v28 = vmax.f32 %v10613_v10, %v10793_v38  ;;  %v10825_v1 = vmax.f32 %v10460_v58, %v2696_v32  ;;  %v10828_v16 = vmax.f32 %v10447_v51, %v2695_v11  ;;  %vm18299_vm12 = vcmp.eq.s32.totalorder %v9355_v60, 1 }
 0x161   : > { %v8368_v40 = vpop.eup %8367  ;;  %v757_v10 = vmul.f32 1.442695, %v704_v35  ;;  %19134 = vst [vmem:[#allocation102_spill] sm:$0xff] %v10822_v0  ;;  %vm18339_vm14 = vcmp.eq.s32.totalorder %v9468_v15, 1  ;;  %vm18292_vm11 = vcmp.eq.s32.totalorder %v10449_v6, 1  ;;  %v19141_v27 = vrot.slane %v10715_v22, 1 }
 0x162   : > { %v10819_v39 = vmax.f32 %v2041_v28, %v19132_v18  ;;  %3513 = vperm.xlu1 %8283, %v3444_v7   ;;  %19135 = vst [vmem:[#allocation103_spill] sm:$0xff] %v10825_v1  ;;  %v799_v20 = vadd.f32 1.0, %v8368_v40  ;;  %3516 = vperm.xlu2 %8284, %v3445_v24   ;;  %v18267_v35 = vrot.slane %v10825_v1, 2  ;;  %v18265_v40 = vrot.slane %v10778_v54, 1 }
 0x163   : > { %8371 = vpow2.f32 %v757_v10  ;;  %19136 = vst [vmem:[#allocation104_spill] sm:$0xff] %v10830_v42  ;;  %v2634_v18 = vrot.slane %v10649_v2, 1  ;;  %v19138_v10 = vrot.slane %v10647_v44, 1  ;;  %v19144_v38 = vrot.slane %v9459_v4, 1 }
 0x164   : > { %19133 = vst [vmem:[#allocation101_spill] sm:$0xff] %v10819_v39  ;;  %v8370_v30 = vpop.eup %8369  ;;  %8373 = vrcp.f32 %v799_v20  ;;  %v2680_v32 = vsel %vm939_vm1, %v18265_v40, %v2631_v19  ;;  %vm18287_vm13 = vcmp.eq.s32.totalorder %v10822_v0, 1  ;;  %v19152_v5 = vrot.slane %v10707_v12, 1 }
 0x165   : > { %2975 = vperm.xlu0 %8282, %v2880_v9   ;;  %v10833_v8 = vmul.f32 %v8370_v30, %v10652_v50  ;;  %v10846_v50 = vpop.permute.xlu1 %2891  ;;  %v19139_v30 = vrot.slane %v10647_v44, 7  ;;  %v2676_v19 = vsel %vm939_vm1, %v2634_v18, %v19141_v27  ;;  %v19153_v63 = vrot.slane %v10710_v49, 7 }
 0x166   : > { %19137 = vst [vmem:[#allocation105_spill] sm:$0xff] %v10846_v50  ;;  %v19140_v50 = vrot.slane %v10828_v16, 2  ;;  %v10891_v52 = vpop.permute.xlu2 %2912  ;;  %v2698_v21 = vsel %vm18337_vm10, %v2676_v19, -inf  ;;  %v10904_v45 = vpop.permute.xlu0 %1576  ;;  %v19158_v60 = vrot.slane %v10563_v59, 1 }
 0x167   : > { %v926_v7 = vrot.slane %v10833_v8, 1  ;;  %v1375_v24 = vrot.slane %v10833_v8, 7  ;;  %19150 = vst [vmem:[#allocation106_spill] sm:$0xff] %v10904_v45 }
 0x168   : > { %v2808_v42 = vsel %vm2784_vm7, %v19140_v50, %v18267_v35  ;;  %v19142_v35 = vld [vmem:[#allocation27_spill] sm:$0xff] }
 0x169   : > { %v8372_v11 = vpop.eup %8371  ;;  %v952_v9 = vsel %vm939_vm1, %v19138_v10, %v926_v7  ;;  %v1401_v28 = vsel %vm1388_vm2, %v19139_v30, %v1375_v24  ;;  %19146 = vst [vmem:[#allocation27_spill] sm:$0xff] %v10891_v52 }
 0x16a   : > { %v8374_v20 = vpop.eup %8373  ;;  %v1182_v10 = vsel %vm18339_vm14, %v952_v9, -inf  ;;  %v1632_v46 = vsel %vm18292_vm11, %v1401_v28, -inf  ;;  %v800_v30 = vadd.f32 1.0, %v8372_v11  ;;  %v19143_v9 = vrot.slane %v19142_v35, 1  ;;  %v19145_v11 = vld [vmem:[#allocation29_spill] sm:$0xff] }
 0x16b   : > { %v10876_v40 = vmax.f32 %v10647_v44, %v1182_v10  ;;  %v10879_v33 = vmax.f32 %v10833_v8, %v1632_v46  ;;  %v10882_v50 = vmul.f32 %v8374_v20, %v10720_v3  ;;  %vm18312_vm3 = vcmp.eq.s32.totalorder %v19145_v11, 1  ;;  %v19148_v20 = vld [vmem:[#allocation66_spill] sm:$0xff] }
 0x16c   : > { %v970_v28 = vsel %vm939_vm1, %v19144_v38, %v19143_v9  ;;  %v2694_v10 = vsel %vm18323_vm0, %v2680_v32, -inf  ;;  %8375 = vrcp.f32 %v800_v30  ;;  %vm18298_vm4 = vcmp.eq.s32.totalorder %v19148_v20, 1  ;;  %v19151_v30 = vld [vmem:[#allocation17_spill] sm:$0xff] }
 0x16d   : > { %v1246_v46 = vrot.slane %v10876_v40, 1  ;;  %v1696_v3 = vrot.slane %v10879_v33, 7  ;;  %v927_v35 = vrot.slane %v10882_v50, 1  ;;  %v3016_v38 = vsel %vm18287_vm13, %v2808_v42, -inf }
 0x16e   : > { %v1376_v32 = vrot.slane %v10882_v50, 7  ;;  %vm18642_vm8 = vcmp.eq.s32.totalorder %v19151_v30, 1  ;;  %v10919_v19 = vmax.f32 %v10778_v54, %v2694_v10  ;;  %v10941_v6 = vsel %vm18299_vm12, %v970_v28, -inf }
 0x16f   : > { %v1273_v34 = vsel %vm939_vm1, %v19152_v5, %v1246_v46  ;;  %v1721_v0 = vsel %vm1388_vm2, %v19153_v63, %v1696_v3  ;;  %v951_v42 = vsel %vm939_vm1, %v926_v7, %v927_v35  ;;  %v658_v63 = vpop.f32.mrf.mxu0  ;;  %vm18311_vm13 = vcmp.eq.s32.totalorder %v10677_v31, 1 }
 0x170   : > { %19154 = vst [vmem:[#allocation107_spill] sm:$0xff] %v10919_v19  ;;  %v1309_v45 = vsel %vm18342_vm9, %v1273_v34, -inf  ;;  %v10925_v9 = vsel %vm18292_vm11, %v1721_v0, -inf  ;;  %v1183_v5 = vsel %vm18312_vm3, %v951_v42, -inf  ;;  %v1400_v1 = vsel %vm1388_vm2, %v1375_v24, %v1376_v32 }
 0x171   : > { %v1341_v27 = vmax.f32 %v10707_v12, %v1309_v45  ;;  %v10935_v10 = vmax.f32 %v10833_v8, %v1183_v5  ;;  %v1633_v34 = vsel %vm18298_vm4, %v1400_v1, -inf  ;;  %v10948_v12 = vpop.permute.xlu1 %2900  ;;  %v10951_v42 = vmax.f32 %v10828_v16, %v3016_v38 }
 0x172   : > { %v8376_v0 = vpop.eup %8375  ;;  %v10946_v45 = vmax.f32 %v10882_v50, %v1633_v34  ;;  %19155 = vst [vmem:[#allocation108_spill] sm:$0xff] %v10948_v12  ;;  %v19157_v1 = vmax.f32 %v10590_v23, %v10637_v26  ;;  %v10963_v24 = vmax.f32 %v10649_v2, %v2698_v21  ;;  %v2677_v38 = vsel %vm939_vm1, %v19158_v60, %v2634_v18  ;;  %v10983_v18 = vpop.permute.xlu2 %3465 }
 0x173   : > { %19156 = vst [vmem:[#allocation109_spill] sm:$0xff] %v10951_v42  ;;  %v1247_v28 = vrot.slane %v10935_v10, 1  ;;  %v10960_v7 = vmul.f32 %v8376_v0, %v10796_v41  ;;  %vm18304_vm11 = vcmp.eq.s32.totalorder %v10948_v12, 1  ;;  %v19160_v0 = vrot.slane %v10715_v22, 1 }
 0x174   : > { %v10956_v5 = vmax.f32 %v1341_v27, %v19157_v1  ;;  %v1697_v34 = vrot.slane %v10946_v45, 7  ;;  %v19159_v27 = vrot.slane %v10819_v39, 1  ;;  %19161 = vst [vmem:[#allocation110_spill] sm:$0xff] %v10983_v18  ;;  %v10990_v26 = vadd.f32 %v10170_v36, %v658_v63 }
 0x175   : > { %v1272_v23 = vsel %vm939_vm1, %v1246_v46, %v1247_v28  ;;  %v19162_v39 = vrot.slane %v10960_v7, 1  ;;  %v2697_v20 = vsel %vm18401_vm6, %v2677_v38, -inf  ;;  %v18302_v63 = vrot.slane %v10460_v58, 7 }
 0x176   : > { %v2675_v60 = vsel %vm939_vm1, %v19160_v0, %v19159_v27  ;;  %v1310_v46 = vsel %vm18339_vm14, %v1272_v23, -inf  ;;  %v1720_v1 = vsel %vm1388_vm2, %v1696_v3, %v1697_v34  ;;  %v19163_v0 = vrot.slane %v10960_v7, 7  ;;  %v11005_v3 = vpop.permute.xlu0 %2888 }
 0x177   : > { %v1342_v21 = vmax.f32 %v10876_v40, %v1310_v46  ;;  %v10995_v41 = vsel %vm18298_vm4, %v1720_v1, -inf  ;;  %v950_v27 = vsel %vm939_vm1, %v927_v35, %v19162_v39  ;;  %19164 = vst [vmem:[#allocation111_spill] sm:$0xff] %v11005_v3  ;;  %v19166_v39 = vmax.f32 %v10710_v49, %v10757_v55  ;;  %v19168_v3 = vld [vmem:[#allocation68_spill] sm:$0xff]  ;;  %v660_v49 = vpop.f32.mrf.mxu0 }
 0x178   : > { %v1399_v23 = vsel %vm1388_vm2, %v1376_v32, %v19163_v0  ;;  %v1184_v40 = vsel %vm18642_vm8, %v950_v27, -inf  ;;  %v2699_v18 = vsel %vm18300_vm5, %v2675_v60, -inf  ;;  %v900_v38 = vpack.c.bf16 %v10833_v8, %v10647_v44  ;;  %v19169_v44 = vld [vmem:[#allocation67_spill] sm:$0xff] }
 0x179   : > { %v1634_v46 = vsel %vm18311_vm13, %v1399_v23, -inf  ;;  %v11018_v35 = vmax.f32 %v1342_v21, %v19166_v39  ;;  %v11021_v32 = vmax.f32 %v10882_v50, %v1184_v40  ;;  %v705_v23 = vsub.f32 0.0, %v10990_v26 }
 0x17a   : > { %v11024_v0 = vmax.f32 %v10960_v7, %v1634_v46  ;;  %vm3415_vm4 = vcmp.ge.s32.totalorder %v19168_v3, 2  ;;  %vm3416_vm12 = vcmp.ge.s32.totalorder %v10541_v29, 2  ;;  %v11038_v46 = vmax.f32 %v10563_v59, %v2697_v20  ;;  %2588 = vmatmul.bf16.gmra.mxu2 %v900_v38 }
 0x17b   : > { %v18305_v55 = vrot.slane %v11021_v32, 1  ;;  %v3447_v40 = vsel %vm3415_vm4, 1, %v19031_v61  ;;  %v759_v60 = vmul.f32 1.442695, %v705_v23  ;;  %v3448_v39 = vsel %vm3416_vm12, 1, %v19031_v61 }
 0x17c   : > { %v18301_v21 = vrot.slane %v11024_v0, 7  ;;  %3522 = vperm.xlu1 %8283, %v3447_v40   ;;  %vm3414_vm5 = vcmp.ge.s32.totalorder %v19169_v44, 2  ;;  %v11043_v8 = vmax.f32 %v10715_v22, %v2699_v18  ;;  %3525 = vperm.xlu2 %8284, %v3448_v39   ;;  %v2762_v23 = vrot.slane %v10963_v24, 2 }
 0x17d   : > { %v1271_v3 = vsel %vm939_vm1, %v1247_v28, %v18305_v55  ;;  %v3446_v20 = vsel %vm3414_vm5, 1, %v19031_v61  ;;  %v18303_v40 = vrot.slane %v10778_v54, 7  ;;  %v19170_v28 = vrot.slane %v10828_v16, 2 }
 0x17e   : > { %v1719_v29 = vsel %vm1388_vm2, %v1697_v34, %v18301_v21  ;;  %v1311_v38 = vsel %vm18312_vm3, %v1271_v3, -inf  ;;  %3519 = vperm.xlu0 %8282, %v3446_v20   ;;  %v19171_v44 = vrot.slane %v10919_v19, 2  ;;  %v3256_v3 = vsel %vm1388_vm2, %v3208_v25, %v18302_v63  ;;  %v11077_v20 = vpop.permute.xlu2 %3474  ;;  %v11098_v21 = vpop.permute.xlu0 %2897 }
 0x17f   : > { %v11059_v18 = vsel %vm18311_vm13, %v1719_v29, -inf  ;;  %v1343_v39 = vmax.f32 %v10935_v10, %v1311_v38  ;;  %19172 = vst [vmem:[#allocation68_spill] sm:$0xff] %v11077_v20  ;;  %v3257_v16 = vsel %vm1388_vm2, %v18303_v40, %v3208_v25  ;;  %8377 = vpow2.f32 %v759_v60  ;;  %v663_v40 = vpop.f32.mrf.mxu0 }
 0x180   : > { %v2809_v34 = vsel %vm2784_vm7, %v19171_v44, %v19170_v28  ;;  %v11085_v10 = vmax.f32 %v10659_v14, %v10956_v5  ;;  %v18315_v38 = vrot.slane %v11043_v8, 2  ;;  %v19174_v28 = vmax.f32 %v10879_v33, %v10925_v9  ;;  %19177 = vst [vmem:[#allocation114_spill] sm:$0xff] %v11098_v21  ;;  %v11107_v33 = vpop.permute.xlu1 %2909 }
 0x181   : > { %v3015_v29 = vsel %vm18304_vm11, %v2809_v34, -inf  ;;  %v18307_v34 = vrot.slane %v11038_v46, 2  ;;  %v11096_v63 = vmax.f32 %v10508_v53, %v10366_v47  ;;  %v11103_v60 = vadd.f32 %v10170_v36, %v660_v49  ;;  %19178 = vst [vmem:[#allocation115_spill] sm:$0xff] %v11107_v33 }
 0x182   : > { %19173 = vst [vmem:[#allocation67_spill] sm:$0xff] %v11085_v10  ;;  %v11091_v44 = vmax.f32 %v1343_v39, %v19174_v28  ;;  %v2042_v25 = vmax.f32 %v10681_v37, %v11085_v10  ;;  %vm3418_vm5 = vcmp.ge.s32.totalorder %v10528_v62, 2  ;;  %vm3419_vm4 = vcmp.ge.s32.totalorder %v10697_v13, 2  ;;  %v19179_v28 = vld [vmem:[#allocation79_spill] sm:$0xff]  ;;  %v19180_v62 = vld [vmem:[#allocation52_spill] sm:$0xff] }
 0x183   : > { %19176 = vst [vmem:[#allocation113_spill] sm:$0xff] %v11096_v63  ;;  %v2266_v9 = vmax.f32 %v11096_v63, %v10599_v48  ;;  %v3450_v47 = vsel %vm3418_vm5, 1, %v19031_v61  ;;  %v3451_v39 = vsel %vm3419_vm4, 1, %v19031_v61  ;;  %vm3417_vm12 = vcmp.ge.s32.totalorder %v19179_v28, 2 }
 0x184   : > { %19175 = vst [vmem:[#allocation112_spill] sm:$0xff] %v11091_v44  ;;  %v2806_v37 = vsel %vm2784_vm7, %v18307_v34, %v2762_v23  ;;  %vm19181_vm11 = vcmp.eq.s32.totalorder %v19180_v62, 1  ;;  %v706_v49 = vsub.f32 0.0, %v11103_v60  ;;  %3531 = vperm.xlu1 %8283, %v3450_v47   ;;  %v3449_v48 = vsel %vm3417_vm12, 1, %v19031_v61  ;;  %3534 = vperm.xlu2 %8284, %v3451_v39  }
 0x185   : > { %v3273_v13 = vsel %vm19181_vm11, %v3256_v3, -inf  ;;  %v2805_v55 = vsel %vm2784_vm7, %v2762_v23, %v18315_v38  ;;  %vm18309_vm5 = vcmp.eq.s32.totalorder %v10891_v52, 1  ;;  %v11128_v28 = vmax.f32 %v10919_v19, %v3015_v29  ;;  %v8378_v34 = vpop.eup %8377  ;;  %v19184_v3 = vld [vmem:[#allocation51_spill] sm:$0xff] }
 0x186   : > { %v11130_v12 = vmax.f32 %v2042_v25, %v2266_v9  ;;  %vm18310_vm11 = vcmp.eq.s32.totalorder %v11107_v33, 1  ;;  %vm19185_vm4 = vcmp.eq.s32.totalorder %v19184_v3, 1  ;;  %v761_v62 = vmul.f32 1.442695, %v706_v49  ;;  %3528 = vperm.xlu0 %8282, %v3449_v48   ;;  %v19202_v3 = vld [vmem:[#allocation72_spill] sm:$0xff] }
 0x187   : > { %19182 = vst [vmem:[#allocation79_spill] sm:$0xff] %v11128_v28  ;;  %v3272_v47 = vsel %vm19185_vm4, %v3257_v16, -inf  ;;  %v11136_v20 = vadd.f32 %v10170_v36, %v663_v40  ;;  %v18314_v23 = vrot.slane %v10951_v42, 1  ;;  %v3018_v29 = vsel %vm18310_vm11, %v2806_v37, -inf  ;;  %v19234_v42 = vld [vmem:[#allocation37_spill] sm:$0xff] }
 0x188   : > { %19183 = vst [vmem:[#allocation116_spill] sm:$0xff] %v11130_v12  ;;  %v11142_v25 = vmax.f32 %v10460_v58, %v3273_v13  ;;  %v801_v9 = vadd.f32 1.0, %v8378_v34  ;;  %v3019_v39 = vsel %vm18309_vm5, %v2805_v55, -inf  ;;  %8379 = vpow2.f32 %v761_v62  ;;  %v11160_v55 = vpop.permute.xlu2 %3483  ;;  %v11240_v19 = vpop.permute.xlu1 %3462 }
 0x189   : > { %v707_v16 = vsub.f32 0.0, %v11136_v20  ;;  %v901_v49 = vpack.c.bf16 %v10960_v7, %v10882_v50  ;;  %v11151_v36 = vmax.f32 %v9459_v4, %v10941_v6  ;;  %v18313_v40 = vrot.slane %v11128_v28, 1  ;;  %19189 = vst [vmem:[#allocation120_spill] sm:$0xff] %v11160_v55 }
 0x18a   : > { %v11155_v37 = vmax.f32 %v10447_v51, %v3272_v47  ;;  %8381 = vrcp.f32 %v801_v9  ;;  %v11158_v34 = vmax.f32 %v11038_v46, %v3018_v29  ;;  %vm3421_vm12 = vcmp.ge.s32.totalorder %v10670_v17, 2  ;;  %v665_v47 = vpop.f32.mrf.mxu0  ;;  %v11176_v17 = vpop.permute.xlu0 %2906 }
 0x18b   : > { %19186 = vst [vmem:[#allocation117_spill] sm:$0xff] %v11151_v36  ;;  %v763_v62 = vmul.f32 1.442695, %v707_v16  ;;  %vm3422_vm4 = vcmp.ge.s32.totalorder %v10769_v57, 2  ;;  %v11165_v50 = vmax.f32 %v10963_v24, %v3019_v39  ;;  %v3129_v6 = vsel %vm939_vm1, %v18313_v40, %v18314_v23  ;;  %2593 = vmatmul.bf16.gmra.mxu2 %v901_v49  ;;  %v19192_v24 = vld [vmem:[#allocation33_spill] sm:$0xff]  ;;  %v19193_v16 = vld [vmem:[#allocation80_spill] sm:$0xff] }
 0x18c   : > { %19187 = vst [vmem:[#allocation118_spill] sm:$0xff] %v11155_v37  ;;  %v18320_v13 = vrot.slane %v11142_v25, 6  ;;  %v3453_v48 = vsel %vm3421_vm12, 1, %v19031_v61  ;;  %vm3361_vm5 = vcmp.lt.s32.totalorder %v9481_v43, 2  ;;  %v3454_v57 = vsel %vm3422_vm4, 1, %v19031_v61 }
 0x18d   : > { %19188 = vst [vmem:[#allocation119_spill] sm:$0xff] %v11158_v34  ;;  %8383 = vpow2.f32 %v763_v62  ;;  %3540 = vperm.xlu1 %8283, %v3453_v48   ;;  %vm3420_vm11 = vcmp.ge.s32.totalorder %v10664_v56, 2  ;;  %vm18600_vm13 = vcmp.eq.s32.totalorder %v19192_v24, 1  ;;  %v18319_v29 = vrot.slane %v11155_v37, 6  ;;  %3543 = vperm.xlu2 %8284, %v3454_v57   ;;  %v11193_v56 = vld [vmem:[%s18091_s6] ss:$0 sm:$0xff] }
 0x18e   : > { %19190 = vst [vmem:[#allocation121_spill] sm:$0xff] %v11165_v50  ;;  %vm18322_vm3 = vcmp.eq.s32.totalorder %v11160_v55, 1  ;;  %v3452_v9 = vsel %vm3420_vm11, 1, %v19031_v61  ;;  %v8380_v39 = vpop.eup %8379  ;;  %vm18378_vm12 = vcmp.eq.s32.totalorder %v19193_v16, 1  ;;  %v11187_v49 = vsel %vm18323_vm0, %v3129_v6, -inf  ;;  %v19199_v55 = vld [vmem:[#allocation94_spill] sm:$0xff] }
 0x18f   : > { %19191 = vst [vmem:[#allocation122_spill] sm:$0xff] %v11176_v17  ;;  %3537 = vperm.xlu0 %8282, %v3452_v9   ;;  %v11196_v48 = vadd.f32 %v11193_v56, %v665_v47  ;;  %v3385_v6 = vsel %vm3361_vm5, %v18319_v29, %v18320_v13  ;;  %v802_v38 = vadd.f32 1.0, %v8380_v39  ;;  %v19196_v51 = vrot.slane %v11038_v46, 2  ;;  %v19197_v47 = vld [vmem:[#allocation103_spill] sm:$0xff] }
 0x190   : > { %19195 = vst [vmem:[#allocation123_spill] sm:$0xff] %v11187_v49  ;;  %v8382_v57 = vpop.eup %8381  ;;  %v3594_v62 = vsel %vm18322_vm3, %v3385_v6, -inf  ;;  %v19198_v52 = vrot.slane %v19197_v47, 2  ;;  %vm18341_vm11 = vcmp.eq.s32.totalorder %v11176_v17, 1  ;;  %v3211_v29 = vrot.slane %v10649_v2, 7  ;;  %v19201_v39 = vld [vmem:[#allocation31_spill] sm:$0xff]  ;;  %v11347_v16 = vpop.permute.xlu2 %2915 }
 0x191   : > { %v11215_v33 = vmul.f32 %v8382_v57, %v10990_v26  ;;  %v708_v40 = vsub.f32 0.0, %v11196_v48  ;;  %8385 = vrcp.f32 %v802_v38  ;;  %vm3424_vm4 = vcmp.ge.s32.totalorder %v19199_v55, 2  ;;  %19205 = vst [vmem:[#allocation103_spill] sm:$0xff] %v11240_v19  ;;  %v19219_v17 = vld [vmem:[#allocation58_spill] sm:$0xff] }
 0x192   : > { %v2807_v23 = vsel %vm2784_vm7, %v19198_v52, %v19196_v51  ;;  %v19200_v52 = vrot.slane %v10715_v22, 7  ;;  %v3456_v38 = vsel %vm3424_vm4, 1, %v19031_v61  ;;  %vm18618_vm3 = vcmp.eq.s32.totalorder %v19201_v39, 1  ;;  %v11264_v31 = vpop.permute.xlu0 %3459  ;;  %v19284_v39 = vld [vmem:[#allocation85_spill] sm:$0xff] }
 0x193   : > { %v8384_v6 = vpop.eup %8383  ;;  %v929_v46 = vrot.slane %v11215_v33, 1  ;;  %v1378_v13 = vrot.slane %v11215_v33, 7  ;;  %v765_v9 = vmul.f32 1.442695, %v708_v40  ;;  %vm18372_vm0 = vcmp.eq.s32.totalorder %v19202_v3, 1  ;;  %19210 = vst [vmem:[#allocation124_spill] sm:$0xff] %v11264_v31 }
 0x194   : > { %v3253_v26 = vsel %vm1388_vm2, %v3211_v29, %v19200_v52  ;;  %v803_v57 = vadd.f32 1.0, %v8384_v6  ;;  %v19203_v37 = vrot.slane %v10960_v7, 1  ;;  %v19204_v55 = vrot.slane %v10960_v7, 7  ;;  %v11245_v6 = vld [vmem:[%s18085_s0] sm:$0xff] }
 0x195   : > { %8387 = vpow2.f32 %v765_v9  ;;  %3549 = vperm.xlu1 %8283, %v3456_v38   ;;  %19206 = vst [vmem:[#allocation94_spill] sm:$0xff] %v11245_v6  ;;  %vm4941_vm4 = vcmp.lt.s32.totalorder %v11245_v6, 13  ;;  %v19207_v54 = vrot.slane %v11130_v12, 1  ;;  %v19212_v36 = vrot.slane %v11165_v50, 1  ;;  %v19233_v12 = vld [vmem:[#allocation86_spill] sm:$0xff] }
 0x196   : > { %v949_v40 = vsel %vm939_vm1, %v19203_v37, %v929_v46  ;;  %v1398_v51 = vsel %vm1388_vm2, %v19204_v55, %v1378_v13  ;;  %v19208_v55 = vld [vmem:[#allocation101_spill] sm:$0xff]  ;;  %8389 = vrcp.f32 %v803_v57  ;;  %v4973_v4 = vsel %vm4941_vm4, 1, %v19031_v61 }
 0x197   : > { %v1185_v52 = vsel %vm18600_vm13, %v949_v40, -inf  ;;  %v1635_v37 = vsel %vm18378_vm12, %v1398_v51, -inf  ;;  %v19209_v21 = vrot.slane %v19208_v55, 1  ;;  %v19211_v40 = vrot.slane %v10563_v59, 7  ;;  %v8386_v11 = vpop.eup %8385  ;;  %5006 = vperm.xlu2 %8284, %v4973_v4   ;;  %v19221_v4 = vld [vmem:[#allocation61_spill] sm:$0xff] }
 0x198   : > { %v11259_v38 = vmax.f32 %v10960_v7, %v1185_v52  ;;  %v11262_v19 = vmax.f32 %v11215_v33, %v1635_v37  ;;  %v11284_v57 = vsel %vm18341_vm11, %v2807_v23, -inf  ;;  %vm19220_vm11 = vcmp.eq.s32.totalorder %v19219_v17, 1 }
 0x199   : > { %v2674_v9 = vsel %vm939_vm1, %v19209_v21, %v19207_v54  ;;  %v3254_v51 = vsel %vm1388_vm2, %v19211_v40, %v3211_v29  ;;  %v19213_v54 = vrot.slane %v11158_v34, 1  ;;  %v11280_v21 = vmax.f32 %v11142_v25, %v3594_v62  ;;  %v19215_v29 = vld [vmem:[#allocation93_spill] sm:$0xff]  ;;  %v19218_v62 = vld [vmem:[#allocation96_spill] sm:$0xff]  ;;  %v19235_v34 = vld [vmem:[#allocation87_spill] sm:$0xff] }
 0x19a   : > { %vm3423_vm10 = vcmp.ge.s32.totalorder %v19215_v29, 2  ;;  %v1249_v52 = vrot.slane %v11259_v38, 1  ;;  %v1699_v37 = vrot.slane %v11262_v19, 7  ;;  %v2700_v31 = vsel %vm18495_vm15, %v2674_v9, -inf }
 0x19b   : > { %v11277_v7 = vsel %vm939_vm1, %v19213_v54, %v19212_v36  ;;  %19214 = vst [vmem:[#allocation125_spill] sm:$0xff] %v11280_v21  ;;  %v11292_v36 = vmul.f32 %v8386_v11, %v11103_v60  ;;  %v19217_v54 = vld [vmem:[#allocation20_spill] sm:$0xff]  ;;  %vm18376_vm14 = vcmp.eq.s32.totalorder %v19218_v62, 1  ;;  %v3275_v23 = vsel %vm19220_vm11, %v3254_v51, -inf  ;;  %v8388_v9 = vpop.eup %8387 }
 0x19c   : > { %vm18435_vm4 = vcmp.eq.s32.totalorder %v19217_v54, 1  ;;  %vm19222_vm9 = vcmp.eq.s32.totalorder %v19221_v4, 1  ;;  %v3455_v6 = vsel %vm3423_vm10, 1, %v19031_v61  ;;  %v11303_v27 = vmax.f32 %v10956_v5, %v11091_v44  ;;  %v8390_v17 = vpop.eup %8389  ;;  %v19279_v54 = vld [vmem:[#allocation35_spill] sm:$0xff] }
 0x19d   : > { %v3276_v29 = vsel %vm19222_vm9, %v3253_v26, -inf  ;;  %v19223_v11 = vrot.slane %v11021_v32, 1  ;;  %v19224_v40 = vrot.slane %v11024_v0, 7  ;;  %v930_v4 = vrot.slane %v11292_v36, 1  ;;  %3546 = vperm.xlu0 %8282, %v3455_v6  }
 0x19e   : > { %v1379_v26 = vrot.slane %v11292_v36, 7  ;;  %v804_v15 = vadd.f32 1.0, %v8388_v9  ;;  %v19225_v9 = vld [vmem:[#allocation84_spill] sm:$0xff]  ;;  %vm18425_vm10 = vcmp.eq.s32.totalorder %v19234_v42, 1  ;;  %vm18375_vm9 = vcmp.eq.s32.totalorder %v19235_v34, 1 }
 0x19f   : > { %v1270_v60 = vsel %vm939_vm1, %v19223_v11, %v1249_v52  ;;  %v1718_v51 = vsel %vm1388_vm2, %v19224_v40, %v1699_v37  ;;  %v11322_v11 = vmax.f32 %v19208_v55, %v2700_v31  ;;  %v948_v6 = vsel %vm939_vm1, %v929_v46, %v930_v4  ;;  %19229 = vst [vmem:[#allocation84_spill] sm:$0xff] %v11347_v16  ;;  %v19339_v42 = vld [vmem:[#allocation104_spill] sm:$0xff] }
 0x1a0   : > { %v1312_v28 = vsel %vm18642_vm8, %v1270_v60, -inf  ;;  %v11319_v49 = vsel %vm18378_vm12, %v1718_v51, -inf  ;;  %v1397_v30 = vsel %vm1388_vm2, %v1378_v13, %v1379_v26  ;;  %v1186_v60 = vsel %vm18618_vm3, %v948_v6, -inf }
 0x1a1   : > { %v1344_v50 = vmax.f32 %v11021_v32, %v1312_v28  ;;  %v1636_v51 = vsel %vm18372_vm0, %v1397_v30, -inf  ;;  %v11336_v31 = vmul.f32 %v8390_v17, %v11136_v20  ;;  %v19226_v32 = vld [vmem:[#allocation98_spill] sm:$0xff]  ;;  %v19227_v40 = vmax.f32 %v10946_v45, %v10995_v41  ;;  %v11355_v30 = vpop.permute.xlu1 %3471 }
 0x1a2   : > { %v11340_v28 = vmax.f32 %v19226_v32, %v19225_v9  ;;  %v11350_v13 = vmax.f32 %v11215_v33, %v1186_v60  ;;  %v11353_v6 = vmax.f32 %v11292_v36, %v1636_v51  ;;  %19230 = vst [vmem:[#allocation98_spill] sm:$0xff] %v11355_v30  ;;  %8391 = vrcp.f32 %v804_v15 }
 0x1a3   : > { %v11345_v46 = vmax.f32 %v1344_v50, %v19227_v40  ;;  %v931_v17 = vrot.slane %v11336_v31, 1  ;;  %v1380_v9 = vrot.slane %v11336_v31, 7  ;;  %v11362_v45 = vmax.f32 %v19226_v32, %v11018_v35  ;;  %v11366_v40 = vpop.permute.xlu0 %3468 }
 0x1a4   : > { %v1250_v41 = vrot.slane %v11350_v13, 1  ;;  %v1700_v50 = vrot.slane %v11353_v6, 7  ;;  %19231 = vst [vmem:[#allocation126_spill] sm:$0xff] %v11366_v40  ;;  %v11374_v51 = vmax.f32 %v10956_v5, %v10659_v14  ;;  %v11382_v30 = vmax.f32 %v10659_v14, %v10508_v53 }
 0x1a5   : > { %19228 = vst [vmem:[#allocation93_spill] sm:$0xff] %v11345_v46  ;;  %v11370_v60 = vmax.f32 %v11018_v35, %v11345_v46  ;;  %v947_v15 = vsel %vm939_vm1, %v930_v4, %v931_v17  ;;  %v1396_v20 = vsel %vm1388_vm2, %v1379_v26, %v1380_v9  ;;  %v2269_v40 = vmax.f32 %v11340_v28, %v19233_v12 }
 0x1a6   : > { %19232 = vst [vmem:[#allocation127_spill] sm:$0xff] %v11382_v30  ;;  %v1269_v63 = vsel %vm939_vm1, %v1249_v52, %v1250_v41  ;;  %v1717_v4 = vsel %vm1388_vm2, %v1699_v37, %v1700_v50  ;;  %v1187_v26 = vsel %vm18435_vm4, %v947_v15, -inf  ;;  %v1637_v53 = vsel %vm18376_vm14, %v1396_v20, -inf }
 0x1a7   : > { %v1313_v14 = vsel %vm18600_vm13, %v1269_v63, -inf  ;;  %v11400_v12 = vsel %vm18372_vm0, %v1717_v4, -inf  ;;  %v11403_v10 = vmax.f32 %v11292_v36, %v1187_v26  ;;  %v11406_v52 = vmax.f32 %v11336_v31, %v1637_v53 }
 0x1a8   : > { %v1345_v37 = vmax.f32 %v11259_v38, %v1313_v14  ;;  %v2045_v20 = vmax.f32 %v11362_v45, %v11370_v60  ;;  %v2270_v63 = vmax.f32 %v11374_v51, %v11382_v30  ;;  %v8392_v3 = vpop.eup %8391  ;;  %v11417_v4 = vmax.f32 %v19197_v47, %v11284_v57 }
 0x1a9   : > { %19236 = vst [vmem:[#allocation128_spill] sm:$0xff] %v11406_v52  ;;  %v11420_v26 = vmax.f32 %v10649_v2, %v3275_v23  ;;  %v1251_v53 = vrot.slane %v11403_v10, 1  ;;  %v1701_v38 = vrot.slane %v11406_v52, 7  ;;  %v19238_v14 = vmax.f32 %v11024_v0, %v11059_v18 }
 0x1aa   : > { %19237 = vst [vmem:[#allocation129_spill] sm:$0xff] %v11417_v4  ;;  %v11430_v24 = vmax.f32 %v10715_v22, %v3276_v29  ;;  %v11433_v30 = vmul.f32 %v8392_v3, %v11196_v48  ;;  %v11435_v47 = vmax.f32 %v2045_v20, %v2269_v40  ;;  %v19241_v0 = vrot.slane %v19208_v55, 7  ;;  %v11448_v3 = vpop.permute.xlu2 %3492 }
 0x1ab   : > { %v11427_v15 = vmax.f32 %v1345_v37, %v19238_v14  ;;  %v1268_v23 = vsel %vm939_vm1, %v1250_v41, %v1251_v53  ;;  %v1716_v2 = vsel %vm1388_vm2, %v1700_v50, %v1701_v38  ;;  %v19242_v18 = vrot.slane %v10715_v22, 7  ;;  %v668_v37 = vpop.f32.mrf.mxu0  ;;  %19243 = vst [vmem:[#allocation132_spill] sm:$0xff] %v11448_v3  ;;  %v11456_v41 = vpop.permute.xlu1 %3480 }
 0x1ac   : > { %19240 = vst [vmem:[#allocation131_spill] sm:$0xff] %v11435_v47  ;;  %v1314_v48 = vsel %vm18618_vm3, %v1268_v23, -inf  ;;  %v11454_v40 = vsel %vm18376_vm14, %v1716_v2, -inf  ;;  %v18369_v50 = vrot.slane %v11433_v30, 1  ;;  %v18370_v20 = vrot.slane %v11433_v30, 7  ;;  %v11471_v2 = vpop.permute.xlu0 %3477 }
 0x1ad   : > { %19239 = vst [vmem:[#allocation130_spill] sm:$0xff] %v11427_v15  ;;  %v3252_v29 = vsel %vm1388_vm2, %v19242_v18, %v19241_v0  ;;  %v1346_v14 = vmax.f32 %v11350_v13, %v1314_v48  ;;  %v11465_v18 = vmax.f32 %v11091_v44, %v11427_v15  ;;  %v11469_v23 = vmax.f32 %v11018_v35, %v19226_v32 }
 0x1ae   : > { %19244 = vst [vmem:[#allocation133_spill] sm:$0xff] %v11454_v40  ;;  %v946_v57 = vsel %vm939_vm1, %v931_v17, %v18369_v50  ;;  %v1395_v13 = vsel %vm1388_vm2, %v1380_v9, %v18370_v20  ;;  %v19248_v48 = vrot.slane %v10563_v59, 7  ;;  %v19249_v0 = vrot.slane %v10460_v58, 7  ;;  %v19252_v58 = vld [vmem:[#allocation59_spill] sm:$0xff]  ;;  %v11798_v40 = vpop.f32.mrf.mxu2 }
 0x1af   : > { %19245 = vst [vmem:[#allocation134_spill] sm:$0xff] %v11456_v41  ;;  %v11488_v22 = vadd.f32 %v11193_v56, %v668_v37  ;;  %v1638_v17 = vsel %vm18375_vm9, %v1395_v13, -inf  ;;  %v19250_v50 = vmax.f32 %v11262_v19, %v11319_v49  ;;  %v2046_v20 = vmax.f32 %v11303_v27, %v11465_v18 }
 0x1b0   : > { %19246 = vst [vmem:[#allocation135_spill] sm:$0xff] %v11469_v23  ;;  %v3255_v32 = vsel %vm1388_vm2, %v19249_v0, %v19248_v48  ;;  %vm19253_vm11 = vcmp.eq.s32.totalorder %v19252_v58, 1  ;;  %v11507_v48 = vmax.f32 %v11433_v30, %v1638_v17  ;;  %v902_v49 = vpack.c.bf16 %v11292_v36, %v11215_v33 }
 0x1b1   : > { %19247 = vst [vmem:[#allocation136_spill] sm:$0xff] %v11471_v2  ;;  %v1188_v2 = vsel %vm18425_vm10, %v946_v57, -inf  ;;  %v11497_v9 = vmax.f32 %v1346_v14, %v19250_v50  ;;  %v3277_v0 = vsel %vm19253_vm11, %v3252_v29, -inf  ;;  %v709_v57 = vsub.f32 0.0, %v11488_v22  ;;  %v11521_v29 = vld [vmem:[%s18085_s0 + $0x10] sm:$0xff] }
 0x1b2   : > { %v11504_v37 = vmax.f32 %v11336_v31, %v1188_v2  ;;  %v11514_v19 = vmax.f32 %v2046_v20, %v2270_v63  ;;  %19256 = vst [vmem:[#allocation140_spill] sm:$0xff] %v11521_v29  ;;  %vm4943_vm11 = vcmp.lt.s32.totalorder %v11521_v29, 13  ;;  %v19257_v2 = vld [vmem:[#allocation55_spill] sm:$0xff]  ;;  %v11529_v63 = vmax.f32 %v19208_v55, %v3277_v0  ;;  %2598 = vmatmul.bf16.gmra.mxu2 %v902_v49  ;;  %v19296_v29 = vld [vmem:[#allocation24_spill] sm:$0xff] }
 0x1b3   : > { %19251 = vst [vmem:[#allocation137_spill] sm:$0xff] %v11497_v9  ;;  %v11512_v13 = vmax.f32 %v11345_v46, %v11497_v9  ;;  %vm19258_vm0 = vcmp.eq.s32.totalorder %v19257_v2, 1  ;;  %v767_v41 = vmul.f32 1.442695, %v709_v57  ;;  %v2271_v36 = vmax.f32 %v11469_v23, %v11340_v28 }
 0x1b4   : > { %19255 = vst [vmem:[#allocation139_spill] sm:$0xff] %v11514_v19  ;;  %v3274_v17 = vsel %vm19258_vm0, %v3255_v32, -inf  ;;  %v4975_v20 = vsel %vm4943_vm11, 1, %v19031_v61  ;;  %v3340_v50 = vrot.slane %v11430_v24, 6  ;;  %v19259_v14 = vrot.slane %v11504_v37, 1 }
 0x1b5   : > { %19254 = vst [vmem:[#allocation138_spill] sm:$0xff] %v11512_v13  ;;  %v2047_v33 = vmax.f32 %v11370_v60, %v11512_v13  ;;  %v19260_v57 = vrot.slane %v11507_v48, 7  ;;  %8393 = vpow2.f32 %v767_v41  ;;  %5012 = vperm.xlu1 %8283, %v4975_v20   ;;  %v11554_v62 = vmax.f32 %v10563_v59, %v3274_v17  ;;  %v11563_v41 = vpop.permute.xlu2 %3495 }
 0x1b6   : > { %v1267_v32 = vsel %vm939_vm1, %v1251_v53, %v19259_v14  ;;  %v19262_v53 = vrot.slane %v11322_v11, 2  ;;  %v19263_v14 = vrot.slane %v11043_v8, 2  ;;  %vm18388_vm0 = vcmp.eq.s32.totalorder %v11448_v3, 1  ;;  %19264 = vst [vmem:[#allocation142_spill] sm:$0xff] %v11563_v41 }
 0x1b7   : > { %v1715_v0 = vsel %vm1388_vm2, %v1701_v38, %v19260_v57  ;;  %v1315_v28 = vsel %vm18435_vm4, %v1267_v32, -inf  ;;  %v11551_v49 = vmax.f32 %v2047_v33, %v2271_v36  ;;  %v11568_v36 = vpop.permute.xlu1 %3552  ;;  %v18380_v17 = vrot.slane %v11420_v26, 6  ;;  %v11575_v57 = vld [vmem:[%s18085_s0 + $0x18] sm:$0xff]  ;;  %19321 = vst [vmem:[#allocation151_spill] sm:$0xff] %v11798_v40 }
 0x1b8   : > { %v11549_v60 = vsel %vm18375_vm9, %v1715_v0, -inf  ;;  %v2804_v38 = vsel %vm2784_vm7, %v19263_v14, %v19262_v53  ;;  %v1347_v20 = vmax.f32 %v11403_v10, %v1315_v28  ;;  %19265 = vst [vmem:[#allocation143_spill] sm:$0xff] %v11568_v36  ;;  %vm4944_vm11 = vcmp.lt.s32.totalorder %v11575_v57, 13  ;;  %v11581_v10 = vld [vmem:[%s18085_s0 + $0x8] sm:$0xff]  ;;  %v11590_v53 = vpop.permute.xlu0 %3486 }
 0x1b9   : > { %19261 = vst [vmem:[#allocation141_spill] sm:$0xff] %v11551_v49  ;;  %vm4942_vm9 = vcmp.lt.s32.totalorder %v11581_v10, 13  ;;  %vm18399_vm14 = vcmp.eq.s32.totalorder %v11347_v16, 1  ;;  %v19267_v0 = vmax.f32 %v11353_v6, %v11400_v12  ;;  %v4976_v14 = vsel %vm4944_vm11, 1, %v19031_v61 }
 0x1ba   : > { %19266 = vst [vmem:[#allocation144_spill] sm:$0xff] %v11575_v57  ;;  %v4974_v33 = vsel %vm4942_vm9, 1, %v19031_v61  ;;  %v3020_v32 = vsel %vm18399_vm14, %v2804_v38, -inf  ;;  %v3382_v59 = vsel %vm3361_vm5, %v18380_v17, %v3340_v50  ;;  %vm18395_vm12 = vcmp.eq.s32.totalorder %v11563_v41, 1  ;;  %5015 = vperm.xlu2 %8284, %v4976_v14  }
 0x1bb   : > { %v11588_v28 = vmax.f32 %v1347_v20, %v19267_v0  ;;  %19269 = vst [vmem:[#allocation146_spill] sm:$0xff] %v11590_v53  ;;  %5009 = vperm.xlu0 %8282, %v4974_v33   ;;  %v8394_v6 = vpop.eup %8393  ;;  %v11605_v20 = vsel %vm18401_vm6, %v11277_v7, -inf  ;;  %v3081_v38 = vrot.slane %v11417_v4, 1  ;;  %v3597_v16 = vsel %vm18388_vm0, %v3382_v59, -inf  ;;  %v670_v7 = vpop.f32.mrf.mxu0  ;;  %v19355_v4 = vld [vmem:[#allocation11_spill] sm:$0xff] }
 0x1bc   : > { %v19270_v17 = vrot.slane %v11529_v63, 6  ;;  %vm18396_vm9 = vcmp.eq.s32.totalorder %v11590_v53, 1  ;;  %v805_v33 = vadd.f32 1.0, %v8394_v6  ;;  %v11621_v0 = vmax.f32 %v11043_v8, %v3020_v32  ;;  %v19278_v53 = vld [vmem:[#allocation127_spill] sm:$0xff] }
 0x1bd   : > { %19268 = vst [vmem:[#allocation145_spill] sm:$0xff] %v11588_v28  ;;  %v11618_v14 = vmax.f32 %v11427_v15, %v11588_v28  ;;  %v2642_v59 = vrot.slane %v11551_v49, 1  ;;  %v11628_v1 = vmax.f32 %v11091_v44, %v10956_v5  ;;  %v19274_v6 = vrot.slane %v11142_v25, 6 }
 0x1be   : > { %v3381_v12 = vsel %vm3361_vm5, %v3340_v50, %v19270_v17  ;;  %v2641_v50 = vrot.slane %v11514_v19, 1  ;;  %v19273_v17 = vrot.slane %v11554_v62, 6  ;;  %8395 = vrcp.f32 %v805_v33 }
 0x1bf   : > { %19271 = vst [vmem:[#allocation147_spill] sm:$0xff] %v11618_v14  ;;  %v3598_v3 = vsel %vm18395_vm12, %v3381_v12, -inf  ;;  %v2048_v8 = vmax.f32 %v11465_v18, %v11618_v14  ;;  %v2272_v5 = vmax.f32 %v11628_v1, %v11374_v51  ;;  %v19275_v12 = vld [vmem:[#allocation99_spill] sm:$0xff]  ;;  %v11646_v34 = vadd.f32 %v11193_v56, %v670_v7  ;;  %v19280_v51 = vld [vmem:[#allocation78_spill] sm:$0xff]  ;;  %v11660_v7 = vpop.permute.xlu1 %3489  ;;  %v19289_v14 = vld [vmem:[#allocation109_spill] sm:$0xff] }
 0x1c0   : > { %19272 = vst [vmem:[#allocation148_spill] sm:$0xff] %v11628_v1  ;;  %v3384_v36 = vsel %vm3361_vm5, %v19274_v6, %v19273_v17  ;;  %v2043_v41 = vmax.f32 %v19275_v12, %v11362_v45  ;;  %v11649_v25 = vmax.f32 %v11529_v63, %v3598_v3  ;;  %v19276_v17 = vld [vmem:[#allocation67_spill] sm:$0xff]  ;;  %v19277_v6 = vld [vmem:[#allocation113_spill] sm:$0xff]  ;;  %vm18471_vm11 = vcmp.eq.s32.totalorder %v19279_v54, 1  ;;  %v19283_v3 = vld [vmem:[#allocation86_spill] sm:$0xff]  ;;  %v11789_v13 = vpop.permute.xlu0 %2918 }
 0x1c1   : > { %v3595_v32 = vsel %vm18396_vm9, %v3384_v36, -inf  ;;  %v2044_v18 = vmax.f32 %v19276_v17, %v11303_v27  ;;  %v2268_v36 = vmax.f32 %v19278_v53, %v19277_v6  ;;  %vm18424_vm0 = vcmp.eq.s32.totalorder %v19280_v51, 1  ;;  %19281 = vst [vmem:[#allocation99_spill] sm:$0xff] %v11660_v7  ;;  %v19287_v17 = vld [vmem:[#allocation119_spill] sm:$0xff] }
 0x1c2   : > { %v2669_v45 = vsel %vm939_vm1, %v2641_v50, %v2642_v59  ;;  %v11662_v12 = vmax.f32 %v2048_v8, %v2272_v5  ;;  %v19285_v33 = vmax.f32 %v19283_v3, %v19284_v39  ;;  %v710_v27 = vsub.f32 0.0, %v11646_v34  ;;  %v8829_v39 = vld [vmem:[%s18085_s0 + $0x28] sm:$0xff]  ;;  %v19338_v51 = vld [vmem:[#allocation23_spill] sm:$0xff] }
 0x1c3   : > { %v19288_v53 = vrot.slane %v19287_v17, 1  ;;  %v19290_v15 = vrot.slane %v19289_v14, 1  ;;  %v11679_v8 = vmax.f32 %v11554_v62, %v3595_v32  ;;  %vm4946_vm12 = vcmp.lt.s32.totalorder %v8829_v39, 13 }
 0x1c4   : > { %19282 = vst [vmem:[#allocation67_spill] sm:$0xff] %v11662_v12  ;;  %v11667_v1 = vmax.f32 %v2043_v41, %v19285_v33  ;;  %v11686_v5 = vmax.f32 %v11430_v24, %v3597_v16  ;;  %v19291_v33 = vrot.slane %v11435_v47, 1  ;;  %vm18408_vm14 = vcmp.eq.s32.totalorder %v11660_v7, 1  ;;  %v19294_v16 = vld [vmem:[#allocation116_spill] sm:$0xff] }
 0x1c5   : > { %v3127_v6 = vsel %vm939_vm1, %v3081_v38, %v19288_v53  ;;  %v3128_v44 = vsel %vm939_vm1, %v19290_v15, %v3081_v38  ;;  %v8396_v38 = vpop.eup %8395  ;;  %v19292_v53 = vld [vmem:[#allocation14_spill] sm:$0xff]  ;;  %v769_v39 = vmul.f32 1.442695, %v710_v27  ;;  %v4978_v32 = vsel %vm4946_vm12, 1, %v19031_v61  ;;  %v19298_v27 = vld [vmem:[#allocation21_spill] sm:$0xff] }
 0x1c6   : > { %19286 = vst [vmem:[#allocation113_spill] sm:$0xff] %v11667_v1  ;;  %v2670_v3 = vsel %vm939_vm1, %v19291_v33, %v2641_v50  ;;  %v18403_v15 = vrot.slane %v11667_v1, 1  ;;  %vm19293_vm9 = vcmp.eq.s32.totalorder %v19292_v53, 1  ;;  %v11698_v41 = vmul.f32 %v8396_v38, %v11488_v22  ;;  %5021 = vperm.xlu1 %8283, %v4978_v32   ;;  %v8830_v32 = vld [vmem:[%s18085_s0 + $0x30] sm:$0xff] }
 0x1c7   : > { %v2705_v28 = vsel %vm19293_vm9, %v2669_v45, -inf  ;;  %v19295_v50 = vrot.slane %v19294_v16, 1  ;;  %vm19297_vm6 = vcmp.eq.s32.totalorder %v19296_v29, 1  ;;  %vm19299_vm9 = vcmp.eq.s32.totalorder %v19298_v27, 1 }
 0x1c8   : > { %v2704_v45 = vsel %vm19297_vm6, %v2670_v3, -inf  ;;  %8397 = vpow2.f32 %v769_v39  ;;  %v11714_v38 = vmax.f32 %v11514_v19, %v2705_v28  ;;  %v18404_v24 = vrot.slane %v11698_v41, 1  ;;  %v11732_v28 = vld [vmem:[%s18085_s0 + $0x20] sm:$0xff] }
 0x1c9   : > { %v2673_v33 = vsel %vm939_vm1, %v19295_v50, %v18403_v15  ;;  %v18406_v57 = vrot.slane %v11698_v41, 7  ;;  %v19300_v50 = vrot.slane %v11420_v26, 6  ;;  %v19301_v15 = vrot.slane %v11554_v62, 6  ;;  %19302 = vst [vmem:[#allocation127_spill] sm:$0xff] %v11732_v28 }
 0x1ca   : > { %v2701_v22 = vsel %vm19299_vm9, %v2673_v33, -inf  ;;  %vm4947_vm6 = vcmp.lt.s32.totalorder %v8830_v32, 13  ;;  %vm4945_vm12 = vcmp.lt.s32.totalorder %v11732_v28, 13  ;;  %v11735_v39 = vmax.f32 %v2044_v18, %v2268_v36  ;;  %v11756_v32 = vpop.permute.xlu2 %2930 }
 0x1cb   : > { %v3383_v3 = vsel %vm3361_vm5, %v19301_v15, %v19300_v50  ;;  %v19304_v62 = vrot.slane %v11433_v30, 1  ;;  %v19305_v33 = vrot.slane %v11433_v30, 7  ;;  %v11754_v36 = vmax.f32 %v19294_v16, %v2701_v22  ;;  %19307 = vst [vmem:[#allocation85_spill] sm:$0xff] %v11756_v32 }
 0x1cc   : > { %v3596_v53 = vsel %vm18408_vm14, %v3383_v3, -inf  ;;  %19303 = vst [vmem:[#allocation86_spill] sm:$0xff] %v11735_v39  ;;  %v19306_v3 = vrot.slane %v11662_v12, 1  ;;  %v4979_v7 = vsel %vm4947_vm6, 1, %v19031_v61  ;;  %v19315_v12 = vrot.slane %v11621_v0, 1 }
 0x1cd   : > { %v945_v15 = vsel %vm939_vm1, %v19304_v62, %v18404_v24  ;;  %v1394_v50 = vsel %vm1388_vm2, %v19305_v33, %v18406_v57  ;;  %v4977_v33 = vsel %vm4945_vm12, 1, %v19031_v61  ;;  %v19308_v57 = vld [vmem:[#allocation15_spill] sm:$0xff]  ;;  %5024 = vperm.xlu2 %8284, %v4979_v7   ;;  %v3661_v23 = vrot.slane %v11686_v5, 7 }
 0x1ce   : > { %v2668_v18 = vsel %vm939_vm1, %v2642_v59, %v19306_v3  ;;  %v1189_v62 = vsel %vm18471_vm11, %v945_v15, -inf  ;;  %v1639_v24 = vsel %vm18424_vm0, %v1394_v50, -inf  ;;  %vm19309_vm9 = vcmp.eq.s32.totalorder %v19308_v57, 1  ;;  %v8398_v15 = vpop.eup %8397  ;;  %v19312_v50 = vld [vmem:[#allocation7_spill] sm:$0xff]  ;;  %v19316_v57 = vld [vmem:[#allocation121_spill] sm:$0xff]  ;;  %5018 = vperm.xlu0 %8282, %v4977_v33  }
 0x1cf   : > { %v11766_v28 = vsel %vm19309_vm9, %v3128_v44, -inf  ;;  %v11769_v59 = vmax.f32 %v11435_v47, %v2704_v45  ;;  %v11772_v22 = vmax.f32 %v11433_v30, %v1189_v62  ;;  %v11775_v3 = vmax.f32 %v11698_v41, %v1639_v24  ;;  %19318 = vst [vmem:[#allocation121_spill] sm:$0xff] %v11789_v13 }
 0x1d0   : > { %19310 = vst [vmem:[#allocation119_spill] sm:$0xff] %v11766_v28  ;;  %vm19313_vm14 = vcmp.eq.s32.totalorder %v19312_v50, 1  ;;  %v19317_v44 = vrot.slane %v19316_v57, 1  ;;  %v2769_v62 = vrot.slane %v11714_v38, 2  ;;  %v19319_v50 = vld [vmem:[#allocation30_spill] sm:$0xff]  ;;  %v19323_v52 = vrot.slane %v11679_v8, 7 }
 0x1d1   : > { %19311 = vst [vmem:[#allocation149_spill] sm:$0xff] %v11775_v3  ;;  %v11779_v29 = vsel %vm19313_vm14, %v3127_v6, -inf  ;;  %v11794_v6 = vmax.f32 %v11420_v26, %v3596_v53  ;;  %vm19320_vm14 = vcmp.eq.s32.totalorder %v19319_v50, 1  ;;  %v19324_v33 = vrot.slane %v11280_v21, 7 }
 0x1d2   : > { %19314 = vst [vmem:[#allocation150_spill] sm:$0xff] %v11779_v29  ;;  %v3125_v45 = vsel %vm939_vm1, %v19317_v44, %v19315_v12  ;;  %v2706_v9 = vsel %vm19320_vm14, %v2668_v18, -inf  ;;  %v19322_v12 = vrot.slane %v11649_v25, 7  ;;  %v806_v53 = vadd.f32 1.0, %v8398_v15  ;;  %v11878_v26 = vpop.permute.xlu2 %2933 }
 0x1d3   : > { %v3704_v24 = vsel %vm1388_vm2, %v19324_v33, %v19323_v52  ;;  %v18421_v7 = vrot.slane %v11769_v59, 2  ;;  %v19325_v18 = vrot.slane %v11772_v22, 1  ;;  %v19326_v40 = vrot.slane %v11504_v37, 1  ;;  %19342 = vst [vmem:[#allocation155_spill] sm:$0xff] %v11878_v26 }
 0x1d4   : > { %v3701_v44 = vsel %vm1388_vm2, %v3661_v23, %v19322_v12  ;;  %v19327_v12 = vrot.slane %v11775_v3, 7  ;;  %v19328_v46 = vrot.slane %v11507_v48, 7  ;;  %vm18432_vm6 = vcmp.eq.s32.totalorder %v11789_v13, 1 }
 0x1d5   : > { %v1266_v50 = vsel %vm939_vm1, %v19326_v40, %v19325_v18  ;;  %v11834_v33 = vmax.f32 %v11551_v49, %v2706_v9  ;;  %8399 = vrcp.f32 %v806_v53  ;;  %v2799_v40 = vsel %vm2784_vm7, %v18421_v7, %v2769_v62  ;;  %v19358_v49 = vld [vmem:[#allocation61_spill] sm:$0xff] }
 0x1d6   : > { %v1714_v21 = vsel %vm1388_vm2, %v19328_v46, %v19327_v12  ;;  %v11827_v52 = vsel %vm18425_vm10, %v1266_v50, -inf  ;;  %v3660_v18 = vrot.slane %v11794_v6, 7  ;;  %vm19333_vm12 = vcmp.eq.s32.totalorder %v19252_v58, 1 }
 0x1d7   : > { %v11831_v15 = vsel %vm18424_vm0, %v1714_v21, -inf  ;;  %19330 = vst [vmem:[#allocation153_spill] sm:$0xff] %v11834_v33  ;;  %v11849_v9 = vsel %vm19333_vm12, %v3701_v44, -inf  ;;  %vm19335_vm9 = vcmp.eq.s32.totalorder %v19257_v2, 1  ;;  %v19336_v7 = vrot.slane %v11754_v36, 2  ;;  %v19340_v44 = vld [vmem:[#allocation18_spill] sm:$0xff]  ;;  %v673_v2 = vpop.f32.mrf.mxu0 }
 0x1d8   : > { %19329 = vst [vmem:[#allocation152_spill] sm:$0xff] %v11831_v15  ;;  %v11853_v53 = vsel %vm19335_vm9, %v3704_v24, -inf  ;;  %v19337_v46 = vrot.slane %v11322_v11, 2  ;;  %vm18518_vm14 = vcmp.eq.s32.totalorder %v19338_v51, 1  ;;  %vm18464_vm0 = vcmp.eq.s32.totalorder %v19339_v42, 1  ;;  %v12040_v42 = vpop.permute.xlu0 %2921 }
 0x1d9   : > { %19334 = vst [vmem:[#allocation154_spill] sm:$0xff] %v11849_v9  ;;  %vm18431_vm12 = vcmp.eq.s32.totalorder %v11756_v32, 1  ;;  %vm19341_vm10 = vcmp.eq.s32.totalorder %v19340_v44, 1  ;;  %v19343_v13 = vrot.slane %v11679_v8, 7  ;;  %v11896_v21 = vadd.f32 %v11193_v56, %v673_v2 }
 0x1da   : > { %v2803_v50 = vsel %vm2784_vm7, %v19337_v46, %v19336_v7  ;;  %v11868_v24 = vsel %vm19341_vm10, %v3125_v45, -inf  ;;  %v3025_v12 = vsel %vm18431_vm12, %v2799_v40, -inf  ;;  %v2639_v46 = vrot.slane %v11735_v39, 1  ;;  %v11909_v40 = vpop.f32.mrf.mxu2  ;;  %19374 = vst [vmem:[#allocation161_spill] sm:$0xff] %v12040_v42 }
 0x1db   : > { %v3021_v58 = vsel %vm18432_vm6, %v2803_v50, -inf  ;;  %v3703_v7 = vsel %vm1388_vm2, %v19343_v13, %v3660_v18  ;;  %v8400_v44 = vpop.eup %8399  ;;  %v903_v45 = vpack.c.bf16 %v11433_v30, %v11336_v31  ;;  %v11901_v50 = vmax.f32 %v11769_v59, %v3025_v12  ;;  %19344 = vst [vmem:[#allocation156_spill] sm:$0xff] %v11909_v40  ;;  %v19352_v40 = vld [vmem:[#allocation25_spill] sm:$0xff] }
 0x1dc   : > { %v11893_v32 = vmax.f32 %v11322_v11, %v3021_v58  ;;  %v3702_v13 = vsel %vm1388_vm2, %v3660_v18, %v3661_v23  ;;  %vm18455_vm10 = vcmp.eq.s32.totalorder %v11878_v26, 1  ;;  %v11907_v29 = vmul.f32 %v8400_v44, %v11646_v34  ;;  %v19345_v58 = vld [vmem:[#allocation58_spill] sm:$0xff] }
 0x1dd   : > { %vm19346_vm9 = vcmp.eq.s32.totalorder %v19345_v58, 1  ;;  %v19347_v2 = vrot.slane %v11834_v33, 2  ;;  %v19348_v30 = vrot.slane %v11435_v47, 1  ;;  %2603 = vmatmul.bf16.gmra.mxu2 %v903_v45  ;;  %v19349_v44 = vrot.slane %v11667_v1, 1  ;;  %v8832_v45 = vld [vmem:[%s18085_s0 + $0x40] sm:$0xff] }
 0x1de   : > { %v11913_v11 = vsel %vm19346_vm9, %v3703_v7, -inf  ;;  %v18433_v34 = vrot.slane %v11907_v29, 1  ;;  %v18437_v12 = vrot.slane %v11907_v29, 7  ;;  %vm4949_vm9 = vcmp.lt.s32.totalorder %v8832_v45, 13  ;;  %v11954_v45 = vld [vmem:[%s18085_s0 + $0x48] sm:$0xff] }
 0x1df   : > { %v2798_v31 = vsel %vm2784_vm7, %v2769_v62, %v19347_v2  ;;  %v2671_v23 = vsel %vm939_vm1, %v2639_v46, %v19348_v30  ;;  %v2672_v7 = vsel %vm939_vm1, %v19349_v44, %v2639_v46  ;;  %v3217_v2 = vrot.slane %v11435_v47, 7  ;;  %19354 = vst [vmem:[#allocation157_spill] sm:$0xff] %v11954_v45  ;;  %v675_v26 = vpop.f32.mrf.mxu0 }
 0x1e0   : > { %v711_v30 = vsub.f32 0.0, %v11896_v21  ;;  %v19350_v18 = vrot.slane %v11698_v41, 1  ;;  %v19351_v44 = vrot.slane %v11698_v41, 7  ;;  %vm19353_vm12 = vcmp.eq.s32.totalorder %v19352_v40, 1 }
 0x1e1   : > { %v2703_v58 = vsel %vm19353_vm12, %v2671_v23, -inf  ;;  %vm4950_vm6 = vcmp.lt.s32.totalorder %v11954_v45, 13  ;;  %vm19356_vm4 = vcmp.eq.s32.totalorder %v19355_v4, 1  ;;  %vm19359_vm12 = vcmp.eq.s32.totalorder %v19358_v49, 1 }
 0x1e2   : > { %v944_v46 = vsel %vm939_vm1, %v19350_v18, %v18433_v34  ;;  %v1393_v62 = vsel %vm1388_vm2, %v19351_v44, %v18437_v12  ;;  %v2702_v28 = vsel %vm19356_vm4, %v2672_v7, -inf  ;;  %v19357_v44 = vrot.slane %v11514_v19, 7 }
 0x1e3   : > { %v1190_v18 = vsel %vm18518_vm14, %v944_v46, -inf  ;;  %v1640_v34 = vsel %vm18464_vm0, %v1393_v62, -inf  ;;  %v771_v45 = vmul.f32 1.442695, %v711_v30  ;;  %v4981_v46 = vsel %vm4949_vm9, 1, %v19031_v61 }
 0x1e4   : > { %v3247_v23 = vsel %vm1388_vm2, %v3217_v2, %v19357_v44  ;;  %v11968_v12 = vmax.f32 %v11698_v41, %v1190_v18  ;;  %v11971_v14 = vmax.f32 %v11907_v29, %v1640_v34  ;;  %v11976_v62 = vsel %vm19359_vm12, %v3702_v13, -inf  ;;  %5030 = vperm.xlu1 %8283, %v4981_v46   ;;  %v19361_v13 = vld [vmem:[#allocation64_spill] sm:$0xff] }
 0x1e5   : > { %v11979_v7 = vmax.f32 %v11735_v39, %v2703_v58  ;;  %v19360_v33 = vrot.slane %v11735_v39, 7  ;;  %v4982_v18 = vsel %vm4950_vm6, 1, %v19031_v61  ;;  %v3026_v34 = vsel %vm18455_vm10, %v2798_v31, -inf  ;;  %v12002_v31 = vld [vmem:[%s18085_s0 + $0x38] sm:$0xff] }
 0x1e6   : > { %v18448_v30 = vrot.slane %v11968_v12, 1  ;;  %v18450_v49 = vrot.slane %v11971_v14, 7  ;;  %vm19362_vm4 = vcmp.eq.s32.totalorder %v19361_v13, 1  ;;  %5033 = vperm.xlu2 %8284, %v4982_v18   ;;  %v19363_v58 = vrot.slane %v11893_v32, 1  ;;  %19365 = vst [vmem:[#allocation158_spill] sm:$0xff] %v12002_v31 }
 0x1e7   : > { %v3248_v44 = vsel %vm1388_vm2, %v19360_v33, %v3217_v2  ;;  %v3282_v15 = vsel %vm19362_vm4, %v3247_v23, -inf  ;;  %v19364_v9 = vrot.slane %v11621_v0, 1  ;;  %v2734_v2 = vmax.f32 %v11667_v1, %v2702_v28 }
 0x1e8   : > { %8401 = vpow2.f32 %v771_v45  ;;  %vm4948_vm6 = vcmp.lt.s32.totalorder %v12002_v31, 13  ;;  %v19366_v23 = vrot.slane %v11772_v22, 1  ;;  %v19368_v45 = vld [vmem:[#allocation70_spill] sm:$0xff] }
 0x1e9   : > { %v3124_v33 = vsel %vm939_vm1, %v19364_v9, %v19363_v58  ;;  %v19367_v9 = vrot.slane %v11775_v3, 7  ;;  %vm19369_vm9 = vcmp.eq.s32.totalorder %v19368_v45, 1  ;;  %v4980_v58 = vsel %vm4948_vm6, 1, %v19031_v61 }
 0x1ea   : > { %v1265_v46 = vsel %vm939_vm1, %v19366_v23, %v18448_v30  ;;  %v3281_v18 = vsel %vm19369_vm9, %v3248_v44, -inf  ;;  %v12026_v23 = vpop.permute.xlu1 %2924  ;;  %v2767_v30 = vrot.slane %v11979_v7, 2  ;;  %v12030_v3 = vmax.f32 %v11514_v19, %v3282_v15  ;;  %5027 = vperm.xlu0 %8282, %v4980_v58   ;;  %v19445_v19 = vld [vmem:[#allocation106_spill] sm:$0xff] }
 0x1eb   : > { %v1713_v28 = vsel %vm1388_vm2, %v19367_v9, %v18450_v49  ;;  %v1317_v31 = vsel %vm18471_vm11, %v1265_v46, -inf  ;;  %19370 = vst [vmem:[#allocation159_spill] sm:$0xff] %v12026_v23  ;;  %v12033_v44 = vmax.f32 %v11714_v38, %v3026_v34  ;;  %v19372_v9 = vld [vmem:[#allocation8_spill] sm:$0xff]  ;;  %v2766_v54 = vrot.slane %v2734_v2, 2 }
 0x1ec   : > { %v12024_v13 = vsel %vm18464_vm0, %v1713_v28, -inf  ;;  %19371 = vst [vmem:[#allocation160_spill] sm:$0xff] %v12030_v3  ;;  %vm19373_vm12 = vcmp.eq.s32.totalorder %v19372_v9, 1  ;;  %v1349_v46 = vmax.f32 %v11772_v22, %v1317_v31  ;;  %v12043_v45 = vmax.f32 %v11435_v47, %v3281_v18 }
 0x1ed   : > { %v3148_v49 = vsel %vm19373_vm12, %v3124_v33, -inf  ;;  %v3214_v15 = vrot.slane %v19294_v16, 7  ;;  %v12047_v58 = vadd.f32 %v11193_v56, %v675_v26  ;;  %v3756_v38 = vmax.f32 %v11794_v6, %v11913_v11  ;;  %v19379_v26 = vld [vmem:[#allocation63_spill] sm:$0xff]  ;;  %v12079_v11 = vpop.permute.xlu2 %3510 }
 0x1ee   : > { %v3757_v22 = vmax.f32 %v11686_v5, %v11976_v62  ;;  %v19375_v34 = vmax.f32 %v11507_v48, %v11549_v60  ;;  %vm18456_vm4 = vcmp.eq.s32.totalorder %v12026_v23, 1  ;;  %v8402_v31 = vpop.eup %8401  ;;  %v2801_v18 = vsel %vm2784_vm7, %v2766_v54, %v2767_v30  ;;  %19381 = vst [vmem:[#allocation163_spill] sm:$0xff] %v12079_v11 }
 0x1ef   : > { %v19377_v28 = vrot.slane %v19208_v55, 7  ;;  %v712_v5 = vsub.f32 0.0, %v12047_v58  ;;  %v3180_v48 = vmax.f32 %v11621_v0, %v3148_v49  ;;  %vm18457_vm6 = vcmp.eq.s32.totalorder %v12040_v42, 1  ;;  %v8835_v49 = vld [vmem:[%s18085_s0 + $0x58] sm:$0xff]  ;;  %v8836_v0 = vld [vmem:[%s18085_s0 + $0x60] sm:$0xff] }
 0x1f0   : > { %v12056_v33 = vmax.f32 %v1349_v46, %v19375_v34  ;;  %v807_v60 = vadd.f32 1.0, %v8402_v31  ;;  %v18458_v62 = vrot.slane %v12043_v45, 6  ;;  %v19378_v46 = vrot.slane %v11754_v36, 2 }
 0x1f1   : > { %v3251_v6 = vsel %vm1388_vm2, %v19377_v28, %v3214_v15  ;;  %vm19380_vm9 = vcmp.eq.s32.totalorder %v19379_v26, 1  ;;  %v773_v28 = vmul.f32 1.442695, %v712_v5  ;;  %v3023_v55 = vsel %vm18456_vm4, %v2801_v18, -inf }
 0x1f2   : > { %19376 = vst [vmem:[#allocation162_spill] sm:$0xff] %v12056_v33  ;;  %v2802_v34 = vsel %vm2784_vm7, %v19378_v46, %v2766_v54  ;;  %v3278_v47 = vsel %vm19380_vm9, %v3251_v6, -inf  ;;  %8403 = vrcp.f32 %v807_v60  ;;  %vm4952_vm12 = vcmp.lt.s32.totalorder %v8835_v49, 13  ;;  %v12103_v46 = vld [vmem:[%s18085_s0 + $0x50] sm:$0xff] }
 0x1f3   : > { %vm4953_vm10 = vcmp.lt.s32.totalorder %v8836_v0, 13  ;;  %v19382_v54 = vrot.slane %v12030_v3, 6  ;;  %v3022_v18 = vsel %vm18457_vm6, %v2802_v34, -inf  ;;  %8405 = vpow2.f32 %v773_v28  ;;  %19383 = vst [vmem:[#allocation164_spill] sm:$0xff] %v12103_v46  ;;  %v19384_v0 = vld [vmem:[#allocation39_spill] sm:$0xff] }
 0x1f4   : > { %v4984_v6 = vsel %vm4952_vm12, 1, %v19031_v61  ;;  %v12097_v5 = vmax.f32 %v19294_v16, %v3278_v47  ;;  %v4985_v60 = vsel %vm4953_vm10, 1, %v19031_v61  ;;  %vm4951_vm9 = vcmp.lt.s32.totalorder %v12103_v46, 13  ;;  %v19385_v34 = vld [vmem:[#allocation91_spill] sm:$0xff]  ;;  %v12135_v46 = vpop.permute.xlu0 %3498 }
 0x1f5   : > { %v3376_v31 = vsel %vm3361_vm5, %v18458_v62, %v19382_v54  ;;  %5039 = vperm.xlu1 %8283, %v4984_v6   ;;  %v3215_v49 = vrot.slane %v11667_v1, 7  ;;  %vm18509_vm4 = vcmp.eq.s32.totalorder %v19384_v0, 1  ;;  %vm18497_vm6 = vcmp.eq.s32.totalorder %v19385_v34, 1  ;;  %v12113_v54 = vpop.permute.xlu1 %2927  ;;  %5042 = vperm.xlu2 %8284, %v4985_v60   ;;  %v678_v62 = vpop.f32.mrf.mxu0  ;;  %19393 = vst [vmem:[#allocation168_spill] sm:$0xff] %v12135_v46  ;;  %v19417_v34 = vld [vmem:[#allocation82_spill] sm:$0xff] }
 0x1f6   : > { %v12110_v47 = vmax.f32 %v2734_v2, %v3023_v55  ;;  %vm18463_vm12 = vcmp.eq.s32.totalorder %v12079_v11, 1  ;;  %19386 = vst [vmem:[#allocation165_spill] sm:$0xff] %v12113_v54  ;;  %v4983_v6 = vsel %vm4951_vm9, 1, %v19031_v61  ;;  %v19387_v16 = vmax.f32 %v11679_v8, %v11853_v53  ;;  %v12137_v8 = vpop.f32.mrf.mxu2 }
 0x1f7   : > { %v19388_v23 = vmax.f32 %v19287_v17, %v11605_v20  ;;  %v19390_v55 = vmax.f32 %v19316_v57, %v11868_v24  ;;  %v3603_v28 = vsel %vm18463_vm12, %v3376_v31, -inf  ;;  %v19392_v60 = vrot.slane %v11769_v59, 2  ;;  %5036 = vperm.xlu0 %8282, %v4983_v6   ;;  %19394 = vst [vmem:[#allocation169_spill] sm:$0xff] %v12137_v8 }
 0x1f8   : > { %v19395_v20 = vrot.slane %v12033_v44, 1  ;;  %v19396_v17 = vrot.slane %v11901_v50, 1  ;;  %v12150_v59 = vmax.f32 %v11754_v36, %v3022_v18  ;;  %v19397_v53 = vrot.slane %v11735_v39, 7 }
 0x1f9   : > { %v12122_v42 = vmax.f32 %v19388_v23, %v19387_v16  ;;  %v12127_v2 = vmax.f32 %v19390_v55, %v3756_v38  ;;  %v2800_v9 = vsel %vm2784_vm7, %v2767_v30, %v19392_v60  ;;  %v12147_v16 = vmax.f32 %v3180_v48, %v3757_v22  ;;  %v8404_v30 = vpop.eup %8403  ;;  %v19399_v60 = vld [vmem:[#allocation69_spill] sm:$0xff] }
 0x1fa   : > { %v12145_v57 = vsel %vm939_vm1, %v19396_v17, %v19395_v20  ;;  %v3249_v24 = vsel %vm1388_vm2, %v3215_v49, %v19397_v53  ;;  %vm18467_vm10 = vcmp.eq.s32.totalorder %v12113_v54, 1  ;;  %v18468_v23 = vrot.slane %v12097_v5, 6  ;;  %v8406_v22 = vpop.eup %8405  ;;  %v19401_v20 = vld [vmem:[#allocation62_spill] sm:$0xff] }
 0x1fb   : > { %19389 = vst [vmem:[#allocation166_spill] sm:$0xff] %v12122_v42  ;;  %v3250_v38 = vsel %vm1388_vm2, %v3214_v15, %v3215_v49  ;;  %v12161_v31 = vadd.f32 %v11193_v56, %v678_v62  ;;  %v18466_v36 = vrot.slane %v12110_v47, 1  ;;  %v12165_v48 = vmax.f32 %v12030_v3, %v3603_v28 }
 0x1fc   : > { %19391 = vst [vmem:[#allocation167_spill] sm:$0xff] %v12127_v2  ;;  %v12168_v18 = vmul.f32 %v8404_v30, %v11896_v21  ;;  %v3024_v6 = vsel %vm18467_vm10, %v2800_v9, -inf  ;;  %vm18469_vm9 = vcmp.eq.s32.totalorder %v12135_v46, 1  ;;  %v808_v55 = vadd.f32 1.0, %v8406_v22 }
 0x1fd   : > { %vm19400_vm12 = vcmp.eq.s32.totalorder %v19399_v60, 1  ;;  %v713_v56 = vsub.f32 0.0, %v12161_v31  ;;  %v3086_v62 = vrot.slane %v12150_v59, 1  ;;  %vm19402_vm0 = vcmp.eq.s32.totalorder %v19401_v20, 1 }
 0x1fe   : > { %19398 = vst [vmem:[#allocation170_spill] sm:$0xff] %v12168_v18  ;;  %v3280_v15 = vsel %vm19400_vm12, %v3249_v24, -inf  ;;  %v935_v49 = vrot.slane %v12168_v18, 1  ;;  %v18465_v28 = vrot.slane %v12168_v18, 7  ;;  %v3279_v21 = vsel %vm19402_vm0, %v3250_v38, -inf }
 0x1ff   : > { %v12182_v17 = vmax.f32 %v11979_v7, %v3024_v6  ;;  %v19403_v9 = vrot.slane %v11529_v63, 6  ;;  %8407 = vrcp.f32 %v808_v55  ;;  %v775_v24 = vmul.f32 1.442695, %v713_v56 }
 0x200   : > { %v19404_v30 = vrot.slane %v11907_v29, 1  ;;  %v19405_v38 = vrot.slane %v11907_v29, 7  ;;  %v12203_v6 = vmax.f32 %v11735_v39, %v3280_v15  ;;  %vm5519_vm10 = vcmp.ge.s32.totalorder %v11581_v10, 3 }
 0x201   : > { %v3380_v53 = vsel %vm3361_vm5, %v19403_v9, %v18468_v23  ;;  %v3311_v9 = vmax.f32 %v11667_v1, %v3279_v21  ;;  %8409 = vpow2.f32 %v775_v24  ;;  %v19408_v21 = vrot.slane %v11893_v32, 1 }
 0x202   : > { %v943_v22 = vsel %vm939_vm1, %v19404_v30, %v935_v49  ;;  %v1392_v7 = vsel %vm1388_vm2, %v19405_v38, %v18465_v28  ;;  %v3599_v63 = vsel %vm18469_vm9, %v3380_v53, -inf  ;;  %v19406_v30 = vld [vmem:[#allocation38_spill] sm:$0xff]  ;;  %v3122_v38 = vsel %vm939_vm1, %v3086_v62, %v18466_v36  ;;  %v12232_v36 = vpop.permute.xlu0 %3501 }
 0x203   : > { %v1191_v55 = vsel %vm18509_vm4, %v943_v22, -inf  ;;  %v1641_v56 = vsel %vm18497_vm6, %v1392_v7, -inf  ;;  %vm18506_vm0 = vcmp.eq.s32.totalorder %v19406_v30, 1  ;;  %v12221_v22 = vpop.permute.xlu1 %3504  ;;  %v904_v7 = vpack.c.bf16 %v11907_v29, %v11698_v41  ;;  %19409 = vst [vmem:[#allocation172_spill] sm:$0xff] %v12232_v36 }
 0x204   : > { %v12216_v53 = vmax.f32 %v11907_v29, %v1191_v55  ;;  %v12219_v15 = vmax.f32 %v12168_v18, %v1641_v56  ;;  %19407 = vst [vmem:[#allocation171_spill] sm:$0xff] %v12221_v22  ;;  %v3123_v24 = vsel %vm939_vm1, %v19408_v21, %v3086_v62  ;;  %v12230_v28 = vmax.f32 %v12097_v5, %v3599_v63  ;;  %v19410_v55 = vld [vmem:[#allocation94_spill] sm:$0xff]  ;;  %v12236_v56 = vpop.f32.mrf.mxu2 }
 0x205   : > { %vm5518_vm12 = vcmp.ge.s32.totalorder %v19410_v55, 3  ;;  %19411 = vst [vmem:[#allocation94_spill] sm:$0xff] %v12236_v56  ;;  %v3088_v41 = vrot.slane %v12182_v17, 1  ;;  %2608 = vmatmul.bf16.gmra.mxu2 %v904_v7  ;;  %v8408_v62 = vpop.eup %8407  ;;  %v3343_v63 = vrot.slane %v3311_v9, 6  ;;  %vm18486_vm9 = vcmp.eq.s32.totalorder %v12221_v22, 1 }
 0x206   : > { %v1255_v23 = vrot.slane %v12216_v53, 1  ;;  %v18475_v29 = vrot.slane %v12219_v15, 7  ;;  %v5550_v21 = vsel %vm5518_vm12, 1, %v19031_v61  ;;  %v5551_v55 = vsel %vm5519_vm10, 1, %v19031_v61 }
 0x207   : > { %v19412_v10 = vrot.slane %v11968_v12, 1  ;;  %v19413_v11 = vrot.slane %v11971_v14, 7  ;;  %v12256_v8 = vmul.f32 %v8408_v62, %v12047_v58  ;;  %vm18487_vm11 = vcmp.eq.s32.totalorder %v12232_v36, 1  ;;  %5583 = vperm.xlu1 %8283, %v5550_v21   ;;  %v8410_v39 = vpop.eup %8409  ;;  %5586 = vperm.xlu2 %8284, %v5551_v55   ;;  %v12271_v58 = vld [vmem:[%s18085_s0 + $0x68] sm:$0xff] }
 0x208   : > { %19414 = vst [vmem:[#allocation173_spill] sm:$0xff] %v12271_v58  ;;  %vm4954_vm10 = vcmp.lt.s32.totalorder %v12271_v58, 13  ;;  %v19415_v21 = vrot.slane %v12203_v6, 6  ;;  %v809_v46 = vadd.f32 1.0, %v8410_v39  ;;  %vm18516_vm12 = vcmp.eq.s32.totalorder %v19417_v34, 1  ;;  %v19429_v58 = vld [vmem:[#allocation117_spill] sm:$0xff] }
 0x209   : > { %v1264_v56 = vsel %vm939_vm1, %v19412_v10, %v1255_v23  ;;  %v1712_v7 = vsel %vm1388_vm2, %v19413_v11, %v18475_v29  ;;  %v19416_v29 = vrot.slane %v12097_v5, 6  ;;  %v4986_v11 = vsel %vm4954_vm10, 1, %v19031_v61 }
 0x20a   : > { %v12261_v1 = vsel %vm18518_vm14, %v1264_v56, -inf  ;;  %v12265_v10 = vsel %vm18497_vm6, %v1712_v7, -inf  ;;  %v3378_v55 = vsel %vm3361_vm5, %v3343_v63, %v19415_v21  ;;  %v12293_v56 = vmax.f32 %v12122_v42, %v12147_v16  ;;  %5045 = vperm.xlu0 %8282, %v4986_v11  }
 0x20b   : > { %v3601_v7 = vsel %vm18486_vm9, %v3378_v55, -inf  ;;  %v3379_v54 = vsel %vm3361_vm5, %v19416_v29, %v3343_v63  ;;  %v12297_v21 = vsel %vm18495_vm15, %v3123_v24, -inf  ;;  %v19420_v55 = vrot.slane %v12256_v8, 1 }
 0x20c   : > { %19418 = vst [vmem:[#allocation174_spill] sm:$0xff] %v12293_v56  ;;  %v3600_v39 = vsel %vm18487_vm11, %v3379_v54, -inf  ;;  %v12307_v29 = vmax.f32 %v12147_v16, %v12122_v42  ;;  %vm19422_vm10 = vcmp.eq.s32.totalorder %v19298_v27, 1  ;;  %v19423_v24 = vrot.slane %v11901_v50, 1 }
 0x20d   : > { %v942_v5 = vsel %vm939_vm1, %v935_v49, %v19420_v55  ;;  %v12311_v63 = vsel %vm19422_vm10, %v3122_v38, -inf  ;;  %v19424_v55 = vrot.slane %v12230_v28, 7  ;;  %v19425_v54 = vrot.slane %v11649_v25, 7 }
 0x20e   : > { %19421 = vst [vmem:[#allocation175_spill] sm:$0xff] %v12307_v29  ;;  %v3120_v22 = vsel %vm939_vm1, %v3088_v41, %v19423_v24  ;;  %v1192_v49 = vsel %vm18506_vm0, %v942_v5, -inf  ;;  %v1385_v38 = vrot.slane %v12256_v8, 7  ;;  %v12330_v27 = vmax.f32 %v12203_v6, %v3601_v7  ;;  %v680_v7 = vpop.f32.mrf.mxu0  ;;  %v19437_v24 = vld [vmem:[#allocation28_spill] sm:$0xff] }
 0x20f   : > { %v3700_v11 = vsel %vm1388_vm2, %v19425_v54, %v19424_v55  ;;  %v12326_v36 = vmax.f32 %v12168_v18, %v1192_v49  ;;  %v3181_v5 = vmax.f32 %v11893_v32, %v12297_v21  ;;  %v12335_v62 = vmax.f32 %v3311_v9, %v3600_v39  ;;  %v12340_v49 = vpop.permute.xlu1 %3507  ;;  %v19427_v54 = vld [vmem:[#allocation93_spill] sm:$0xff]  ;;  %v19433_v9 = vld [vmem:[#allocation128_spill] sm:$0xff] }
 0x210   : > { %8411 = vrcp.f32 %v809_v46  ;;  %v3182_v42 = vmax.f32 %v12150_v59, %v12311_v63  ;;  %19426 = vst [vmem:[#allocation176_spill] sm:$0xff] %v12340_v49  ;;  %v12344_v3 = vmax.f32 %v19427_v54, %v11018_v35  ;;  %v19430_v51 = vrot.slane %v12110_v47, 1  ;;  %v19434_v21 = vld [vmem:[#allocation133_spill] sm:$0xff] }
 0x211   : > { %v18488_v55 = vrot.slane %v12326_v36, 1  ;;  %vm19431_vm10 = vcmp.eq.s32.totalorder %v19352_v40, 1  ;;  %vm19432_vm9 = vcmp.eq.s32.totalorder %v19379_v26, 1  ;;  %v19435_v39 = vmax.f32 %v19433_v9, %v19434_v21 }
 0x212   : > { %19428 = vst [vmem:[#allocation93_spill] sm:$0xff] %v12344_v3  ;;  %v3121_v32 = vsel %vm939_vm1, %v19430_v51, %v3088_v41  ;;  %v12353_v46 = vsel %vm19431_vm10, %v3120_v22, -inf  ;;  %v3727_v59 = vsel %vm19432_vm9, %v3700_v11, -inf  ;;  %v19436_v35 = vmax.f32 %v11504_v37, %v11827_v52  ;;  %v8839_v37 = vld [vmem:[%s18091_s6] ss:$0 sm:$0xff] }
 0x213   : > { %vm18735_vm11 = vcmp.eq.s32.totalorder %v19437_v24, 1  ;;  %v1263_v51 = vsel %vm939_vm1, %v1255_v23, %v18488_v55  ;;  %v19438_v22 = vrot.slane %v12168_v18, 7  ;;  %v12378_v52 = vadd.f32 %v8839_v37, %v680_v7  ;;  %v19439_v23 = vld [vmem:[#allocation137_spill] sm:$0xff]  ;;  %v19447_v18 = vld [vmem:[#allocation135_spill] sm:$0xff] }
 0x214   : > { %v12363_v63 = vmax.f32 %v19436_v35, %v19435_v39  ;;  %v1319_v9 = vsel %vm18509_vm4, %v1263_v51, -inf  ;;  %v3664_v21 = vrot.slane %v12335_v62, 7  ;;  %vm18504_vm9 = vcmp.eq.s32.totalorder %v12340_v49, 1  ;;  %v19442_v51 = vld [vmem:[#allocation34_spill] sm:$0xff]  ;;  %v19525_v24 = vld [vmem:[#allocation45_spill] sm:$0xff] }
 0x215   : > { %v1391_v41 = vsel %vm1388_vm2, %v19438_v22, %v1385_v38  ;;  %v1351_v35 = vmax.f32 %v12216_v53, %v1319_v9  ;;  %v19440_v22 = vrot.slane %v12043_v45, 6  ;;  %v19441_v55 = vrot.slane %v12203_v6, 6  ;;  %v19446_v6 = vld [vmem:[#allocation138_spill] sm:$0xff] }
 0x216   : > { %v12386_v39 = vmax.f32 %v19439_v23, %v12363_v63  ;;  %v714_v37 = vsub.f32 0.0, %v12378_v52  ;;  %v19443_v11 = vrot.slane %v19442_v51, 1  ;;  %v19444_v26 = vrot.slane %v19429_v58, 1  ;;  %v8412_v0 = vpop.eup %8411 }
 0x217   : > { %v3377_v7 = vsel %vm3361_vm5, %v19441_v55, %v19440_v22  ;;  %vm18675_vm10 = vcmp.eq.s32.totalorder %v19445_v19, 1  ;;  %v1642_v53 = vsel %vm18516_vm12, %v1391_v41, -inf  ;;  %v2273_v55 = vmax.f32 %v12344_v3, %v19447_v18  ;;  %v19448_v22 = vld [vmem:[#allocation10_spill] sm:$0xff] }
 0x218   : > { %v1290_v40 = vsel %vm939_vm1, %v19444_v26, %v19443_v11  ;;  %v2049_v9 = vmax.f32 %v19446_v6, %v12386_v39  ;;  %vm19449_vm15 = vcmp.eq.s32.totalorder %v19448_v22, 1  ;;  %v19450_v51 = vmax.f32 %v11971_v14, %v12024_v13  ;;  %v19510_v19 = vld [vmem:[#allocation26_spill] sm:$0xff] }
 0x219   : > { %v12411_v29 = vsel %vm19449_vm15, %v1290_v40, -inf  ;;  %vm19451_vm6 = vcmp.eq.s32.totalorder %v19355_v4, 1  ;;  %v12421_v41 = vmul.f32 %v8412_v0, %v12161_v31  ;;  %v3602_v6 = vsel %vm18504_vm9, %v3377_v7, -inf }
 0x21a   : > { %v12416_v26 = vmax.f32 %v1351_v35, %v19450_v51  ;;  %v3151_v11 = vsel %vm19451_vm6, %v3121_v32, -inf  ;;  %v3759_v18 = vmax.f32 %v12230_v28, %v3727_v59  ;;  %v19453_v22 = vrot.slane %v12330_v27, 7  ;;  %v19456_v51 = vld [vmem:[#allocation154_spill] sm:$0xff] }
 0x21b   : > { %19452 = vst [vmem:[#allocation117_spill] sm:$0xff] %v12421_v41  ;;  %v12430_v3 = vmax.f32 %v2049_v9, %v2273_v55  ;;  %v777_v14 = vmul.f32 1.442695, %v714_v37  ;;  %v12433_v13 = vmax.f32 %v12256_v8, %v1642_v53  ;;  %v18501_v32 = vrot.slane %v12421_v41, 1 }
 0x21c   : > { %v3698_v40 = vsel %vm1388_vm2, %v3664_v21, %v19453_v22  ;;  %v18500_v0 = vrot.slane %v12421_v41, 7  ;;  %v19455_v59 = vrot.slane %v12230_v28, 7  ;;  %v12444_v7 = vmax.f32 %v12043_v45, %v3602_v6  ;;  %v19460_v22 = vld [vmem:[#allocation149_spill] sm:$0xff]  ;;  %v19461_v45 = vld [vmem:[#allocation152_spill] sm:$0xff] }
 0x21d   : > { %19454 = vst [vmem:[#allocation128_spill] sm:$0xff] %v12430_v3  ;;  %v18499_v37 = vrot.slane %v12430_v3, 1  ;;  %8413 = vpow2.f32 %v777_v14  ;;  %v19457_v53 = vmax.f32 %v11649_v25, %v19456_v51  ;;  %vm19458_vm15 = vcmp.eq.s32.totalorder %v19399_v60, 1 }
 0x21e   : > { %v3699_v35 = vsel %vm1388_vm2, %v19455_v59, %v3664_v21  ;;  %v3729_v55 = vsel %vm19458_vm15, %v3698_v40, -inf  ;;  %v19459_v28 = vrot.slane %v12256_v8, 1  ;;  %v19462_v6 = vmax.f32 %v19460_v22, %v19461_v45 }
 0x21f   : > { %v3790_v9 = vmax.f32 %v3181_v5, %v19457_v53  ;;  %v19463_v14 = vmax.f32 %v11968_v12, %v12261_v1  ;;  %v3184_v25 = vmax.f32 %v12182_v17, %v12353_v46  ;;  %v3183_v5 = vmax.f32 %v12110_v47, %v3151_v11  ;;  %v19465_v17 = vld [vmem:[#allocation67_spill] sm:$0xff] }
 0x220   : > { %v941_v21 = vsel %vm939_vm1, %v19459_v28, %v18501_v32  ;;  %v1390_v51 = vsel %vm1388_vm2, %v1385_v38, %v18500_v0  ;;  %v1706_v53 = vrot.slane %v12433_v13, 7  ;;  %vm19464_vm6 = vcmp.eq.s32.totalorder %v19401_v20, 1  ;;  %v19496_v20 = vld [vmem:[#allocation64_spill] sm:$0xff] }
 0x221   : > { %v12464_v59 = vmax.f32 %v19463_v14, %v19462_v6  ;;  %v1193_v40 = vsel %vm18735_vm11, %v941_v21, -inf  ;;  %v3728_v1 = vsel %vm19464_vm6, %v3699_v35, -inf  ;;  %v19466_v47 = vrot.slane %v19465_v17, 1  ;;  %v19467_v21 = vld [vmem:[#allocation29_spill] sm:$0xff]  ;;  %v12494_v6 = vpop.permute.xlu0 %2936 }
 0x222   : > { %v12479_v12 = vmax.f32 %v12256_v8, %v1193_v40  ;;  %v3791_v11 = vmax.f32 %v3182_v42, %v3759_v18  ;;  %v3761_v28 = vmax.f32 %v12330_v27, %v3729_v55  ;;  %v3666_v38 = vrot.slane %v12444_v7, 7  ;;  %19469 = vst [vmem:[#allocation133_spill] sm:$0xff] %v12494_v6 }
 0x223   : > { %v2667_v46 = vsel %vm939_vm1, %v19466_v47, %v18499_v37  ;;  %vm19468_vm15 = vcmp.eq.s32.totalorder %v19467_v21, 1  ;;  %v1643_v45 = vsel %vm18675_vm10, %v1390_v51, -inf  ;;  %v12501_v42 = vmax.f32 %v12363_v63, %v19439_v23  ;;  %v8414_v18 = vpop.eup %8413 }
 0x224   : > { %v2707_v22 = vsel %vm19468_vm15, %v2667_v46, -inf  ;;  %v18502_v35 = vrot.slane %v12479_v12, 1  ;;  %v3760_v55 = vmax.f32 %v12335_v62, %v3728_v1  ;;  %v12504_v40 = vmax.f32 %v3184_v25, %v3761_v28 }
 0x225   : > { %v12497_v14 = vmax.f32 %v19465_v17, %v2707_v22  ;;  %v12508_v47 = vmax.f32 %v12464_v59, %v12363_v63  ;;  %v12512_v51 = vmax.f32 %v12416_v26, %v12056_v33  ;;  %v19471_v46 = vrot.slane %v12219_v15, 7 }
 0x226   : > { %v19472_v37 = vrot.slane %v12326_v36, 1  ;;  %v810_v1 = vadd.f32 1.0, %v8414_v18  ;;  %v12528_v31 = vmax.f32 %v12421_v41, %v1643_v45  ;;  %vm18508_vm6 = vcmp.eq.s32.totalorder %v12494_v6, 1  ;;  %v19474_v18 = vld [vmem:[#allocation153_spill] sm:$0xff] }
 0x227   : > { %19470 = vst [vmem:[#allocation137_spill] sm:$0xff] %v12512_v51  ;;  %v1711_v22 = vsel %vm1388_vm2, %v19471_v46, %v1706_v53  ;;  %v18505_v25 = vrot.slane %v12497_v14, 2  ;;  %v19473_v32 = vrot.slane %v12330_v27, 7  ;;  %v12547_v49 = vmax.f32 %v3791_v11, %v12504_v40 }
 0x228   : > { %v1262_v62 = vsel %vm939_vm1, %v19472_v37, %v18502_v35  ;;  %v19475_v35 = vrot.slane %v19474_v18, 2  ;;  %8415 = vrcp.f32 %v810_v1  ;;  %v12558_v46 = vmax.f32 %v3790_v9, %v12127_v2  ;;  %v19483_v1 = vld [vmem:[#allocation41_spill] sm:$0xff] }
 0x229   : > { %v1320_v28 = vsel %vm18506_vm0, %v1262_v62, -inf  ;;  %v3697_v37 = vsel %vm1388_vm2, %v19473_v32, %v3666_v38  ;;  %v12544_v62 = vmax.f32 %v3183_v5, %v3760_v55  ;;  %19476 = vst [vmem:[#allocation138_spill] sm:$0xff] %v12547_v49  ;;  %v19478_v32 = vld [vmem:[#allocation24_spill] sm:$0xff]  ;;  %v19482_v5 = vmax.f32 %v12219_v15, %v12265_v10 }
 0x22a   : > { %v1352_v0 = vmax.f32 %v12326_v36, %v1320_v28  ;;  %v2797_v45 = vsel %vm2784_vm7, %v19475_v35, %v18505_v25  ;;  %v12550_v36 = vmax.f32 %v12127_v2, %v3790_v9  ;;  %vm19479_vm15 = vcmp.eq.s32.totalorder %v19478_v32, 1  ;;  %19480 = vst [vmem:[#allocation154_spill] sm:$0xff] %v12558_v46  ;;  %v19484_v25 = vld [vmem:[#allocation42_spill] sm:$0xff]  ;;  %v19488_v10 = vld [vmem:[#allocation32_spill] sm:$0xff] }
 0x22b   : > { %v3027_v27 = vsel %vm18508_vm6, %v2797_v45, -inf  ;;  %v3153_v28 = vsel %vm19479_vm15, %v12145_v57, -inf  ;;  %vm18674_vm9 = vcmp.eq.s32.totalorder %v19483_v1, 1  ;;  %vm18562_vm0 = vcmp.eq.s32.totalorder %v19484_v25, 1  ;;  %v19504_v57 = vld [vmem:[#allocation140_spill] sm:$0xff] }
 0x22c   : > { %19477 = vst [vmem:[#allocation135_spill] sm:$0xff] %v12550_v36  ;;  %v12561_v35 = vmax.f32 %v19474_v18, %v3027_v27  ;;  %v12566_v55 = vmax.f32 %v1352_v0, %v19482_v5  ;;  %v12572_v45 = vsel %vm18516_vm12, %v1711_v22, -inf  ;;  %v19485_v60 = vrot.slane %v12165_v48, 7  ;;  %v19486_v27 = vld [vmem:[#allocation70_spill] sm:$0xff]  ;;  %v19489_v0 = vld [vmem:[#allocation65_spill] sm:$0xff] }
 0x22d   : > { %vm19487_vm15 = vcmp.eq.s32.totalorder %v19486_v27, 1  ;;  %vm18565_vm6 = vcmp.eq.s32.totalorder %v19488_v10, 1  ;;  %vm18676_vm4 = vcmp.eq.s32.totalorder %v19489_v0, 1  ;;  %v12584_v5 = vmax.f32 %v12147_v16, %v3791_v11  ;;  %v19532_v0 = vld [vmem:[#allocation40_spill] sm:$0xff] }
 0x22e   : > { %19481 = vst [vmem:[#allocation149_spill] sm:$0xff] %v12561_v35  ;;  %v3696_v18 = vsel %vm1388_vm2, %v3666_v38, %v19485_v60  ;;  %v3730_v15 = vsel %vm19487_vm15, %v3697_v37, -inf  ;;  %v12587_v22 = vmax.f32 %v3791_v11, %v12147_v16  ;;  %v12592_v32 = vmax.f32 %v12464_v59, %v12566_v55  ;;  %v8416_v16 = vpop.eup %8415 }
 0x22f   : > { %19490 = vst [vmem:[#allocation152_spill] sm:$0xff] %v12584_v5  ;;  %v12595_v60 = vmax.f32 %v3790_v9, %v12544_v62  ;;  %v12599_v38 = vmax.f32 %v12293_v56, %v12547_v49  ;;  %v12602_v37 = vmax.f32 %v12544_v62, %v3790_v9  ;;  %v12605_v27 = vmax.f32 %v12504_v40, %v3791_v11  ;;  %v19501_v49 = vld [vmem:[#allocation127_spill] sm:$0xff] }
 0x230   : > { %19491 = vst [vmem:[#allocation153_spill] sm:$0xff] %v12587_v22  ;;  %v3185_v6 = vmax.f32 %v11901_v50, %v3153_v28  ;;  %vm19497_vm15 = vcmp.eq.s32.totalorder %v19496_v20, 1  ;;  %v3762_v34 = vmax.f32 %v12444_v7, %v3730_v15  ;;  %v19498_v56 = vrot.slane %v12528_v31, 7 }
 0x231   : > { %19492 = vst [vmem:[#allocation177_spill] sm:$0xff] %v12595_v60  ;;  %v12612_v4 = vsel %vm19497_vm15, %v3696_v18, -inf  ;;  %v12620_v11 = vmul.f32 %v8416_v16, %v12378_v52  ;;  %vm5522_vm14 = vcmp.ge.s32.totalorder %v19501_v49, 3  ;;  %v19502_v50 = vrot.slane %v12561_v35, 1  ;;  %v19514_v35 = vld [vmem:[#allocation14_spill] sm:$0xff] }
 0x232   : > { %19493 = vst [vmem:[#allocation178_spill] sm:$0xff] %v12599_v38  ;;  %v1710_v9 = vsel %vm1388_vm2, %v1706_v53, %v19498_v56  ;;  %v19503_v28 = vrot.slane %v12033_v44, 1  ;;  %v5554_v15 = vsel %vm5522_vm14, 1, %v19031_v61  ;;  %vm5520_vm15 = vcmp.ge.s32.totalorder %v19504_v57, 3  ;;  %v19505_v53 = vld [vmem:[#allocation145_spill] sm:$0xff] }
 0x233   : > { %19494 = vst [vmem:[#allocation179_spill] sm:$0xff] %v12602_v37  ;;  %v19500_v37 = vld [vmem:[#allocation144_spill] sm:$0xff]  ;;  %v938_v56 = vrot.slane %v12620_v11, 1  ;;  %v1387_v52 = vrot.slane %v12620_v11, 7  ;;  %5595 = vperm.xlu2 %8284, %v5554_v15   ;;  %v5552_v49 = vsel %vm5520_vm15, 1, %v19031_v61  ;;  %v1771_v16 = vsel %vm18675_vm10, %v1710_v9, -inf }
 0x234   : > { %19495 = vst [vmem:[#allocation180_spill] sm:$0xff] %v12605_v27  ;;  %vm5521_vm12 = vcmp.ge.s32.totalorder %v19500_v37, 3  ;;  %v3118_v18 = vsel %vm939_vm1, %v19503_v28, %v19502_v50  ;;  %v12638_v37 = vmax.f32 %v19505_v53, %v12056_v33  ;;  %5589 = vperm.xlu0 %8282, %v5552_v49   ;;  %v12644_v50 = vmax.f32 %v12363_v63, %v12464_v59  ;;  %v19507_v28 = vld [vmem:[#allocation112_spill] sm:$0xff] }
 0x235   : > { %19499 = vst [vmem:[#allocation181_spill] sm:$0xff] %v12620_v11  ;;  %v5553_v7 = vsel %vm5521_vm12, 1, %v19031_v61  ;;  %v12648_v57 = vmax.f32 %v12056_v33, %v12416_v26  ;;  %v19509_v20 = vrot.slane %v12421_v41, 1  ;;  %v19511_v9 = vrot.slane %v19510_v19, 1  ;;  %v12691_v33 = vpop.permute.xlu2 %2945 }
 0x236   : > { %5592 = vperm.xlu1 %8283, %v5553_v7   ;;  %v19508_v7 = vld [vmem:[#allocation130_spill] sm:$0xff]  ;;  %v19512_v63 = vrot.slane %v12421_v41, 7  ;;  %v19513_v21 = vrot.slane %v19510_v19, 7  ;;  %vm19515_vm14 = vcmp.eq.s32.totalorder %v19514_v35, 1  ;;  %v1803_v30 = vmax.f32 %v12528_v31, %v1771_v16  ;;  %19517 = vst [vmem:[#allocation140_spill] sm:$0xff] %v12691_v33 }
 0x237   : > { %19506 = vst [vmem:[#allocation144_spill] sm:$0xff] %v12648_v57  ;;  %v12652_v15 = vmax.f32 %v19508_v7, %v19507_v28  ;;  %v940_v60 = vsel %vm939_vm1, %v19509_v20, %v938_v56  ;;  %v971_v49 = vsel %vm939_vm1, %v938_v56, %v19511_v9  ;;  %v12674_v20 = vsel %vm19515_vm14, %v3118_v18, -inf }
 0x238   : > { %v1389_v2 = vsel %vm1388_vm2, %v19512_v63, %v1387_v52  ;;  %v1420_v28 = vsel %vm1388_vm2, %v1387_v52, %v19513_v21  ;;  %v1194_v56 = vsel %vm18562_vm0, %v940_v60, -inf  ;;  %v1195_v9 = vsel %vm18674_vm9, %v971_v49, -inf }
 0x239   : > { %v1226_v63 = vmax.f32 %v12421_v41, %v1194_v56  ;;  %v1227_v17 = vmax.f32 %v12620_v11, %v1195_v9  ;;  %v1613_v21 = vsel %vm18565_vm6, %v1420_v28, -inf  ;;  %v1644_v52 = vsel %vm18676_vm4, %v1389_v2, -inf  ;;  %v19518_v9 = vld [vmem:[#allocation147_spill] sm:$0xff] }
 0x23a   : > { %v12687_v18 = vmax.f32 %v3185_v6, %v3762_v34  ;;  %v1645_v35 = vmax.f32 %v19510_v19, %v1613_v21  ;;  %v1676_v60 = vmax.f32 %v12620_v11, %v1644_v52  ;;  %v2050_v41 = vmax.f32 %v19518_v9, %v12638_v37 }
 0x23b   : > { %v1258_v49 = vrot.slane %v1226_v63, 1  ;;  %v1259_v56 = vrot.slane %v1227_v17, 1  ;;  %v2051_v28 = vmax.f32 %v12386_v39, %v12644_v50  ;;  %v2052_v19 = vmax.f32 %v12638_v37, %v12648_v57 }
 0x23c   : > { %19516 = vst [vmem:[#allocation127_spill] sm:$0xff] %v12687_v18  ;;  %v1677_v16 = vrot.slane %v1645_v35, 7  ;;  %v1708_v34 = vrot.slane %v1676_v60, 7  ;;  %v19519_v21 = vrot.slane %v12479_v12, 1  ;;  %v19520_v9 = vrot.slane %v19429_v58, 1 }
 0x23d   : > { %v1260_v6 = vsel %vm939_vm1, %v1258_v49, %v1259_v56  ;;  %v12713_v2 = vmax.f32 %v19439_v23, %v19427_v54  ;;  %v19523_v54 = vld [vmem:[#allocation46_spill] sm:$0xff]  ;;  %vm19526_vm12 = vcmp.eq.s32.totalorder %v19525_v24, 1  ;;  %vm18548_vm15 = vcmp.eq.s32.totalorder %v12691_v33, 1  ;;  %v19603_v33 = vld [vmem:[#allocation67_spill] sm:$0xff] }
 0x23e   : > { %v1261_v52 = vsel %vm939_vm1, %v19519_v21, %v1258_v49  ;;  %v1291_v39 = vsel %vm939_vm1, %v1259_v56, %v19520_v9  ;;  %v1322_v11 = vsel %vm18562_vm0, %v1260_v6, -inf  ;;  %v19522_v49 = vrot.slane %v12528_v31, 7 }
 0x23f   : > { %19521 = vst [vmem:[#allocation145_spill] sm:$0xff] %v12713_v2  ;;  %v1321_v37 = vsel %vm18735_vm11, %v1261_v52, -inf  ;;  %v1323_v57 = vsel %vm18674_vm9, %v1291_v39, -inf  ;;  %v1354_v9 = vmax.f32 %v1226_v63, %v1322_v11  ;;  %v19524_v23 = vrot.slane %v19523_v54, 7 }
 0x240   : > { %v1709_v21 = vsel %vm1388_vm2, %v19522_v49, %v1708_v34  ;;  %v1353_v56 = vmax.f32 %v12479_v12, %v1321_v37  ;;  %v1355_v22 = vmax.f32 %v1227_v17, %v1323_v57  ;;  %v1740_v6 = vsel %vm1388_vm2, %v1708_v34, %v1677_v16  ;;  %v19529_v37 = vld [vmem:[#allocation148_spill] sm:$0xff] }
 0x241   : > { %v1739_v52 = vsel %vm1388_vm2, %v1677_v16, %v19524_v23  ;;  %v1772_v31 = vsel %vm18676_vm4, %v1709_v21, -inf  ;;  %v12738_v49 = vmax.f32 %v19505_v53, %v19508_v7  ;;  %v1741_v12 = vsel %vm18565_vm6, %v1740_v6, -inf  ;;  %v19530_v23 = vld [vmem:[#allocation93_spill] sm:$0xff] }
 0x242   : > { %v1742_v39 = vsel %vm19526_vm12, %v1739_v52, -inf  ;;  %v1804_v11 = vmax.f32 %v1676_v60, %v1772_v31  ;;  %v19528_v57 = vmax.f32 %v12433_v13, %v12572_v45  ;;  %v1773_v16 = vmax.f32 %v1645_v35, %v1741_v12  ;;  %v19531_v52 = vld [vmem:[#allocation34_spill] sm:$0xff] }
 0x243   : > { %19527 = vst [vmem:[#allocation112_spill] sm:$0xff] %v12738_v49  ;;  %v1774_v17 = vmax.f32 %v19523_v54, %v1742_v39  ;;  %v12748_v34 = vmax.f32 %v1354_v9, %v1803_v30  ;;  %v2274_v21 = vmax.f32 %v12652_v15, %v19529_v37  ;;  %v2275_v7 = vmax.f32 %v12713_v2, %v19530_v23 }
 0x244   : > { %v12746_v63 = vmax.f32 %v1353_v56, %v19528_v57  ;;  %v19533_v6 = vmax.f32 %v19531_v52, %v19532_v0  ;;  %v1836_v54 = vmax.f32 %v1355_v22, %v1804_v11  ;;  %v2276_v13 = vmax.f32 %v12738_v49, %v12652_v15  ;;  %v12772_v0 = vpop.permute.xlu2 %2954  ;;  %v19539_v22 = vld [vmem:[#allocation49_spill] sm:$0xff]  ;;  %v19542_v11 = vld [vmem:[#allocation56_spill] sm:$0xff] }
 0x245   : > { %v19534_v30 = vmax.f32 %v19429_v58, %v12411_v29  ;;  %v12766_v45 = vmax.f32 %v12566_v55, %v12748_v34  ;;  %v12768_v56 = vmax.f32 %v2050_v41, %v2274_v21  ;;  %v12770_v9 = vmax.f32 %v2051_v28, %v2275_v7  ;;  %19538 = vst [vmem:[#allocation46_spill] sm:$0xff] %v12772_v0  ;;  %v19541_v29 = vld [vmem:[#allocation50_spill] sm:$0xff]  ;;  %v19543_v21 = vld [vmem:[#allocation73_spill] sm:$0xff] }
 0x246   : > { %v1806_v24 = vmax.f32 %v19533_v6, %v1774_v17  ;;  %v2218_v60 = vmax.f32 %v12746_v63, %v12416_v26  ;;  %v12776_v31 = vmax.f32 %v12746_v63, %v1836_v54  ;;  %v2220_v58 = vmax.f32 %v1836_v54, %v12746_v63  ;;  %v19544_v7 = vld [vmem:[#allocation53_spill] sm:$0xff] }
 0x247   : > { %v1805_v35 = vmax.f32 %v19534_v30, %v1773_v16  ;;  %19535 = vst [vmem:[#allocation130_spill] sm:$0xff] %v12766_v45  ;;  %v2055_v17 = vmax.f32 %v12592_v32, %v12766_v45  ;;  %v19545_v30 = vld [vmem:[#allocation54_spill] sm:$0xff]  ;;  %v19546_v45 = vld [vmem:[#allocation60_spill] sm:$0xff] }
 0x248   : > { %19536 = vst [vmem:[#allocation26_spill] sm:$0xff] %v12768_v56  ;;  %v1966_v39 = vmax.f32 %v1806_v24, %v19539_v22  ;;  %v2192_v15 = vmax.f32 %v19539_v22, %v1806_v24  ;;  %v2282_v28 = vmax.f32 %v2218_v60, %v12512_v51  ;;  %v2058_v16 = vmax.f32 %v12776_v31, %v1836_v54 }
 0x249   : > { %19537 = vst [vmem:[#allocation147_spill] sm:$0xff] %v12770_v9  ;;  %v1965_v12 = vmax.f32 %v1805_v35, %v19541_v29  ;;  %v2191_v41 = vmax.f32 %v19541_v29, %v1805_v35  ;;  %v2284_v0 = vmax.f32 %v2220_v58, %v2218_v60  ;;  %v19547_v29 = vmax.f32 %v19542_v11, %v19546_v45 }
 0x24a   : > { %19540 = vst [vmem:[#allocation148_spill] sm:$0xff] %v12776_v31  ;;  %v2030_v57 = vmax.f32 %v1966_v39, %v19542_v11  ;;  %v2256_v37 = vmax.f32 %v2192_v15, %v1806_v24  ;;  %v2258_v23 = vmax.f32 %v19543_v21, %v2192_v15  ;;  %v19549_v39 = vld [vmem:[#allocation71_spill] sm:$0xff]  ;;  %v19552_v15 = vmax.f32 %v12508_v47, %v12501_v42 }
 0x24b   : > { %v2029_v52 = vmax.f32 %v1965_v12, %v19544_v7  ;;  %v2255_v6 = vmax.f32 %v2191_v41, %v1805_v35  ;;  %v2257_v22 = vmax.f32 %v19545_v30, %v2191_v41  ;;  %v19550_v51 = vmax.f32 %v19546_v45, %v19549_v39  ;;  %v19558_v41 = vld [vmem:[#allocation76_spill] sm:$0xff]  ;;  %v19571_v39 = vld [vmem:[#allocation175_spill] sm:$0xff] }
 0x24c   : > { %v12790_v49 = vmax.f32 %v2030_v57, %v1806_v24  ;;  %v12795_v2 = vmax.f32 %v19547_v29, %v2256_v37  ;;  %v12805_v12 = vmax.f32 %v2055_v17, %v19552_v15  ;;  %v19555_v24 = vld [vmem:[#allocation57_spill] sm:$0xff]  ;;  %v12819_v45 = vmax.f32 %v2058_v16, %v2282_v28  ;;  %v12857_v29 = vpop.f32.mrf.mxu2  ;;  %v19660_v16 = vld [vmem:[#allocation90_spill] sm:$0xff] }
 0x24d   : > { %v12800_v31 = vmax.f32 %v19550_v51, %v2258_v23  ;;  %v12807_v21 = vmax.f32 %v2029_v52, %v1805_v35  ;;  %v19556_v60 = vmax.f32 %v19544_v7, %v19555_v24  ;;  %v19559_v11 = vmax.f32 %v19555_v24, %v19558_v41  ;;  %19570 = vst [vmem:[#allocation71_spill] sm:$0xff] %v12857_v29  ;;  %v12863_v24 = vpop.permute.xlu2 %2963 }
 0x24e   : > { %19548 = vst [vmem:[#allocation93_spill] sm:$0xff] %v12795_v2  ;;  %v12821_v51 = vmax.f32 %v1836_v54, %v2284_v0  ;;  %v12823_v37 = vmax.f32 %v2052_v19, %v2276_v13  ;;  %v2645_v17 = vrot.slane %v12768_v56, 1  ;;  %v2646_v35 = vrot.slane %v12770_v9, 1 }
 0x24f   : > { %19551 = vst [vmem:[#allocation34_spill] sm:$0xff] %v12800_v31  ;;  %v12812_v58 = vmax.f32 %v19556_v60, %v2255_v6  ;;  %v12817_v57 = vmax.f32 %v19559_v11, %v2257_v22  ;;  %v19564_v23 = vmax.f32 %v12165_v48, %v12612_v4  ;;  %v19565_v7 = vmax.f32 %v12033_v44, %v12674_v20 }
 0x250   : > { %19553 = vst [vmem:[#allocation40_spill] sm:$0xff] %v12805_v12  ;;  %v18544_v6 = vrot.slane %v12807_v21, 7  ;;  %v12838_v54 = vmax.f32 %v12566_v55, %v12464_v59  ;;  %v2219_v19 = vmax.f32 %v12748_v34, %v12566_v55  ;;  %v18543_v13 = vrot.slane %v12821_v51, 7 }
 0x251   : > { %19554 = vst [vmem:[#allocation49_spill] sm:$0xff] %v12807_v21  ;;  %v12833_v52 = vmax.f32 %v19565_v7, %v19564_v23  ;;  %v18540_v4 = vrot.slane %v12823_v37, 1  ;;  %v2665_v44 = vsel %vm939_vm1, %v2645_v17, %v2646_v35  ;;  %v19567_v20 = vrot.slane %v12430_v3, 1  ;;  %v12875_v23 = vpop.permute.xlu1 %2942 }
 0x252   : > { %19557 = vst [vmem:[#allocation50_spill] sm:$0xff] %v12812_v58  ;;  %v2709_v55 = vsel %vm18600_vm13, %v2665_v44, -inf  ;;  %v2283_v30 = vmax.f32 %v2219_v19, %v12838_v54  ;;  %v12861_v15 = vmax.f32 %v12605_v27, %v19571_v39  ;;  %vm18549_vm14 = vcmp.eq.s32.totalorder %v12875_v23, 1 }
 0x253   : > { %19560 = vst [vmem:[#allocation56_spill] sm:$0xff] %v12817_v57  ;;  %v2666_v0 = vsel %vm939_vm1, %v19567_v20, %v2645_v17  ;;  %v2664_v60 = vsel %vm939_vm1, %v2646_v35, %v18540_v4  ;;  %v2741_v11 = vmax.f32 %v12768_v56, %v2709_v55  ;;  %v12873_v17 = vmax.f32 %v12544_v62, %v12687_v18  ;;  %v12890_v4 = vpop.permute.xlu0 %2939 }
 0x254   : > { %19561 = vst [vmem:[#allocation73_spill] sm:$0xff] %v12819_v45  ;;  %v2708_v59 = vsel %vm18642_vm8, %v2666_v0, -inf  ;;  %v2710_v19 = vsel %vm18618_vm3, %v2664_v60, -inf  ;;  %v12880_v44 = vmax.f32 %v12748_v34, %v2283_v30  ;;  %v2655_v20 = vrot.slane %v12821_v51, 1 }
 0x255   : > { %19562 = vst [vmem:[#allocation53_spill] sm:$0xff] %v12821_v51  ;;  %v2740_v41 = vmax.f32 %v12430_v3, %v2708_v59  ;;  %v12885_v35 = vmax.f32 %v12687_v18, %v12544_v62  ;;  %v12888_v0 = vmax.f32 %v12770_v9, %v2710_v19  ;;  %v2773_v55 = vrot.slane %v2741_v11, 2 }
 0x256   : > { %19563 = vst [vmem:[#allocation54_spill] sm:$0xff] %v12823_v37  ;;  %v12894_v22 = vmax.f32 %v12504_v40, %v12833_v52  ;;  %v3264_v30 = vsel %vm1388_vm2, %v18543_v13, %v18544_v6  ;;  %v18547_v62 = vrot.slane %v12880_v44, 1  ;;  %v19581_v60 = vrot.slane %v12807_v21, 1  ;;  %v8206_v13 = vld [vmem:[%s18089_s4 + $0x78] sm:$0xff] }
 0x257   : > { %19566 = vst [vmem:[#allocation60_spill] sm:$0xff] %v12833_v52  ;;  %v2772_v59 = vrot.slane %v2740_v41, 2  ;;  %v19582_v29 = vrot.slane %v12497_v14, 2  ;;  %vm18550_vm12 = vcmp.eq.s32.totalorder %v12890_v4, 1  ;;  %v19583_v1 = vrot.slane %v12888_v0, 2  ;;  %2398 = vmatpush.bf16.msra.mxu1 %v8206_v13 }
 0x258   : > { %19572 = vst [vmem:[#allocation57_spill] sm:$0xff] %v12861_v15  ;;  %v2687_v19 = vsel %vm939_vm1, %v2655_v20, %v19581_v60  ;;  %v2656_v60 = vsel %vm939_vm1, %v18547_v62, %v2655_v20 }
 0x259   : > { %19573 = vst [vmem:[#allocation76_spill] sm:$0xff] %v12863_v24  ;;  %v2795_v27 = vsel %vm2784_vm7, %v2772_v59, %v2773_v55  ;;  %v2719_v15 = vsel %vm18674_vm9, %v2687_v19, -inf  ;;  %v2796_v39 = vsel %vm2784_vm7, %v19582_v29, %v2772_v59  ;;  %v3265_v19 = vsel %vm18565_vm6, %v3264_v30, -inf }
 0x25a   : > { %19574 = vst [vmem:[#allocation182_spill] sm:$0xff] %v12873_v17  ;;  %v3029_v6 = vsel %vm18549_vm14, %v2795_v27, -inf  ;;  %v2794_v27 = vsel %vm2784_vm7, %v2773_v55, %v19583_v1  ;;  %v3028_v20 = vsel %vm18550_vm12, %v2796_v39, -inf  ;;  %v12945_v30 = vmax.f32 %v12821_v51, %v2719_v15  ;;  %v8205_v1 = vld [vmem:[%s18089_s4 + $0x70] sm:$0xff]  ;;  %v19587_v39 = vld [vmem:[#allocation170_spill] sm:$0xff] }
 0x25b   : > { %19575 = vst [vmem:[#allocation183_spill] sm:$0xff] %v12875_v23  ;;  %v2718_v23 = vsel %vm18562_vm0, %v2656_v60, -inf  ;;  %v3030_v29 = vsel %vm18548_vm15, %v2794_v27, -inf  ;;  %v12939_v59 = vmax.f32 %v2740_v41, %v3029_v6  ;;  %v12952_v55 = vmax.f32 %v12833_v52, %v12504_v40  ;;  %v8840_v41 = vld [vmem:[%s18085_s0 + $0x30] sm:$0xff]  ;;  %v19589_v60 = vld [vmem:[#allocation158_spill] sm:$0xff]  ;;  %2399 = vmatpush.bf16.msra.mxu1 %v8205_v1 }
 0x25c   : > { %19577 = vst [vmem:[#allocation184_spill] sm:$0xff] %v12880_v44  ;;  %v12942_v62 = vmax.f32 %v12880_v44, %v2718_v23  ;;  %v12955_v13 = vmax.f32 %v12497_v14, %v3028_v20  ;;  %v905_v6 = vpack.c.bf16 %v12256_v8, %v19587_v39  ;;  %vm5524_vm15 = vcmp.ge.s32.totalorder %v8840_v41, 3  ;;  %v12971_v14 = vpop.f32.mrf.mxu2  ;;  %v12975_v8 = vpop.permute.xlu2 %2972  ;;  %v8841_v39 = vld [vmem:[%s18085_s0 + $0x28] sm:$0xff]  ;;  %v19631_v51 = vld [vmem:[#allocation35_spill] sm:$0xff] }
 0x25d   : > { %19578 = vst [vmem:[#allocation185_spill] sm:$0xff] %v12885_v35  ;;  %v12964_v15 = vmax.f32 %v12584_v5, %v12894_v22  ;;  %v12967_v23 = vmax.f32 %v12807_v21, %v3265_v19  ;;  %v5556_v40 = vsel %vm5524_vm15, 1, %v19031_v61  ;;  %vm5525_vm14 = vcmp.ge.s32.totalorder %v19589_v60, 3 }
 0x25e   : > { %19579 = vst [vmem:[#allocation186_spill] sm:$0xff] %v12890_v4  ;;  %v12973_v27 = vmax.f32 %v2741_v11, %v3030_v29  ;;  %2613 = vmatmul.bf16.gmra.mxu2 %v905_v6  ;;  %5601 = vperm.xlu1 %8283, %v5556_v40   ;;  %v5557_v20 = vsel %vm5525_vm14, 1, %v19031_v61  ;;  %vm5523_vm12 = vcmp.ge.s32.totalorder %v8841_v39, 3  ;;  %v12983_v19 = vmax.f32 %v12416_v26, %v12746_v63  ;;  %v19595_v39 = vld [vmem:[#allocation153_spill] sm:$0xff]  ;;  %v19597_v11 = vld [vmem:[#allocation144_spill] sm:$0xff] }
 0x25f   : > { %19580 = vst [vmem:[#allocation187_spill] sm:$0xff] %v12894_v22  ;;  %v3093_v41 = vrot.slane %v12939_v59, 1  ;;  %5604 = vperm.xlu2 %8284, %v5557_v20   ;;  %v5555_v6 = vsel %vm5523_vm12, 1, %v19031_v61  ;;  %v12991_v40 = vmax.f32 %v12550_v36, %v12873_v17  ;;  %v12995_v60 = vmax.f32 %v12885_v35, %v12558_v46  ;;  %v19608_v17 = vld [vmem:[#allocation139_spill] sm:$0xff] }
 0x260   : > { %19584 = vst [vmem:[#allocation188_spill] sm:$0xff] %v12939_v59  ;;  %v3092_v26 = vrot.slane %v12955_v13, 1  ;;  %5598 = vperm.xlu0 %8282, %v5555_v6   ;;  %v2053_v63 = vmax.f32 %v12644_v50, %v12592_v32  ;;  %v13004_v1 = vmax.f32 %v12952_v55, %v19595_v39  ;;  %vm18581_vm15 = vcmp.eq.s32.totalorder %v12975_v8, 1  ;;  %v19598_v6 = vld [vmem:[#allocation162_spill] sm:$0xff]  ;;  %v19599_v32 = vld [vmem:[#allocation145_spill] sm:$0xff]  ;;  %v19615_v46 = vld [vmem:[#allocation75_spill] sm:$0xff] }
 0x261   : > { %19585 = vst [vmem:[#allocation189_spill] sm:$0xff] %v12945_v30  ;;  %v2054_v29 = vmax.f32 %v19597_v11, %v12983_v19  ;;  %v2214_v4 = vmax.f32 %v19598_v6, %v19505_v53  ;;  %v2277_v50 = vmax.f32 %v12501_v42, %v19599_v32  ;;  %v19600_v20 = vrot.slane %v12945_v30, 2  ;;  %v19604_v39 = vld [vmem:[#allocation149_spill] sm:$0xff]  ;;  %v19606_v6 = vld [vmem:[#allocation112_spill] sm:$0xff] }
 0x262   : > { %19586 = vst [vmem:[#allocation190_spill] sm:$0xff] %v12952_v55  ;;  %v19601_v38 = vrot.slane %v12942_v62, 2  ;;  %v13023_v11 = vsel %vm939_vm1, %v3092_v26, %v3093_v41  ;;  %v18567_v22 = vrot.slane %v19603_v33, 7  ;;  %v19605_v53 = vrot.slane %v19604_v39, 1 }
 0x263   : > { %19588 = vst [vmem:[#allocation170_spill] sm:$0xff] %v12964_v15  ;;  %v2278_v32 = vmax.f32 %v2214_v4, %v19606_v6  ;;  %v13034_v35 = vmax.f32 %v2053_v63, %v2277_v50  ;;  %v19609_v25 = vrot.slane %v19608_v17, 7  ;;  %v19611_v63 = vld [vmem:[#allocation164_spill] sm:$0xff]  ;;  %vm19616_vm6 = vcmp.eq.s32.totalorder %v19615_v46, 1 }
 0x264   : > { %19590 = vst [vmem:[#allocation158_spill] sm:$0xff] %v12971_v14  ;;  %v19602_v14 = vld [vmem:[#allocation141_spill] sm:$0xff]  ;;  %v13031_v42 = vsel %vm939_vm1, %v19605_v53, %v3092_v26  ;;  %vm5528_vm12 = vcmp.ge.s32.totalorder %v19611_v63, 3  ;;  %v19622_v63 = vld [vmem:[#allocation148_spill] sm:$0xff] }
 0x265   : > { %19591 = vst [vmem:[#allocation191_spill] sm:$0xff] %v12973_v27  ;;  %v3219_v55 = vrot.slane %v19602_v14, 7  ;;  %v19610_v53 = vld [vmem:[#allocation157_spill] sm:$0xff]  ;;  %v13050_v50 = vmax.f32 %v2054_v29, %v2278_v32  ;;  %v2648_v6 = vrot.slane %v13034_v35, 1  ;;  %v5560_v32 = vsel %vm5528_vm12, 1, %v19031_v61  ;;  %v19623_v15 = vld [vmem:[#allocation20_spill] sm:$0xff] }
 0x266   : > { %19592 = vst [vmem:[#allocation192_spill] sm:$0xff] %v12975_v8  ;;  %vm5527_vm14 = vcmp.ge.s32.totalorder %v19610_v53, 3  ;;  %v19619_v53 = vld [vmem:[#allocation46_spill] sm:$0xff]  ;;  %v2056_v17 = vmax.f32 %v12983_v19, %v19622_v63  ;;  %v13103_v63 = vpop.permute.xlu0 %2948  ;;  %v19629_v8 = vld [vmem:[#allocation37_spill] sm:$0xff] }
 0x267   : > { %19593 = vst [vmem:[#allocation193_spill] sm:$0xff] %v12991_v40  ;;  %v3245_v5 = vsel %vm1388_vm2, %v3219_v55, %v18567_v22  ;;  %v3246_v26 = vsel %vm1388_vm2, %v19609_v25, %v3219_v55  ;;  %v19617_v22 = vrot.slane %v12973_v27, 1  ;;  %v5559_v29 = vsel %vm5527_vm14, 1, %v19031_v61  ;;  %5613 = vperm.xlu2 %8284, %v5560_v32  }
 0x268   : > { %19594 = vst [vmem:[#allocation194_spill] sm:$0xff] %v12995_v60  ;;  %v3284_v60 = vsel %vm19616_vm6, %v3245_v5, -inf  ;;  %v13072_v5 = vpop.permute.xlu1 %2951  ;;  %5610 = vperm.xlu1 %8283, %v5559_v29   ;;  %vm19624_vm14 = vcmp.eq.s32.totalorder %v19623_v15, 1  ;;  %v19625_v32 = vrot.slane %v12805_v12, 1  ;;  %vm19630_vm12 = vcmp.eq.s32.totalorder %v19629_v8, 1 }
 0x269   : > { %19596 = vst [vmem:[#allocation195_spill] sm:$0xff] %v13004_v1  ;;  %v2785_v1 = vsel %vm2784_vm7, %v19601_v38, %v19600_v20  ;;  %v8204_v20 = vld [vmem:[%s18089_s4 + $0x68] sm:$0xff]  ;;  %v19613_v38 = vld [vmem:[#allocation83_spill] sm:$0xff]  ;;  %v13061_v25 = vsel %vm939_vm1, %v3093_v41, %v19617_v22  ;;  %v13064_v55 = vmax.f32 %v19603_v33, %v3284_v60  ;;  %v19621_v22 = vrot.slane %v12823_v37, 1  ;;  %v8842_v60 = vld [vmem:[%s18085_s0 + $0x40] sm:$0xff] }
 0x26a   : > { %19607 = vst [vmem:[#allocation144_spill] sm:$0xff] %v13034_v35  ;;  %vm19614_vm0 = vcmp.eq.s32.totalorder %v19613_v38, 1  ;;  %2400 = vmatpush.bf16.msra.mxu1 %v8204_v20  ;;  %v2649_v20 = vrot.slane %v13050_v50, 1  ;;  %vm5526_vm6 = vcmp.ge.s32.totalorder %v8842_v60, 3  ;;  %v13086_v33 = vsel %vm18581_vm15, %v2785_v1, -inf  ;;  %v13101_v1 = vpop.permute.xlu2 %3516 }
 0x26b   : > { %19612 = vst [vmem:[#allocation162_spill] sm:$0xff] %v13050_v50  ;;  %v3283_v10 = vsel %vm19614_vm0, %v3246_v26, -inf  ;;  %v8203_v26 = vld [vmem:[%s18089_s4 + $0x60] sm:$0xff]  ;;  %vm18588_vm0 = vcmp.eq.s32.totalorder %v19619_v53, 1  ;;  %v2663_v41 = vsel %vm939_vm1, %v19621_v22, %v2648_v6  ;;  %v5558_v29 = vsel %vm5526_vm6, 1, %v19031_v61 }
 0x26c   : > { %19618 = vst [vmem:[#allocation145_spill] sm:$0xff] %v13064_v55  ;;  %v2711_v36 = vsel %vm19624_vm14, %v2663_v41, -inf  ;;  %v13091_v30 = vmax.f32 %v19602_v14, %v3283_v10  ;;  %v2661_v22 = vsel %vm939_vm1, %v2649_v20, %v19625_v32  ;;  %v2662_v19 = vsel %vm939_vm1, %v2648_v6, %v2649_v20  ;;  %5607 = vperm.xlu0 %8282, %v5558_v29   ;;  %v19628_v10 = vld [vmem:[#allocation130_spill] sm:$0xff]  ;;  %v19633_v32 = vld [vmem:[#allocation137_spill] sm:$0xff] }
 0x26d   : > { %19620 = vst [vmem:[#allocation149_spill] sm:$0xff] %v13072_v5  ;;  %v2743_v60 = vmax.f32 %v12823_v37, %v2711_v36  ;;  %v2057_v41 = vmax.f32 %v19628_v10, %v12748_v34  ;;  %v2712_v14 = vsel %vm19630_vm12, %v2662_v19, -inf  ;;  %vm19632_vm6 = vcmp.eq.s32.totalorder %v19631_v51, 1 }
 0x26e   : > { %19626 = vst [vmem:[#allocation112_spill] sm:$0xff] %v13101_v1  ;;  %v2713_v40 = vsel %vm19632_vm6, %v2661_v22, -inf  ;;  %vm18636_vm14 = vcmp.eq.s32.totalorder %v13072_v5, 1  ;;  %v2280_v6 = vmax.f32 %v19633_v32, %v2214_v4  ;;  %2401 = vmatpush.bf16.msra.mxu1 %v8203_v26  ;;  %v2744_v36 = vmax.f32 %v13034_v35, %v2712_v14  ;;  %v19651_v5 = vld [vmem:[#allocation38_spill] sm:$0xff] }
 0x26f   : > { %19627 = vst [vmem:[#allocation157_spill] sm:$0xff] %v13103_v63  ;;  %v13115_v20 = vmax.f32 %v13050_v50, %v2713_v40  ;;  %v2775_v29 = vrot.slane %v2743_v60, 2  ;;  %vm18639_vm15 = vcmp.eq.s32.totalorder %v13101_v1, 1  ;;  %vm18583_vm12 = vcmp.eq.s32.totalorder %v13103_v63, 1 }
 0x270   : > { %v2281_v34 = vmax.f32 %v12838_v54, %v12508_v47  ;;  %v13122_v22 = vmax.f32 %v2056_v17, %v2280_v6  ;;  %v2776_v19 = vrot.slane %v2744_v36, 2  ;;  %v18584_v14 = vrot.slane %v13091_v30, 6 }
 0x271   : > { %v18582_v4 = vrot.slane %v13115_v20, 2  ;;  %v19635_v40 = vrot.slane %v12888_v0, 2  ;;  %v19637_v6 = vrot.slane %v13064_v55, 6  ;;  %vm18605_vm6 = vcmp.eq.s32.totalorder %v12863_v24, 1 }
 0x272   : > { %19634 = vst [vmem:[#allocation164_spill] sm:$0xff] %v13122_v22  ;;  %v13132_v32 = vmax.f32 %v2057_v41, %v2281_v34  ;;  %v2651_v52 = vrot.slane %v13122_v22, 1  ;;  %v2792_v17 = vsel %vm2784_vm7, %v2775_v29, %v2776_v19 }
 0x273   : > { %v2793_v26 = vsel %vm2784_vm7, %v19635_v40, %v2775_v29  ;;  %v2791_v54 = vsel %vm2784_vm7, %v2776_v19, %v18582_v4  ;;  %v3374_v41 = vsel %vm3361_vm5, %v18584_v14, %v19637_v6  ;;  %v3032_v40 = vsel %vm18636_vm14, %v2792_v17, -inf  ;;  %v8202_v6 = vld [vmem:[%s18089_s4 + $0x58] sm:$0xff] }
 0x274   : > { %v3031_v10 = vsel %vm18583_vm12, %v2793_v26, -inf  ;;  %19636 = vst [vmem:[#allocation148_spill] sm:$0xff] %v13132_v32  ;;  %v3033_v26 = vsel %vm18588_vm0, %v2791_v54, -inf  ;;  %v2652_v4 = vrot.slane %v13132_v32, 1  ;;  %v19639_v29 = vrot.slane %v12805_v12, 1  ;;  %v19642_v54 = vld [vmem:[#allocation23_spill] sm:$0xff]  ;;  %2402 = vmatpush.bf16.msra.mxu1 %v8202_v6  ;;  %v13196_v6 = vpop.permute.xlu1 %2960 }
 0x275   : > { %v13149_v34 = vmax.f32 %v12888_v0, %v3031_v10  ;;  %v13164_v0 = vmax.f32 %v2743_v60, %v3032_v40  ;;  %v13166_v10 = vmax.f32 %v2744_v36, %v3033_v26  ;;  %vm19643_vm12 = vcmp.eq.s32.totalorder %v19642_v54, 1  ;;  %v8201_v36 = vld [vmem:[%s18089_s4 + $0x50] sm:$0xff]  ;;  %v13183_v40 = vpop.f32.mrf.mxu2  ;;  %19650 = vst [vmem:[#allocation198_spill] sm:$0xff] %v13196_v6 }
 0x276   : > { %v2660_v19 = vsel %vm939_vm1, %v19639_v29, %v2651_v52  ;;  %v3605_v47 = vsel %vm18639_vm15, %v3374_v41, -inf  ;;  %v19644_v29 = vrot.slane %v12819_v45, 1  ;;  %v2659_v53 = vsel %vm939_vm1, %v2651_v52, %v2652_v4  ;;  %19645 = vst [vmem:[#allocation197_spill] sm:$0xff] %v13183_v40 }
 0x277   : > { %19638 = vst [vmem:[#allocation130_spill] sm:$0xff] %v13149_v34  ;;  %v2714_v14 = vsel %vm19643_vm12, %v2660_v19, -inf  ;;  %v3096_v26 = vrot.slane %v13164_v0, 1  ;;  %v19646_v19 = vld [vmem:[#allocation39_spill] sm:$0xff]  ;;  %v19648_v52 = vrot.slane %v13149_v34, 1  ;;  %vm19652_vm0 = vcmp.eq.s32.totalorder %v19651_v5, 1 }
 0x278   : > { %19640 = vst [vmem:[#allocation137_spill] sm:$0xff] %v13164_v0  ;;  %v2658_v63 = vsel %vm939_vm1, %v2652_v4, %v19644_v29  ;;  %v2746_v60 = vmax.f32 %v12805_v12, %v2714_v14  ;;  %vm19647_vm12 = vcmp.eq.s32.totalorder %v19646_v19, 1  ;;  %v3222_v29 = vrot.slane %v12768_v56, 7  ;;  %v19654_v19 = vld [vmem:[#allocation29_spill] sm:$0xff]  ;;  %2403 = vmatpush.bf16.msra.mxu1 %v8201_v36 }
 0x279   : > { %19641 = vst [vmem:[#allocation196_spill] sm:$0xff] %v13166_v10  ;;  %v2715_v17 = vsel %vm19647_vm12, %v2659_v53, -inf  ;;  %v19649_v4 = vrot.slane %v12973_v27, 1  ;;  %v2716_v40 = vsel %vm19652_vm0, %v2658_v63, -inf  ;;  %v13204_v53 = vsel %vm18642_vm8, %v13061_v25, -inf  ;;  %v19723_v0 = vld [vmem:[#allocation9_spill] sm:$0xff] }
 0x27a   : > { %v2747_v1 = vmax.f32 %v13122_v22, %v2715_v17  ;;  %v2778_v41 = vrot.slane %v2746_v60, 2  ;;  %19653 = vst [vmem:[#allocation199_spill] sm:$0xff] %v13204_v53  ;;  %vm19655_vm12 = vcmp.eq.s32.totalorder %v19654_v19, 1  ;;  %v13217_v63 = vmax.f32 %v12942_v62, %v13086_v33  ;;  %v13233_v19 = vpop.permute.xlu0 %2957 }
 0x27b   : > { %v3114_v14 = vsel %vm939_vm1, %v19649_v4, %v19648_v52  ;;  %v13209_v18 = vsel %vm19655_vm12, %v13023_v11, -inf  ;;  %v13212_v52 = vmax.f32 %v13132_v32, %v2716_v40  ;;  %v18595_v4 = vrot.slane %v12430_v3, 7  ;;  %19658 = vst [vmem:[#allocation202_spill] sm:$0xff] %v13233_v19 }
 0x27c   : > { %19656 = vst [vmem:[#allocation200_spill] sm:$0xff] %v13217_v63  ;;  %v13220_v17 = vmax.f32 %v13064_v55, %v3605_v47  ;;  %v2779_v28 = vrot.slane %v2747_v1, 2  ;;  %v18603_v25 = vrot.slane %v12770_v9, 7  ;;  %v13225_v11 = vsel %vm18600_vm13, %v3114_v14, -inf }
 0x27d   : > { %19657 = vst [vmem:[#allocation201_spill] sm:$0xff] %v13225_v11  ;;  %vm18606_vm0 = vcmp.eq.s32.totalorder %v13196_v6, 1  ;;  %v3243_v33 = vsel %vm1388_vm2, %v18595_v4, %v3222_v29  ;;  %v19659_v47 = vrot.slane %v13166_v10, 1  ;;  %vm19661_vm12 = vcmp.eq.s32.totalorder %v19660_v16, 1 }
 0x27e   : > { %v2789_v14 = vsel %vm2784_vm7, %v2778_v41, %v2779_v28  ;;  %v3242_v40 = vsel %vm1388_vm2, %v3222_v29, %v18603_v25  ;;  %v3286_v55 = vsel %vm19661_vm12, %v3243_v33, -inf  ;;  %v19662_v4 = vrot.slane %v13212_v52, 2 }
 0x27f   : > { %v3112_v36 = vsel %vm939_vm1, %v3096_v26, %v19659_v47  ;;  %v3035_v32 = vsel %vm18606_vm0, %v2789_v14, -inf  ;;  %v19663_v47 = vld [vmem:[#allocation80_spill] sm:$0xff]  ;;  %v13256_v22 = vmax.f32 %v12768_v56, %v3286_v55  ;;  %v19668_v16 = vrot.slane %v13115_v20, 2  ;;  %v19670_v55 = vld [vmem:[#allocation117_spill] sm:$0xff]  ;;  %v13330_v56 = vpop.permute.xlu1 %2969 }
 0x280   : > { %v2788_v3 = vsel %vm2784_vm7, %v2779_v28, %v19662_v4  ;;  %vm19664_vm13 = vcmp.eq.s32.totalorder %v19663_v47, 1  ;;  %v13260_v25 = vmax.f32 %v2746_v60, %v3035_v32  ;;  %v19671_v14 = vld [vmem:[#allocation181_spill] sm:$0xff]  ;;  %v13276_v32 = vpop.permute.xlu2 %3525  ;;  %v18620_v6 = vrot.slane %v12823_v37, 7 }
 0x281   : > { %v3287_v5 = vsel %vm19664_vm13, %v3242_v40, -inf  ;;  %19665 = vst [vmem:[#allocation203_spill] sm:$0xff] %v13256_v22  ;;  %v3036_v29 = vsel %vm18605_vm6, %v2788_v3, -inf  ;;  %v2790_v28 = vsel %vm2784_vm7, %v19668_v16, %v2778_v41  ;;  %v18608_v40 = vrot.slane %v13256_v22, 6  ;;  %v8843_v16 = vld [vmem:[%s18085_s0 + $0x60] sm:$0xff] }
 0x282   : > { %19666 = vst [vmem:[#allocation204_spill] sm:$0xff] %v13260_v25  ;;  %v13263_v33 = vmax.f32 %v12770_v9, %v3287_v5  ;;  %v13269_v4 = vmax.f32 %v2747_v1, %v3036_v29  ;;  %vm18629_vm13 = vcmp.eq.s32.totalorder %v13233_v19, 1  ;;  %v906_v24 = vpack.c.bf16 %v19671_v14, %v19670_v55  ;;  %v13284_v1 = vpop.f32.mrf.mxu2  ;;  %v19675_v14 = vld [vmem:[#allocation173_spill] sm:$0xff]  ;;  %v13333_v19 = vpop.permute.xlu0 %2966 }
 0x283   : > { %v3099_v3 = vrot.slane %v13260_v25, 1  ;;  %19672 = vst [vmem:[#allocation117_spill] sm:$0xff] %v13276_v32  ;;  %v3034_v60 = vsel %vm18629_vm13, %v2790_v28, -inf  ;;  %vm5530_vm12 = vcmp.ge.s32.totalorder %v8843_v16, 3  ;;  %vm5531_vm6 = vcmp.ge.s32.totalorder %v19675_v14, 3 }
 0x284   : > { %19667 = vst [vmem:[#allocation205_spill] sm:$0xff] %v13263_v33  ;;  %v18607_v5 = vrot.slane %v13263_v33, 6  ;;  %v13288_v29 = vmax.f32 %v13115_v20, %v3034_v60  ;;  %2618 = vmatmul.bf16.gmra.mxu2 %v906_v24  ;;  %v5562_v55 = vsel %vm5530_vm12, 1, %v19031_v61  ;;  %v5563_v16 = vsel %vm5531_vm6, 1, %v19031_v61  ;;  %v8844_v20 = vld [vmem:[%s18085_s0 + $0x58] sm:$0xff] }
 0x285   : > { %19669 = vst [vmem:[#allocation206_spill] sm:$0xff] %v13269_v4  ;;  %5619 = vperm.xlu1 %8283, %v5562_v55   ;;  %vm5529_vm0 = vcmp.ge.s32.totalorder %v8844_v20, 3  ;;  %v19676_v24 = vrot.slane %v12880_v44, 1  ;;  %v19677_v60 = vrot.slane %v12819_v45, 1  ;;  %v19678_v41 = vrot.slane %v13149_v34, 1  ;;  %5622 = vperm.xlu2 %8284, %v5563_v16   ;;  %v19729_v34 = vld [vmem:[#allocation107_spill] sm:$0xff] }
 0x286   : > { %19673 = vst [vmem:[#allocation181_spill] sm:$0xff] %v13284_v1  ;;  %v3371_v28 = vsel %vm3361_vm5, %v18608_v40, %v18607_v5  ;;  %v19679_v55 = vrot.slane %v13269_v4, 1  ;;  %vm18612_vm6 = vcmp.eq.s32.totalorder %v13276_v32, 1  ;;  %v5561_v20 = vsel %vm5529_vm0, 1, %v19031_v61  ;;  %v19750_v44 = vld [vmem:[#allocation68_spill] sm:$0xff] }
 0x287   : > { %19674 = vst [vmem:[#allocation207_spill] sm:$0xff] %v13288_v29  ;;  %v2657_v14 = vsel %vm939_vm1, %v19677_v60, %v19676_v24  ;;  %v3113_v5 = vsel %vm939_vm1, %v19678_v41, %v3096_v26  ;;  %v3608_v60 = vsel %vm18612_vm6, %v3371_v28, -inf  ;;  %5616 = vperm.xlu0 %8282, %v5561_v20   ;;  %vm19683_vm0 = vcmp.eq.s32.totalorder %v19623_v15, 1  ;;  %v19838_v26 = vld [vmem:[#allocation13_spill] sm:$0xff] }
 0x288   : > { %v3109_v40 = vsel %vm939_vm1, %v3099_v3, %v19679_v55  ;;  %v2717_v41 = vsel %vm18735_vm11, %v2657_v14, -inf  ;;  %19681 = vst [vmem:[#allocation173_spill] sm:$0xff] %v13330_v56  ;;  %v13337_v28 = vsel %vm19683_vm0, %v3112_v36, -inf  ;;  %v13341_v14 = vsel %vm18618_vm3, %v3113_v5, -inf }
 0x289   : > { %v2749_v1 = vmax.f32 %v12819_v45, %v2717_v41  ;;  %19682 = vst [vmem:[#allocation208_spill] sm:$0xff] %v13333_v19  ;;  %vm19686_vm12 = vcmp.eq.s32.totalorder %v19642_v54, 1  ;;  %v3098_v16 = vrot.slane %v13288_v29, 1  ;;  %v13349_v24 = vmax.f32 %v13263_v33, %v3608_v60  ;;  %v19693_v33 = vld [vmem:[#allocation96_spill] sm:$0xff]  ;;  %v19751_v45 = vld [vmem:[#allocation134_spill] sm:$0xff] }
 0x28a   : > { %19684 = vst [vmem:[#allocation209_spill] sm:$0xff] %v13337_v28  ;;  %v13345_v20 = vsel %vm19686_vm12, %v3109_v40, -inf  ;;  %v3225_v55 = vrot.slane %v13034_v35, 7  ;;  %vm18628_vm0 = vcmp.eq.s32.totalorder %v13330_v56, 1  ;;  %vm18625_vm6 = vcmp.eq.s32.totalorder %v13333_v19, 1  ;;  %v13359_v40 = vld [vmem:[%s18085_s0 + $0x78] sm:$0xff] }
 0x28b   : > { %19685 = vst [vmem:[#allocation210_spill] sm:$0xff] %v13341_v14  ;;  %v2781_v41 = vrot.slane %v2749_v1, 2  ;;  %vm4956_vm12 = vcmp.lt.s32.totalorder %v13359_v40, 13  ;;  %v19690_v5 = vrot.slane %v12942_v62, 2  ;;  %v19691_v36 = vrot.slane %v13212_v52, 2  ;;  %v19707_v19 = vld [vmem:[#allocation95_spill] sm:$0xff] }
 0x28c   : > { %19687 = vst [vmem:[#allocation211_spill] sm:$0xff] %v13345_v20  ;;  %v3240_v32 = vsel %vm1388_vm2, %v18620_v6, %v3225_v55  ;;  %v4988_v54 = vsel %vm4956_vm12, 1, %v19031_v61  ;;  %v19692_v62 = vrot.slane %v13050_v50, 7  ;;  %vm19694_vm3 = vcmp.eq.s32.totalorder %v19693_v33, 1  ;;  %v19712_v20 = vld [vmem:[#allocation97_spill] sm:$0xff]  ;;  %v19719_v33 = vld [vmem:[#allocation6_spill] sm:$0xff] }
 0x28d   : > { %19688 = vst [vmem:[#allocation212_spill] sm:$0xff] %v13349_v24  ;;  %v2786_v60 = vsel %vm2784_vm7, %v2781_v41, %v19690_v5  ;;  %v2787_v7 = vsel %vm2784_vm7, %v19691_v36, %v2781_v41  ;;  %v3289_v11 = vsel %vm19694_vm3, %v3240_v32, -inf  ;;  %5051 = vperm.xlu1 %8283, %v4988_v54   ;;  %v19695_v27 = vrot.slane %v13166_v10, 1  ;;  %v19715_v10 = vld [vmem:[#allocation12_spill] sm:$0xff] }
 0x28e   : > { %19689 = vst [vmem:[#allocation213_spill] sm:$0xff] %v13359_v40  ;;  %v3038_v15 = vsel %vm18628_vm0, %v2786_v60, -inf  ;;  %v3239_v5 = vsel %vm1388_vm2, %v3225_v55, %v19692_v62  ;;  %v3037_v6 = vsel %vm18625_vm6, %v2787_v7, -inf  ;;  %v19697_v60 = vld [vmem:[#allocation87_spill] sm:$0xff]  ;;  %v3110_v32 = vsel %vm939_vm1, %v3098_v16, %v3099_v3 }
 0x28f   : > { %v3111_v41 = vsel %vm939_vm1, %v19695_v27, %v3098_v16  ;;  %v13389_v36 = vmax.f32 %v2749_v1, %v3038_v15  ;;  %vm19698_vm12 = vcmp.eq.s32.totalorder %v19697_v60, 1  ;;  %v13394_v9 = vmax.f32 %v13212_v52, %v3037_v6  ;;  %v8846_v7 = vld [vmem:[%s18085_s0 + $0x70] sm:$0xff]  ;;  %v19726_v60 = vld [vmem:[#allocation30_spill] sm:$0xff] }
 0x290   : > { %v3290_v56 = vsel %vm19698_vm12, %v3239_v5, -inf  ;;  %vm5532_vm3 = vcmp.ge.s32.totalorder %v8846_v7, 3  ;;  %vm4955_vm6 = vcmp.lt.s32.totalorder %v8846_v7, 13  ;;  %v13406_v27 = vmax.f32 %v13034_v35, %v3289_v11  ;;  %v19709_v11 = vld [vmem:[#allocation114_spill] sm:$0xff] }
 0x291   : > { %19696 = vst [vmem:[#allocation214_spill] sm:$0xff] %v13389_v36  ;;  %v13399_v55 = vmax.f32 %v13050_v50, %v3290_v56  ;;  %v3102_v15 = vrot.slane %v13389_v36, 1  ;;  %v3101_v54 = vrot.slane %v13394_v9, 1  ;;  %v5564_v6 = vsel %vm5532_vm3, 1, %v19031_v61  ;;  %v19761_v36 = vld [vmem:[#allocation160_spill] sm:$0xff] }
 0x292   : > { %19699 = vst [vmem:[#allocation215_spill] sm:$0xff] %v13394_v9  ;;  %vm19702_vm12 = vcmp.eq.s32.totalorder %v19629_v8, 1  ;;  %5625 = vperm.xlu2 %8284, %v5564_v6   ;;  %v4987_v56 = vsel %vm4955_vm6, 1, %v19031_v61  ;;  %v2627_v3 = vrot.slane %v12795_v2, 1  ;;  %v2628_v1 = vrot.slane %v12817_v57, 1 }
 0x293   : > { %19700 = vst [vmem:[#allocation216_spill] sm:$0xff] %v13399_v55  ;;  %v13412_v52 = vsel %vm19702_vm12, %v3111_v41, -inf  ;;  %5048 = vperm.xlu0 %8282, %v4987_v56   ;;  %v2629_v5 = vrot.slane %v12800_v31, 1  ;;  %v19704_v41 = vld [vmem:[#allocation105_spill] sm:$0xff]  ;;  %vm19705_vm6 = vcmp.eq.s32.totalorder %v19631_v51, 1  ;;  %vm18663_vm12 = vcmp.eq.s32.totalorder %v19707_v19, 1 }
 0x294   : > { %19701 = vst [vmem:[#allocation217_spill] sm:$0xff] %v13406_v27  ;;  %vm18665_vm3 = vcmp.eq.s32.totalorder %v19704_v41, 1  ;;  %v13429_v35 = vsel %vm19705_vm6, %v3110_v32, -inf  ;;  %v19708_v56 = vld [vmem:[#allocation111_spill] sm:$0xff]  ;;  %vm18661_vm13 = vcmp.eq.s32.totalorder %v19709_v11, 1  ;;  %v19710_v8 = vrot.slane %v13217_v63, 1 }
 0x295   : > { %19703 = vst [vmem:[#allocation218_spill] sm:$0xff] %v13412_v52  ;;  %vm18662_vm0 = vcmp.eq.s32.totalorder %v19708_v56, 1  ;;  %v13446_v6 = vsel %vm939_vm1, %v3101_v54, %v3102_v15  ;;  %v19711_v16 = vrot.slane %v13269_v4, 1  ;;  %v19713_v62 = vrot.slane %v19712_v20, 1  ;;  %v19739_v11 = vld [vmem:[#allocation48_spill] sm:$0xff]  ;;  %v19741_v56 = vld [vmem:[#allocation47_spill] sm:$0xff] }
 0x296   : > { %19706 = vst [vmem:[#allocation219_spill] sm:$0xff] %v13429_v35  ;;  %v13441_v7 = vsel %vm939_vm1, %v3102_v15, %v19710_v8  ;;  %v2682_v8 = vsel %vm939_vm1, %v2628_v1, %v2629_v5  ;;  %v2683_v32 = vsel %vm939_vm1, %v2627_v3, %v2628_v1  ;;  %v19714_v15 = vrot.slane %v12812_v58, 1  ;;  %v19745_v19 = vld [vmem:[#allocation98_spill] sm:$0xff] }
 0x297   : > { %v13452_v51 = vsel %vm939_vm1, %v19711_v16, %v3101_v54  ;;  %v2681_v25 = vsel %vm939_vm1, %v2629_v5, %v19713_v62  ;;  %vm19716_vm6 = vcmp.eq.s32.totalorder %v19715_v10, 1  ;;  %v19717_v16 = vld [vmem:[#allocation5_spill] sm:$0xff]  ;;  %vm19720_vm15 = vcmp.eq.s32.totalorder %v19719_v33, 1  ;;  %v19746_v41 = vld [vmem:[#allocation126_spill] sm:$0xff] }
 0x298   : > { %v2684_v52 = vsel %vm939_vm1, %v19714_v15, %v2627_v3  ;;  %v2691_v54 = vsel %vm19716_vm6, %v2683_v32, -inf  ;;  %vm19718_vm14 = vcmp.eq.s32.totalorder %v19717_v16, 1  ;;  %v2693_v62 = vsel %vm19720_vm15, %v2681_v25, -inf }
 0x299   : > { %v2692_v50 = vsel %vm19718_vm14, %v2682_v8, -inf  ;;  %v19721_v28 = vrot.slane %v13399_v55, 6  ;;  %v19722_v5 = vrot.slane %v13406_v27, 6  ;;  %vm19724_vm8 = vcmp.eq.s32.totalorder %v19723_v0, 1 }
 0x29a   : > { %v2690_v3 = vsel %vm19724_vm8, %v2684_v52, -inf  ;;  %v2723_v15 = vmax.f32 %v12795_v2, %v2691_v54  ;;  %v2724_v32 = vmax.f32 %v12817_v57, %v2692_v50  ;;  %v2725_v25 = vmax.f32 %v12800_v31, %v2693_v62 }
 0x29b   : > { %v13478_v1 = vsel %vm3361_vm5, %v19722_v5, %v19721_v28  ;;  %v13485_v8 = vmax.f32 %v12812_v58, %v2690_v3  ;;  %vm19727_vm15 = vcmp.eq.s32.totalorder %v19726_v60, 1  ;;  %v3202_v28 = vrot.slane %v12790_v49, 7 }
 0x29c   : > { %v13491_v27 = vsel %vm19727_vm15, %v13031_v42, -inf  ;;  %v2755_v5 = vrot.slane %v2723_v15, 2  ;;  %v2756_v37 = vrot.slane %v2724_v32, 2  ;;  %v3203_v54 = vrot.slane %v12812_v58, 7 }
 0x29d   : > { %19725 = vst [vmem:[#allocation220_spill] sm:$0xff] %v13485_v8  ;;  %v2757_v3 = vrot.slane %v2725_v25, 2  ;;  %v3204_v53 = vrot.slane %v12795_v2, 7  ;;  %v3205_v62 = vrot.slane %v12817_v57, 7  ;;  %v3206_v60 = vrot.slane %v12800_v31, 7 }
 0x29e   : > { %v2812_v42 = vsel %vm2784_vm7, %v2755_v5, %v2756_v37  ;;  %v3262_v59 = vsel %vm1388_vm2, %v3202_v28, %v3203_v54  ;;  %v19728_v14 = vrot.slane %v12807_v21, 7  ;;  %v19730_v50 = vrot.slane %v19729_v34, 2  ;;  %v19752_v21 = vld [vmem:[#allocation136_spill] sm:$0xff] }
 0x29f   : > { %v2811_v47 = vsel %vm2784_vm7, %v2756_v37, %v2757_v3  ;;  %v19731_v24 = vrot.slane %v13485_v8, 2  ;;  %v3012_v40 = vsel %vm18665_vm3, %v2812_v42, -inf  ;;  %vm19740_vm15 = vcmp.eq.s32.totalorder %v19739_v11, 1 }
 0x2a0   : > { %v3263_v52 = vsel %vm1388_vm2, %v19728_v14, %v3202_v28  ;;  %v2810_v63 = vsel %vm2784_vm7, %v2757_v3, %v19730_v50  ;;  %v3013_v34 = vsel %vm18663_vm12, %v2811_v47, -inf  ;;  %v13527_v28 = vmax.f32 %v2723_v15, %v3012_v40  ;;  %v19744_v40 = vld [vmem:[#allocation103_spill] sm:$0xff] }
 0x2a1   : > { %v2813_v22 = vsel %vm2784_vm7, %v19731_v24, %v2755_v5  ;;  %v3014_v14 = vsel %vm18661_vm13, %v2810_v63, -inf  ;;  %v13532_v50 = vmax.f32 %v2724_v32, %v3013_v34  ;;  %v19732_v5 = vrot.slane %v19712_v20, 7  ;;  %v19735_v34 = vld [vmem:[#allocation44_spill] sm:$0xff] }
 0x2a2   : > { %v3011_v61 = vsel %vm18662_vm0, %v2813_v22, -inf  ;;  %v13534_v24 = vmax.f32 %v2725_v25, %v3014_v14  ;;  %v3076_v3 = vrot.slane %v13527_v28, 1  ;;  %v3259_v47 = vsel %vm1388_vm2, %v3205_v62, %v3206_v60  ;;  %v19733_v25 = vld [vmem:[#allocation45_spill] sm:$0xff] }
 0x2a3   : > { %v13530_v37 = vmax.f32 %v13485_v8, %v3011_v61  ;;  %v3258_v22 = vsel %vm1388_vm2, %v3206_v60, %v19732_v5  ;;  %v3260_v63 = vsel %vm1388_vm2, %v3204_v53, %v3205_v62  ;;  %v3261_v61 = vsel %vm1388_vm2, %v3203_v54, %v3204_v53  ;;  %v19737_v5 = vld [vmem:[#allocation36_spill] sm:$0xff]  ;;  %v19743_v54 = vld [vmem:[#allocation110_spill] sm:$0xff] }
 0x2a4   : > { %v3077_v15 = vrot.slane %v13532_v50, 1  ;;  %v3078_v32 = vrot.slane %v13534_v24, 1  ;;  %vm19734_vm8 = vcmp.eq.s32.totalorder %v19733_v25, 1  ;;  %vm19736_vm14 = vcmp.eq.s32.totalorder %v19735_v34, 1 }
 0x2a5   : > { %v3266_v42 = vsel %vm19734_vm8, %v3263_v52, -inf  ;;  %v3267_v14 = vsel %vm19736_vm14, %v3262_v59, -inf  ;;  %vm19738_vm6 = vcmp.eq.s32.totalorder %v19737_v5, 1  ;;  %v3269_v62 = vsel %vm19740_vm15, %v3260_v63, -inf  ;;  %v19747_v52 = vld [vmem:[#allocation79_spill] sm:$0xff] }
 0x2a6   : > { %v3268_v60 = vsel %vm19738_vm6, %v3261_v61, -inf  ;;  %vm19742_vm13 = vcmp.eq.s32.totalorder %v19741_v56, 1  ;;  %vm18703_vm0 = vcmp.eq.s32.totalorder %v19743_v54, 1  ;;  %vm3555_vm12 = vcmp.eq.s32.totalorder %v19744_v40, 1 }
 0x2a7   : > { %v3270_v53 = vsel %vm19742_vm13, %v3259_v47, -inf  ;;  %vm3558_vm3 = vcmp.eq.s32.totalorder %v19745_v19, 1  ;;  %vm3557_vm8 = vcmp.eq.s32.totalorder %v19746_v41, 1  ;;  %v19748_v25 = vrot.slane %v19747_v52, 1 }
 0x2a8   : > { %v3131_v61 = vsel %vm939_vm1, %v3077_v15, %v3078_v32  ;;  %v3132_v63 = vsel %vm939_vm1, %v3076_v3, %v3077_v15  ;;  %v19749_v47 = vrot.slane %v13530_v37, 1  ;;  %vm18702_vm13 = vcmp.eq.s32.totalorder %v19750_v44, 1 }
 0x2a9   : > { %v3130_v59 = vsel %vm939_vm1, %v3078_v32, %v19748_v25  ;;  %vm18704_vm14 = vcmp.eq.s32.totalorder %v19751_v45, 1  ;;  %vm18705_vm6 = vcmp.eq.s32.totalorder %v19752_v21, 1  ;;  %vm19753_vm15 = vcmp.eq.s32.totalorder %v19723_v0, 1 }
 0x2aa   : > { %v3133_v8 = vsel %vm939_vm1, %v19749_v47, %v3076_v3  ;;  %vm19754_vm9 = vcmp.eq.s32.totalorder %v19715_v10, 1  ;;  %vm19755_vm10 = vcmp.eq.s32.totalorder %v19717_v16, 1  ;;  %vm19756_vm4 = vcmp.eq.s32.totalorder %v19719_v33, 1  ;;  %v13595_v47 = vpop.permute.xlu1 %3513 }
 0x2ab   : > { %v13581_v25 = vsel %vm19753_vm15, %v3133_v8, -inf  ;;  %v13585_v32 = vsel %vm19754_vm9, %v3132_v63, -inf  ;;  %v13589_v15 = vsel %vm19755_vm10, %v3131_v61, -inf  ;;  %v13593_v3 = vsel %vm19756_vm4, %v3130_v59, -inf  ;;  %19757 = vst [vmem:[#allocation107_spill] sm:$0xff] %v13595_v47  ;;  %v19758_v61 = vld [vmem:[#allocation43_spill] sm:$0xff] }
 0x2ac   : > { %vm19759_vm9 = vcmp.eq.s32.totalorder %v19758_v61, 1  ;;  %v3298_v59 = vmax.f32 %v12790_v49, %v3266_v42  ;;  %v3299_v33 = vmax.f32 %v12812_v58, %v3267_v14  ;;  %v3300_v0 = vmax.f32 %v12795_v2, %v3268_v60 }
 0x2ad   : > { %v3271_v10 = vsel %vm19759_vm9, %v3258_v22, -inf  ;;  %v3301_v9 = vmax.f32 %v12817_v57, %v3269_v62  ;;  %v3302_v4 = vmax.f32 %v12800_v31, %v3270_v53  ;;  %v19760_v63 = vrot.slane %v13091_v30, 6 }
 0x2ae   : > { %v3303_v8 = vmax.f32 %v19712_v20, %v3271_v10  ;;  %v19762_v29 = vrot.slane %v19761_v36, 6  ;;  %v3330_v22 = vrot.slane %v3298_v59, 6  ;;  %v3331_v35 = vrot.slane %v3299_v33, 6  ;;  %v19764_v20 = vld [vmem:[#allocation118_spill] sm:$0xff] }
 0x2af   : > { %v3332_v42 = vrot.slane %v3300_v0, 6  ;;  %vm18701_vm4 = vcmp.eq.s32.totalorder %v13595_v47, 1  ;;  %v3333_v14 = vrot.slane %v3301_v9, 6  ;;  %v3334_v60 = vrot.slane %v3302_v4, 6 }
 0x2b0   : > { %v3375_v16 = vsel %vm3361_vm5, %v19762_v29, %v19760_v63  ;;  %v3335_v2 = vrot.slane %v3303_v8, 6  ;;  %v3391_v36 = vsel %vm3361_vm5, %v3330_v22, %v3331_v35  ;;  %v19763_v53 = vrot.slane %v12967_v23, 6 }
 0x2b1   : > { %v3604_v62 = vsel %vm18701_vm4, %v3375_v16, -inf  ;;  %v3390_v10 = vsel %vm3361_vm5, %v3331_v35, %v3332_v42  ;;  %v19765_v31 = vrot.slane %v19764_v20, 6  ;;  %v3388_v57 = vsel %vm3361_vm5, %v3333_v14, %v3334_v60 }
 0x2b2   : > { %v3392_v29 = vsel %vm3361_vm5, %v19763_v53, %v3330_v22  ;;  %v13631_v63 = vmax.f32 %v13091_v30, %v3604_v62  ;;  %v3387_v16 = vsel %vm3361_vm5, %v3334_v60, %v3335_v2  ;;  %v3389_v35 = vsel %vm3361_vm5, %v3332_v42, %v3333_v14  ;;  %v13659_v53 = vpop.permute.xlu2 %3534 }
 0x2b3   : > { %v3386_v47 = vsel %vm3361_vm5, %v3335_v2, %v19765_v31  ;;  %v3587_v22 = vsel %vm3555_vm12, %v3392_v29, -inf  ;;  %v3588_v30 = vsel %vm18703_vm0, %v3391_v36, -inf  ;;  %v3589_v62 = vsel %vm3557_vm8, %v3390_v10, -inf  ;;  %19766 = vst [vmem:[#allocation79_spill] sm:$0xff] %v13659_v53 }
 0x2b4   : > { %v3590_v31 = vsel %vm3558_vm3, %v3389_v35, -inf  ;;  %v3591_v2 = vsel %vm18702_vm13, %v3388_v57, -inf  ;;  %v3592_v60 = vsel %vm18705_vm6, %v3387_v16, -inf  ;;  %v3593_v42 = vsel %vm18704_vm14, %v3386_v47, -inf }
 0x2b5   : > { %v13657_v14 = vmax.f32 %v3298_v59, %v3587_v22  ;;  %v3620_v36 = vmax.f32 %v3299_v33, %v3588_v30  ;;  %v3621_v29 = vmax.f32 %v3300_v0, %v3589_v62  ;;  %v3622_v54 = vmax.f32 %v3301_v9, %v3590_v31  ;;  %v19769_v62 = vld [vmem:[#allocation125_spill] sm:$0xff] }
 0x2b6   : > { %v3623_v10 = vmax.f32 %v3302_v4, %v3591_v2  ;;  %v3624_v41 = vmax.f32 %v3303_v8, %v3592_v60  ;;  %v3625_v35 = vmax.f32 %v19764_v20, %v3593_v42  ;;  %v3668_v57 = vrot.slane %v13631_v63, 7 }
 0x2b7   : > { %v18706_v44 = vrot.slane %v13657_v14, 7  ;;  %v3652_v21 = vrot.slane %v3620_v36, 7  ;;  %v3653_v16 = vrot.slane %v3621_v29, 7  ;;  %v3654_v19 = vrot.slane %v3622_v54, 7 }
 0x2b8   : > { %v3655_v45 = vrot.slane %v3623_v10, 7  ;;  %vm18736_vm10 = vcmp.eq.s32.totalorder %v13659_v53, 1  ;;  %v3656_v47 = vrot.slane %v3624_v41, 7  ;;  %v3657_v59 = vrot.slane %v3625_v35, 7  ;;  %v19832_v53 = vld [vmem:[#allocation49_spill] sm:$0xff] }
 0x2b9   : > { %v19767_v33 = vrot.slane %v13220_v17, 7  ;;  %v19768_v0 = vrot.slane %v12165_v48, 7  ;;  %v3709_v8 = vsel %vm1388_vm2, %v3653_v16, %v3654_v19  ;;  %v3710_v22 = vsel %vm1388_vm2, %v3652_v21, %v3653_v16 }
 0x2ba   : > { %v3708_v20 = vsel %vm1388_vm2, %v3654_v19, %v3655_v45  ;;  %v3711_v30 = vsel %vm1388_vm2, %v18706_v44, %v3652_v21  ;;  %v19770_v31 = vrot.slane %v19769_v62, 7  ;;  %v3706_v2 = vsel %vm1388_vm2, %v3656_v47, %v3657_v59 }
 0x2bb   : > { %v3694_v9 = vsel %vm1388_vm2, %v3668_v57, %v19767_v33  ;;  %v3695_v4 = vsel %vm1388_vm2, %v19768_v0, %v3668_v57  ;;  %v3707_v60 = vsel %vm1388_vm2, %v3655_v45, %v3656_v47  ;;  %vm19771_vm15 = vcmp.eq.s32.totalorder %v19735_v34, 1  ;;  %v19776_v33 = vld [vmem:[#allocation51_spill] sm:$0xff]  ;;  %v19778_v0 = vld [vmem:[#allocation52_spill] sm:$0xff] }
 0x2bc   : > { %v3705_v48 = vsel %vm1388_vm2, %v3657_v59, %v19770_v31  ;;  %v3716_v19 = vsel %vm19771_vm15, %v3711_v30, -inf  ;;  %vm19772_vm9 = vcmp.eq.s32.totalorder %v19737_v5, 1  ;;  %vm19773_vm4 = vcmp.eq.s32.totalorder %v19739_v11, 1  ;;  %v19827_v11 = vld [vmem:[#allocation179_spill] sm:$0xff]  ;;  %v19829_v34 = vld [vmem:[#allocation104_spill] sm:$0xff] }
 0x2bd   : > { %v3717_v42 = vsel %vm19772_vm9, %v3710_v22, -inf  ;;  %v3718_v21 = vsel %vm19773_vm4, %v3709_v8, -inf  ;;  %vm19774_vm13 = vcmp.eq.s32.totalorder %v19741_v56, 1  ;;  %vm19775_vm0 = vcmp.eq.s32.totalorder %v19758_v61, 1 }
 0x2be   : > { %v3719_v57 = vsel %vm19774_vm13, %v3708_v20, -inf  ;;  %v3720_v16 = vsel %vm19775_vm0, %v3707_v60, -inf  ;;  %vm19777_vm14 = vcmp.eq.s32.totalorder %v19776_v33, 1  ;;  %vm19779_vm6 = vcmp.eq.s32.totalorder %v19778_v0, 1 }
 0x2bf   : > { %v3721_v59 = vsel %vm19777_vm14, %v3706_v2, -inf  ;;  %v3722_v45 = vsel %vm19779_vm6, %v3705_v48, -inf  ;;  %vm19780_vm15 = vcmp.eq.s32.totalorder %v19613_v38, 1  ;;  %vm19781_vm9 = vcmp.eq.s32.totalorder %v19615_v46, 1  ;;  %v19841_v46 = vld [vmem:[#allocation193_spill] sm:$0xff] }
 0x2c0   : > { %v3732_v47 = vsel %vm19780_vm15, %v3695_v4, -inf  ;;  %v3733_v22 = vsel %vm19781_vm9, %v3694_v9, -inf  ;;  %v3748_v30 = vmax.f32 %v3620_v36, %v3716_v19  ;;  %v3749_v8 = vmax.f32 %v3621_v29, %v3717_v42  ;;  %v19788_v4 = vld [vmem:[#allocation109_spill] sm:$0xff]  ;;  %v19792_v42 = vld [vmem:[#allocation150_spill] sm:$0xff] }
 0x2c1   : > { %v3750_v31 = vmax.f32 %v3622_v54, %v3718_v21  ;;  %v3751_v44 = vmax.f32 %v3623_v10, %v3719_v57  ;;  %v3752_v20 = vmax.f32 %v3624_v41, %v3720_v16  ;;  %v3753_v56 = vmax.f32 %v3625_v35, %v3721_v59  ;;  %v19786_v10 = vld [vmem:[#allocation123_spill] sm:$0xff] }
 0x2c2   : > { %v3754_v60 = vmax.f32 %v19769_v62, %v3722_v45  ;;  %v3764_v33 = vmax.f32 %v13631_v63, %v3732_v47  ;;  %v3765_v2 = vmax.f32 %v13220_v17, %v3733_v22  ;;  %v19782_v48 = vmax.f32 %v13530_v37, %v13581_v25  ;;  %v19789_v62 = vld [vmem:[#allocation119_spill] sm:$0xff] }
 0x2c3   : > { %v19783_v9 = vmax.f32 %v13527_v28, %v13585_v32  ;;  %v19784_v41 = vmax.f32 %v13532_v50, %v13589_v15  ;;  %v19785_v63 = vmax.f32 %v13534_v24, %v13593_v3  ;;  %v19787_v25 = vmax.f32 %v19747_v52, %v19786_v10  ;;  %v19791_v32 = vld [vmem:[#allocation129_spill] sm:$0xff]  ;;  %v19802_v47 = vld [vmem:[#allocation127_spill] sm:$0xff] }
 0x2c4   : > { %v13715_v38 = vmax.f32 %v19782_v48, %v3748_v30  ;;  %v19790_v19 = vmax.f32 %v19788_v4, %v19789_v62  ;;  %v19793_v21 = vmax.f32 %v19791_v32, %v19792_v42  ;;  %v3611_v24 = vsel %vm18736_vm10, %v13478_v1, -inf  ;;  %v19825_v32 = vld [vmem:[#allocation138_spill] sm:$0xff]  ;;  %v19849_v42 = vld [vmem:[#allocation220_spill] sm:$0xff] }
 0x2c5   : > { %v13720_v36 = vmax.f32 %v19783_v9, %v3749_v8  ;;  %v13725_v54 = vmax.f32 %v19784_v41, %v3750_v31  ;;  %v13730_v29 = vmax.f32 %v19785_v63, %v3751_v44  ;;  %v3784_v35 = vmax.f32 %v19787_v25, %v3752_v20  ;;  %v19805_v31 = vld [vmem:[#allocation164_spill] sm:$0xff]  ;;  %v19808_v63 = vld [vmem:[#allocation39_spill] sm:$0xff]  ;;  %v19811_v25 = vld [vmem:[#allocation38_spill] sm:$0xff] }
 0x2c6   : > { %v13738_v28 = vmax.f32 %v19790_v19, %v3753_v56  ;;  %v13743_v50 = vmax.f32 %v19793_v21, %v3754_v60  ;;  %v19794_v44 = vmax.f32 %v19604_v39, %v13491_v27  ;;  %v19795_v52 = vmax.f32 %v12955_v13, %v13209_v18  ;;  %v19799_v13 = vld [vmem:[#allocation166_spill] sm:$0xff]  ;;  %v19815_v19 = vld [vmem:[#allocation148_spill] sm:$0xff] }
 0x2c7   : > { %v13760_v56 = vmax.f32 %v13725_v54, %v13715_v38  ;;  %v13764_v57 = vmax.f32 %v13730_v29, %v13720_v36  ;;  %v13767_v1 = vmax.f32 %v3784_v35, %v13725_v54  ;;  %v13779_v18 = vsel %vm18735_vm11, %v13441_v7, -inf  ;;  %v19803_v7 = vld [vmem:[#allocation175_spill] sm:$0xff] }
 0x2c8   : > { %v13751_v15 = vmax.f32 %v19794_v44, %v3764_v33  ;;  %v13756_v3 = vmax.f32 %v19795_v52, %v3765_v2  ;;  %v13771_v39 = vmax.f32 %v13738_v28, %v13730_v29  ;;  %v13774_v27 = vmax.f32 %v13743_v50, %v3784_v35  ;;  %19798 = vst [vmem:[#allocation125_spill] sm:$0xff] %v13779_v18  ;;  %v19801_v33 = vld [vmem:[#allocation167_spill] sm:$0xff]  ;;  %v19806_v2 = vld [vmem:[#allocation60_spill] sm:$0xff]  ;;  %v19818_v52 = vld [vmem:[#allocation89_spill] sm:$0xff] }
 0x2c9   : > { %v13783_v16 = vmax.f32 %v19799_v13, %v13738_v28  ;;  %v13787_v59 = vmax.f32 %v19801_v33, %v13743_v50  ;;  %v18709_v45 = vrot.slane %v12805_v12, 7  ;;  %v3228_v20 = vrot.slane %v19805_v31, 7  ;;  %v19834_v18 = vld [vmem:[#allocation91_spill] sm:$0xff] }
 0x2ca   : > { %19796 = vst [vmem:[#allocation160_spill] sm:$0xff] %v13756_v3  ;;  %v13792_v22 = vmax.f32 %v19802_v47, %v13751_v15  ;;  %v13796_v30 = vmax.f32 %v13774_v27, %v13760_v56  ;;  %v13800_v8 = vmax.f32 %v19803_v7, %v13771_v39  ;;  %v13804_v60 = vmax.f32 %v13399_v55, %v3611_v24  ;;  %v19821_v24 = vld [vmem:[#allocation177_spill] sm:$0xff]  ;;  %v19836_v7 = vld [vmem:[#allocation10_spill] sm:$0xff]  ;;  %v13891_v55 = vpop.permute.xlu0 %2975 }
 0x2cb   : > { %19797 = vst [vmem:[#allocation118_spill] sm:$0xff] %v13771_v39  ;;  %v13808_v48 = vmax.f32 %v19806_v2, %v13756_v3  ;;  %v13812_v9 = vmax.f32 %v13783_v16, %v13764_v57  ;;  %v13816_v41 = vmax.f32 %v13787_v59, %v13767_v1  ;;  %vm19809_vm0 = vcmp.eq.s32.totalorder %v19808_v63, 1  ;;  %v19857_v3 = vld [vmem:[#allocation106_spill] sm:$0xff] }
 0x2cc   : > { %19800 = vst [vmem:[#allocation123_spill] sm:$0xff] %v13783_v16  ;;  %v13821_v10 = vsel %vm19809_vm0, %v13452_v51, -inf  ;;  %vm19812_vm13 = vcmp.eq.s32.totalorder %v19811_v25, 1  ;;  %v13830_v62 = vmax.f32 %v13751_v15, %v19802_v47  ;;  %vm2978_vm14 = vcmp.eq.s32.totalorder %v19818_v52, 1  ;;  %v19819_v47 = vld [vmem:[#allocation100_spill] sm:$0xff] }
 0x2cd   : > { %19804 = vst [vmem:[#allocation109_spill] sm:$0xff] %v13800_v8  ;;  %v13826_v4 = vsel %vm19812_vm13, %v13446_v6, -inf  ;;  %v3237_v6 = vsel %vm1388_vm2, %v18709_v45, %v3228_v20  ;;  %vm2977_vm6 = vcmp.eq.s32.totalorder %v19819_v47, 1  ;;  %v13849_v25 = vmax.f32 %v19821_v24, %v13792_v22 }
 0x2ce   : > { %19807 = vst [vmem:[#allocation119_spill] sm:$0xff] %v13808_v48  ;;  %v19822_v44 = vrot.slane %v19815_v19, 7  ;;  %v2625_v63 = vrot.slane %v12790_v49, 1  ;;  %v13863_v61 = vmax.f32 %v19825_v32, %v13808_v48  ;;  %v13867_v5 = vmax.f32 %v13830_v62, %v19827_v11 }
 0x2cf   : > { %19810 = vst [vmem:[#allocation129_spill] sm:$0xff] %v13821_v10  ;;  %vm19830_vm4 = vcmp.eq.s32.totalorder %v19829_v34, 1  ;;  %v19833_v40 = vrot.slane %v19832_v53, 1  ;;  %vm19835_vm15 = vcmp.eq.s32.totalorder %v19834_v18, 1  ;;  %vm19837_vm9 = vcmp.eq.s32.totalorder %v19836_v7, 1 }
 0x2d0   : > { %19813 = vst [vmem:[#allocation150_spill] sm:$0xff] %v13826_v4  ;;  %v3236_v51 = vsel %vm1388_vm2, %v3228_v20, %v19822_v44  ;;  %v3292_v20 = vsel %vm19830_vm4, %v3237_v6, -inf  ;;  %v19831_v44 = vrot.slane %v12812_v58, 1  ;;  %vm19839_vm0 = vcmp.eq.s32.totalorder %v19838_v26, 1  ;;  %v19840_v6 = vld [vmem:[#allocation73_spill] sm:$0xff]  ;;  %v8222_v4 = vld [vmem:[%s18089_s4 + $0xf8] sm:$0xff] }
 0x2d1   : > { %19814 = vst [vmem:[#allocation166_spill] sm:$0xff] %v13830_v62  ;;  %v2686_v0 = vsel %vm939_vm1, %v19833_v40, %v2625_v63  ;;  %v3293_v32 = vsel %vm19835_vm15, %v3236_v51, -inf  ;;  %v19843_v51 = vld [vmem:[#allocation184_spill] sm:$0xff]  ;;  %v13903_v18 = vmax.f32 %v19805_v31, %v3292_v20  ;;  %v3844_v48 = vmax.f32 %v13715_v38, %v13725_v54  ;;  %v8199_v58 = vld [vmem:[%s18089_s4 + $0x40] sm:$0xff]  ;;  %6495 = vmatpush.bf16.msrb.mxu0 %v8222_v4 }
 0x2d2   : > { %19826 = vst [vmem:[#allocation167_spill] sm:$0xff] %v13863_v61  ;;  %v2685_v45 = vsel %vm939_vm1, %v2625_v63, %v19831_v44  ;;  %v2688_v10 = vsel %vm19837_vm9, %v2686_v0, -inf  ;;  %v8200_v44 = vld [vmem:[%s18089_s4 + $0x48] sm:$0xff]  ;;  %v3231_v0 = vrot.slane %v19843_v51, 7  ;;  %v13915_v39 = vmax.f32 %v19815_v19, %v3293_v32  ;;  %v19845_v20 = vld [vmem:[#allocation53_spill] sm:$0xff]  ;;  %v13930_v19 = vpop.permute.xlu2 %3543 }
 0x2d3   : > { %19828 = vst [vmem:[#allocation127_spill] sm:$0xff] %v13867_v5  ;;  %v2689_v34 = vsel %vm19839_vm0, %v2685_v45, -inf  ;;  %v2720_v40 = vmax.f32 %v19832_v53, %v2688_v10  ;;  %v8214_v45 = vld [vmem:[%s18089_s4 + $0xb8] sm:$0xff]  ;;  %v13908_v10 = vmax.f32 %v13725_v54, %v3784_v35  ;;  %2404 = vmatpush.bf16.msra.mxu1 %v8200_v44  ;;  %v19846_v31 = vrot.slane %v19845_v20, 7  ;;  %v19892_v5 = vld [vmem:[#allocation174_spill] sm:$0xff] }
 0x2d4   : > { %19842 = vst [vmem:[#allocation175_spill] sm:$0xff] %v13891_v55  ;;  %v2721_v63 = vmax.f32 %v12790_v49, %v2689_v34  ;;  %v3848_v34 = vmax.f32 %v3784_v35, %v13743_v50  ;;  %4499 = vmatpush.bf16.msra.mxu3 %v8214_v45  ;;  %vm18734_vm13 = vcmp.eq.s32.totalorder %v13891_v55, 1  ;;  %v19847_v54 = vrot.slane %v19840_v6, 7  ;;  %v19851_v45 = vld [vmem:[#allocation189_spill] sm:$0xff] }
 0x2d5   : > { %19844 = vst [vmem:[#allocation89_spill] sm:$0xff] %v13903_v18  ;;  %v2752_v12 = vrot.slane %v2720_v40, 2  ;;  %v3233_v16 = vsel %vm1388_vm2, %v3231_v0, %v19846_v31  ;;  %v3850_v32 = vmax.f32 %v13743_v50, %v19801_v33  ;;  %v19850_v21 = vrot.slane %v19849_v42, 2  ;;  %v19855_v33 = vld [vmem:[#allocation124_spill] sm:$0xff] }
 0x2d6   : > { %v2753_v2 = vrot.slane %v2721_v63, 2  ;;  %v3234_v35 = vsel %vm1388_vm2, %v19847_v54, %v3231_v0  ;;  %v13928_v44 = vmax.f32 %v3844_v48, %v3848_v34  ;;  %19848 = vst [vmem:[#allocation100_spill] sm:$0xff] %v13930_v19  ;;  %v19852_v6 = vrot.slane %v19851_v45, 2  ;;  %v19853_v54 = vld [vmem:[#allocation65_spill] sm:$0xff]  ;;  %v19856_v48 = vld [vmem:[#allocation143_spill] sm:$0xff] }
 0x2d7   : > { %vm19854_vm4 = vcmp.eq.s32.totalorder %v19853_v54, 1  ;;  %vm3554_vm15 = vcmp.eq.s32.totalorder %v19855_v33, 1  ;;  %vm3585_vm9 = vcmp.eq.s32.totalorder %v19856_v48, 1  ;;  %vm19858_vm0 = vcmp.eq.s32.totalorder %v19857_v3, 1  ;;  %2405 = vmatpush.bf16.msra.mxu1 %v8199_v58  ;;  %v19879_v3 = vld [vmem:[#allocation128_spill] sm:$0xff] }
 0x2d8   : > { %v2814_v31 = vsel %vm2784_vm7, %v2753_v2, %v19850_v21  ;;  %v2815_v4 = vsel %vm2784_vm7, %v2752_v12, %v2753_v2  ;;  %v2816_v0 = vsel %vm2784_vm7, %v19852_v6, %v2752_v12  ;;  %v3296_v50 = vsel %vm19854_vm4, %v3233_v16, -inf }
 0x2d9   : > { %v3009_v42 = vsel %vm2977_vm6, %v2815_v4, -inf  ;;  %v3010_v21 = vsel %vm2978_vm14, %v2814_v31, -inf  ;;  %v3040_v2 = vsel %vm18734_vm13, %v2816_v0, -inf  ;;  %v3295_v62 = vsel %vm19858_vm0, %v3234_v35, -inf }
 0x2da   : > { %v13955_v16 = vmax.f32 %v2720_v40, %v3009_v42  ;;  %v13957_v6 = vmax.f32 %v2721_v63, %v3010_v21  ;;  %v13960_v54 = vmax.f32 %v19851_v45, %v3040_v2  ;;  %vm18754_vm4 = vcmp.eq.s32.totalorder %v13930_v19, 1  ;;  %v19860_v45 = vld [vmem:[#allocation135_spill] sm:$0xff] }
 0x2db   : > { %v13965_v31 = vmax.f32 %v19843_v51, %v3295_v62  ;;  %v3328_v0 = vmax.f32 %v19845_v20, %v3296_v50  ;;  %v13969_v58 = vmax.f32 %v13908_v10, %v3850_v32  ;;  %v13975_v42 = vmax.f32 %v3848_v34, %v19860_v45  ;;  %v19866_v50 = vld [vmem:[#allocation41_spill] sm:$0xff] }
 0x2dc   : > { %v3073_v40 = vrot.slane %v13955_v16, 1  ;;  %v3074_v63 = vrot.slane %v13957_v6, 1  ;;  %v13979_v62 = vmax.f32 %v3850_v32, %v19821_v24  ;;  %v19861_v12 = vrot.slane %v13530_v37, 1  ;;  %v13996_v24 = vld [vmem:[%s18085_s0 + $0x80] sm:$0xff]  ;;  %v19863_v37 = vld [vmem:[#allocation170_spill] sm:$0xff] }
 0x2dd   : > { %19859 = vst [vmem:[#allocation177_spill] sm:$0xff] %v13965_v31  ;;  %v3360_v2 = vrot.slane %v3328_v0, 6  ;;  %v19862_v34 = vrot.slane %v13960_v54, 1  ;;  %vm4957_vm0 = vcmp.lt.s32.totalorder %v13996_v24, 13  ;;  %vm19864_vm13 = vcmp.eq.s32.totalorder %v19836_v7, 1 }
 0x2de   : > { %v3134_v4 = vsel %vm939_vm1, %v3074_v63, %v19861_v12  ;;  %v3135_v35 = vsel %vm939_vm1, %v3073_v40, %v3074_v63  ;;  %vm19865_vm11 = vcmp.eq.s32.totalorder %v19838_v26, 1  ;;  %vm19867_vm10 = vcmp.eq.s32.totalorder %v19866_v50, 1 }
 0x2df   : > { %v3136_v45 = vsel %vm939_vm1, %v19862_v34, %v3073_v40  ;;  %v3137_v12 = vsel %vm19864_vm13, %v3135_v35, -inf  ;;  %v3138_v63 = vsel %vm19865_vm11, %v3134_v4, -inf  ;;  %v19869_v40 = vrot.slane %v13915_v39, 6 }
 0x2e0   : > { %v14007_v21 = vsel %vm19867_vm10, %v3136_v45, -inf  ;;  %v19870_v34 = vrot.slane %v13903_v18, 6  ;;  %v3169_v51 = vmax.f32 %v13955_v16, %v3137_v12  ;;  %v3170_v32 = vmax.f32 %v13957_v6, %v3138_v63  ;;  %v6844_v6 = vld [vmem:[%s18088_s3] sm:$0x3]  ;;  %v19883_v18 = vld [vmem:[#allocation66_spill] sm:$0xff] }
 0x2e1   : > { %19868 = vst [vmem:[#allocation138_spill] sm:$0xff] %v14007_v21  ;;  %v19871_v4 = vrot.slane %v13965_v31, 6  ;;  %v19872_v55 = vrot.slane %v12967_v23, 6  ;;  %vm19878_vm13 = vcmask 1041408  }
 0x2e2   : > { %v3365_v20 = vsel %vm3361_vm5, %v19870_v34, %v19869_v40  ;;  %v19873_v34 = vmov 0  }
 0x2e3   : > { %v3362_v45 = vsel %vm3361_vm5, %v19871_v4, %v3360_v2  ;;  %v3393_v50 = vsel %vm3361_vm5, %v3360_v2, %v19872_v55  ;;  %v4989_v16 = vsel %vm4957_vm0, 1, %v19873_v34  ;;  %v8848_v55 = vld [vmem:[%s18085_s0 + $0x88] sm:$0xff]  ;;  %v19874_v2 = vld [vmem:[#allocation213_spill] sm:$0xff]  ;;  %vm19884_vm0 = vcmp.eq.s32.totalorder %v19883_v18, 1 }
 0x2e4   : > { %v3586_v12 = vsel %vm3554_vm15, %v3393_v50, -inf  ;;  %v3617_v63 = vsel %vm3585_vm9, %v3362_v45, -inf  ;;  %5054 = vperm.xlu1 %8283, %v4989_v16   ;;  %vm4958_vm11 = vcmp.lt.s32.totalorder %v8848_v55, 13  ;;  %vm5533_vm10 = vcmp.ge.s32.totalorder %v19874_v2, 3  ;;  %v14046_v50 = vpop.permute.xlu1 %3522 }
 0x2e5   : > { %v3618_v4 = vmax.f32 %v12967_v23, %v3586_v12  ;;  %v14042_v35 = vmax.f32 %v3328_v0, %v3617_v63  ;;  %v4990_v40 = vsel %vm4958_vm11, 1, %v19873_v34  ;;  %v5565_v33 = vsel %vm5533_vm10, 1, %v19873_v34  ;;  %19876 = vst [vmem:[#allocation49_spill] sm:$0xff] %v14046_v50  ;;  %v19881_v0 = vld [vmem:[#allocation67_spill] sm:$0xff] }
 0x2e6   : > { %v3614_v16 = vsel %vm18754_vm4, %v3365_v20, -inf  ;;  %5057 = vperm.xlu2 %8284, %v4990_v40   ;;  %5628 = vperm.xlu0 %8282, %v5565_v33   ;;  %v6850_v2 = vsel %vm19878_vm13, %v6844_v6, 0  ;;  %v19880_v23 = vrot.slane %v19879_v3, 7  ;;  %v19882_v12 = vrot.slane %v19881_v0, 7 }
 0x2e7   : > { %19875 = vst [vmem:[#allocation179_spill] sm:$0xff] %v14042_v35  ;;  %v3650_v21 = vrot.slane %v3618_v4, 7  ;;  %v18749_v31 = vrot.slane %v14042_v35, 7  ;;  %6859 = vmatpush.bf16.msrb.mxu1 %v6850_v2  ;;  %v3845_v20 = vmax.f32 %v13720_v36, %v13730_v29  ;;  %vm18782_vm11 = vcmp.eq.s32.totalorder %v14046_v50, 1  ;;  %v8213_v2 = vld [vmem:[%s18089_s4 + $0xb0] sm:$0xff] }
 0x2e8   : > { %v3244_v63 = vsel %vm1388_vm2, %v19882_v12, %v19880_v23  ;;  %v3847_v40 = vmax.f32 %v13730_v29, %v13738_v28  ;;  %v14070_v6 = vmax.f32 %v13738_v28, %v19799_v13  ;;  %v14072_v23 = vpop.permute.xlu0 %3519  ;;  %v19886_v12 = vrot.slane %v13657_v14, 7  ;;  %v19887_v28 = vld [vmem:[#allocation154_spill] sm:$0xff]  ;;  %4500 = vmatpush.bf16.msra.mxu3 %v8213_v2  ;;  %v19895_v2 = vld [vmem:[#allocation145_spill] sm:$0xff]  ;;  %v19920_v50 = vld [vmem:[#allocation199_spill] sm:$0xff] }
 0x2e9   : > { %v3285_v45 = vsel %vm19884_vm0, %v3244_v63, -inf  ;;  %19885 = vst [vmem:[#allocation10_spill] sm:$0xff] %v14072_v23  ;;  %v3713_v29 = vsel %vm1388_vm2, %v18749_v31, %v3650_v21  ;;  %vm3574_vm10 = vcmp.eq.s32.totalorder %v14072_v23, 1  ;;  %v14088_v13 = vmax.f32 %v19887_v28, %v13774_v27  ;;  %v19888_v63 = vld [vmem:[#allocation32_spill] sm:$0xff]  ;;  %v19893_v28 = vld [vmem:[#allocation203_spill] sm:$0xff] }
 0x2ea   : > { %v3317_v33 = vmax.f32 %v19879_v3, %v3285_v45  ;;  %v3712_v45 = vsel %vm1388_vm2, %v3650_v21, %v19886_v12  ;;  %vm19889_vm13 = vcmp.eq.s32.totalorder %v19888_v63, 1  ;;  %v19890_v3 = vld [vmem:[#allocation45_spill] sm:$0xff]  ;;  %v4005_v12 = vmax.f32 %v3845_v20, %v14070_v6  ;;  %v8212_v21 = vld [vmem:[%s18089_s4 + $0xa8] sm:$0xff] }
 0x2eb   : > { %v3714_v19 = vsel %vm19889_vm13, %v3713_v29, -inf  ;;  %vm19891_vm0 = vcmp.eq.s32.totalorder %v19890_v3, 1  ;;  %v14100_v27 = vmax.f32 %v3847_v40, %v19892_v5  ;;  %v14104_v29 = vmax.f32 %v19827_v11, %v13787_v59 }
 0x2ec   : > { %v3715_v0 = vsel %vm19891_vm0, %v3712_v45, -inf  ;;  %v3349_v48 = vrot.slane %v3317_v33, 6  ;;  %v3746_v31 = vmax.f32 %v3618_v4, %v3714_v19  ;;  %v19894_v45 = vrot.slane %v19893_v28, 6  ;;  %4501 = vmatpush.bf16.msra.mxu3 %v8212_v21 }
 0x2ed   : > { %v3747_v35 = vmax.f32 %v13657_v14, %v3715_v0  ;;  %v19896_v3 = vrot.slane %v19895_v2, 6  ;;  %v2334_v5 = vpack.c.bf16 %v12790_v49, %v19832_v53  ;;  %v4069_v59 = vmax.f32 %v4005_v12, %v14100_v27  ;;  %v19917_v14 = vld [vmem:[#allocation9_spill] sm:$0xff] }
 0x2ee   : > { %v3372_v20 = vsel %vm3361_vm5, %v3349_v48, %v19894_v45  ;;  %v3778_v19 = vmax.f32 %v3169_v51, %v3746_v31  ;;  %vm5535_vm13 = vcmp.ge.s32.totalorder %v8848_v55, 3 }
 0x2ef   : > { %v3373_v63 = vsel %vm3361_vm5, %v19896_v3, %v3349_v48  ;;  %v14118_v4 = vmax.f32 %v3170_v32, %v3747_v35  ;;  %v3607_v11 = vsel %vm18782_vm11, %v3372_v20, -inf  ;;  %2406 = vmatmul.bf16.vlgmr.msra.gmra.mxu1 %v2334_v5  ;;  %v5567_v55 = vsel %vm5535_vm13, 1, %v19873_v34  ;;  %v19897_v20 = vld [vmem:[#allocation212_spill] sm:$0xff] }
 0x2f0   : > { %v14124_v0 = vmax.f32 %v19893_v28, %v3607_v11  ;;  %v3606_v3 = vsel %vm3574_vm10, %v3373_v63, -inf  ;;  %v14131_v49 = vmax.f32 %v13715_v38, %v3778_v19  ;;  %v14138_v51 = vmax.f32 %v13760_v56, %v3778_v19  ;;  %5634 = vperm.xlu1 %8283, %v5567_v55  }
 0x2f1   : > { %v14135_v53 = vmax.f32 %v13720_v36, %v14118_v4  ;;  %v3842_v31 = vmax.f32 %v3778_v19, %v13715_v38  ;;  %v3843_v35 = vmax.f32 %v14118_v4, %v13720_v36  ;;  %v3638_v63 = vmax.f32 %v3317_v33, %v3606_v3 }
 0x2f2   : > { %v3671_v32 = vrot.slane %v14124_v0, 7  ;;  %v14147_v21 = vmax.f32 %v13767_v1, %v14131_v49  ;;  %v4356_v28 = vmax.f32 %v14131_v49, %v3778_v19  ;;  %v14154_v38 = vmax.f32 %v13915_v39, %v3614_v16  ;;  %v14171_v16 = vld [vmem:[%s18085_s0 + $0x90] sm:$0xff] }
 0x2f3   : > { %v4002_v45 = vmax.f32 %v3842_v31, %v13908_v10  ;;  %v4357_v56 = vmax.f32 %v14135_v53, %v14118_v4  ;;  %v19898_v36 = vrot.slane %v19897_v20, 7  ;;  %v4003_v2 = vmax.f32 %v3843_v35, %v3847_v40  ;;  %v19901_v31 = vld [vmem:[#allocation80_spill] sm:$0xff] }
 0x2f4   : > { %v3670_v5 = vrot.slane %v3638_v63, 7  ;;  %v4360_v1 = vmax.f32 %v14147_v21, %v14138_v51  ;;  %v19899_v10 = vmax.f32 %v13928_v44, %v13969_v58  ;;  %vm4959_vm0 = vcmp.lt.s32.totalorder %v14171_v16, 13 }
 0x2f5   : > { %v3691_v33 = vsel %vm1388_vm2, %v3671_v32, %v19898_v36  ;;  %v4066_v3 = vmax.f32 %v4002_v45, %v13928_v44  ;;  %vm19902_vm13 = vcmp.eq.s32.totalorder %v19901_v31, 1  ;;  %v4067_v35 = vmax.f32 %v4003_v2, %v4005_v12  ;;  %v19919_v31 = vld [vmem:[#allocation188_spill] sm:$0xff] }
 0x2f6   : > { %v14165_v11 = vmax.f32 %v19899_v10, %v4356_v28  ;;  %v3736_v40 = vsel %vm19902_vm13, %v3691_v33, -inf  ;;  %v14176_v55 = vmax.f32 %v4069_v59, %v4357_v56  ;;  %v3692_v36 = vsel %vm1388_vm2, %v3670_v5, %v3671_v32  ;;  %v19909_v59 = vld [vmem:[#allocation200_spill] sm:$0xff] }
 0x2f7   : > { %v19904_v28 = vmax.f32 %v13975_v42, %v13979_v62  ;;  %v14185_v45 = vmax.f32 %v4066_v3, %v3778_v19  ;;  %v19907_v48 = vrot.slane %v13220_v17, 7  ;;  %v19908_v12 = vrot.slane %v13960_v54, 1 }
 0x2f8   : > { %19900 = vst [vmem:[#allocation13_spill] sm:$0xff] %v14165_v11  ;;  %v4622_v10 = vrot.slane %v14165_v11, 1  ;;  %v19910_v56 = vrot.slane %v19909_v59, 1  ;;  %v14199_v2 = vmax.f32 %v4067_v35, %v14118_v4  ;;  %v18758_v19 = vrot.slane %v14176_v55, 1 }
 0x2f9   : > { %19903 = vst [vmem:[#allocation193_spill] sm:$0xff] %v14176_v55  ;;  %v14183_v44 = vmax.f32 %v19904_v28, %v4360_v1  ;;  %v3693_v33 = vsel %vm1388_vm2, %v19907_v48, %v3670_v5  ;;  %vm19911_vm13 = vcmp.eq.s32.totalorder %v19883_v18, 1  ;;  %v3768_v17 = vmax.f32 %v19897_v20, %v3736_v40  ;;  %v19914_v40 = vld [vmem:[#allocation130_spill] sm:$0xff] }
 0x2fa   : > { %19906 = vst [vmem:[#allocation189_spill] sm:$0xff] %v14185_v45  ;;  %v3105_v32 = vsel %vm939_vm1, %v19910_v56, %v19908_v12  ;;  %v3734_v1 = vsel %vm19911_vm13, %v3693_v33, -inf  ;;  %v4991_v5 = vsel %vm4959_vm0, 1, %v19873_v34  ;;  %v4621_v28 = vrot.slane %v14199_v2, 1  ;;  %v19912_v12 = vld [vmem:[#allocation90_spill] sm:$0xff] }
 0x2fb   : > { %19905 = vst [vmem:[#allocation220_spill] sm:$0xff] %v14183_v44  ;;  %v3766_v48 = vmax.f32 %v3638_v63, %v3734_v1  ;;  %v4680_v35 = vsel %vm939_vm1, %v4622_v10, %v18758_v19  ;;  %vm19913_vm4 = vcmp.eq.s32.totalorder %v19912_v12, 1  ;;  %5060 = vperm.xlu2 %8284, %v4991_v5   ;;  %vm5534_vm13 = vcmp.ge.s32.totalorder %v13996_v24, 3  ;;  %v19915_v33 = vld [vmem:[#allocation210_spill] sm:$0xff] }
 0x2fc   : > { %v3735_v56 = vsel %vm19913_vm4, %v3692_v36, -inf  ;;  %v19916_v63 = vmax.f32 %v19914_v40, %v19915_v33  ;;  %vm19918_vm0 = vcmp.eq.s32.totalorder %v19917_v14, 1  ;;  %v19921_v23 = vmax.f32 %v19919_v31, %v19920_v50  ;;  %v8211_v36 = vld [vmem:[%s18089_s4 + $0xa0] sm:$0xff]  ;;  %v19924_v50 = vld [vmem:[#allocation54_spill] sm:$0xff]  ;;  %v19926_v31 = vld [vmem:[#allocation147_spill] sm:$0xff] }
 0x2fd   : > { %v4686_v3 = vsel %vm19918_vm0, %v4680_v35, -inf  ;;  %v5566_v19 = vsel %vm5534_vm13, 1, %v19873_v34  ;;  %v4681_v24 = vsel %vm939_vm1, %v4621_v28, %v4622_v10  ;;  %v19922_v5 = vrot.slane %v14185_v45, 1  ;;  %4502 = vmatpush.bf16.msra.mxu3 %v8211_v36 }
 0x2fe   : > { %v14220_v1 = vmax.f32 %v19916_v63, %v3768_v17  ;;  %v3798_v18 = vmax.f32 %v19921_v23, %v3766_v48  ;;  %v14238_v14 = vmax.f32 %v14165_v11, %v4686_v3  ;;  %5631 = vperm.xlu0 %8282, %v5566_v19   ;;  %v19925_v23 = vrot.slane %v19924_v50, 7  ;;  %v8210_v63 = vld [vmem:[%s18089_s4 + $0x98] sm:$0xff] }
 0x2ff   : > { %v4682_v17 = vsel %vm939_vm1, %v19922_v5, %v4621_v28  ;;  %v19927_v48 = vrot.slane %v19926_v31, 7  ;;  %v19928_v40 = vmax.f32 %v13816_v41, %v13796_v30  ;;  %v19929_v10 = vmax.f32 %v19841_v46, %v13849_v25  ;;  %v19933_v5 = vld [vmem:[#allocation42_spill] sm:$0xff] }
 0x300   : > { %19923 = vst [vmem:[#allocation135_spill] sm:$0xff] %v14238_v14  ;;  %vm19931_vm4 = vcmp.eq.s32.totalorder %v19836_v7, 1  ;;  %vm19932_vm13 = vcmp.eq.s32.totalorder %v19838_v26, 1  ;;  %v3767_v28 = vmax.f32 %v14124_v0, %v3735_v56  ;;  %vm19934_vm0 = vcmp.eq.s32.totalorder %v19933_v5, 1 }
 0x301   : > { %v3241_v35 = vsel %vm1388_vm2, %v19927_v48, %v19925_v23  ;;  %v14252_v33 = vmax.f32 %v19929_v10, %v19928_v40  ;;  %v4684_v3 = vsel %vm19931_vm4, %v4682_v17, -inf  ;;  %v4685_v19 = vsel %vm19932_vm13, %v4681_v24, -inf  ;;  %v5007_v48 = vpop.permute.xlu2 %5006  ;;  %v14283_v17 = vpop.permute.xlu1 %3531  ;;  %v19941_v10 = vld [vmem:[#allocation72_spill] sm:$0xff]  ;;  %v19944_v24 = vld [vmem:[#allocation201_spill] sm:$0xff]  ;;  %4503 = vmatpush.bf16.msra.mxu3 %v8210_v63 }
 0x302   : > { %v14264_v23 = vsel %vm19934_vm0, %v3105_v32, -inf  ;;  %v14267_v40 = vmax.f32 %v14185_v45, %v4684_v3  ;;  %v4717_v7 = vmax.f32 %v14199_v2, %v4685_v19  ;;  %v19937_v0 = vmax.f32 %v13800_v8, %v13812_v9  ;;  %19940 = vst [vmem:[#allocation203_spill] sm:$0xff] %v14283_v17 }
 0x303   : > { %19930 = vst [vmem:[#allocation170_spill] sm:$0xff] %v14252_v33  ;;  %v19938_v56 = vmax.f32 %v19863_v37, %v13863_v61  ;;  %v14281_v32 = vmax.f32 %v14220_v1, %v3798_v18  ;;  %vm19942_vm4 = vcmp.eq.s32.totalorder %v19941_v10, 1  ;;  %v14289_v31 = vmax.f32 %v13751_v15, %v3798_v18  ;;  %v20053_v61 = vld [vmem:[#allocation102_spill] sm:$0xff] }
 0x304   : > { %19935 = vst [vmem:[#allocation213_spill] sm:$0xff] %v14264_v23  ;;  %v3288_v3 = vsel %vm19942_vm4, %v3241_v35, -inf  ;;  %v4749_v26 = vrot.slane %v4717_v7, 2  ;;  %vm4908_vm13 = vcmp.lt.s32.totalorder %v9481_v43, 5  ;;  %vm5101_vm0 = vcmp.eq.s32.totalorder %v5007_v48, 1 }
 0x305   : > { %19936 = vst [vmem:[#allocation154_spill] sm:$0xff] %v14267_v40  ;;  %v14277_v36 = vmax.f32 %v19938_v56, %v19937_v0  ;;  %v3320_v5 = vmax.f32 %v19924_v50, %v3288_v3  ;;  %v19943_v56 = vld [vmem:[#allocation191_spill] sm:$0xff]  ;;  %v19946_v35 = vrot.slane %v14238_v14, 2  ;;  %v19947_v8 = vrot.slane %v14267_v40, 2 }
 0x306   : > { %v19945_v12 = vmax.f32 %v19943_v56, %v19944_v24  ;;  %vm18798_vm4 = vcmp.eq.s32.totalorder %v14283_v17, 1  ;;  %v14317_v63 = vmax.f32 %v3798_v18, %v13751_v15  ;;  %v19968_v17 = vrot.slane %v14183_v44, 1 }
 0x307   : > { %19939 = vst [vmem:[#allocation174_spill] sm:$0xff] %v14277_v36  ;;  %v4809_v19 = vsel %vm2784_vm7, %v4749_v26, %v19946_v35  ;;  %v4810_v3 = vsel %vm2784_vm7, %v19947_v8, %v4749_v26  ;;  %v3352_v0 = vrot.slane %v3320_v5, 6  ;;  %v19950_v8 = vld [vmem:[#allocation182_spill] sm:$0xff]  ;;  %v19951_v35 = vld [vmem:[#allocation217_spill] sm:$0xff] }
 0x308   : > { %v14298_v11 = vmax.f32 %v19945_v12, %v3767_v28  ;;  %v4812_v50 = vsel %vm2977_vm6, %v4810_v3, -inf  ;;  %v4813_v12 = vsel %vm2978_vm14, %v4809_v19, -inf  ;;  %v14314_v28 = vmax.f32 %v3798_v18, %v14220_v1  ;;  %v19953_v3 = vld [vmem:[#allocation152_spill] sm:$0xff] }
 0x309   : > { %v14320_v24 = vmax.f32 %v14267_v40, %v4812_v50  ;;  %v14322_v56 = vmax.f32 %v4717_v7, %v4813_v12  ;;  %v4016_v26 = vmax.f32 %v19950_v8, %v14289_v31  ;;  %v19952_v47 = vrot.slane %v19951_v35, 6 }
 0x30a   : > { %v14334_v15 = vmax.f32 %v14070_v6, %v19953_v3  ;;  %v4070_v18 = vmax.f32 %v13969_v58, %v13975_v42  ;;  %v14340_v50 = vmax.f32 %v13764_v57, %v14118_v4  ;;  %v14353_v6 = vmax.f32 %v13792_v22, %v14314_v28  ;;  %v19955_v58 = vld [vmem:[#allocation185_spill] sm:$0xff] }
 0x30b   : > { %19948 = vst [vmem:[#allocation145_spill] sm:$0xff] %v14320_v24  ;;  %v3369_v52 = vsel %vm3361_vm5, %v3352_v0, %v19952_v47  ;;  %v18764_v7 = vrot.slane %v14320_v24, 3  ;;  %v18765_v12 = vrot.slane %v14322_v56, 3  ;;  %v4358_v47 = vmax.f32 %v14138_v51, %v14131_v49  ;;  %v19959_v3 = vld [vmem:[#allocation205_spill] sm:$0xff]  ;;  %v19973_v24 = vld [vmem:[#allocation6_spill] sm:$0xff] }
 0x30c   : > { %19949 = vst [vmem:[#allocation212_spill] sm:$0xff] %v14322_v56  ;;  %v3610_v19 = vsel %vm18798_vm4, %v3369_v52, -inf  ;;  %v14349_v52 = vpop.permute.xlu0 %3528  ;;  %v14357_v57 = vmax.f32 %v14317_v63, %v19955_v58  ;;  %v4071_v42 = vmax.f32 %v14100_v27, %v14334_v15  ;;  %v4359_v4 = vmax.f32 %v14340_v50, %v14135_v53 }
 0x30d   : > { %v14345_v8 = vmax.f32 %v19951_v35, %v3610_v19  ;;  %19954 = vst [vmem:[#allocation200_spill] sm:$0xff] %v14349_v52  ;;  %v4939_v49 = vsel %vm4908_vm13, %v18764_v7, %v18765_v12  ;;  %v14370_v51 = vmax.f32 %v4070_v18, %v4358_v47  ;;  %v19960_v58 = vrot.slane %v19959_v3, 6  ;;  %v19964_v12 = vld [vmem:[#allocation166_spill] sm:$0xff] }
 0x30e   : > { %v14374_v19 = vsel %vm5101_vm0, %v4939_v49, -inf  ;;  %v14376_v27 = vmax.f32 %v4071_v42, %v4359_v4  ;;  %vm18771_vm14 = vcmp.eq.s32.totalorder %v14349_v52, 1  ;;  %v19961_v18 = vrot.slane %v13804_v60, 7  ;;  %v19962_v49 = vld [vmem:[#allocation87_spill] sm:$0xff] }
 0x30f   : > { %v3674_v22 = vrot.slane %v14345_v8, 7  ;;  %19956 = vst [vmem:[#allocation130_spill] sm:$0xff] %v14370_v51  ;;  %v3370_v40 = vsel %vm3361_vm5, %v19960_v58, %v3352_v0  ;;  %v4624_v48 = vrot.slane %v14370_v51, 1  ;;  %v4078_v4 = vmax.f32 %v13849_v25, %v4016_v26 }
 0x310   : > { %19957 = vst [vmem:[#allocation210_spill] sm:$0xff] %v14374_v19  ;;  %v3609_v42 = vsel %vm18771_vm14, %v3370_v40, -inf  ;;  %vm19963_vm6 = vcmp.eq.s32.totalorder %v19962_v49, 1  ;;  %v4625_v3 = vrot.slane %v14376_v27, 1  ;;  %v4080_v7 = vmax.f32 %v4016_v26, %v14353_v6  ;;  %v19967_v40 = vld [vmem:[#allocation160_spill] sm:$0xff]  ;;  %v19971_v19 = vld [vmem:[#allocation5_spill] sm:$0xff] }
 0x311   : > { %19958 = vst [vmem:[#allocation9_spill] sm:$0xff] %v14376_v27  ;;  %v3688_v47 = vsel %vm1388_vm2, %v3674_v22, %v19961_v18  ;;  %v3641_v58 = vmax.f32 %v3320_v5, %v3609_v42  ;;  %v14399_v35 = vmax.f32 %v14281_v32, %v19964_v12  ;;  %v19966_v18 = vrot.slane %v14176_v55, 1  ;;  %v19969_v26 = vld [vmem:[#allocation12_spill] sm:$0xff] }
 0x312   : > { %v3739_v0 = vsel %vm19963_vm6, %v3688_v47, -inf  ;;  %v4151_v25 = vmax.f32 %v14298_v11, %v19967_v40  ;;  %v4677_v47 = vsel %vm939_vm1, %v4625_v3, %v19968_v17  ;;  %v4678_v5 = vsel %vm939_vm1, %v4624_v48, %v4625_v3 }
 0x313   : > { %19965 = vst [vmem:[#allocation188_spill] sm:$0xff] %v14399_v35  ;;  %v4679_v52 = vsel %vm939_vm1, %v19966_v18, %v4624_v48  ;;  %vm19970_vm0 = vcmp.eq.s32.totalorder %v19969_v26, 1  ;;  %v3673_v42 = vrot.slane %v3641_v58, 7  ;;  %v3771_v49 = vmax.f32 %v13804_v60, %v3739_v0  ;;  %v19983_v0 = vld [vmem:[#allocation219_spill] sm:$0xff] }
 0x314   : > { %v4687_v12 = vsel %vm19970_vm0, %v4679_v52, -inf  ;;  %vm19972_vm6 = vcmp.eq.s32.totalorder %v19971_v19, 1  ;;  %vm19974_vm14 = vcmp.eq.s32.totalorder %v19973_v24, 1  ;;  %v19977_v52 = vrot.slane %v19897_v20, 7  ;;  %v19982_v24 = vld [vmem:[#allocation207_spill] sm:$0xff] }
 0x315   : > { %v4688_v18 = vsel %vm19972_vm6, %v4678_v5, -inf  ;;  %v4689_v56 = vsel %vm19974_vm14, %v4677_v47, -inf  ;;  %v14421_v14 = vmax.f32 %v14176_v55, %v4687_v12  ;;  %vm19978_vm14 = vcmp.eq.s32.totalorder %v19941_v10, 1  ;;  %v20009_v55 = vld [vmem:[#allocation40_spill] sm:$0xff] }
 0x316   : > { %v4720_v48 = vmax.f32 %v14370_v51, %v4688_v18  ;;  %v14427_v3 = vmax.f32 %v14376_v27, %v4689_v56  ;;  %v3690_v19 = vsel %vm1388_vm2, %v19977_v52, %v3673_v42  ;;  %v14440_v5 = vmax.f32 %v19967_v40, %v14298_v11  ;;  %v19985_v56 = vld [vmem:[#allocation123_spill] sm:$0xff]  ;;  %v19986_v51 = vld [vmem:[#allocation153_spill] sm:$0xff] }
 0x317   : > { %v3737_v47 = vsel %vm19978_vm14, %v3690_v19, -inf  ;;  %v3689_v20 = vsel %vm1388_vm2, %v3673_v42, %v3674_v22  ;;  %v19979_v18 = vmax.f32 %v14088_v13, %v13816_v41  ;;  %v19980_v17 = vmax.f32 %v14104_v29, %v14088_v13 }
 0x318   : > { %19976 = vst [vmem:[#allocation199_spill] sm:$0xff] %v14427_v3  ;;  %v4752_v26 = vrot.slane %v4720_v48, 2  ;;  %v3769_v12 = vmax.f32 %v3641_v58, %v3737_v47  ;;  %v19984_v10 = vmax.f32 %v19982_v24, %v19983_v0  ;;  %v14462_v23 = vmax.f32 %v19986_v51, %v19985_v56  ;;  %v19990_v58 = vld [vmem:[#allocation209_spill] sm:$0xff]  ;;  %v19996_v0 = vld [vmem:[#allocation96_spill] sm:$0xff] }
 0x319   : > { %v14448_v52 = vmax.f32 %v4078_v4, %v19979_v18  ;;  %v14453_v19 = vmax.f32 %v4080_v7, %v19980_v17  ;;  %v19987_v22 = vrot.slane %v14427_v3, 2  ;;  %v19988_v4 = vrot.slane %v14421_v14, 2  ;;  %v19989_v7 = vld [vmem:[#allocation137_spill] sm:$0xff] }
 0x31a   : > { %v14458_v27 = vmax.f32 %v19984_v10, %v3771_v49  ;;  %v19991_v42 = vmax.f32 %v19989_v7, %v19990_v58  ;;  %vm5536_vm0 = vcmp.ge.s32.totalorder %v14171_v16, 3  ;;  %v19992_v10 = vld [vmem:[#allocation105_spill] sm:$0xff]  ;;  %v19994_v49 = vld [vmem:[#allocation95_spill] sm:$0xff]  ;;  %vm19997_vm11 = vcmp.eq.s32.totalorder %v19996_v0, 1 }
 0x31b   : > { %19981 = vst [vmem:[#allocation191_spill] sm:$0xff] %v14453_v19  ;;  %v4806_v41 = vsel %vm2784_vm7, %v4752_v26, %v19987_v22  ;;  %v4807_v13 = vsel %vm2784_vm7, %v19988_v4, %v4752_v26  ;;  %vm19993_vm6 = vcmp.eq.s32.totalorder %v19992_v10, 1  ;;  %vm19995_vm14 = vcmp.eq.s32.totalorder %v19994_v49, 1  ;;  %v19998_v56 = vld [vmem:[#allocation57_spill] sm:$0xff]  ;;  %v8209_v26 = vld [vmem:[%s18089_s4 + $0x90] sm:$0xff]  ;;  %v8208_v10 = vld [vmem:[%s18089_s4 + $0x88] sm:$0xff] }
 0x31c   : > { %v3801_v17 = vmax.f32 %v19991_v42, %v3769_v12  ;;  %v4815_v51 = vsel %vm19993_vm6, %v4807_v13, -inf  ;;  %v4816_v24 = vsel %vm19995_vm14, %v4806_v41, -inf  ;;  %v3738_v47 = vsel %vm19997_vm11, %v3689_v20, -inf  ;;  %v20001_v22 = vld [vmem:[#allocation187_spill] sm:$0xff]  ;;  %v20002_v41 = vld [vmem:[#allocation60_spill] sm:$0xff]  ;;  %v5016_v20 = vpop.permute.xlu2 %5015  ;;  %4504 = vmatpush.bf16.msra.mxu3 %v8209_v26 }
 0x31d   : > { %v14488_v12 = vmax.f32 %v14421_v14, %v4815_v51  ;;  %v14490_v16 = vmax.f32 %v4720_v48, %v4816_v24  ;;  %v14494_v4 = vmax.f32 %v20001_v22, %v14440_v5  ;;  %v4149_v13 = vmax.f32 %v19967_v40, %v20002_v41  ;;  %v8850_v48 = vld [vmem:[%s18085_s0 + $0x98] sm:$0xff]  ;;  %v20003_v24 = vld [vmem:[#allocation190_spill] sm:$0xff] }
 0x31e   : > { %v14499_v7 = vmax.f32 %v3801_v17, %v14298_v11  ;;  %v14502_v58 = vmax.f32 %v14458_v27, %v3801_v17  ;;  %v5568_v42 = vsel %vm5536_vm0, 1, %v19873_v34  ;;  %vm5537_vm11 = vcmp.ge.s32.totalorder %v8850_v48, 3 }
 0x31f   : > { %19999 = vst [vmem:[#allocation201_spill] sm:$0xff] %v14488_v12  ;;  %v18788_v40 = vrot.slane %v14488_v12, 3  ;;  %v18787_v51 = vrot.slane %v14490_v16, 3  ;;  %v3770_v49 = vmax.f32 %v14345_v8, %v3738_v47  ;;  %v14515_v22 = vmax.f32 %v4151_v25, %v20003_v24  ;;  %5637 = vperm.xlu1 %8283, %v5568_v42   ;;  %v20006_v47 = vld [vmem:[#allocation180_spill] sm:$0xff] }
 0x320   : > { %20000 = vst [vmem:[#allocation182_spill] sm:$0xff] %v14490_v16  ;;  %v14518_v41 = vmax.f32 %v14499_v7, %v4149_v13  ;;  %v14521_v18 = vmax.f32 %v14502_v58, %v4151_v25  ;;  %v5569_v26 = vsel %vm5537_vm11, 1, %v19873_v34  ;;  %vm4960_vm0 = vcmp.lt.s32.totalorder %v8850_v48, 13  ;;  %v14540_v16 = vpop.permute.xlu1 %3540  ;;  %4505 = vmatpush.bf16.msra.mxu3 %v8208_v10  ;;  %v20016_v48 = vld [vmem:[#allocation78_spill] sm:$0xff]  ;;  %v20051_v12 = vld [vmem:[#allocation108_spill] sm:$0xff] }
 0x321   : > { %20004 = vst [vmem:[#allocation217_spill] sm:$0xff] %v14515_v22  ;;  %v4936_v8 = vsel %vm4908_vm13, %v18788_v40, %v18787_v51  ;;  %vm5104_vm6 = vcmp.eq.s32.totalorder %v5016_v20, 1  ;;  %v14531_v24 = vmax.f32 %v4149_v13, %v20006_v47  ;;  %5640 = vperm.xlu2 %8284, %v5569_v26   ;;  %v4992_v42 = vsel %vm4960_vm0, 1, %v19873_v34  ;;  %v20011_v20 = vld [vmem:[#allocation162_spill] sm:$0xff] }
 0x322   : > { %20005 = vst [vmem:[#allocation152_spill] sm:$0xff] %v14518_v41  ;;  %v14534_v0 = vsel %vm5104_vm6, %v4936_v8, -inf  ;;  %5063 = vperm.xlu0 %8282, %v4992_v42   ;;  %v20010_v51 = vrot.slane %v20009_v55, 7  ;;  %v20012_v40 = vrot.slane %v20011_v20, 7  ;;  %v20013_v8 = vld [vmem:[#allocation196_spill] sm:$0xff]  ;;  %v20014_v47 = vld [vmem:[#allocation218_spill] sm:$0xff]  ;;  %v14559_v41 = vpop.permute.xlu0 %3537 }
 0x323   : > { %20007 = vst [vmem:[#allocation185_spill] sm:$0xff] %v14534_v0  ;;  %v20015_v25 = vmax.f32 %v20013_v8, %v20014_v47  ;;  %vm20017_vm14 = vcmp.eq.s32.totalorder %v20016_v48, 1  ;;  %v20020_v8 = vld [vmem:[#allocation118_spill] sm:$0xff]  ;;  %vm18796_vm11 = vcmp.eq.s32.totalorder %v14540_v16, 1  ;;  %vm18797_vm0 = vcmp.eq.s32.totalorder %v14559_v41, 1  ;;  %v20031_v0 = vld [vmem:[#allocation119_spill] sm:$0xff] }
 0x324   : > { %20008 = vst [vmem:[#allocation205_spill] sm:$0xff] %v14540_v16  ;;  %v3238_v13 = vsel %vm1388_vm2, %v20012_v40, %v20010_v51  ;;  %v20019_v40 = vld [vmem:[#allocation178_spill] sm:$0xff]  ;;  %v4074_v51 = vmax.f32 %v13979_v62, %v19841_v46  ;;  %v14580_v46 = vmax.f32 %v3801_v17, %v14458_v27 }
 0x325   : > { %v14553_v3 = vmax.f32 %v20015_v25, %v3770_v49  ;;  %v3291_v19 = vsel %vm20017_vm14, %v3238_v13, -inf  ;;  %20018 = vst [vmem:[#allocation166_spill] sm:$0xff] %v14559_v41  ;;  %v4073_v10 = vmax.f32 %v14334_v15, %v20019_v40  ;;  %v4297_v49 = vmax.f32 %v20020_v8, %v14135_v53  ;;  %v20024_v8 = vld [vmem:[#allocation93_spill] sm:$0xff] }
 0x326   : > { %v3323_v20 = vmax.f32 %v20009_v55, %v3291_v19  ;;  %v14569_v25 = vmax.f32 %v14298_v11, %v3801_v17  ;;  %v4362_v19 = vmax.f32 %v13796_v30, %v14147_v21  ;;  %v20023_v11 = vld [vmem:[#allocation50_spill] sm:$0xff]  ;;  %v20025_v30 = vld [vmem:[#allocation89_spill] sm:$0xff]  ;;  %v20028_v17 = vmax.f32 %v20019_v40, %v19863_v37 }
 0x327   : > { %v4361_v15 = vmax.f32 %v4297_v49, %v14340_v50  ;;  %v4363_v42 = vmax.f32 %v13812_v9, %v4297_v49  ;;  %v14586_v53 = vmax.f32 %v14553_v3, %v14220_v1  ;;  %v2335_v26 = vpack.c.bf16 %v20024_v8, %v20023_v11 }
 0x328   : > { %v3355_v13 = vrot.slane %v3323_v20, 6  ;;  %v14582_v62 = vmax.f32 %v4074_v51, %v4362_v19  ;;  %v20026_v21 = vrot.slane %v20025_v30, 6  ;;  %v20029_v51 = vld [vmem:[#allocation216_spill] sm:$0xff]  ;;  %v14607_v11 = vmax.f32 %v20031_v0, %v14569_v25 }
 0x329   : > { %v14594_v9 = vmax.f32 %v4073_v10, %v4361_v15  ;;  %v14599_v49 = vmax.f32 %v20028_v17, %v4363_v42  ;;  %v20030_v19 = vrot.slane %v20029_v51, 6  ;;  %2411 = vmatmul.bf16.gmra.mxu1 %v2335_v26  ;;  %v14621_v0 = vmax.f32 %v14440_v5, %v14580_v46  ;;  %v8852_v26 = vld [vmem:[%s18085_s0 + $0xa0] sm:$0xff]  ;;  %v20036_v17 = vld [vmem:[#allocation16_spill] sm:$0xff] }
 0x32a   : > { %20022 = vst [vmem:[#allocation160_spill] sm:$0xff] %v14582_v62  ;;  %v3366_v50 = vsel %vm3361_vm5, %v3355_v13, %v20026_v21  ;;  %v4628_v10 = vrot.slane %v14582_v62, 1  ;;  %v14625_v21 = vmax.f32 %v14586_v53, %v14317_v63  ;;  %vm5538_vm14 = vcmp.ge.s32.totalorder %v8852_v26, 3 }
 0x32b   : > { %20027 = vst [vmem:[#allocation12_spill] sm:$0xff] %v14594_v9  ;;  %v3367_v55 = vsel %vm3361_vm5, %v20030_v19, %v3355_v13  ;;  %v3613_v8 = vsel %vm18796_vm11, %v3366_v50, -inf  ;;  %v4627_v42 = vrot.slane %v14594_v9, 1  ;;  %v18801_v40 = vrot.slane %v14599_v49, 1  ;;  %v20038_v19 = vld [vmem:[#allocation15_spill] sm:$0xff] }
 0x32c   : > { %20032 = vst [vmem:[#allocation5_spill] sm:$0xff] %v14607_v11  ;;  %v3612_v15 = vsel %vm18797_vm0, %v3367_v55, -inf  ;;  %v14615_v37 = vmax.f32 %v20025_v30, %v3613_v8  ;;  %v14630_v55 = vld [vmem:[%s18085_s0 + $0xa8] sm:$0xff]  ;;  %v20035_v30 = vrot.slane %v14183_v44, 1  ;;  %vm20037_vm11 = vcmp.eq.s32.totalorder %v20036_v17, 1 }
 0x32d   : > { %v3644_v13 = vmax.f32 %v3323_v20, %v3612_v15  ;;  %20033 = vst [vmem:[#allocation6_spill] sm:$0xff] %v14621_v0  ;;  %vm4962_vm6 = vcmp.lt.s32.totalorder %v14630_v55, 13  ;;  %v4674_v63 = vsel %vm939_vm1, %v4628_v10, %v18801_v40  ;;  %v4675_v5 = vsel %vm939_vm1, %v4627_v42, %v4628_v10  ;;  %v20040_v15 = vld [vmem:[#allocation7_spill] sm:$0xff] }
 0x32e   : > { %20034 = vst [vmem:[#allocation207_spill] sm:$0xff] %v14625_v21  ;;  %v3677_v20 = vrot.slane %v14615_v37, 7  ;;  %v4676_v50 = vsel %vm939_vm1, %v20035_v30, %v4627_v42  ;;  %vm20039_vm0 = vcmp.eq.s32.totalorder %v20038_v19, 1  ;;  %vm20041_vm4 = vcmp.eq.s32.totalorder %v20040_v15, 1 }
 0x32f   : > { %v4690_v51 = vsel %vm20037_vm11, %v4676_v50, -inf  ;;  %v4691_v8 = vsel %vm20039_vm0, %v4675_v5, -inf  ;;  %v4692_v16 = vsel %vm20041_vm4, %v4674_v63, -inf  ;;  %v3676_v41 = vrot.slane %v3644_v13, 7  ;;  %v20044_v50 = vld [vmem:[#allocation91_spill] sm:$0xff] }
 0x330   : > { %v20042_v40 = vrot.slane %v14154_v38, 7  ;;  %v14658_v47 = vmax.f32 %v14183_v44, %v4690_v51  ;;  %v4723_v42 = vmax.f32 %v14594_v9, %v4691_v8  ;;  %v14662_v30 = vmax.f32 %v14582_v62, %v4692_v16  ;;  %v20048_v62 = vld [vmem:[#allocation215_spill] sm:$0xff]  ;;  %v20049_v9 = vld [vmem:[#allocation150_spill] sm:$0xff] }
 0x331   : > { %vm20045_vm11 = vcmp.eq.s32.totalorder %v20044_v50, 1  ;;  %v20046_v17 = vrot.slane %v13804_v60, 7  ;;  %vm20047_vm4 = vcmp.eq.s32.totalorder %v20016_v48, 1  ;;  %v4994_v60 = vsel %vm4962_vm6, 1, %v19873_v34 }
 0x332   : > { %v3685_v10 = vsel %vm1388_vm2, %v3677_v20, %v20042_v40  ;;  %20043 = vst [vmem:[#allocation219_spill] sm:$0xff] %v14662_v30  ;;  %v18815_v8 = vrot.slane %v14658_v47, 2  ;;  %v4755_v16 = vrot.slane %v4723_v42, 2  ;;  %v18814_v15 = vrot.slane %v14662_v30, 2  ;;  %5069 = vperm.xlu1 %8283, %v4994_v60  }
 0x333   : > { %v3742_v63 = vsel %vm20045_vm11, %v3685_v10, -inf  ;;  %v3687_v19 = vsel %vm1388_vm2, %v20046_v17, %v3676_v41  ;;  %v14681_v10 = vmax.f32 %v14220_v1, %v14553_v3  ;;  %v5570_v17 = vsel %vm5538_vm14, 1, %v19873_v34 }
 0x334   : > { %v3774_v51 = vmax.f32 %v14154_v38, %v3742_v63  ;;  %v3740_v5 = vsel %vm20047_vm4, %v3687_v19, -inf  ;;  %v5025_v63 = vpop.permute.xlu2 %5024  ;;  %v4803_v40 = vsel %vm2784_vm7, %v4755_v16, %v18814_v15  ;;  %v4804_v19 = vsel %vm2784_vm7, %v18815_v8, %v4755_v16  ;;  %5643 = vperm.xlu2 %8284, %v5570_v17  }
 0x335   : > { %v3686_v1 = vsel %vm1388_vm2, %v3676_v41, %v3677_v20  ;;  %v3772_v48 = vmax.f32 %v3644_v13, %v3740_v5  ;;  %v20050_v44 = vmax.f32 %v20048_v62, %v20049_v9  ;;  %vm20052_vm0 = vcmp.eq.s32.totalorder %v20051_v12, 1  ;;  %v20057_v41 = vld [vmem:[#allocation204_spill] sm:$0xff]  ;;  %v20058_v13 = vld [vmem:[#allocation211_spill] sm:$0xff]  ;;  %v8207_v12 = vld [vmem:[%s18089_s4 + $0x80] sm:$0xff] }
 0x336   : > { %v4818_v30 = vsel %vm20052_vm0, %v4804_v19, -inf  ;;  %vm20054_vm6 = vcmp.eq.s32.totalorder %v20053_v61, 1  ;;  %vm4961_vm14 = vcmp.lt.s32.totalorder %v8852_v26, 13  ;;  %v20059_v20 = vmax.f32 %v20057_v41, %v20058_v13  ;;  %v20060_v62 = vld [vmem:[#allocation104_spill] sm:$0xff]  ;;  %v20062_v26 = vld [vmem:[#allocation73_spill] sm:$0xff]  ;;  %4506 = vmatpush.bf16.msra.mxu3 %v8207_v12  ;;  %v14740_v41 = vpop.permute.xlu1 %3549  ;;  %v20067_v13 = vld [vmem:[#allocation82_spill] sm:$0xff] }
 0x337   : > { %v14701_v50 = vmax.f32 %v20050_v44, %v3774_v51  ;;  %v4819_v15 = vsel %vm20054_vm6, %v4803_v40, -inf  ;;  %v14708_v16 = vmax.f32 %v14658_v47, %v4818_v30  ;;  %v4993_v44 = vsel %vm4961_vm14, 1, %v19873_v34  ;;  %v20064_v30 = vld [vmem:[#allocation148_spill] sm:$0xff]  ;;  %20066 = vst [vmem:[#allocation137_spill] sm:$0xff] %v14740_v41 }
 0x338   : > { %v14710_v8 = vmax.f32 %v4723_v42, %v4819_v15  ;;  %v3804_v5 = vmax.f32 %v20059_v20, %v3772_v48  ;;  %vm5107_vm11 = vcmp.eq.s32.totalorder %v5025_v63, 1  ;;  %vm20061_vm4 = vcmp.eq.s32.totalorder %v20060_v62, 1  ;;  %5066 = vperm.xlu0 %8282, %v4993_v44  }
 0x339   : > { %20055 = vst [vmem:[#allocation123_spill] sm:$0xff] %v14708_v16  ;;  %v3741_v9 = vsel %vm20061_vm4, %v3686_v1, -inf  ;;  %v20063_v42 = vrot.slane %v20062_v26, 7  ;;  %v20065_v40 = vrot.slane %v20064_v30, 7  ;;  %v18819_v51 = vrot.slane %v14708_v16, 3 }
 0x33a   : > { %20056 = vst [vmem:[#allocation153_spill] sm:$0xff] %v14710_v8  ;;  %v18818_v15 = vrot.slane %v14710_v8, 3  ;;  %v14733_v60 = vmax.f32 %v14289_v31, %v14681_v10  ;;  %v4630_v17 = vrot.slane %v14252_v33, 1  ;;  %v14737_v19 = vmax.f32 %v3804_v5, %v14553_v3 }
 0x33b   : > { %v3235_v48 = vsel %vm1388_vm2, %v20065_v40, %v20063_v42  ;;  %v4158_v1 = vmax.f32 %v14701_v50, %v3804_v5  ;;  %vm20068_vm0 = vcmp.eq.s32.totalorder %v20067_v13, 1  ;;  %v4631_v44 = vrot.slane %v14277_v36, 1  ;;  %v20069_v42 = vld [vmem:[#allocation194_spill] sm:$0xff] }
 0x33c   : > { %v3294_v20 = vsel %vm20068_vm0, %v3235_v48, -inf  ;;  %v4933_v31 = vsel %vm4908_vm13, %v18819_v51, %v18818_v15  ;;  %v3773_v12 = vmax.f32 %v14615_v37, %v3741_v9  ;;  %v4370_v40 = vmax.f32 %v20069_v42, %v14104_v29  ;;  %v20074_v51 = vld [vmem:[#allocation177_spill] sm:$0xff] }
 0x33d   : > { %v3326_v61 = vmax.f32 %v20062_v26, %v3294_v20  ;;  %v14756_v30 = vsel %vm5107_vm11, %v4933_v31, -inf  ;;  %v14760_v48 = vmax.f32 %v14737_v19, %v14281_v32  ;;  %v14763_v62 = vmax.f32 %v4158_v1, %v14586_v53  ;;  %v20071_v20 = vld [vmem:[#allocation206_spill] sm:$0xff]  ;;  %v20072_v31 = vld [vmem:[#allocation129_spill] sm:$0xff] }
 0x33e   : > { %20070 = vst [vmem:[#allocation209_spill] sm:$0xff] %v14756_v30  ;;  %v18821_v0 = vrot.slane %v14448_v52, 1  ;;  %v4082_v29 = vmax.f32 %v14353_v6, %v14733_v60  ;;  %vm18831_vm6 = vcmp.eq.s32.totalorder %v14740_v41, 1  ;;  %v4672_v1 = vsel %vm939_vm1, %v4630_v17, %v4631_v44  ;;  %v14797_v30 = vpop.permute.xlu0 %3546  ;;  %v20090_v41 = vld [vmem:[#allocation65_spill] sm:$0xff] }
 0x33f   : > { %v3358_v9 = vrot.slane %v3326_v61, 6  ;;  %v20073_v6 = vmax.f32 %v20071_v20, %v20072_v31  ;;  %v14787_v15 = vmax.f32 %v14553_v3, %v3804_v5  ;;  %v20075_v63 = vrot.slane %v20074_v51, 6  ;;  %v20079_v3 = vld [vmem:[#allocation18_spill] sm:$0xff] }
 0x340   : > { %v4671_v53 = vsel %vm939_vm1, %v4631_v44, %v18821_v0  ;;  %v20076_v26 = vrot.slane %v14599_v49, 1  ;;  %vm20080_vm11 = vcmp.eq.s32.totalorder %v20079_v3, 1  ;;  %vm3583_vm0 = vcmp.eq.s32.totalorder %v14797_v30, 1 }
 0x341   : > { %v14784_v37 = vmax.f32 %v20073_v6, %v3773_v12  ;;  %v3363_v32 = vsel %vm3361_vm5, %v3358_v9, %v20075_v63  ;;  %v20077_v12 = vld [vmem:[#allocation19_spill] sm:$0xff]  ;;  %v4694_v31 = vsel %vm20080_vm11, %v4672_v1, -inf  ;;  %v20081_v6 = vld [vmem:[#allocation8_spill] sm:$0xff] }
 0x342   : > { %v4673_v0 = vsel %vm939_vm1, %v20076_v26, %v4630_v17  ;;  %v3616_v44 = vsel %vm18831_vm6, %v3363_v32, -inf  ;;  %vm20078_vm14 = vcmp.eq.s32.totalorder %v20077_v12, 1  ;;  %vm20082_vm4 = vcmp.eq.s32.totalorder %v20081_v6, 1 }
 0x343   : > { %v4693_v20 = vsel %vm20078_vm14, %v4673_v0, -inf  ;;  %v4695_v8 = vsel %vm20082_vm4, %v4671_v53, -inf  ;;  %v3648_v63 = vmax.f32 %v20074_v51, %v3616_v44  ;;  %v4726_v26 = vmax.f32 %v14252_v33, %v4694_v31 }
 0x344   : > { %v14809_v42 = vmax.f32 %v14599_v49, %v4693_v20  ;;  %v14813_v17 = vmax.f32 %v14277_v36, %v4695_v8  ;;  %v20083_v32 = vmax.f32 %v19998_v56, %v14462_v23  ;;  %v20084_v0 = vmax.f32 %v14494_v4, %v14607_v11  ;;  %v5034_v8 = vpop.permute.xlu2 %5033  ;;  %v20092_v56 = vld [vmem:[#allocation115_spill] sm:$0xff] }
 0x345   : > { %v14823_v12 = vmax.f32 %v4082_v29, %v4370_v40  ;;  %v20087_v51 = vrot.slane %v13915_v39, 6  ;;  %v3680_v44 = vrot.slane %v3648_v63, 7  ;;  %v4758_v3 = vrot.slane %v4726_v26, 2 }
 0x346   : > { %v14821_v1 = vmax.f32 %v20084_v0, %v20083_v32  ;;  %v18837_v20 = vrot.slane %v14809_v42, 2  ;;  %v18832_v31 = vrot.slane %v14813_v17, 2  ;;  %v3868_v6 = vmax.f32 %v3804_v5, %v14701_v50 }
 0x347   : > { %20086 = vst [vmem:[#allocation95_spill] sm:$0xff] %v14823_v12  ;;  %v3364_v53 = vsel %vm3361_vm5, %v20087_v51, %v3358_v9  ;;  %v14835_v40 = vmax.f32 %v14314_v28, %v14787_v15  ;;  %v14841_v29 = vmax.f32 %v14784_v37, %v14458_v27  ;;  %v20088_v9 = vld [vmem:[#allocation179_spill] sm:$0xff]  ;;  %vm20091_vm14 = vcmp.eq.s32.totalorder %v20090_v41, 1 }
 0x348   : > { %20085 = vst [vmem:[#allocation105_spill] sm:$0xff] %v14821_v1  ;;  %v3615_v39 = vsel %vm3583_vm0, %v3364_v53, -inf  ;;  %v20089_v32 = vrot.slane %v20088_v9, 7  ;;  %v4800_v5 = vsel %vm2784_vm7, %v4758_v3, %v18832_v31  ;;  %v4801_v28 = vsel %vm2784_vm7, %v18837_v20, %v4758_v3  ;;  %v8221_v53 = vld [vmem:[%s18089_s4 + $0xf0] sm:$0xff] }
 0x349   : > { %v3647_v51 = vmax.f32 %v3326_v61, %v3615_v39  ;;  %vm20093_vm11 = vcmp.eq.s32.totalorder %v20092_v56, 1  ;;  %v20094_v12 = vld [vmem:[#allocation27_spill] sm:$0xff]  ;;  %vm5110_vm6 = vcmp.eq.s32.totalorder %v5034_v8, 1  ;;  %6496 = vmatpush.bf16.msrb.mxu0 %v8221_v53  ;;  %v3867_v39 = vmax.f32 %v14458_v27, %v14784_v37  ;;  %v20100_v53 = vld [vmem:[#allocation106_spill] sm:$0xff] }
 0x34a   : > { %v3682_v0 = vsel %vm1388_vm2, %v3680_v44, %v20089_v32  ;;  %v4821_v32 = vsel %vm20093_vm11, %v4801_v28, -inf  ;;  %vm20095_vm4 = vcmp.eq.s32.totalorder %v20094_v12, 1  ;;  %v14874_v56 = vmax.f32 %v14841_v29, %v14499_v7  ;;  %v20107_v8 = vld [vmem:[#allocation135_spill] sm:$0xff] }
 0x34b   : > { %v3745_v11 = vsel %vm20091_vm14, %v3682_v0, -inf  ;;  %v4822_v36 = vsel %vm20095_vm4, %v4800_v5, -inf  ;;  %v14866_v33 = vmax.f32 %v14809_v42, %v4821_v32  ;;  %v3679_v3 = vrot.slane %v3647_v51, 7 }
 0x34c   : > { %v3777_v31 = vmax.f32 %v20088_v9, %v3745_v11  ;;  %v14868_v61 = vmax.f32 %v4726_v26, %v4822_v36  ;;  %v4435_v12 = vpack.c.bf16 %v14199_v2, %v14185_v45  ;;  %v14881_v11 = vld [vmem:[%s18085_s0 + $0xb0] sm:$0xff]  ;;  %v20097_v36 = vld [vmem:[#allocation138_spill] sm:$0xff]  ;;  %v20099_v5 = vrot.slane %v14154_v38, 7 }
 0x34d   : > { %20096 = vst [vmem:[#allocation187_spill] sm:$0xff] %v14866_v33  ;;  %vm4963_vm14 = vcmp.lt.s32.totalorder %v14881_v11, 13  ;;  %v20098_v26 = vmax.f32 %v13960_v54, %v20097_v36  ;;  %v18836_v27 = vrot.slane %v14866_v33, 3  ;;  %v3683_v0 = vsel %vm1388_vm2, %v3679_v3, %v3680_v44  ;;  %v14913_v36 = vld [vmem:[%s18085_s0 + $0xb8] sm:$0xff] }
 0x34e   : > { %v18835_v7 = vrot.slane %v14868_v61, 3  ;;  %v3684_v28 = vsel %vm1388_vm2, %v20099_v5, %v3679_v3  ;;  %vm20101_vm11 = vcmp.eq.s32.totalorder %v20100_v53, 1  ;;  %v4381_v54 = vmax.f32 %v14874_v56, %v14521_v18  ;;  %4507 = vmatmul.bf16.vlgmr.msra.gmra.mxu3 %v4435_v12 }
 0x34f   : > { %v14887_v9 = vmax.f32 %v20098_v26, %v3777_v31  ;;  %v3744_v32 = vsel %vm20101_vm11, %v3683_v0, -inf  ;;  %v4995_v31 = vsel %vm4963_vm14, 1, %v19873_v34  ;;  %vm20102_vm4 = vcmp.eq.s32.totalorder %v20067_v13, 1 }
 0x350   : > { %v4930_v44 = vsel %vm4908_vm13, %v18836_v27, %v18835_v7  ;;  %v3743_v38 = vsel %vm20102_vm4, %v3684_v28, -inf  ;;  %v3776_v3 = vmax.f32 %v3648_v63, %v3744_v32  ;;  %5072 = vperm.xlu1 %8283, %v4995_v31   ;;  %vm4964_vm11 = vcmp.lt.s32.totalorder %v14913_v36, 13  ;;  %v20104_v63 = vld [vmem:[#allocation213_spill] sm:$0xff] }
 0x351   : > { %v14917_v12 = vsel %vm5110_vm6, %v4930_v44, -inf  ;;  %v3775_v26 = vmax.f32 %v3647_v51, %v3743_v38  ;;  %v4996_v0 = vsel %vm4964_vm11, 1, %v19873_v34  ;;  %vm5539_vm14 = vcmp.ge.s32.totalorder %v14630_v55, 3  ;;  %v20109_v55 = vld [vmem:[#allocation214_spill] sm:$0xff]  ;;  %v20110_v27 = vld [vmem:[#allocation125_spill] sm:$0xff] }
 0x352   : > { %20103 = vst [vmem:[#allocation60_spill] sm:$0xff] %v14917_v12  ;;  %v20105_v28 = vmax.f32 %v19909_v59, %v20104_v63  ;;  %5075 = vperm.xlu2 %8284, %v4996_v0   ;;  %v5571_v31 = vsel %vm5539_vm14, 1, %v19873_v34  ;;  %v20106_v7 = vrot.slane %v14421_v14, 2  ;;  %v20108_v44 = vrot.slane %v20107_v8, 2 }
 0x353   : > { %v14934_v38 = vmax.f32 %v14681_v10, %v3868_v6  ;;  %v20111_v5 = vmax.f32 %v20109_v55, %v20110_v27  ;;  %v14940_v59 = vmax.f32 %v14569_v25, %v3867_v39  ;;  %5646 = vperm.xlu0 %8282, %v5571_v31   ;;  %vm20142_vm14 = vcmp.eq.s32.totalorder %v20067_v13, 1 }
 0x354   : > { %v3808_v32 = vmax.f32 %v20105_v28, %v3776_v3  ;;  %v4808_v51 = vsel %vm2784_vm7, %v20108_v44, %v20106_v7  ;;  %v20112_v3 = vld [vmem:[#allocation109_spill] sm:$0xff]  ;;  %v20114_v28 = vld [vmem:[#allocation111_spill] sm:$0xff] }
 0x355   : > { %v3807_v20 = vmax.f32 %v20111_v5, %v3775_v26  ;;  %v4367_v0 = vmax.f32 %v14462_v23, %v20112_v3  ;;  %vm20115_vm6 = vcmp.eq.s32.totalorder %v20114_v28, 1 }
 0x356   : > { %v3870_v14 = vmax.f32 %v14701_v50, %v3808_v32  ;;  %v14945_v63 = vmax.f32 %v3868_v6, %v3808_v32  ;;  %v4160_v7 = vmax.f32 %v3808_v32, %v14701_v50  ;;  %v4814_v10 = vsel %vm20115_vm6, %v4808_v51, -inf }
 0x357   : > { %v3869_v44 = vmax.f32 %v14784_v37, %v3807_v20  ;;  %v3871_v27 = vmax.f32 %v3807_v20, %v14887_v9  ;;  %v4159_v25 = vmax.f32 %v3807_v20, %v14784_v37  ;;  %v4161_v26 = vmax.f32 %v14887_v9, %v3807_v20 }
 0x358   : > { %20113 = vst [vmem:[#allocation190_spill] sm:$0xff] %v14945_v63  ;;  %v14955_v5 = vmax.f32 %v14787_v15, %v3870_v14  ;;  %v4092_v23 = vmax.f32 %v14945_v63, %v3870_v14  ;;  %v4094_v6 = vmax.f32 %v3870_v14, %v3808_v32  ;;  %v4375_v50 = vmax.f32 %v14515_v22, %v14531_v24 }
 0x359   : > { %v14961_v31 = vmax.f32 %v14580_v46, %v3869_v44  ;;  %v14963_v51 = vmax.f32 %v3867_v39, %v3871_v27  ;;  %v4029_v55 = vmax.f32 %v3869_v44, %v14887_v9  ;;  %v14967_v37 = vmax.f32 %v20107_v8, %v4814_v10  ;;  %v5013_v8 = vpop.permute.xlu1 %5012 }
 0x35a   : > { %20116 = vst [vmem:[#allocation180_spill] sm:$0xff] %v14955_v5  ;;  %v4088_v15 = vmax.f32 %v14934_v38, %v14955_v5  ;;  %v4319_v20 = vmax.f32 %v4159_v25, %v14502_v58  ;;  %v4320_v3 = vmax.f32 %v4160_v7, %v14737_v19  ;;  %v4321_v14 = vmax.f32 %v4161_v26, %v14841_v29  ;;  %v20125_v26 = vld [vmem:[#allocation152_spill] sm:$0xff] }
 0x35b   : > { %20117 = vst [vmem:[#allocation196_spill] sm:$0xff] %v14961_v31  ;;  %v4087_v46 = vmax.f32 %v14940_v59, %v14961_v31  ;;  %v4091_v28 = vmax.f32 %v14963_v51, %v4029_v55  ;;  %v4093_v44 = vmax.f32 %v4029_v55, %v3871_v27  ;;  %v4095_v10 = vmax.f32 %v3871_v27, %v14887_v9 }
 0x35c   : > { %20118 = vst [vmem:[#allocation218_spill] sm:$0xff] %v14963_v51  ;;  %v4383_v22 = vmax.f32 %v4319_v20, %v14874_v56  ;;  %v20120_v58 = vmax.f32 %v14399_v35, %v14357_v57  ;;  %v20122_v29 = vmax.f32 %v14760_v48, %v14625_v21  ;;  %v20126_v55 = vmax.f32 %v14521_v18, %v20125_v26  ;;  %v20175_v51 = vld [vmem:[#allocation45_spill] sm:$0xff] }
 0x35d   : > { %20119 = vst [vmem:[#allocation178_spill] sm:$0xff] %v14967_v37  ;;  %v14991_v25 = vmax.f32 %v4087_v46, %v4375_v50  ;;  %v14998_v27 = vmax.f32 %v4093_v44, %v4381_v54  ;;  %v20129_v56 = vmax.f32 %v14763_v62, %v14760_v48  ;;  %vm5103_vm4 = vcmp.eq.s32.totalorder %v5013_v8, 1 }
 0x35e   : > { %v14984_v19 = vmax.f32 %v4088_v15, %v20120_v58  ;;  %v14989_v7 = vmax.f32 %v4092_v23, %v20122_v29  ;;  %v14996_v39 = vmax.f32 %v4091_v28, %v20126_v55  ;;  %v4384_v15 = vmax.f32 %v4320_v3, %v14763_v62  ;;  %v20132_v28 = vld [vmem:[#allocation167_spill] sm:$0xff] }
 0x35f   : > { %20124 = vst [vmem:[#allocation93_spill] sm:$0xff] %v14991_v25  ;;  %v15003_v35 = vmax.f32 %v4094_v6, %v20129_v56  ;;  %v15006_v58 = vmax.f32 %v4095_v10, %v4383_v22  ;;  %v4878_v23 = vrot.slane %v14967_v37, 3  ;;  %v4385_v50 = vmax.f32 %v4321_v14, %v4319_v20  ;;  %v20134_v6 = vld [vmem:[#allocation201_spill] sm:$0xff]  ;;  %v20136_v62 = vld [vmem:[#allocation191_spill] sm:$0xff] }
 0x360   : > { %20121 = vst [vmem:[#allocation118_spill] sm:$0xff] %v14984_v19  ;;  %v18840_v46 = vrot.slane %v14998_v27, 7  ;;  %v20133_v54 = vmax.f32 %v20132_v28, %v14494_v4  ;;  %v20135_v29 = vrot.slane %v20134_v6, 3  ;;  %v4634_v3 = vrot.slane %v20136_v62, 1  ;;  %v20139_v56 = vld [vmem:[#allocation91_spill] sm:$0xff] }
 0x361   : > { %20123 = vst [vmem:[#allocation50_spill] sm:$0xff] %v14989_v7  ;;  %v5225_v18 = vrot.slane %v15003_v35, 7  ;;  %v18842_v48 = vrot.slane %v15006_v58, 7  ;;  %v18841_v20 = vrot.slane %v14821_v1, 1  ;;  %v15032_v10 = vmax.f32 %v3808_v32, %v4384_v15 }
 0x362   : > { %20127 = vst [vmem:[#allocation89_spill] sm:$0xff] %v14996_v39  ;;  %v15014_v44 = vmax.f32 %v20133_v54, %v4367_v0  ;;  %v4937_v22 = vsel %vm4908_vm13, %v4878_v23, %v20135_v29  ;;  %vm20140_vm11 = vcmp.eq.s32.totalorder %v20139_v56, 1  ;;  %v5010_v29 = vpop.permute.xlu0 %5009  ;;  %v20172_v39 = vrot.slane %v14708_v16, 3 }
 0x363   : > { %20128 = vst [vmem:[#allocation216_spill] sm:$0xff] %v14998_v27  ;;  %v5232_v4 = vsel %vm1388_vm2, %v18840_v46, %v5225_v18  ;;  %v15029_v0 = vsel %vm5103_vm4, %v4937_v22, -inf  ;;  %v5231_v55 = vsel %vm1388_vm2, %v5225_v18, %v18842_v48  ;;  %v15043_v46 = vmax.f32 %v14887_v9, %v4385_v50  ;;  %v20146_v50 = vld [vmem:[#allocation11_spill] sm:$0xff] }
 0x364   : > { %20130 = vst [vmem:[#allocation119_spill] sm:$0xff] %v15003_v35  ;;  %v4633_v8 = vrot.slane %v15014_v44, 1  ;;  %v5289_v28 = vsel %vm20140_vm11, %v5232_v4, -inf  ;;  %v5290_v22 = vsel %vm20142_vm14, %v5231_v55, -inf  ;;  %v4668_v15 = vsel %vm939_vm1, %v4634_v3, %v18841_v20  ;;  %v20150_v20 = vld [vmem:[#allocation21_spill] sm:$0xff] }
 0x365   : > { %20131 = vst [vmem:[#allocation16_spill] sm:$0xff] %v15006_v58  ;;  %v15048_v32 = vmax.f32 %v15003_v35, %v5289_v28  ;;  %v15055_v18 = vmax.f32 %v15006_v58, %v5290_v22  ;;  %v20145_v9 = vrot.slane %v14448_v52, 1  ;;  %vm20147_vm6 = vcmp.eq.s32.totalorder %v20146_v50, 1  ;;  %v20148_v28 = vld [vmem:[#allocation22_spill] sm:$0xff] }
 0x366   : > { %20137 = vst [vmem:[#allocation15_spill] sm:$0xff] %v15029_v0  ;;  %v4669_v4 = vsel %vm939_vm1, %v4633_v8, %v4634_v3  ;;  %v4698_v55 = vsel %vm20147_vm6, %v4668_v15, -inf  ;;  %vm20149_vm4 = vcmp.eq.s32.totalorder %v20148_v28, 1  ;;  %vm20151_vm11 = vcmp.eq.s32.totalorder %v20150_v20, 1  ;;  %v20154_v20 = vld [vmem:[#allocation56_spill] sm:$0xff] }
 0x367   : > { %20138 = vst [vmem:[#allocation7_spill] sm:$0xff] %v15032_v10  ;;  %v4670_v13 = vsel %vm939_vm1, %v20145_v9, %v4633_v8  ;;  %v18845_v56 = vrot.slane %v15048_v32, 6  ;;  %v4697_v22 = vsel %vm20151_vm11, %v4669_v4, -inf  ;;  %v15071_v48 = vmax.f32 %v20136_v62, %v4698_v55  ;;  %v20152_v9 = vld [vmem:[#allocation212_spill] sm:$0xff]  ;;  %v20155_v4 = vld [vmem:[#allocation34_spill] sm:$0xff] }
 0x368   : > { %20141 = vst [vmem:[#allocation215_spill] sm:$0xff] %v15043_v46  ;;  %v4696_v54 = vsel %vm20149_vm4, %v4670_v13, -inf  ;;  %v18846_v3 = vrot.slane %v15055_v18, 6  ;;  %v4729_v8 = vmax.f32 %v15014_v44, %v4697_v22  ;;  %v20153_v15 = vrot.slane %v20152_v9, 3 }
 0x369   : > { %20143 = vst [vmem:[#allocation150_spill] sm:$0xff] %v15048_v32  ;;  %v15075_v14 = vmax.f32 %v14448_v52, %v4696_v54  ;;  %v18847_v13 = vrot.slane %v15071_v48, 2  ;;  %vm5102_vm14 = vcmp.eq.s32.totalorder %v5010_v29, 1  ;;  %v2336_v28 = vpack.c.bf16 %v20155_v4, %v20154_v20  ;;  %v5043_v4 = vpop.permute.xlu2 %5042 }
 0x36a   : > { %20144 = vst [vmem:[#allocation108_spill] sm:$0xff] %v15055_v18  ;;  %v4938_v50 = vsel %vm4908_vm13, %v20153_v15, %v4878_v23  ;;  %vm5541_vm6 = vcmp.ge.s32.totalorder %v14913_v36, 3  ;;  %v5359_v54 = vsel %vm3361_vm5, %v18845_v56, %v18846_v3  ;;  %v4761_v22 = vrot.slane %v4729_v8, 2  ;;  %v8855_v15 = vld [vmem:[%s18085_s0 + $0xc0] sm:$0xff] }
 0x36b   : > { %v18851_v55 = vrot.slane %v15075_v14, 2  ;;  %v15093_v35 = vsel %vm5102_vm14, %v4938_v50, -inf  ;;  %v5418_v23 = vsel %vm3583_vm0, %v5359_v54, -inf  ;;  %2416 = vmatmul.bf16.gmra.mxu1 %v2336_v28  ;;  %v5573_v36 = vsel %vm5541_vm6, 1, %v19873_v34  ;;  %v20157_v54 = vld [vmem:[#allocation121_spill] sm:$0xff] }
 0x36c   : > { %vm4965_vm4 = vcmp.lt.s32.totalorder %v8855_v15, 13  ;;  %v15104_v20 = vmax.f32 %v15055_v18, %v5418_v23  ;;  %v4797_v30 = vsel %vm2784_vm7, %v4761_v22, %v18847_v13  ;;  %5652 = vperm.xlu1 %8283, %v5573_v36   ;;  %vm20158_vm0 = vcmp.eq.s32.totalorder %v20157_v54, 1  ;;  %v20159_v3 = vld [vmem:[#allocation161_spill] sm:$0xff]  ;;  %v20162_v13 = vld [vmem:[#allocation199_spill] sm:$0xff] }
 0x36d   : > { %v4798_v50 = vsel %vm2784_vm7, %v18851_v55, %v4761_v22  ;;  %v4997_v28 = vsel %vm4965_vm4, 1, %v19873_v34  ;;  %vm20160_vm11 = vcmp.eq.s32.totalorder %v20159_v3, 1  ;;  %vm5540_vm14 = vcmp.ge.s32.totalorder %v14881_v11, 3  ;;  %v20168_v22 = vld [vmem:[#allocation13_spill] sm:$0xff] }
 0x36e   : > { %20156 = vst [vmem:[#allocation102_spill] sm:$0xff] %v15104_v20  ;;  %v4824_v56 = vsel %vm20158_vm0, %v4798_v50, -inf  ;;  %v4825_v23 = vsel %vm20160_vm11, %v4797_v30, -inf  ;;  %5078 = vperm.xlu2 %8284, %v4997_v28   ;;  %v20161_v29 = vrot.slane %v14658_v47, 2  ;;  %v20163_v32 = vrot.slane %v20162_v13, 2  ;;  %v5022_v30 = vpop.permute.xlu1 %5021  ;;  %v5019_v28 = vpop.permute.xlu0 %5018  ;;  %v20165_v47 = vld [vmem:[#allocation114_spill] sm:$0xff] }
 0x36f   : > { %v15129_v36 = vmax.f32 %v15075_v14, %v4824_v56  ;;  %v15131_v50 = vmax.f32 %v4729_v8, %v4825_v23  ;;  %v5572_v3 = vsel %vm5540_vm14, 1, %v19873_v34  ;;  %vm5113_vm6 = vcmp.eq.s32.totalorder %v5043_v4, 1 }
 0x370   : > { %v4805_v20 = vsel %vm2784_vm7, %v20163_v32, %v20161_v29  ;;  %5649 = vperm.xlu0 %8282, %v5572_v3   ;;  %vm20166_vm4 = vcmp.eq.s32.totalorder %v20165_v47, 1  ;;  %v5197_v32 = vrot.slane %v14185_v45, 7  ;;  %v5198_v23 = vrot.slane %v14199_v2, 7  ;;  %v20169_v47 = vld [vmem:[#allocation193_spill] sm:$0xff] }
 0x371   : > { %20164 = vst [vmem:[#allocation204_spill] sm:$0xff] %v15129_v36  ;;  %v4817_v54 = vsel %vm20166_vm4, %v4805_v20, -inf  ;;  %v18858_v29 = vrot.slane %v15129_v36, 3  ;;  %v18857_v56 = vrot.slane %v15131_v50, 3  ;;  %vm5106_vm0 = vcmp.eq.s32.totalorder %v5022_v30, 1 }
 0x372   : > { %v15141_v8 = vmax.f32 %v20162_v13, %v4817_v54  ;;  %v5199_v55 = vrot.slane %v20168_v22, 7  ;;  %v5228_v11 = vrot.slane %v15043_v46, 7  ;;  %vm5105_vm11 = vcmp.eq.s32.totalorder %v5019_v28, 1 }
 0x373   : > { %v4927_v20 = vsel %vm4908_vm13, %v18858_v29, %v18857_v56  ;;  %v5259_v13 = vsel %vm1388_vm2, %v5197_v32, %v5198_v23  ;;  %v4436_v54 = vpack.c.bf16 %v20169_v47, %v20168_v22  ;;  %v20171_v19 = vrot.slane %v15032_v10, 7 }
 0x374   : > { %20167 = vst [vmem:[#allocation211_spill] sm:$0xff] %v15141_v8  ;;  %v4881_v3 = vrot.slane %v15141_v8, 3  ;;  %v15158_v18 = vsel %vm5113_vm6, %v4927_v20, -inf  ;;  %v5258_v7 = vsel %vm1388_vm2, %v5198_v23, %v5199_v55  ;;  %v5260_v56 = vsel %vm1388_vm2, %v5228_v11, %v5197_v32  ;;  %v20173_v20 = vld [vmem:[#allocation32_spill] sm:$0xff] }
 0x375   : > { %20170 = vst [vmem:[#allocation82_spill] sm:$0xff] %v15158_v18  ;;  %v5229_v27 = vsel %vm1388_vm2, %v20171_v19, %v5228_v11  ;;  %vm20174_vm14 = vcmp.eq.s32.totalorder %v20173_v20, 1  ;;  %vm20176_vm6 = vcmp.eq.s32.totalorder %v20175_v51, 1  ;;  %4512 = vmatmul.bf16.gmra.mxu3 %v4436_v54  ;;  %vm20178_vm4 = vcmp.eq.s32.totalorder %v20090_v41, 1  ;;  %v20179_v51 = vld [vmem:[#allocation182_spill] sm:$0xff]  ;;  %v20222_v18 = vld [vmem:[#allocation160_spill] sm:$0xff] }
 0x376   : > { %v4934_v4 = vsel %vm4908_vm13, %v4881_v3, %v20172_v39  ;;  %v5261_v21 = vsel %vm20174_vm14, %v5260_v56, -inf  ;;  %v5262_v19 = vsel %vm20176_vm6, %v5259_v13, -inf  ;;  %v5292_v11 = vsel %vm20178_vm4, %v5229_v27, -inf  ;;  %v8856_v20 = vld [vmem:[%s18085_s0 + $0xc8] sm:$0xff]  ;;  %v20184_v39 = vld [vmem:[#allocation127_spill] sm:$0xff]  ;;  %v5031_v26 = vpop.permute.xlu1 %5030  ;;  %v5028_v63 = vpop.permute.xlu0 %5027 }
 0x377   : > { %v15179_v23 = vsel %vm5106_vm0, %v4934_v4, -inf  ;;  %v5293_v32 = vmax.f32 %v14185_v45, %v5261_v21  ;;  %v15185_v29 = vmax.f32 %v14199_v2, %v5262_v19  ;;  %v15190_v56 = vmax.f32 %v15043_v46, %v5292_v11 }
 0x378   : > { %20177 = vst [vmem:[#allocation206_spill] sm:$0xff] %v15179_v23  ;;  %v20180_v13 = vrot.slane %v20179_v51, 3  ;;  %vm5542_vm0 = vcmp.ge.s32.totalorder %v8855_v15, 3  ;;  %vm5543_vm14 = vcmp.ge.s32.totalorder %v8856_v20, 3  ;;  %vm4966_vm6 = vcmp.lt.s32.totalorder %v8856_v20, 13  ;;  %v15207_v15 = vpop.permute.xlu2 %5586  ;;  %v20185_v20 = vld [vmem:[#allocation194_spill] sm:$0xff] }
 0x379   : > { %v5325_v54 = vrot.slane %v5293_v32, 6  ;;  %v18863_v41 = vrot.slane %v15185_v29, 6  ;;  %v5574_v2 = vsel %vm5542_vm0, 1, %v19873_v34  ;;  %v4998_v19 = vsel %vm4966_vm6, 1, %v19873_v34  ;;  %v20229_v23 = vld [vmem:[#allocation51_spill] sm:$0xff] }
 0x37a   : > { %v4935_v30 = vsel %vm4908_vm13, %v20180_v13, %v4881_v3  ;;  %5655 = vperm.xlu1 %8283, %v5574_v2   ;;  %v5575_v3 = vsel %vm5543_vm14, 1, %v19873_v34  ;;  %v20181_v11 = vrot.slane %v14809_v42, 2  ;;  %v20182_v13 = vld [vmem:[#allocation219_spill] sm:$0xff]  ;;  %v20186_v4 = vmax.f32 %v20184_v39, %v20185_v20  ;;  %5081 = vperm.xlu0 %8282, %v4998_v19   ;;  %v20196_v19 = vld [vmem:[#allocation9_spill] sm:$0xff] }
 0x37b   : > { %v15198_v21 = vsel %vm5105_vm11, %v4935_v30, -inf  ;;  %v5387_v28 = vsel %vm3361_vm5, %v5325_v54, %v18863_v41  ;;  %v20183_v30 = vrot.slane %v20182_v13, 2  ;;  %v20187_v27 = vmax.f32 %v14733_v60, %v14835_v40  ;;  %5658 = vperm.xlu2 %8284, %v5575_v3   ;;  %v8220_v60 = vld [vmem:[%s18089_s4 + $0xe8] sm:$0xff] }
 0x37c   : > { %v20189_v41 = vrot.slane %v15190_v56, 6  ;;  %v5390_v42 = vsel %vm3555_vm12, %v5387_v28, -inf  ;;  %v5200_v31 = vrot.slane %v20169_v47, 7  ;;  %v20195_v28 = vld [vmem:[#allocation130_spill] sm:$0xff]  ;;  %6497 = vmatpush.bf16.msrb.mxu0 %v8220_v60  ;;  %v20201_v60 = vld [vmem:[#allocation36_spill] sm:$0xff]  ;;  %vm20207_vm14 = vcmp.eq.s32.totalorder %v20100_v53, 1 }
 0x37d   : > { %v4802_v2 = vsel %vm2784_vm7, %v20183_v30, %v20181_v11  ;;  %v15227_v45 = vmax.f32 %v20187_v27, %v20186_v4  ;;  %v20191_v11 = vld [vmem:[#allocation122_spill] sm:$0xff]  ;;  %v15243_v20 = vmax.f32 %v15185_v29, %v5390_v42  ;;  %v5201_v3 = vrot.slane %v20195_v28, 7 }
 0x37e   : > { %v5388_v46 = vsel %vm3361_vm5, %v20189_v41, %v5325_v54  ;;  %vm20192_vm11 = vcmp.eq.s32.totalorder %v20191_v11, 1  ;;  %v20197_v11 = vld [vmem:[#allocation44_spill] sm:$0xff]  ;;  %vm20202_vm4 = vcmp.eq.s32.totalorder %v20201_v60, 1  ;;  %vm5485_vm6 = vcmp.lt.s32.totalorder %v9481_v43, 3  ;;  %v5040_v0 = vpop.permute.xlu1 %5039 }
 0x37f   : > { %20188 = vst [vmem:[#allocation129_spill] sm:$0xff] %v15227_v45  ;;  %v4820_v30 = vsel %vm20192_vm11, %v4802_v2, -inf  ;;  %v5389_v4 = vsel %vm3554_vm15, %v5388_v46, -inf  ;;  %v18869_v2 = vrot.slane %v20196_v19, 7  ;;  %vm20198_vm12 = vcmp.eq.s32.totalorder %v20197_v11, 1 }
 0x380   : > { %v15246_v54 = vmax.f32 %v20182_v13, %v4820_v30  ;;  %v15249_v41 = vmax.f32 %v5293_v32, %v5389_v4  ;;  %v5263_v5 = vsel %vm20198_vm12, %v5258_v7, -inf  ;;  %vm5109_vm15 = vcmp.eq.s32.totalorder %v5031_v26, 1  ;;  %v20204_v4 = vld [vmem:[#allocation48_spill] sm:$0xff]  ;;  %v5596_v53 = vpop.permute.xlu2 %5595 }
 0x381   : > { %v5257_v13 = vsel %vm1388_vm2, %v5199_v55, %v5200_v31  ;;  %v15259_v42 = vmax.f32 %v20168_v22, %v5263_v5  ;;  %v20199_v32 = vrot.slane %v15032_v10, 7  ;;  %v20200_v30 = vrot.slane %v15006_v58, 7 }
 0x382   : > { %20194 = vst [vmem:[#allocation177_spill] sm:$0xff] %v15246_v54  ;;  %v4884_v46 = vrot.slane %v15246_v54, 3  ;;  %v5255_v7 = vsel %vm1388_vm2, %v5201_v3, %v18869_v2  ;;  %v5256_v26 = vsel %vm1388_vm2, %v5200_v31, %v5201_v3  ;;  %v5264_v55 = vsel %vm20202_vm4, %v5257_v13, -inf }
 0x383   : > { %v5230_v27 = vsel %vm1388_vm2, %v20200_v30, %v20199_v32  ;;  %v20203_v5 = vrot.slane %v14866_v33, 3  ;;  %vm20205_vm0 = vcmp.eq.s32.totalorder %v20204_v4, 1  ;;  %v5296_v32 = vmax.f32 %v20169_v47, %v5264_v55  ;;  %v20208_v47 = vld [vmem:[#allocation153_spill] sm:$0xff] }
 0x384   : > { %v5265_v11 = vsel %vm20205_vm0, %v5256_v26, -inf  ;;  %v18872_v30 = vrot.slane %v15259_v42, 6  ;;  %v18877_v58 = vrot.slane %v15243_v20, 5  ;;  %v15292_v13 = vsel %vm20207_vm14, %v5230_v27, -inf  ;;  %v20210_v4 = vld [vmem:[#allocation97_spill] sm:$0xff] }
 0x385   : > { %v4931_v22 = vsel %vm4908_vm13, %v4884_v46, %v20203_v5  ;;  %v15288_v3 = vmax.f32 %v20195_v28, %v5265_v11  ;;  %v5328_v60 = vrot.slane %v5296_v32, 6  ;;  %v20209_v55 = vrot.slane %v20208_v47, 3  ;;  %v20211_v11 = vld [vmem:[#allocation74_spill] sm:$0xff] }
 0x386   : > { %v15285_v31 = vsel %vm5109_vm15, %v4931_v22, -inf  ;;  %vm5108_vm11 = vcmp.eq.s32.totalorder %v5028_v63, 1  ;;  %v2337_v2 = vpack.c.bf16 %v20211_v11, %v20210_v4  ;;  %v8858_v63 = vld [vmem:[%s18085_s0 + $0xd0] sm:$0xff]  ;;  %vm5682_vm4 = vcmp.eq.s32.totalorder %v5596_v53, 1  ;;  %v20219_v11 = vld [vmem:[#allocation220_spill] sm:$0xff] }
 0x387   : > { %20206 = vst [vmem:[#allocation19_spill] sm:$0xff] %v15285_v31  ;;  %v4932_v5 = vsel %vm4908_vm13, %v20209_v55, %v4884_v46  ;;  %v18880_v22 = vrot.slane %v15288_v3, 6  ;;  %v5385_v27 = vsel %vm3361_vm5, %v18872_v30, %v5328_v60  ;;  %v15313_v46 = vld [vmem:[%s18085_s0 + $0xd8] sm:$0xff]  ;;  %vm5544_vm15 = vcmp.ge.s32.totalorder %v8858_v63, 3 }
 0x388   : > { %v15308_v26 = vsel %vm5108_vm11, %v4932_v5, -inf  ;;  %vm4968_vm12 = vcmp.lt.s32.totalorder %v15313_v46, 13  ;;  %v20212_v55 = vrot.slane %v15249_v41, 5  ;;  %v5392_v30 = vsel %vm3557_vm8, %v5385_v27, -inf  ;;  %2421 = vmatmul.bf16.gmra.mxu1 %v2337_v2 }
 0x389   : > { %v5384_v4 = vsel %vm3361_vm5, %v5328_v60, %v18880_v22  ;;  %v15337_v25 = vmax.f32 %v5296_v32, %v5392_v30  ;;  %vm4967_vm8 = vcmp.lt.s32.totalorder %v8858_v63, 13  ;;  %v20215_v60 = vrot.slane %v15075_v14, 2  ;;  %v5037_v30 = vpop.permute.xlu0 %5036  ;;  %v20221_v63 = vld [vmem:[#allocation12_spill] sm:$0xff] }
 0x38a   : > { %v15325_v5 = vsel %vm5485_vm6, %v20212_v55, %v18877_v58  ;;  %v5393_v54 = vsel %vm3558_vm3, %v5384_v4, -inf  ;;  %v5000_v55 = vsel %vm4968_vm12, 1, %v19873_v34  ;;  %v5576_v58 = vsel %vm5544_vm15, 1, %v19873_v34  ;;  %v20217_v4 = vld [vmem:[#allocation84_spill] sm:$0xff] }
 0x38b   : > { %v15342_v37 = vmax.f32 %v15288_v3, %v5393_v54  ;;  %5087 = vperm.xlu1 %8283, %v5000_v55   ;;  %5661 = vperm.xlu2 %8284, %v5576_v58   ;;  %v20216_v2 = vrot.slane %v14813_v17, 2  ;;  %v4999_v27 = vsel %vm4967_vm8, 1, %v19873_v34  ;;  %vm20218_vm3 = vcmp.eq.s32.totalorder %v20217_v4, 1  ;;  %v20224_v4 = vld [vmem:[#allocation47_spill] sm:$0xff] }
 0x38c   : > { %v5203_v22 = vrot.slane %v20219_v11, 7  ;;  %5084 = vperm.xlu0 %8282, %v4999_v27   ;;  %v5204_v55 = vrot.slane %v20221_v63, 7  ;;  %vm5112_vm0 = vcmp.eq.s32.totalorder %v5040_v0, 1  ;;  %vm20225_vm14 = vcmp.eq.s32.totalorder %v20224_v4, 1  ;;  %v20227_v4 = vld [vmem:[#allocation43_spill] sm:$0xff] }
 0x38d   : > { %v4799_v32 = vsel %vm2784_vm7, %v20216_v2, %v20215_v60  ;;  %v18886_v58 = vrot.slane %v15342_v37, 5  ;;  %v5205_v60 = vrot.slane %v20222_v18, 7  ;;  %v20223_v2 = vrot.slane %v20196_v19, 7 }
 0x38e   : > { %v4823_v54 = vsel %vm20218_vm3, %v4799_v32, -inf  ;;  %v5266_v32 = vsel %vm20225_vm14, %v5255_v7, -inf  ;;  %vm5111_vm11 = vcmp.eq.s32.totalorder %v5037_v30, 1  ;;  %v20226_v27 = vrot.slane %v15337_v25, 5 }
 0x38f   : > { %v15357_v14 = vmax.f32 %v14813_v17, %v4823_v54  ;;  %v5254_v31 = vsel %vm1388_vm2, %v20223_v2, %v5203_v22  ;;  %v5252_v12 = vsel %vm1388_vm2, %v5204_v55, %v5205_v60  ;;  %v5253_v33 = vsel %vm1388_vm2, %v5203_v22, %v5204_v55 }
 0x390   : > { %v5513_v17 = vsel %vm5485_vm6, %v20226_v27, %v18886_v58  ;;  %vm20228_vm12 = vcmp.eq.s32.totalorder %v20227_v4, 1  ;;  %vm20230_vm15 = vcmp.eq.s32.totalorder %v20229_v23, 1  ;;  %v15384_v16 = vmax.f32 %v20196_v19, %v5266_v32 }
 0x391   : > { %20220 = vst [vmem:[#allocation18_spill] sm:$0xff] %v15357_v14  ;;  %v4887_v54 = vrot.slane %v15357_v14, 3  ;;  %v5714_v2 = vsel %vm5682_vm4, %v5513_v17, -inf  ;;  %v5267_v7 = vsel %vm20228_vm12, %v5254_v31, -inf  ;;  %v5268_v8 = vsel %vm20230_vm15, %v5253_v33, -inf }
 0x392   : > { %vm5679_vm8 = vcmp.eq.s32.totalorder %v15207_v15, 1  ;;  %v5746_v27 = vmax.f32 %v15342_v37, %v5714_v2  ;;  %v20231_v58 = vrot.slane %v15129_v36, 3  ;;  %v5299_v53 = vmax.f32 %v20219_v11, %v5267_v7  ;;  %v5605_v7 = vpop.permute.xlu2 %5604 }
 0x393   : > { %v15394_v55 = vmax.f32 %v20221_v63, %v5268_v8  ;;  %v18888_v33 = vrot.slane %v15384_v16, 6  ;;  %v20233_v31 = vrot.slane %v14868_v61, 3  ;;  %v4437_v17 = vpack.c.bf16 %v20196_v19, %v20195_v28  ;;  %v15420_v28 = vld [vmem:[%s18085_s0 + $0xe0] sm:$0xff] }
 0x394   : > { %v4928_v22 = vsel %vm4908_vm13, %v4887_v54, %v20231_v58  ;;  %v20234_v58 = vmax.f32 %v20179_v51, %v15198_v21  ;;  %v5331_v8 = vrot.slane %v5299_v53, 6  ;;  %vm4969_vm4 = vcmp.lt.s32.totalorder %v15420_v28, 13  ;;  %v8860_v51 = vld [vmem:[%s18085_s0 + $0xe8] sm:$0xff]  ;;  %v15427_v21 = vpop.permute.xlu1 %5583 }
 0x395   : > { %v15397_v23 = vsel %vm5112_vm0, %v4928_v22, -inf  ;;  %v4929_v32 = vsel %vm4908_vm13, %v20233_v31, %v4887_v54  ;;  %v18887_v4 = vrot.slane %v15394_v55, 6  ;;  %4517 = vmatmul.bf16.gmra.mxu3 %v4437_v17  ;;  %vm4970_vm3 = vcmp.lt.s32.totalorder %v8860_v51, 13  ;;  %v20235_v31 = vld [vmem:[#allocation136_spill] sm:$0xff] }
 0x396   : > { %20232 = vst [vmem:[#allocation8_spill] sm:$0xff] %v15397_v23  ;;  %v15409_v2 = vmax.f32 %v20234_v58, %v5746_v27  ;;  %v15415_v22 = vsel %vm5111_vm11, %v4929_v32, -inf  ;;  %vm5545_vm0 = vcmp.ge.s32.totalorder %v15313_v46, 3  ;;  %v5382_v30 = vsel %vm3361_vm5, %v18888_v33, %v5331_v8  ;;  %v20237_v32 = vld [vmem:[#allocation134_spill] sm:$0xff]  ;;  %v20242_v54 = vld [vmem:[#allocation52_spill] sm:$0xff] }
 0x397   : > { %v5381_v19 = vsel %vm3361_vm5, %v5331_v8, %v18887_v4  ;;  %v5001_v27 = vsel %vm4969_vm4, 1, %v19873_v34  ;;  %vm20236_vm14 = vcmp.eq.s32.totalorder %v20235_v31, 1  ;;  %vm20238_vm11 = vcmp.eq.s32.totalorder %v20237_v32, 1  ;;  %v20241_v32 = vld [vmem:[#allocation174_spill] sm:$0xff] }
 0x398   : > { %v5395_v46 = vsel %vm20236_vm14, %v5382_v30, -inf  ;;  %v5396_v17 = vsel %vm20238_vm11, %v5381_v19, -inf  ;;  %5090 = vperm.xlu1 %8283, %v5001_v27   ;;  %v5002_v58 = vsel %vm4970_vm3, 1, %v19873_v34  ;;  %v5577_v0 = vsel %vm5545_vm0, 1, %v19873_v34  ;;  %v20240_v19 = vld [vmem:[#allocation170_spill] sm:$0xff] }
 0x399   : > { %v15446_v4 = vmax.f32 %v5299_v53, %v5395_v46  ;;  %v15449_v8 = vmax.f32 %v15394_v55, %v5396_v17  ;;  %vm5685_vm12 = vcmp.eq.s32.totalorder %v5605_v7, 1  ;;  %5093 = vperm.xlu2 %8284, %v5002_v58   ;;  %5664 = vperm.xlu0 %8282, %v5577_v0   ;;  %v15453_v31 = vmax.f32 %v15032_v10, %v15292_v13  ;;  %v20246_v10 = vld [vmem:[#allocation55_spill] sm:$0xff]  ;;  %v20248_v23 = vld [vmem:[#allocation58_spill] sm:$0xff] }
 0x39a   : > { %v5206_v30 = vrot.slane %v14599_v49, 7  ;;  %v5207_v27 = vrot.slane %v20240_v19, 7  ;;  %v18889_v33 = vrot.slane %v20241_v32, 7  ;;  %vm20243_vm15 = vcmp.eq.s32.totalorder %v20242_v54, 1 }
 0x39b   : > { %20239 = vst [vmem:[#allocation179_spill] sm:$0xff] %v15453_v31  ;;  %v5269_v53 = vsel %vm20243_vm15, %v5252_v12, -inf  ;;  %v18895_v17 = vrot.slane %v15449_v8, 5  ;;  %v18898_v58 = vrot.slane %v15453_v31, 6  ;;  %v15469_v13 = vsel %vm5679_vm8, %v15325_v5, -inf }
 0x39c   : > { %v15464_v0 = vmax.f32 %v20222_v18, %v5269_v53  ;;  %v5249_v54 = vsel %vm1388_vm2, %v5207_v27, %v18889_v33  ;;  %v5250_v12 = vsel %vm1388_vm2, %v5206_v30, %v5207_v27  ;;  %v5251_v46 = vsel %vm1388_vm2, %v5205_v60, %v5206_v30 }
 0x39d   : > { %v20244_v53 = vrot.slane %v15446_v4, 5  ;;  %v20245_v5 = vrot.slane %v15190_v56, 6  ;;  %vm20247_vm8 = vcmp.eq.s32.totalorder %v20246_v10, 1  ;;  %vm20249_vm4 = vcmp.eq.s32.totalorder %v20248_v23, 1  ;;  %v20252_v23 = vld [vmem:[#allocation95_spill] sm:$0xff] }
 0x39e   : > { %v5270_v27 = vsel %vm20247_vm8, %v5251_v46, -inf  ;;  %v5271_v60 = vsel %vm20249_vm4, %v5250_v12, -inf  ;;  %v15507_v46 = vpop.permute.xlu0 %5045  ;;  %v18900_v7 = vrot.slane %v20252_v23, 1  ;;  %v20253_v12 = vld [vmem:[#allocation6_spill] sm:$0xff]  ;;  %v20258_v14 = vrot.slane %v14821_v1, 1  ;;  %v20265_v23 = vld [vmem:[#allocation99_spill] sm:$0xff] }
 0x39f   : > { %v5510_v15 = vsel %vm5485_vm6, %v20244_v53, %v18895_v17  ;;  %v5357_v33 = vsel %vm3361_vm5, %v18898_v58, %v20245_v5  ;;  %v5302_v53 = vmax.f32 %v14599_v49, %v5270_v27  ;;  %v15500_v17 = vmax.f32 %v20240_v19, %v5271_v60  ;;  %v20254_v27 = vld [vmem:[#allocation77_spill] sm:$0xff]  ;;  %v15515_v19 = vpop.permute.xlu1 %5592 }
 0x3a0   : > { %v5717_v30 = vsel %vm5685_vm12, %v5510_v15, -inf  ;;  %v5420_v36 = vsel %vm3585_vm9, %v5357_v33, -inf  ;;  %v20255_v60 = vld [vmem:[#allocation81_spill] sm:$0xff]  ;;  %v4667_v10 = vsel %vm939_vm1, %v20258_v14, %v18900_v7  ;;  %vm5547_vm9 = vcmp.ge.s32.totalorder %v8860_v51, 3  ;;  %v5614_v15 = vpop.permute.xlu2 %5613  ;;  %v20263_v51 = vld [vmem:[#allocation146_spill] sm:$0xff] }
 0x3a1   : > { %v5749_v31 = vmax.f32 %v15449_v8, %v5717_v30  ;;  %v15504_v5 = vmax.f32 %v15190_v56, %v5420_v36  ;;  %v5334_v33 = vrot.slane %v5302_v53, 6  ;;  %v2338_v58 = vpack.c.bf16 %v20255_v60, %v20254_v27 }
 0x3a2   : > { %v20256_v56 = vmax.f32 %v20208_v47, %v15308_v26  ;;  %v20259_v27 = vrot.slane %v15500_v17, 6  ;;  %v20260_v36 = vrot.slane %v15464_v0, 6  ;;  %v20261_v47 = vld [vmem:[#allocation25_spill] sm:$0xff]  ;;  %vm20264_vm0 = vcmp.eq.s32.totalorder %v20263_v51, 1 }
 0x3a3   : > { %20251 = vst [vmem:[#allocation65_spill] sm:$0xff] %v15504_v5  ;;  %vm20262_vm3 = vcmp.eq.s32.totalorder %v20261_v47, 1  ;;  %2426 = vmatmul.bf16.gmra.mxu1 %v2338_v58  ;;  %v18903_v14 = vrot.slane %v15504_v5, 5  ;;  %vm20266_vm14 = vcmp.eq.s32.totalorder %v20265_v23, 1  ;;  %vm5678_vm11 = vcmp.eq.s32.totalorder %v15427_v21, 1 }
 0x3a4   : > { %v15522_v30 = vmax.f32 %v20256_v56, %v5749_v31  ;;  %v5378_v60 = vsel %vm3361_vm5, %v5334_v33, %v20259_v27  ;;  %v5379_v26 = vsel %vm3361_vm5, %v20260_v36, %v5334_v33  ;;  %v4699_v31 = vsel %vm20262_vm3, %v4667_v10, -inf  ;;  %v8861_v10 = vld [vmem:[%s18085_s0 + $0xf0] sm:$0xff] }
 0x3a5   : > { %v5579_v56 = vsel %vm5547_vm9, 1, %v19873_v34  ;;  %v5398_v7 = vsel %vm20264_vm0, %v5379_v26, -inf  ;;  %v15547_v27 = vmax.f32 %v14821_v1, %v4699_v31  ;;  %vm4971_vm12 = vcmp.lt.s32.totalorder %v8861_v10, 13 }
 0x3a6   : > { %20257 = vst [vmem:[#allocation115_spill] sm:$0xff] %v15522_v30  ;;  %v5399_v30 = vsel %vm20266_vm14, %v5378_v60, -inf  ;;  %5670 = vperm.xlu1 %8283, %v5579_v56   ;;  %v15550_v33 = vmax.f32 %v5302_v53, %v5398_v7  ;;  %vm5688_vm15 = vcmp.eq.s32.totalorder %v5614_v15, 1  ;;  %v5003_v36 = vsel %vm4971_vm12, 1, %v19873_v34  ;;  %v15604_v1 = vpop.permute.xlu0 %5589 }
 0x3a7   : > { %v15553_v58 = vmax.f32 %v15500_v17, %v5399_v30  ;;  %v18904_v23 = vrot.slane %v15547_v27, 2  ;;  %vm5546_vm8 = vcmp.ge.s32.totalorder %v15420_v28, 3  ;;  %5096 = vperm.xlu2 %8284, %v5003_v36   ;;  %v20267_v30 = vrot.slane %v15259_v42, 6 }
 0x3a8   : > { %v18910_v60 = vrot.slane %v15550_v33, 5  ;;  %v5578_v7 = vsel %vm5546_vm8, 1, %v19873_v34  ;;  %v20268_v26 = vrot.slane %v15185_v29, 6  ;;  %v20269_v31 = vrot.slane %v15249_v41, 5  ;;  %v20271_v29 = vld [vmem:[#allocation110_spill] sm:$0xff] }
 0x3a9   : > { %v18909_v53 = vrot.slane %v15553_v58, 5  ;;  %v20270_v56 = vrot.slane %v15071_v48, 2  ;;  %vm5114_vm4 = vcmp.eq.s32.totalorder %v15507_v46, 1  ;;  %5667 = vperm.xlu0 %8282, %v5578_v7   ;;  %vm20272_vm9 = vcmp.eq.s32.totalorder %v20271_v29, 1 }
 0x3aa   : > { %v5386_v47 = vsel %vm3361_vm5, %v20268_v26, %v20267_v30  ;;  %v5517_v28 = vsel %vm5485_vm6, %v18903_v14, %v20269_v31  ;;  %v20273_v26 = vld [vmem:[#allocation159_spill] sm:$0xff]  ;;  %vm5681_vm14 = vcmp.eq.s32.totalorder %v15515_v19, 1  ;;  %v20285_v21 = vrot.slane %v15337_v25, 5 }
 0x3ab   : > { %v4796_v51 = vsel %vm2784_vm7, %v20270_v56, %v18904_v23  ;;  %v5391_v36 = vsel %vm20272_vm9, %v5386_v47, -inf  ;;  %v5507_v30 = vsel %vm5485_vm6, %v18910_v60, %v18909_v53  ;;  %vm20274_vm3 = vcmp.eq.s32.totalorder %v20273_v26, 1  ;;  %v20275_v23 = vld [vmem:[#allocation61_spill] sm:$0xff]  ;;  %v20282_v53 = vld [vmem:[#allocation63_spill] sm:$0xff] }
 0x3ac   : > { %v4826_v31 = vsel %vm20274_vm3, %v4796_v51, -inf  ;;  %v15594_v14 = vmax.f32 %v15259_v42, %v5391_v36  ;;  %v5209_v56 = vrot.slane %v14448_v52, 7  ;;  %v5720_v7 = vsel %vm5688_vm15, %v5507_v30, -inf }
 0x3ad   : > { %v15599_v29 = vmax.f32 %v15071_v48, %v4826_v31  ;;  %v18912_v47 = vrot.slane %v15014_v44, 7  ;;  %vm20276_vm0 = vcmp.eq.s32.totalorder %v20275_v23, 1  ;;  %v5752_v26 = vmax.f32 %v15553_v58, %v5720_v7  ;;  %v15615_v48 = vpop.permute.xlu1 %5601  ;;  %v20278_v23 = vld [vmem:[#allocation59_spill] sm:$0xff] }
 0x3ae   : > { %v5272_v5 = vsel %vm20276_vm0, %v5249_v54, -inf  ;;  %v5455_v51 = vrot.slane %v15594_v14, 5  ;;  %v20277_v42 = vrot.slane %v20241_v32, 7  ;;  %vm20279_vm12 = vcmp.eq.s32.totalorder %v20278_v23, 1 }
 0x3af   : > { %v15613_v36 = vmax.f32 %v20241_v32, %v5272_v5  ;;  %v18911_v30 = vrot.slane %v15599_v29, 3  ;;  %v5247_v54 = vsel %vm1388_vm2, %v5209_v56, %v18912_v47  ;;  %v15627_v7 = vsel %vm5678_vm11, %v5517_v28, -inf }
 0x3b0   : > { %v5248_v15 = vsel %vm1388_vm2, %v20277_v42, %v5209_v56  ;;  %v20280_v5 = vmax.f32 %v14868_v61, %v15415_v22  ;;  %vm20283_vm15 = vcmp.eq.s32.totalorder %v20282_v53, 1  ;;  %v20284_v56 = vrot.slane %v15131_v50, 3  ;;  %v5623_v61 = vpop.permute.xlu2 %5622 }
 0x3b1   : > { %v5273_v31 = vsel %vm20279_vm12, %v5248_v15, -inf  ;;  %v5274_v19 = vsel %vm20283_vm15, %v5247_v54, -inf  ;;  %v5514_v28 = vsel %vm5485_vm6, %v5455_v51, %v20285_v21  ;;  %v5336_v53 = vrot.slane %v15613_v36, 6  ;;  %v20289_v21 = vld [vmem:[#allocation195_spill] sm:$0xff] }
 0x3b2   : > { %v15632_v42 = vmax.f32 %v20280_v5, %v5752_v26  ;;  %v5305_v60 = vmax.f32 %v14448_v52, %v5273_v31  ;;  %v4926_v15 = vsel %vm4908_vm13, %v20284_v56, %v18911_v30  ;;  %v15648_v22 = vmax.f32 %v15014_v44, %v5274_v19 }
 0x3b3   : > { %v20286_v26 = vmax.f32 %v14357_v57, %v20184_v39  ;;  %v20287_v54 = vmax.f32 %v14835_v40, %v14934_v38  ;;  %v15661_v31 = vsel %vm5114_vm4, %v4926_v15, -inf  ;;  %v5713_v5 = vsel %vm5681_vm14, %v5514_v28, -inf  ;;  %v8219_v39 = vld [vmem:[%s18089_s4 + $0xe0] sm:$0xff]  ;;  %v20297_v15 = vld [vmem:[#allocation168_spill] sm:$0xff] }
 0x3b4   : > { %20281 = vst [vmem:[#allocation27_spill] sm:$0xff] %v15632_v42  ;;  %v5337_v56 = vrot.slane %v5305_v60, 6  ;;  %v20290_v19 = vmax.f32 %v14531_v24, %v20289_v21  ;;  %v20291_v30 = vmax.f32 %v20253_v12, %v14940_v59  ;;  %v5178_v57 = vmax.f32 %v15131_v50, %v15661_v31  ;;  %6498 = vmatpush.bf16.msrb.mxu0 %v8219_v39 }
 0x3b5   : > { %v15657_v23 = vmax.f32 %v20287_v54, %v20286_v26  ;;  %v5338_v40 = vrot.slane %v15648_v22, 6  ;;  %v4438_v38 = vpack.c.bf16 %v20221_v63, %v20219_v11  ;;  %v20293_v24 = vmax.f32 %v15243_v20, %v15469_v13 }
 0x3b6   : > { %v15669_v47 = vmax.f32 %v20291_v30, %v20290_v19  ;;  %v20294_v59 = vmax.f32 %v20152_v9, %v15093_v35  ;;  %v5742_v50 = vmax.f32 %v15249_v41, %v15627_v7  ;;  %v5376_v11 = vsel %vm3361_vm5, %v5336_v53, %v5337_v56  ;;  %v20295_v30 = vld [vmem:[#allocation142_spill] sm:$0xff] }
 0x3b7   : > { %20288 = vst [vmem:[#allocation138_spill] sm:$0xff] %v15657_v23  ;;  %vm5548_vm11 = vcmp.ge.s32.totalorder %v8861_v10, 3  ;;  %v5745_v63 = vmax.f32 %v15337_v25, %v5713_v5  ;;  %v5375_v13 = vsel %vm3361_vm5, %v5337_v56, %v5338_v40  ;;  %vm20296_vm8 = vcmp.eq.s32.totalorder %v20295_v30, 1  ;;  %4522 = vmatmul.bf16.gmra.mxu3 %v4438_v38  ;;  %v8862_v25 = vld [vmem:[%s18085_s0 + $0xf8] sm:$0xff] }
 0x3b8   : > { %20292 = vst [vmem:[#allocation106_spill] sm:$0xff] %v15669_v47  ;;  %v15685_v46 = vmax.f32 %v20294_v59, %v20293_v24  ;;  %v5401_v35 = vsel %vm20296_vm8, %v5376_v11, -inf  ;;  %v5580_v9 = vsel %vm5548_vm11, 1, %v19873_v34  ;;  %vm20298_vm4 = vcmp.eq.s32.totalorder %v20297_v15, 1  ;;  %v5611_v24 = vpop.permute.xlu1 %5610  ;;  %v20304_v30 = vld [vmem:[#allocation68_spill] sm:$0xff] }
 0x3b9   : > { %v5402_v28 = vsel %vm20298_vm4, %v5375_v13, -inf  ;;  %v15703_v26 = vmax.f32 %v5305_v60, %v5401_v35  ;;  %vm5691_vm9 = vcmp.eq.s32.totalorder %v5623_v61, 1  ;;  %5673 = vperm.xlu1 %8283, %v5580_v9   ;;  %vm5549_vm3 = vcmp.ge.s32.totalorder %v8862_v25, 3  ;;  %v5599_v60 = vpop.permute.xlu0 %5598  ;;  %v20307_v15 = vld [vmem:[#allocation92_spill] sm:$0xff] }
 0x3ba   : > { %v15709_v10 = vmax.f32 %v15648_v22, %v5402_v28  ;;  %v20299_v54 = vrot.slane %v15243_v20, 5  ;;  %v5581_v5 = vsel %vm5549_vm3, 1, %v19873_v34  ;;  %vm4972_vm0 = vcmp.lt.s32.totalorder %v8862_v25, 13  ;;  %v5626_v25 = vpop.permute.xlu2 %5625 }
 0x3bb   : > { %v5465_v56 = vrot.slane %v15703_v26, 5  ;;  %vm5680_vm14 = vcmp.eq.s32.totalorder %v15604_v1, 1  ;;  %5676 = vperm.xlu2 %8284, %v5581_v5   ;;  %v5004_v19 = vsel %vm4972_vm0, 1, %v19873_v34  ;;  %v20300_v38 = vrot.slane %v15384_v16, 6  ;;  %v20326_v1 = vld [vmem:[#allocation172_spill] sm:$0xff] }
 0x3bc   : > { %v5515_v31 = vsel %vm5485_vm6, %v20299_v54, %v5455_v51  ;;  %v20301_v39 = vrot.slane %v15288_v3, 6  ;;  %v20302_v51 = vld [vmem:[#allocation185_spill] sm:$0xff]  ;;  %v5466_v13 = vrot.slane %v15709_v10, 5  ;;  %5099 = vperm.xlu0 %8282, %v5004_v19   ;;  %vm20305_vm12 = vcmp.eq.s32.totalorder %v20304_v30, 1  ;;  %v20306_v3 = vld [vmem:[#allocation88_spill] sm:$0xff] }
 0x3bd   : > { %v20303_v59 = vmax.f32 %v20134_v6, %v20302_v51  ;;  %v18919_v34 = vrot.slane %v20136_v62, 7  ;;  %vm5684_vm15 = vcmp.eq.s32.totalorder %v15615_v48, 1  ;;  %vm5683_vm11 = vcmp.eq.s32.totalorder %v5599_v60, 1  ;;  %v8218_v6 = vld [vmem:[%s18089_s4 + $0xd8] sm:$0xff]  ;;  %v20311_v51 = vld [vmem:[#allocation62_spill] sm:$0xff] }
 0x3be   : > { %v5383_v20 = vsel %vm3361_vm5, %v20301_v39, %v20300_v38  ;;  %v2339_v28 = vpack.c.bf16 %v20307_v15, %v20306_v3  ;;  %v20309_v5 = vrot.slane %v15464_v0, 6  ;;  %v20310_v19 = vrot.slane %v15394_v55, 6  ;;  %v20313_v30 = vld [vmem:[#allocation120_spill] sm:$0xff]  ;;  %6499 = vmatpush.bf16.msrb.mxu0 %v8218_v6  ;;  %v8217_v3 = vld [vmem:[%s18089_s4 + $0xd0] sm:$0xff] }
 0x3bf   : > { %v15728_v11 = vmax.f32 %v20303_v59, %v5745_v63  ;;  %v5394_v35 = vsel %vm20305_vm12, %v5383_v20, -inf  ;;  %v5504_v63 = vsel %vm5485_vm6, %v5465_v56, %v5466_v13  ;;  %vm5687_vm8 = vcmp.eq.s32.totalorder %v5611_v24, 1 }
 0x3c0   : > { %v5426_v9 = vmax.f32 %v15384_v16, %v5394_v35  ;;  %v20308_v16 = vrot.slane %v15014_v44, 7  ;;  %v5380_v38 = vsel %vm3361_vm5, %v20310_v19, %v20309_v5  ;;  %v5723_v39 = vsel %vm5691_vm9, %v5504_v63, -inf  ;;  %2431 = vmatmul.bf16.gmra.mxu1 %v2339_v28  ;;  %v20315_v63 = vld [vmem:[#allocation57_spill] sm:$0xff] }
 0x3c1   : > { %vm20312_vm4 = vcmp.eq.s32.totalorder %v20311_v51, 1  ;;  %vm20314_vm3 = vcmp.eq.s32.totalorder %v20313_v30, 1  ;;  %v5755_v55 = vmax.f32 %v15709_v10, %v5723_v39  ;;  %v20316_v28 = vrot.slane %v15446_v4, 5 }
 0x3c2   : > { %v5246_v54 = vsel %vm1388_vm2, %v20308_v16, %v18919_v34  ;;  %v5458_v20 = vrot.slane %v5426_v9, 5  ;;  %v5397_v35 = vsel %vm20314_vm3, %v5380_v38, -inf  ;;  %v4371_v16 = vmax.f32 %v20289_v21, %v20315_v63  ;;  %6500 = vmatpush.bf16.msrb.mxu0 %v8217_v3 }
 0x3c3   : > { %v5275_v59 = vsel %vm20312_vm4, %v5246_v54, -inf  ;;  %v15772_v61 = vmax.f32 %v15464_v0, %v5397_v35  ;;  %v20317_v54 = vrot.slane %v15342_v37, 5  ;;  %v4638_v19 = vrot.slane %v15227_v45, 1  ;;  %v20319_v35 = vld [vmem:[#allocation5_spill] sm:$0xff] }
 0x3c4   : > { %v15769_v15 = vmax.f32 %v20136_v62, %v5275_v59  ;;  %v5511_v6 = vsel %vm5485_vm6, %v5458_v20, %v20316_v28  ;;  %v4639_v38 = vrot.slane %v15669_v47, 1  ;;  %v15786_v39 = vmax.f32 %v5178_v57, %v5755_v55  ;;  %v20323_v55 = vld [vmem:[#allocation209_spill] sm:$0xff]  ;;  %v20328_v28 = vld [vmem:[#allocation211_spill] sm:$0xff] }
 0x3c5   : > { %v5512_v5 = vsel %vm5485_vm6, %v20317_v54, %v5458_v20  ;;  %v5716_v0 = vsel %vm5684_vm15, %v5511_v6, -inf  ;;  %v5461_v37 = vrot.slane %v15772_v61, 5  ;;  %v20320_v20 = vmax.f32 %v20319_v35, %v20253_v12  ;;  %v20322_v12 = vld [vmem:[#allocation123_spill] sm:$0xff]  ;;  %v20329_v6 = vld [vmem:[#allocation206_spill] sm:$0xff] }
 0x3c6   : > { %20318 = vst [vmem:[#allocation213_spill] sm:$0xff] %v15786_v39  ;;  %v18916_v21 = vrot.slane %v15769_v15, 6  ;;  %v5715_v51 = vsel %vm5683_vm11, %v5512_v5, -inf  ;;  %v5748_v59 = vmax.f32 %v15446_v4, %v5716_v0  ;;  %v5712_v57 = vsel %vm5680_vm14, %v5515_v31, -inf }
 0x3c7   : > { %v5747_v30 = vmax.f32 %v5426_v9, %v5715_v51  ;;  %v15797_v63 = vmax.f32 %v20320_v20, %v4371_v16  ;;  %v4640_v4 = vrot.slane %v15657_v23, 1  ;;  %v4664_v60 = vsel %vm939_vm1, %v4638_v19, %v4639_v38  ;;  %v5608_v9 = vpop.permute.xlu0 %5607 }
 0x3c8   : > { %v5374_v48 = vsel %vm3361_vm5, %v5338_v40, %v18916_v21  ;;  %v20324_v16 = vmax.f32 %v20322_v12, %v20323_v55  ;;  %vm20327_vm9 = vcmp.eq.s32.totalorder %v20326_v1, 1  ;;  %v20330_v22 = vmax.f32 %v20328_v28, %v20329_v6  ;;  %v20334_v1 = vld [vmem:[#allocation29_spill] sm:$0xff]  ;;  %v20336_v28 = vld [vmem:[#allocation187_spill] sm:$0xff]  ;;  %v20388_v21 = vld [vmem:[#allocation64_spill] sm:$0xff] }
 0x3c9   : > { %20321 = vst [vmem:[#allocation135_spill] sm:$0xff] %v15797_v63  ;;  %v5403_v31 = vsel %vm20327_vm9, %v5374_v48, -inf  ;;  %v20331_v40 = vrot.slane %v15550_v33, 5  ;;  %v4663_v35 = vsel %vm939_vm1, %v4639_v38, %v4640_v4  ;;  %v5744_v20 = vmax.f32 %v15594_v14, %v5712_v57  ;;  %v20332_v48 = vld [vmem:[#allocation30_spill] sm:$0xff]  ;;  %v20337_v14 = vld [vmem:[#allocation60_spill] sm:$0xff] }
 0x3ca   : > { %v15813_v3 = vmax.f32 %v20324_v16, %v5748_v59  ;;  %v15820_v54 = vmax.f32 %v20330_v22, %v5747_v30  ;;  %v15827_v0 = vmax.f32 %v15769_v15, %v5403_v31  ;;  %v4637_v59 = vrot.slane %v15797_v63, 1  ;;  %v15838_v16 = vpop.permute.xlu2 %5057 }
 0x3cb   : > { %v5508_v5 = vsel %vm5485_vm6, %v5461_v37, %v20331_v40  ;;  %vm5692_vm0 = vcmp.eq.s32.totalorder %v5626_v25, 1  ;;  %vm20333_vm14 = vcmp.eq.s32.totalorder %v20332_v48, 1  ;;  %vm20335_vm12 = vcmp.eq.s32.totalorder %v20334_v1, 1  ;;  %v20343_v48 = vld [vmem:[#allocation15_spill] sm:$0xff]  ;;  %v5620_v1 = vpop.permute.xlu1 %5619  ;;  %v8215_v25 = vld [vmem:[%s18089_s4 + $0xc0] sm:$0xff] }
 0x3cc   : > { %20325 = vst [vmem:[#allocation214_spill] sm:$0xff] %v15813_v3  ;;  %v5719_v51 = vsel %vm5687_vm8, %v5508_v5, -inf  ;;  %v4702_v12 = vsel %vm20333_vm14, %v4664_v60, -inf  ;;  %v18914_v55 = vrot.slane %v15827_v0, 5  ;;  %v4665_v24 = vsel %vm939_vm1, %v4637_v59, %v4638_v19 }
 0x3cd   : > { %v5751_v30 = vmax.f32 %v15550_v33, %v5719_v51  ;;  %v4703_v31 = vsel %vm20335_vm12, %v4663_v35, -inf  ;;  %v4734_v38 = vmax.f32 %v15227_v45, %v4702_v12  ;;  %v20338_v57 = vmax.f32 %v20336_v28, %v20337_v14  ;;  %v20339_v33 = vld [vmem:[#allocation14_spill] sm:$0xff] }
 0x3ce   : > { %vm20340_vm15 = vcmp.eq.s32.totalorder %v20339_v33, 1  ;;  %v15853_v22 = vmax.f32 %v15669_v47, %v4703_v31  ;;  %v20341_v40 = vrot.slane %v15449_v8, 5  ;;  %v5503_v5 = vsel %vm5485_vm6, %v5466_v13, %v18914_v55  ;;  %v20342_v8 = vld [vmem:[#allocation178_spill] sm:$0xff] }
 0x3cf   : > { %v15848_v6 = vmax.f32 %v20338_v57, %v5751_v30  ;;  %v4701_v60 = vsel %vm20340_vm15, %v4665_v24, -inf  ;;  %v4766_v35 = vrot.slane %v4734_v38, 2  ;;  %vm5686_vm11 = vcmp.eq.s32.totalorder %v5608_v9, 1  ;;  %v8216_v30 = vld [vmem:[%s18089_s4 + $0xc8] sm:$0xff] }
 0x3d0   : > { %v5509_v19 = vsel %vm5485_vm6, %v20341_v40, %v5461_v37  ;;  %v15866_v51 = vmax.f32 %v15797_v63, %v4701_v60  ;;  %v20344_v12 = vmax.f32 %v20342_v8, %v20343_v48  ;;  %v15877_v24 = vsel %vm5692_vm0, %v5503_v5, -inf  ;;  %6501 = vmatpush.bf16.msrb.mxu0 %v8216_v30  ;;  %v20346_v57 = vld [vmem:[#allocation210_spill] sm:$0xff]  ;;  %v20351_v5 = vld [vmem:[#allocation19_spill] sm:$0xff]  ;;  %v20353_v48 = vld [vmem:[#allocation132_spill] sm:$0xff] }
 0x3d1   : > { %v4767_v10 = vrot.slane %v15853_v22, 2  ;;  %v5718_v13 = vsel %vm5686_vm11, %v5509_v19, -inf  ;;  %v5756_v31 = vmax.f32 %v15827_v0, %v15877_v24  ;;  %v4439_v14 = vpack.c.bf16 %v14599_v49, %v20222_v18  ;;  %v20404_v24 = vld [vmem:[#allocation66_spill] sm:$0xff] }
 0x3d2   : > { %v15874_v37 = vmax.f32 %v20344_v12, %v5744_v20  ;;  %v4765_v9 = vrot.slane %v15866_v51, 2  ;;  %v5750_v28 = vmax.f32 %v15772_v61, %v5718_v13  ;;  %v20345_v20 = vld [vmem:[#allocation145_spill] sm:$0xff]  ;;  %v20348_v49 = vrot.slane %v15500_v17, 6  ;;  %v5617_v12 = vpop.permute.xlu0 %5616 }
 0x3d3   : > { %v20347_v33 = vmax.f32 %v20345_v20, %v20346_v57  ;;  %v4792_v40 = vsel %vm2784_vm7, %v4766_v35, %v4767_v10  ;;  %v20349_v61 = vld [vmem:[#allocation93_spill] sm:$0xff]  ;;  %4527 = vmatmul.bf16.gmra.mxu3 %v4439_v14  ;;  %vm20354_vm8 = vcmp.eq.s32.totalorder %v20353_v48, 1  ;;  %v20358_v14 = vld [vmem:[#allocation115_spill] sm:$0xff]  ;;  %vm5690_vm3 = vcmp.eq.s32.totalorder %v5620_v1, 1 }
 0x3d4   : > { %v5377_v18 = vsel %vm3361_vm5, %v20348_v49, %v5336_v53  ;;  %v18913_v19 = vrot.slane %v20349_v61, 1  ;;  %v4793_v7 = vsel %vm2784_vm7, %v4765_v9, %v4766_v35  ;;  %v20355_v13 = vld [vmem:[#allocation133_spill] sm:$0xff]  ;;  %v15932_v49 = vmax.f32 %v15820_v54, %v20358_v14  ;;  %6502 = vmatpush.bf16.msrb.mxu0 %v8215_v25  ;;  %v20393_v53 = vld [vmem:[#allocation170_spill] sm:$0xff] }
 0x3d5   : > { %v15895_v60 = vmax.f32 %v20347_v33, %v5742_v50  ;;  %v20350_v50 = vld [vmem:[#allocation177_spill] sm:$0xff]  ;;  %v5400_v17 = vsel %vm20354_vm8, %v5377_v18, -inf  ;;  %vm20356_vm4 = vcmp.eq.s32.totalorder %v20355_v13, 1  ;;  %vm5689_vm14 = vcmp.eq.s32.totalorder %v5617_v12, 1 }
 0x3d6   : > { %v20352_v30 = vmax.f32 %v20350_v50, %v20351_v5  ;;  %v4830_v57 = vsel %vm20356_vm4, %v4792_v40, -inf  ;;  %v5432_v33 = vmax.f32 %v15613_v36, %v5400_v17  ;;  %v4662_v35 = vsel %vm939_vm1, %v4640_v4, %v18913_v19  ;;  %20359 = vst [vmem:[#allocation109_spill] sm:$0xff] %v15932_v49  ;;  %v20360_v18 = vld [vmem:[#allocation17_spill] sm:$0xff]  ;;  %v20362_v40 = vld [vmem:[#allocation155_spill] sm:$0xff]  ;;  %v5061_v17 = vpop.permute.xlu2 %5060  ;;  %v20365_v19 = vld [vmem:[#allocation116_spill] sm:$0xff] }
 0x3d7   : > { %vm20361_vm9 = vcmp.eq.s32.totalorder %v20360_v18, 1  ;;  %vm20363_vm0 = vcmp.eq.s32.totalorder %v20362_v40, 1  ;;  %v15943_v4 = vmax.f32 %v20358_v14, %v15848_v6  ;;  %v15945_v48 = vmax.f32 %v4734_v38, %v4830_v57  ;;  %v20364_v13 = vld [vmem:[#allocation101_spill] sm:$0xff]  ;;  %v20369_v57 = vld [vmem:[#allocation24_spill] sm:$0xff] }
 0x3d8   : > { %v15913_v8 = vmax.f32 %v20352_v30, %v5750_v28  ;;  %v15928_v28 = vmax.f32 %v15409_v2, %v15813_v3  ;;  %v4704_v50 = vsel %vm20361_vm9, %v4662_v35, -inf  ;;  %v4829_v36 = vsel %vm20363_vm0, %v4793_v7, -inf  ;;  %v20366_v35 = vld [vmem:[#allocation95_spill] sm:$0xff] }
 0x3d9   : > { %v5464_v5 = vrot.slane %v5432_v33, 5  ;;  %v15939_v30 = vmax.f32 %v15657_v23, %v4704_v50  ;;  %v2340_v18 = vpack.c.bf16 %v20365_v19, %v20364_v13  ;;  %v20367_v25 = vrot.slane %v20366_v35, 1 }
 0x3da   : > { %20357 = vst [vmem:[#allocation125_spill] sm:$0xff] %v15928_v28  ;;  %v20368_v40 = vrot.slane %v15553_v58, 5  ;;  %vm20370_vm12 = vcmp.eq.s32.totalorder %v20369_v57, 1  ;;  %v15965_v13 = vmax.f32 %v15866_v51, %v4829_v36  ;;  %vm5119_vm15 = vcmp.eq.s32.totalorder %v5061_v17, 1  ;;  %v20371_v51 = vld [vmem:[#allocation186_spill] sm:$0xff] }
 0x3db   : > { %v4666_v7 = vsel %vm939_vm1, %v20367_v25, %v4637_v59  ;;  %v5505_v12 = vsel %vm5485_vm6, %v5464_v5, %v5465_v56  ;;  %v18915_v50 = vrot.slane %v15939_v30, 2  ;;  %2436 = vmatmul.bf16.gmra.mxu1 %v2340_v18  ;;  %vm5118_vm11 = vcmp.eq.s32.totalorder %v15838_v16, 1  ;;  %v20394_v16 = vld [vmem:[#allocation107_spill] sm:$0xff] }
 0x3dc   : > { %v5506_v38 = vsel %vm5485_vm6, %v20368_v40, %v5464_v5  ;;  %v4700_v19 = vsel %vm20370_vm12, %v4666_v7, -inf  ;;  %v5722_v59 = vsel %vm5690_vm3, %v5505_v12, -inf  ;;  %v5052_v40 = vpop.permute.xlu1 %5051  ;;  %v4894_v7 = vrot.slane %v15945_v48, 3  ;;  %v20373_v12 = vld [vmem:[#allocation204_spill] sm:$0xff] }
 0x3dd   : > { %v5721_v25 = vsel %vm5689_vm14, %v5506_v38, -inf  ;;  %v4732_v55 = vmax.f32 %v20366_v35, %v4700_v19  ;;  %v5754_v56 = vmax.f32 %v15703_v26, %v5722_v59  ;;  %v4791_v58 = vsel %vm2784_vm7, %v4767_v10, %v18915_v50  ;;  %v20374_v26 = vld [vmem:[#allocation82_spill] sm:$0xff]  ;;  %v20378_v19 = vld [vmem:[#allocation8_spill] sm:$0xff] }
 0x3de   : > { %v5753_v5 = vmax.f32 %v5432_v33, %v5721_v25  ;;  %vm20372_vm8 = vcmp.eq.s32.totalorder %v20371_v51, 1  ;;  %v18918_v18 = vrot.slane %v20366_v35, 7  ;;  %v20375_v38 = vmax.f32 %v20373_v12, %v20374_v26  ;;  %v20377_v33 = vld [vmem:[#allocation18_spill] sm:$0xff] }
 0x3df   : > { %v4831_v1 = vsel %vm20372_vm8, %v4791_v58, -inf  ;;  %v4764_v36 = vrot.slane %v4732_v55, 2  ;;  %v20379_v59 = vmax.f32 %v20377_v33, %v20378_v19  ;;  %v5214_v50 = vrot.slane %v15797_v63, 7  ;;  %v20384_v33 = vld [vmem:[#allocation85_spill] sm:$0xff] }
 0x3e0   : > { %v15982_v57 = vmax.f32 %v20375_v38, %v5754_v56  ;;  %v15985_v10 = vmax.f32 %v15853_v22, %v4831_v1  ;;  %v20381_v51 = vrot.slane %v15547_v27, 2  ;;  %v5215_v56 = vrot.slane %v15227_v45, 7 }
 0x3e1   : > { %v15990_v25 = vmax.f32 %v20379_v59, %v5753_v5  ;;  %v4794_v58 = vsel %vm2784_vm7, %v4764_v36, %v4765_v9  ;;  %v5216_v22 = vrot.slane %v15669_v47, 7  ;;  %v4893_v1 = vrot.slane %v15965_v13, 3  ;;  %v20382_v5 = vld [vmem:[#allocation165_spill] sm:$0xff] }
 0x3e2   : > { %20376 = vst [vmem:[#allocation111_spill] sm:$0xff] %v15982_v57  ;;  %v4795_v12 = vsel %vm2784_vm7, %v20381_v51, %v4764_v36  ;;  %v18917_v26 = vrot.slane %v15985_v10, 3  ;;  %vm20383_vm4 = vcmp.eq.s32.totalorder %v20382_v5, 1  ;;  %vm5116_vm3 = vcmp.eq.s32.totalorder %v5052_v40, 1  ;;  %v16067_v40 = vpop.permute.xlu2 %5640 }
 0x3e3   : > { %20380 = vst [vmem:[#allocation167_spill] sm:$0xff] %v15990_v25  ;;  %v4827_v38 = vsel %vm20383_vm4, %v4795_v12, -inf  ;;  %vm20385_vm9 = vcmp.eq.s32.totalorder %v20384_v33, 1  ;;  %v5241_v36 = vsel %vm1388_vm2, %v5215_v56, %v5216_v22  ;;  %v5242_v59 = vsel %vm1388_vm2, %v5214_v50, %v5215_v56 }
 0x3e4   : > { %v4828_v9 = vsel %vm20385_vm9, %v4794_v58, -inf  ;;  %v16008_v19 = vmax.f32 %v15547_v27, %v4827_v38  ;;  %v4921_v51 = vsel %vm4908_vm13, %v4894_v7, %v18917_v26  ;;  %v5243_v58 = vsel %vm1388_vm2, %v18918_v18, %v5214_v50  ;;  %v20386_v27 = vld [vmem:[#allocation83_spill] sm:$0xff]  ;;  %v5049_v38 = vpop.permute.xlu0 %5048  ;;  %v5055_v18 = vpop.permute.xlu1 %5054 }
 0x3e5   : > { %v16018_v5 = vmax.f32 %v4732_v55, %v4828_v9  ;;  %vm20387_vm0 = vcmp.eq.s32.totalorder %v20386_v27, 1  ;;  %v16027_v33 = vsel %vm5119_vm15, %v4921_v51, -inf  ;;  %vm20389_vm14 = vcmp.eq.s32.totalorder %v20388_v21, 1  ;;  %v20390_v26 = vld [vmem:[#allocation75_spill] sm:$0xff] }
 0x3e6   : > { %v5279_v12 = vsel %vm20387_vm0, %v5242_v59, -inf  ;;  %v4891_v56 = vrot.slane %v16008_v19, 3  ;;  %v5278_v41 = vsel %vm20389_vm14, %v5243_v58, -inf  ;;  %vm20391_vm12 = vcmp.eq.s32.totalorder %v20390_v26, 1 }
 0x3e7   : > { %v5280_v55 = vsel %vm20391_vm12, %v5241_v36, -inf  ;;  %v4892_v50 = vrot.slane %v16018_v5, 3  ;;  %v16038_v27 = vmax.f32 %v15797_v63, %v5278_v41  ;;  %v5311_v17 = vmax.f32 %v15227_v45, %v5279_v12 }
 0x3e8   : > { %v4922_v59 = vsel %vm4908_vm13, %v4893_v1, %v4894_v7  ;;  %v5312_v51 = vmax.f32 %v15669_v47, %v5280_v55  ;;  %v20392_v21 = vrot.slane %v15599_v29, 3  ;;  %vm5115_vm15 = vcmp.eq.s32.totalorder %v5049_v38, 1 }
 0x3e9   : > { %v4924_v36 = vsel %vm4908_vm13, %v4891_v56, %v4892_v50  ;;  %v18920_v58 = vrot.slane %v16038_v27, 6  ;;  %v5343_v41 = vrot.slane %v5311_v17, 6  ;;  %v4440_v34 = vpack.c.bf16 %v20241_v32, %v20393_v53 }
 0x3ea   : > { %v4925_v26 = vsel %vm4908_vm13, %v20392_v21, %v4891_v56  ;;  %v16052_v12 = vsel %vm5116_vm3, %v4924_v36, -inf  ;;  %v5344_v7 = vrot.slane %v5312_v51, 6  ;;  %v16059_v38 = vsel %vm5118_vm11, %v4922_v59, -inf  ;;  %v20399_v36 = vld [vmem:[#allocation112_spill] sm:$0xff] }
 0x3eb   : > { %v5147_v9 = vsel %vm5115_vm15, %v4925_v26, -inf  ;;  %v16063_v56 = vmax.f32 %v15813_v3, %v15913_v8  ;;  %vm20395_vm11 = vcmp.eq.s32.totalorder %v20394_v16, 1  ;;  %4532 = vmatmul.bf16.gmra.mxu3 %v4440_v34  ;;  %vm5117_vm8 = vcmp.eq.s32.totalorder %v5055_v18, 1  ;;  %v20401_v18 = vld [vmem:[#allocation105_spill] sm:$0xff]  ;;  %v20417_v3 = vld [vmem:[#allocation190_spill] sm:$0xff] }
 0x3ec   : > { %v5179_v55 = vmax.f32 %v15599_v29, %v5147_v9  ;;  %v5370_v29 = vsel %vm3361_vm5, %v18920_v58, %v5343_v41  ;;  %v5369_v32 = vsel %vm3361_vm5, %v5343_v41, %v5344_v7  ;;  %v16084_v59 = vmax.f32 %v15632_v42, %v15982_v57  ;;  %v20403_v58 = vld [vmem:[#allocation86_spill] sm:$0xff] }
 0x3ed   : > { %v5407_v53 = vsel %vm20395_vm11, %v5370_v29, -inf  ;;  %v16088_v26 = vmax.f32 %v15990_v25, %v15786_v39  ;;  %vm20400_vm4 = vcmp.eq.s32.totalorder %v20399_v36, 1  ;;  %v18921_v29 = vrot.slane %v15657_v23, 7  ;;  %v20402_v36 = vld [vmem:[#allocation113_spill] sm:$0xff] }
 0x3ee   : > { %v16080_v9 = vmax.f32 %v5179_v55, %v5756_v31  ;;  %20397 = vst [vmem:[#allocation91_spill] sm:$0xff] %v16084_v59  ;;  %v5408_v41 = vsel %vm20400_vm4, %v5369_v32, -inf  ;;  %v16095_v31 = vmax.f32 %v5311_v17, %v5407_v53  ;;  %v4923_v34 = vsel %vm4908_vm13, %v4892_v50, %v4893_v1 }
 0x3ef   : > { %20398 = vst [vmem:[#allocation11_spill] sm:$0xff] %v16088_v26  ;;  %v5212_v55 = vrot.slane %v20401_v18, 7  ;;  %v16100_v16 = vmax.f32 %v5312_v51, %v5408_v41  ;;  %v16102_v21 = vsel %vm5117_vm8, %v4923_v34, -inf  ;;  %v5240_v32 = vsel %vm1388_vm2, %v5216_v22, %v18921_v29  ;;  %v20410_v34 = vld [vmem:[#allocation69_spill] sm:$0xff] }
 0x3f0   : > { %20396 = vst [vmem:[#allocation201_spill] sm:$0xff] %v16080_v9  ;;  %v2341_v20 = vpack.c.bf16 %v20403_v58, %v20402_v36  ;;  %vm20405_vm3 = vcmp.eq.s32.totalorder %v20404_v24, 1  ;;  %v20406_v53 = vrot.slane %v20136_v62, 7  ;;  %v20407_v50 = vmax.f32 %v15895_v60, %v15874_v37  ;;  %v5629_v24 = vpop.permute.xlu0 %5628 }
 0x3f1   : > { %v5281_v17 = vsel %vm20405_vm3, %v5240_v32, -inf  ;;  %v20408_v22 = vmax.f32 %v15685_v46, %v15728_v11  ;;  %vm5697_vm9 = vcmp.eq.s32.totalorder %v16067_v40, 1  ;;  %vm20411_vm0 = vcmp.eq.s32.totalorder %v20410_v34, 1 }
 0x3f2   : > { %v5245_v1 = vsel %vm1388_vm2, %v20406_v53, %v5212_v55  ;;  %v5902_v51 = vmax.f32 %v20407_v50, %v15928_v28  ;;  %v16126_v58 = vmax.f32 %v15657_v23, %v5281_v17  ;;  %2441 = vmatmul.bf16.gmra.mxu1 %v2341_v20  ;;  %v16132_v36 = vmax.f32 %v16063_v56, %v16084_v59  ;;  %v20415_v50 = vld [vmem:[#allocation70_spill] sm:$0xff]  ;;  %v20424_v59 = vld [vmem:[#allocation196_spill] sm:$0xff]  ;;  %v20450_v23 = vld [vmem:[#allocation35_spill] sm:$0xff] }
 0x3f3   : > { %v5903_v41 = vmax.f32 %v20408_v22, %v15932_v49  ;;  %v5276_v32 = vsel %vm20411_vm0, %v5245_v1, -inf  ;;  %v16136_v53 = vmax.f32 %v15943_v4, %v16088_v26  ;;  %v20414_v29 = vrot.slane %v20366_v35, 7  ;;  %v16154_v26 = vpop.permute.xlu2 %5643  ;;  %v20425_v49 = vld [vmem:[#allocation218_spill] sm:$0xff] }
 0x3f4   : > { %20409 = vst [vmem:[#allocation22_spill] sm:$0xff] %v16126_v58  ;;  %v5308_v17 = vmax.f32 %v20401_v18, %v5276_v32  ;;  %v18933_v34 = vrot.slane %v16126_v58, 6  ;;  %v6062_v47 = vmax.f32 %v5902_v51, %v16132_v36  ;;  %vm5693_vm14 = vcmp.eq.s32.totalorder %v5629_v24, 1  ;;  %v20418_v32 = vld [vmem:[#allocation180_spill] sm:$0xff] }
 0x3f5   : > { %20412 = vst [vmem:[#allocation21_spill] sm:$0xff] %v16132_v36  ;;  %v5244_v20 = vsel %vm1388_vm2, %v5212_v55, %v20414_v29  ;;  %v6063_v45 = vmax.f32 %v5903_v41, %v16136_v53  ;;  %vm20416_vm12 = vcmp.eq.s32.totalorder %v20415_v50, 1  ;;  %v4090_v63 = vmax.f32 %v20418_v32, %v20417_v3  ;;  %v20421_v32 = vld [vmem:[#allocation152_spill] sm:$0xff] }
 0x3f6   : > { %20413 = vst [vmem:[#allocation212_spill] sm:$0xff] %v16136_v53  ;;  %v5340_v14 = vrot.slane %v5308_v17, 6  ;;  %v5277_v22 = vsel %vm20416_vm12, %v5244_v20, -inf  ;;  %v5368_v29 = vsel %vm3361_vm5, %v5344_v7, %v18933_v34  ;;  %v6382_v55 = vmax.f32 %v6062_v47, %v15895_v60  ;;  %v20422_v53 = vld [vmem:[#allocation217_spill] sm:$0xff]  ;;  %v20428_v47 = vld [vmem:[#allocation207_spill] sm:$0xff] }
 0x3f7   : > { %v6383_v51 = vmax.f32 %v6063_v45, %v15685_v46  ;;  %v5309_v41 = vmax.f32 %v20366_v35, %v5277_v22  ;;  %v5409_v50 = vsel %vm3574_vm10, %v5368_v29, -inf  ;;  %v20420_v20 = vrot.slane %v15769_v15, 6  ;;  %v20429_v45 = vld [vmem:[#allocation188_spill] sm:$0xff]  ;;  %v5635_v35 = vpop.permute.xlu1 %5634 }
 0x3f8   : > { %v20423_v36 = vmax.f32 %v20421_v32, %v20422_v53  ;;  %v20426_v7 = vmax.f32 %v20424_v59, %v20425_v49  ;;  %v20430_v28 = vmax.f32 %v20428_v47, %v20429_v45  ;;  %v20432_v1 = vrot.slane %v16100_v16, 5  ;;  %v5632_v62 = vpop.permute.xlu0 %5631 }
 0x3f9   : > { %v5373_v3 = vsel %vm3361_vm5, %v20420_v20, %v5340_v14  ;;  %v20433_v15 = vrot.slane %v16095_v31, 5  ;;  %v20434_v20 = vld [vmem:[#allocation171_spill] sm:$0xff]  ;;  %v6431_v32 = vpack.c.bf16 %v6383_v51, %v6382_v55  ;;  %v5341_v49 = vrot.slane %v5309_v41, 6  ;;  %v20438_v51 = vld [vmem:[#allocation50_spill] sm:$0xff] }
 0x3fa   : > { %v16175_v34 = vmax.f32 %v20426_v7, %v20423_v36  ;;  %v16180_v22 = vmax.f32 %v4090_v63, %v20430_v28  ;;  %vm20435_vm10 = vcmp.eq.s32.totalorder %v20434_v20, 1  ;;  %v20436_v63 = vld [vmem:[#allocation89_spill] sm:$0xff]  ;;  %v16194_v47 = vmax.f32 %v16126_v58, %v5409_v50  ;;  %v20440_v20 = vld [vmem:[#allocation176_spill] sm:$0xff]  ;;  %v20442_v36 = vld [vmem:[#allocation163_spill] sm:$0xff] }
 0x3fb   : > { %v5498_v29 = vsel %vm5485_vm6, %v20433_v15, %v20432_v1  ;;  %v5404_v53 = vsel %vm20435_vm10, %v5373_v3, -inf  ;;  %v4645_v28 = vrot.slane %v20436_v63, 1  ;;  %6503 = vmatmul.bf16.vlgmr.msrb.gmra.mxu0 %v6431_v32  ;;  %v20437_v45 = vrot.slane %v16038_v27, 6  ;;  %v16203_v3 = vpop.f32.mrf.mxu1  ;;  %v5076_v24 = vpop.permute.xlu2 %5075 }
 0x3fc   : > { %20427 = vst [vmem:[#allocation56_spill] sm:$0xff] %v16175_v34  ;;  %v5436_v59 = vmax.f32 %v5308_v17, %v5404_v53  ;;  %v4644_v7 = vrot.slane %v16180_v22, 1  ;;  %v5372_v55 = vsel %vm3361_vm5, %v5340_v14, %v5341_v49  ;;  %v4646_v17 = vrot.slane %v20438_v51, 1 }
 0x3fd   : > { %20431 = vst [vmem:[#allocation34_spill] sm:$0xff] %v16180_v22  ;;  %v5371_v1 = vsel %vm3361_vm5, %v5341_v49, %v20437_v45  ;;  %vm20441_vm15 = vcmp.eq.s32.totalorder %v20440_v20, 1  ;;  %vm20443_vm11 = vcmp.eq.s32.totalorder %v20442_v36, 1  ;;  %vm5698_vm8 = vcmp.eq.s32.totalorder %v16154_v26, 1  ;;  %v20446_v20 = vld [vmem:[#allocation37_spill] sm:$0xff] }
 0x3fe   : > { %20439 = vst [vmem:[#allocation121_spill] sm:$0xff] %v16203_v3  ;;  %v5468_v15 = vrot.slane %v5436_v59, 5  ;;  %v5405_v53 = vsel %vm20441_vm15, %v5372_v55, -inf  ;;  %v5406_v50 = vsel %vm20443_vm11, %v5371_v1, -inf  ;;  %v4658_v32 = vsel %vm939_vm1, %v4644_v7, %v4645_v28  ;;  %v20448_v3 = vld [vmem:[#allocation20_spill] sm:$0xff] }
 0x3ff   : > { %v5437_v45 = vmax.f32 %v5309_v41, %v5405_v53  ;;  %v5438_v58 = vmax.f32 %v16038_v27, %v5406_v50  ;;  %vm5695_vm4 = vcmp.eq.s32.totalorder %v5635_v35, 1  ;;  %v4657_v14 = vsel %vm939_vm1, %v4645_v28, %v4646_v17 }
 0x400   : > { %v16217_v49 = vsel %vm5697_vm9, %v5498_v29, -inf  ;;  %v20444_v55 = vrot.slane %v15827_v0, 5  ;;  %v20445_v1 = vrot.slane %v16175_v34, 1  ;;  %vm20447_vm3 = vcmp.eq.s32.totalorder %v20446_v20, 1 }
 0x401   : > { %v4708_v27 = vsel %vm20447_vm3, %v4658_v32, -inf  ;;  %v18942_v53 = vrot.slane %v16194_v47, 5  ;;  %v5469_v40 = vrot.slane %v5437_v45, 5  ;;  %v5470_v29 = vrot.slane %v5438_v58, 5 }
 0x402   : > { %v5502_v36 = vsel %vm5485_vm6, %v20444_v55, %v5468_v15  ;;  %v4659_v41 = vsel %vm939_vm1, %v20445_v1, %v4644_v7  ;;  %vm20449_vm9 = vcmp.eq.s32.totalorder %v20448_v3, 1  ;;  %vm20451_vm0 = vcmp.eq.s32.totalorder %v20450_v23, 1 }
 0x403   : > { %v5725_v28 = vsel %vm5693_vm14, %v5502_v36, -inf  ;;  %v4707_v0 = vsel %vm20449_vm9, %v4659_v41, -inf  ;;  %v4709_v55 = vsel %vm20451_vm0, %v4657_v14, -inf  ;;  %v4740_v18 = vmax.f32 %v16180_v22, %v4708_v27 }
 0x404   : > { %v5757_v50 = vmax.f32 %v5436_v59, %v5725_v28  ;;  %v5500_v32 = vsel %vm5485_vm6, %v5469_v40, %v5470_v29  ;;  %v16241_v36 = vmax.f32 %v16175_v34, %v4707_v0  ;;  %v16244_v59 = vmax.f32 %v20436_v63, %v4709_v55  ;;  %v5638_v0 = vpop.permute.xlu1 %5637 }
 0x405   : > { %v20452_v23 = vmax.f32 %v16008_v19, %v16052_v12  ;;  %v5727_v14 = vsel %vm5695_vm4, %v5500_v32, -inf  ;;  %v4772_v1 = vrot.slane %v4740_v18, 2  ;;  %v5501_v41 = vsel %vm5485_vm6, %v5468_v15, %v5469_v40 }
 0x406   : > { %v5759_v20 = vmax.f32 %v5438_v58, %v5727_v14  ;;  %v18945_v27 = vrot.slane %v16241_v36, 2  ;;  %v4773_v28 = vrot.slane %v16244_v59, 2  ;;  %vm5694_vm14 = vcmp.eq.s32.totalorder %v5632_v62, 1 }
 0x407   : > { %v16249_v3 = vmax.f32 %v20452_v23, %v5757_v50  ;;  %v20454_v55 = vrot.slane %v16100_v16, 5  ;;  %v5726_v35 = vsel %vm5694_vm14, %v5501_v41, -inf  ;;  %v4441_v12 = vpack.c.bf16 %v15014_v44, %v14448_v52  ;;  %v16279_v52 = vpop.f32.mrf.mxu1  ;;  %v20459_v44 = vld [vmem:[#allocation149_spill] sm:$0xff] }
 0x408   : > { %v20455_v15 = vrot.slane %v16095_v31, 5  ;;  %v20456_v62 = vmax.f32 %v15965_v13, %v16059_v38  ;;  %v4786_v50 = vsel %vm2784_vm7, %v4772_v1, %v4773_v28  ;;  %v4787_v32 = vsel %vm2784_vm7, %v18945_v27, %v4772_v1  ;;  %20458 = vst [vmem:[#allocation114_spill] sm:$0xff] %v16279_v52  ;;  %v20463_v13 = vld [vmem:[#allocation216_spill] sm:$0xff]  ;;  %v20484_v52 = vld [vmem:[#allocation31_spill] sm:$0xff] }
 0x409   : > { %20453 = vst [vmem:[#allocation161_spill] sm:$0xff] %v16249_v3  ;;  %v5497_v19 = vsel %vm5485_vm6, %v20454_v55, %v18942_v53  ;;  %v5758_v23 = vmax.f32 %v5437_v45, %v5726_v35  ;;  %vm20460_vm12 = vcmp.eq.s32.totalorder %v20459_v44, 1  ;;  %4537 = vmatmul.bf16.gmra.mxu3 %v4441_v12  ;;  %vm5696_vm15 = vcmp.eq.s32.totalorder %v5638_v0, 1  ;;  %v20472_v44 = vld [vmem:[#allocation139_spill] sm:$0xff] }
 0x40a   : > { %v5499_v58 = vsel %vm5485_vm6, %v5470_v29, %v20455_v15  ;;  %v16271_v40 = vmax.f32 %v20456_v62, %v5759_v20  ;;  %v4835_v14 = vsel %vm20460_vm12, %v4787_v32, -inf  ;;  %v20461_v29 = vld [vmem:[#allocation46_spill] sm:$0xff]  ;;  %v18941_v38 = vrot.slane %v20463_v13, 1 }
 0x40b   : > { %vm20462_vm10 = vcmp.eq.s32.totalorder %v20461_v29, 1  ;;  %v16287_v20 = vmax.f32 %v16241_v36, %v4835_v14  ;;  %v20464_v45 = vmax.f32 %v16018_v5, %v16102_v21  ;;  %v5728_v35 = vsel %vm5696_vm15, %v5499_v58, -inf  ;;  %v20466_v62 = vld [vmem:[#allocation118_spill] sm:$0xff]  ;;  %v20467_v21 = vld [vmem:[#allocation23_spill] sm:$0xff]  ;;  %v5079_v29 = vpop.permute.xlu2 %5078 }
 0x40c   : > { %20457 = vst [vmem:[#allocation199_spill] sm:$0xff] %v16271_v40  ;;  %v4836_v41 = vsel %vm20462_vm10, %v4786_v50, -inf  ;;  %v16298_v15 = vsel %vm5698_vm8, %v5497_v19, -inf  ;;  %v5760_v12 = vmax.f32 %v16095_v31, %v5728_v35  ;;  %v4656_v0 = vsel %vm939_vm1, %v4646_v17, %v18941_v38 }
 0x40d   : > { %v16289_v55 = vmax.f32 %v4740_v18, %v4836_v41  ;;  %v16294_v1 = vmax.f32 %v20464_v45, %v5758_v23  ;;  %v4642_v18 = vrot.slane %v20466_v62, 1  ;;  %v18943_v50 = vrot.slane %v16287_v20, 3  ;;  %v20471_v23 = vld [vmem:[#allocation131_spill] sm:$0xff] }
 0x40e   : > { %vm5124_vm11 = vcmp.eq.s32.totalorder %v5076_v24, 1  ;;  %vm20468_vm4 = vcmp.eq.s32.totalorder %v20467_v21, 1  ;;  %v20469_v26 = vmax.f32 %v15945_v48, %v16027_v33  ;;  %v20470_v17 = vrot.slane %v20349_v61, 1  ;;  %v20473_v48 = vld [vmem:[#allocation33_spill] sm:$0xff] }
 0x40f   : > { %20465 = vst [vmem:[#allocation13_spill] sm:$0xff] %v16294_v1  ;;  %v4900_v5 = vrot.slane %v16289_v55, 3  ;;  %v4710_v58 = vsel %vm20468_vm4, %v4656_v0, -inf  ;;  %v2342_v14 = vpack.c.bf16 %v20472_v44, %v20471_v23  ;;  %vm20474_vm8 = vcmp.eq.s32.totalorder %v20473_v48, 1  ;;  %v5064_v44 = vpop.permute.xlu0 %5063  ;;  %v20475_v48 = vld [vmem:[#allocation202_spill] sm:$0xff] }
 0x410   : > { %v16313_v19 = vmax.f32 %v20469_v26, %v5760_v12  ;;  %v16316_v31 = vmax.f32 %v20438_v51, %v4710_v58  ;;  %v4661_v32 = vsel %vm939_vm1, %v20470_v17, %v4642_v18  ;;  %v5840_v41 = vmax.f32 %v15874_v37, %v15409_v2 }
 0x411   : > { %v4916_v24 = vsel %vm4908_vm13, %v18943_v50, %v4900_v5  ;;  %v4705_v33 = vsel %vm20474_vm8, %v4661_v32, -inf  ;;  %v5841_v45 = vmax.f32 %v15728_v11, %v15820_v54  ;;  %2446 = vmatmul.bf16.gmra.mxu1 %v2342_v14  ;;  %v16340_v21 = vmax.f32 %v15913_v8, %v15632_v42  ;;  %v16372_v50 = vpop.permute.xlu1 %5069  ;;  %v20489_v42 = vld [vmem:[#allocation140_spill] sm:$0xff] }
 0x412   : > { %v16334_v35 = vsel %vm5124_vm11, %v4916_v24, -inf  ;;  %v18944_v12 = vrot.slane %v16316_v31, 2  ;;  %v4737_v0 = vmax.f32 %v20349_v61, %v4705_v33  ;;  %v16346_v26 = vmax.f32 %v15848_v6, %v15990_v25 }
 0x413   : > { %v16350_v17 = vmax.f32 %v15982_v57, %v16080_v9  ;;  %v16354_v32 = vmax.f32 %v15786_v39, %v16249_v3  ;;  %vm5125_vm3 = vcmp.eq.s32.totalorder %v5079_v29, 1  ;;  %v5904_v24 = vmax.f32 %v5840_v41, %v16063_v56 }
 0x414   : > { %v4785_v23 = vsel %vm2784_vm7, %v4773_v28, %v18944_v12  ;;  %v4769_v14 = vrot.slane %v4737_v0, 2  ;;  %vm20476_vm9 = vcmp.eq.s32.totalorder %v20475_v48, 1  ;;  %v5905_v38 = vmax.f32 %v5841_v45, %v15943_v4  ;;  %v16374_v28 = vpop.f32.mrf.mxu1 }
 0x415   : > { %v4837_v33 = vsel %vm20476_vm9, %v4785_v23, -inf  ;;  %v16366_v58 = vmax.f32 %v16340_v21, %v16350_v17  ;;  %v16370_v53 = vmax.f32 %v16346_v26, %v16354_v32  ;;  %20479 = vst [vmem:[#allocation45_spill] sm:$0xff] %v16374_v28  ;;  %v20480_v56 = vrot.slane %v15939_v30, 2  ;;  %v20481_v23 = vld [vmem:[#allocation183_spill] sm:$0xff] }
 0x416   : > { %v16377_v12 = vmax.f32 %v16244_v59, %v4837_v33  ;;  %v16385_v41 = vmax.f32 %v15874_v37, %v15895_v60  ;;  %v16389_v45 = vmax.f32 %v15728_v11, %v15685_v46  ;;  %vm20482_vm0 = vcmp.eq.s32.totalorder %v20481_v23, 1 }
 0x417   : > { %20477 = vst [vmem:[#allocation193_spill] sm:$0xff] %v16366_v58  ;;  %v4790_v4 = vsel %vm2784_vm7, %v20480_v56, %v4769_v14  ;;  %v6064_v7 = vmax.f32 %v5904_v24, %v16366_v58  ;;  %v6065_v59 = vmax.f32 %v5905_v38, %v16370_v53  ;;  %v20483_v33 = vrot.slane %v16175_v34, 1 }
 0x418   : > { %20478 = vst [vmem:[#allocation32_spill] sm:$0xff] %v16370_v53  ;;  %v4832_v48 = vsel %vm20482_vm0, %v4790_v4, -inf  ;;  %v18948_v27 = vrot.slane %v16377_v12, 3  ;;  %vm5120_vm14 = vcmp.eq.s32.totalorder %v5064_v44, 1  ;;  %vm20485_vm12 = vcmp.eq.s32.totalorder %v20484_v52, 1 }
 0x419   : > { %v4660_v56 = vsel %vm939_vm1, %v4642_v18, %v20483_v33  ;;  %v16401_v28 = vmax.f32 %v15939_v30, %v4832_v48  ;;  %v6384_v4 = vmax.f32 %v6064_v7, %v16385_v41  ;;  %v6385_v24 = vmax.f32 %v6065_v59, %v16389_v45 }
 0x41a   : > { %v4706_v39 = vsel %vm20485_vm12, %v4660_v56, -inf  ;;  %v4915_v18 = vsel %vm4908_vm13, %v4900_v5, %v18948_v27  ;;  %v5220_v48 = vrot.slane %v16175_v34, 7  ;;  %v5221_v52 = vrot.slane %v16180_v22, 7 }
 0x41b   : > { %v4738_v38 = vmax.f32 %v20466_v62, %v4706_v39  ;;  %v4896_v30 = vrot.slane %v16401_v28, 3  ;;  %v16417_v33 = vsel %vm5125_vm3, %v4915_v18, -inf  ;;  %v6432_v7 = vpack.c.bf16 %v6385_v24, %v6384_v4 }
 0x41c   : > { %v5222_v39 = vrot.slane %v20436_v63, 7  ;;  %v20486_v23 = vrot.slane %v15985_v10, 3  ;;  %v5236_v27 = vsel %vm1388_vm2, %v5220_v48, %v5221_v52  ;;  %v20487_v57 = vrot.slane %v20466_v62, 7 }
 0x41d   : > { %v4770_v59 = vrot.slane %v4738_v38, 2  ;;  %6508 = vmatmul.bf16.gmra.mxu0 %v6432_v7  ;;  %v20488_v24 = vrot.slane %v16241_v36, 2  ;;  %vm20490_vm10 = vcmp.eq.s32.totalorder %v20489_v42, 1  ;;  %v5067_v7 = vpop.permute.xlu0 %5066  ;;  %v16456_v42 = vpop.f32.mrf.mxu1  ;;  %vm5122_vm3 = vcmp.eq.s32.totalorder %v16372_v50, 1 }
 0x41e   : > { %v4920_v5 = vsel %vm4908_vm13, %v20486_v23, %v4896_v30  ;;  %v5237_v29 = vsel %vm1388_vm2, %v20487_v57, %v5220_v48  ;;  %v5235_v23 = vsel %vm1388_vm2, %v5221_v52, %v5222_v39  ;;  %v20491_v57 = vld [vmem:[#allocation157_spill] sm:$0xff]  ;;  %v20493_v48 = vld [vmem:[#allocation72_spill] sm:$0xff]  ;;  %v20497_v52 = vld [vmem:[#allocation87_spill] sm:$0xff]  ;;  %20499 = vst [vmem:[#allocation182_spill] sm:$0xff] %v16456_v42  ;;  %vm5121_vm9 = vcmp.eq.s32.totalorder %v5067_v7, 1 }
 0x41f   : > { %v5152_v4 = vsel %vm5120_vm14, %v4920_v5, -inf  ;;  %v4788_v18 = vsel %vm2784_vm7, %v4770_v59, %v20488_v24  ;;  %v4789_v56 = vsel %vm2784_vm7, %v4769_v14, %v4770_v59  ;;  %vm20492_vm15 = vcmp.eq.s32.totalorder %v20491_v57, 1  ;;  %v20495_v14 = vld [vmem:[#allocation96_spill] sm:$0xff]  ;;  %v20503_v57 = vld [vmem:[#allocation105_spill] sm:$0xff] }
 0x420   : > { %v5184_v25 = vmax.f32 %v15985_v10, %v5152_v4  ;;  %v4833_v53 = vsel %vm20490_vm10, %v4789_v56, -inf  ;;  %v4834_v44 = vsel %vm20492_vm15, %v4788_v18, -inf  ;;  %vm20494_vm11 = vcmp.eq.s32.totalorder %v20493_v48, 1  ;;  %v5073_v4 = vpop.permute.xlu1 %5072 }
 0x421   : > { %v5284_v36 = vsel %vm20494_vm11, %v5237_v29, -inf  ;;  %v16448_v5 = vmax.f32 %v4737_v0, %v4833_v53  ;;  %v16450_v24 = vmax.f32 %v4738_v38, %v4834_v44  ;;  %vm20496_vm4 = vcmp.eq.s32.totalorder %v20495_v14, 1 }
 0x422   : > { %v5285_v59 = vsel %vm20496_vm4, %v5236_v27, -inf  ;;  %vm20498_vm8 = vcmp.eq.s32.totalorder %v20497_v52, 1  ;;  %v20500_v56 = vmax.f32 %v16100_v16, %v16217_v49  ;;  %v16464_v29 = vmax.f32 %v16175_v34, %v5284_v36  ;;  %v20502_v49 = vld [vmem:[#allocation191_spill] sm:$0xff]  ;;  %v5659_v52 = vpop.permute.xlu2 %5658 }
 0x423   : > { %v5286_v10 = vsel %vm20498_vm8, %v5235_v23, -inf  ;;  %v5317_v53 = vmax.f32 %v16180_v22, %v5285_v59  ;;  %v4897_v27 = vrot.slane %v16448_v5, 3  ;;  %v4898_v38 = vrot.slane %v16450_v24, 3 }
 0x424   : > { %v16461_v18 = vmax.f32 %v5184_v25, %v20500_v56  ;;  %v16468_v0 = vmax.f32 %v20436_v63, %v5286_v10  ;;  %v18956_v23 = vrot.slane %v16464_v29, 6  ;;  %v4442_v44 = vpack.c.bf16 %v20503_v57, %v20502_v49  ;;  %v20529_v63 = vld [vmem:[#allocation166_spill] sm:$0xff] }
 0x425   : > { %v5349_v16 = vrot.slane %v5317_v53, 6  ;;  %v5762_v48 = vmax.f32 %v16194_v47, %v16298_v15  ;;  %v4918_v36 = vsel %vm4908_vm13, %v4897_v27, %v4898_v38  ;;  %v4919_v14 = vsel %vm4908_vm13, %v4896_v30, %v4897_v27  ;;  %v20505_v27 = vld [vmem:[#allocation203_spill] sm:$0xff] }
 0x426   : > { %20501 = vst [vmem:[#allocation219_spill] sm:$0xff] %v16461_v18  ;;  %v5350_v25 = vrot.slane %v16468_v0, 6  ;;  %v20504_v50 = vrot.slane %v16287_v20, 3  ;;  %v16487_v59 = vsel %vm5122_vm3, %v4918_v36, -inf  ;;  %v5153_v56 = vsel %vm5121_vm9, %v4919_v14, -inf  ;;  %4542 = vmatmul.bf16.gmra.mxu3 %v4442_v44  ;;  %v8238_v44 = vld [vmem:[%s18090_s5 + $0x78] sm:$0xff] }
 0x427   : > { %v5364_v15 = vsel %vm3361_vm5, %v18956_v23, %v5349_v16  ;;  %vm20506_vm0 = vcmp.eq.s32.totalorder %v20505_v27, 1  ;;  %v5185_v36 = vmax.f32 %v16401_v28, %v5153_v56  ;;  %vm5123_vm12 = vcmp.eq.s32.totalorder %v5073_v4, 1  ;;  %v8230_v14 = vld [vmem:[%s18090_s5 + $0x38] sm:$0xff]  ;;  %v5647_v27 = vpop.permute.xlu0 %5646  ;;  %7246 = vmatpush.bf16.msrb.mxu2 %v8238_v44  ;;  %v20514_v30 = vld [vmem:[#allocation67_spill] sm:$0xff] }
 0x428   : > { %v4917_v7 = vsel %vm4908_vm13, %v4898_v38, %v20504_v50  ;;  %v5363_v10 = vsel %vm3361_vm5, %v5349_v16, %v5350_v25  ;;  %v5413_v49 = vsel %vm20506_vm0, %v5364_v15, -inf  ;;  %v20507_v38 = vld [vmem:[#allocation79_spill] sm:$0xff]  ;;  %v18957_v16 = vrot.slane %v20438_v51, 7  ;;  %7383 = vmatpush.bf16.msrb.mxu3 %v8230_v14  ;;  %v16535_v15 = vpop.permute.xlu1 %5652 }
 0x429   : > { %vm20508_vm14 = vcmp.eq.s32.totalorder %v20507_v38, 1  ;;  %v16502_v50 = vmax.f32 %v5317_v53, %v5413_v49  ;;  %vm5703_vm10 = vcmp.eq.s32.totalorder %v5659_v52, 1  ;;  %v16516_v28 = vsel %vm5123_vm12, %v4917_v7, -inf  ;;  %v20511_v49 = vld [vmem:[#allocation138_spill] sm:$0xff] }
 0x42a   : > { %v5414_v57 = vsel %vm20508_vm14, %v5363_v10, -inf  ;;  %v16514_v10 = vmax.f32 %v5185_v36, %v5762_v48  ;;  %v5218_v53 = vrot.slane %v20349_v61, 7  ;;  %v5234_v56 = vsel %vm1388_vm2, %v5222_v39, %v18957_v16  ;;  %v20509_v48 = vld [vmem:[#allocation78_spill] sm:$0xff]  ;;  %v20513_v36 = vld [vmem:[#allocation141_spill] sm:$0xff] }
 0x42b   : > { %v16505_v42 = vmax.f32 %v16468_v0, %v5414_v57  ;;  %vm20510_vm15 = vcmp.eq.s32.totalorder %v20509_v48, 1  ;;  %v20512_v38 = vrot.slane %v20511_v49, 7  ;;  %v2343_v23 = vpack.c.bf16 %v20514_v30, %v20513_v36  ;;  %v16537_v0 = vpop.f32.mrf.mxu1  ;;  %v20539_v49 = vld [vmem:[#allocation16_spill] sm:$0xff] }
 0x42c   : > { %v5287_v7 = vsel %vm20510_vm15, %v5234_v56, -inf  ;;  %20515 = vst [vmem:[#allocation127_spill] sm:$0xff] %v16537_v0  ;;  %v20516_v39 = vrot.slane %v16502_v50, 5  ;;  %v20517_v56 = vld [vmem:[#allocation90_spill] sm:$0xff]  ;;  %v16558_v16 = vmax.f32 %v16249_v3, %v16271_v40  ;;  %v20520_v0 = vld [vmem:[#allocation109_spill] sm:$0xff]  ;;  %vm20530_vm4 = vcmp.eq.s32.totalorder %v20529_v63, 1 }
 0x42d   : > { %v5478_v4 = vrot.slane %v16505_v42, 5  ;;  %v5239_v57 = vsel %vm1388_vm2, %v20512_v38, %v5218_v53  ;;  %v16544_v14 = vmax.f32 %v20438_v51, %v5287_v7  ;;  %vm20518_vm11 = vcmp.eq.s32.totalorder %v20517_v56, 1  ;;  %2451 = vmatmul.bf16.gmra.mxu1 %v2343_v23  ;;  %v20519_v7 = vld [vmem:[#allocation125_spill] sm:$0xff] }
 0x42e   : > { %v5282_v48 = vsel %vm20518_vm11, %v5239_v57, -inf  ;;  %v16550_v38 = vmax.f32 %v16080_v9, %v16294_v1  ;;  %v5907_v52 = vmax.f32 %v20520_v0, %v16346_v26  ;;  %v16592_v57 = vpop.f32.mrf.mxu3  ;;  %vm5699_vm0 = vcmp.eq.s32.totalorder %v5647_v27, 1 }
 0x42f   : > { %v5492_v44 = vsel %vm5485_vm6, %v20516_v39, %v5478_v4  ;;  %v5314_v36 = vmax.f32 %v20349_v61, %v5282_v48  ;;  %v5906_v39 = vmax.f32 %v20519_v7, %v16340_v21  ;;  %v18966_v56 = vrot.slane %v16544_v14, 6  ;;  %v20523_v48 = vld [vmem:[#allocation11_spill] sm:$0xff]  ;;  %20528 = vst [vmem:[#allocation130_spill] sm:$0xff] %v16592_v57 }
 0x430   : > { %v16553_v30 = vsel %vm5703_vm10, %v5492_v44, -inf  ;;  %v20521_v44 = vld [vmem:[#allocation91_spill] sm:$0xff]  ;;  %v16573_v3 = vmax.f32 %v20523_v48, %v16558_v16  ;;  %v16577_v21 = vmax.f32 %v15409_v2, %v15874_v37  ;;  %v16581_v7 = vmax.f32 %v15820_v54, %v15728_v11  ;;  %v5662_v37 = vpop.permute.xlu2 %5661  ;;  %v20531_v11 = vld [vmem:[#allocation22_spill] sm:$0xff]  ;;  %v5656_v58 = vpop.permute.xlu1 %5655 }
 0x431   : > { %v16569_v9 = vmax.f32 %v20521_v44, %v16550_v38  ;;  %v5346_v23 = vrot.slane %v5314_v36, 6  ;;  %v5362_v26 = vsel %vm3361_vm5, %v5350_v25, %v18966_v56  ;;  %v20527_v44 = vrot.slane %v20466_v62, 7 }
 0x432   : > { %20524 = vst [vmem:[#allocation103_spill] sm:$0xff] %v16573_v3  ;;  %v5415_v22 = vsel %vm20530_vm4, %v5362_v26, -inf  ;;  %v20532_v34 = vrot.slane %v20531_v11, 6  ;;  %v6067_v25 = vmax.f32 %v5907_v52, %v16573_v3  ;;  %v16612_v63 = vmax.f32 %v16581_v7, %v15685_v46  ;;  %v20537_v26 = vld [vmem:[#allocation80_spill] sm:$0xff] }
 0x433   : > { %20522 = vst [vmem:[#allocation194_spill] sm:$0xff] %v16569_v9  ;;  %v6066_v0 = vmax.f32 %v5906_v39, %v16569_v9  ;;  %v5238_v48 = vsel %vm1388_vm2, %v5218_v53, %v20527_v44  ;;  %v16603_v39 = vmax.f32 %v16577_v21, %v15895_v60  ;;  %v16606_v56 = vmax.f32 %v16544_v14, %v5415_v22  ;;  %v20534_v53 = vld [vmem:[#allocation49_spill] sm:$0xff]  ;;  %v5650_v9 = vpop.permute.xlu0 %5649 }
 0x434   : > { %20525 = vst [vmem:[#allocation122_spill] sm:$0xff] %v16577_v21  ;;  %v5367_v61 = vsel %vm3361_vm5, %v20532_v34, %v5346_v23  ;;  %vm20535_vm8 = vcmp.eq.s32.totalorder %v20534_v53, 1  ;;  %vm20538_vm3 = vcmp.eq.s32.totalorder %v20537_v26, 1  ;;  %vm5704_vm9 = vcmp.eq.s32.totalorder %v5662_v37, 1  ;;  %v16621_v21 = vpop.f32.mrf.mxu1  ;;  %v20542_v37 = vld [vmem:[#allocation215_spill] sm:$0xff] }
 0x435   : > { %20526 = vst [vmem:[#allocation124_spill] sm:$0xff] %v16581_v7  ;;  %v5410_v44 = vsel %vm20535_vm8, %v5367_v61, -inf  ;;  %v5283_v11 = vsel %vm20538_vm3, %v5238_v48, -inf  ;;  %v6386_v52 = vmax.f32 %v6066_v0, %v16603_v39  ;;  %v18972_v3 = vrot.slane %v16606_v56, 5  ;;  %v20541_v48 = vld [vmem:[#allocation7_spill] sm:$0xff] }
 0x436   : > { %20533 = vst [vmem:[#allocation9_spill] sm:$0xff] %v16603_v39  ;;  %v5442_v34 = vmax.f32 %v5314_v36, %v5410_v44  ;;  %v5315_v57 = vmax.f32 %v20466_v62, %v5283_v11  ;;  %v6387_v22 = vmax.f32 %v6067_v25, %v16612_v63  ;;  %v4650_v44 = vrot.slane %v20541_v48, 1  ;;  %v20550_v62 = vld [vmem:[#allocation135_spill] sm:$0xff] }
 0x437   : > { %20536 = vst [vmem:[#allocation44_spill] sm:$0xff] %v16612_v63  ;;  %v5491_v36 = vsel %vm5485_vm6, %v5478_v4, %v18972_v3  ;;  %v20543_v27 = vrot.slane %v16194_v47, 5  ;;  %v20544_v7 = vrot.slane %v16464_v29, 6  ;;  %v20547_v47 = vld [vmem:[#allocation200_spill] sm:$0xff]  ;;  %vm5701_vm10 = vcmp.eq.s32.totalorder %v16535_v15, 1 }
 0x438   : > { %v5474_v53 = vrot.slane %v5442_v34, 5  ;;  %v5347_v61 = vrot.slane %v5315_v57, 6  ;;  %20540 = vst [vmem:[#allocation36_spill] sm:$0xff] %v16621_v21  ;;  %v6433_v0 = vpack.c.bf16 %v6387_v22, %v6386_v52  ;;  %v16629_v25 = vsel %vm5704_vm9, %v5491_v36, -inf  ;;  %v20545_v36 = vld [vmem:[#allocation117_spill] sm:$0xff] }
 0x439   : > { %vm20546_vm14 = vcmp.eq.s32.totalorder %v20545_v36, 1  ;;  %vm20548_vm12 = vcmp.eq.s32.totalorder %v20547_v47, 1  ;;  %vm5700_vm15 = vcmp.eq.s32.totalorder %v5650_v9, 1  ;;  %vm5702_vm8 = vcmp.eq.s32.totalorder %v5656_v58, 1 }
 0x43a   : > { %v5496_v11 = vsel %vm5485_vm6, %v20543_v27, %v5474_v53  ;;  %v5365_v21 = vsel %vm3361_vm5, %v5347_v61, %v20544_v7  ;;  %v5366_v4 = vsel %vm3361_vm5, %v5346_v23, %v5347_v61  ;;  %6513 = vmatmul.bf16.gmra.mxu0 %v6433_v0  ;;  %v20549_v7 = vld [vmem:[#allocation95_spill] sm:$0xff]  ;;  %v16651_v61 = vpop.f32.mrf.mxu3  ;;  %v20552_v0 = vmax.f32 %v16448_v5, %v16487_v59 }
 0x43b   : > { %v5731_v22 = vsel %vm5699_vm0, %v5496_v11, -inf  ;;  %v5411_v3 = vsel %vm20546_vm14, %v5366_v4, -inf  ;;  %v5412_v26 = vsel %vm20548_vm12, %v5365_v21, -inf  ;;  %v4443_v23 = vpack.c.bf16 %v20550_v62, %v20549_v7  ;;  %20551 = vst [vmem:[#allocation48_spill] sm:$0xff] %v16651_v61 }
 0x43c   : > { %v5763_v27 = vmax.f32 %v5442_v34, %v5731_v22  ;;  %v5443_v63 = vmax.f32 %v5315_v57, %v5411_v3  ;;  %v5444_v39 = vmax.f32 %v16464_v29, %v5412_v26  ;;  %v20553_v21 = vrot.slane %v20539_v49, 1  ;;  %v16674_v34 = vpop.f32.mrf.mxu1  ;;  %v20557_v22 = vld [vmem:[#allocation28_spill] sm:$0xff] }
 0x43d   : > { %v20554_v29 = vrot.slane %v20542_v37, 1  ;;  %4547 = vmatmul.bf16.gmra.mxu3 %v4443_v23  ;;  %v20555_v59 = vrot.slane %v16502_v50, 5  ;;  %20556 = vst [vmem:[#allocation153_spill] sm:$0xff] %v16674_v34  ;;  %vm20558_vm11 = vcmp.eq.s32.totalorder %v20557_v22, 1  ;;  %v20581_v34 = vld [vmem:[#allocation198_spill] sm:$0xff] }
 0x43e   : > { %v16656_v11 = vmax.f32 %v20552_v0, %v5763_v27  ;;  %v5475_v4 = vrot.slane %v5443_v63, 5  ;;  %v5476_v36 = vrot.slane %v5444_v39, 5  ;;  %v4653_v3 = vsel %vm939_vm1, %v20553_v21, %v4650_v44  ;;  %v20559_v27 = vld [vmem:[#allocation42_spill] sm:$0xff] }
 0x43f   : > { %v4652_v15 = vsel %vm939_vm1, %v4650_v44, %v20554_v29  ;;  %v4713_v47 = vsel %vm20558_vm11, %v4653_v3, -inf  ;;  %v16678_v44 = vpop.permute.xlu0 %5081  ;;  %vm20560_vm4 = vcmp.eq.s32.totalorder %v20559_v27, 1  ;;  %vm20582_vm9 = vcmp.eq.s32.totalorder %v20581_v34, 1 }
 0x440   : > { %v5494_v62 = vsel %vm5485_vm6, %v5475_v4, %v5476_v36  ;;  %v5495_v5 = vsel %vm5485_vm6, %v5474_v53, %v5475_v4  ;;  %v5493_v57 = vsel %vm5485_vm6, %v5476_v36, %v20555_v59  ;;  %v4714_v7 = vsel %vm20560_vm4, %v4652_v15, -inf  ;;  %v16682_v53 = vpop.permute.xlu1 %5087  ;;  %v20567_v59 = vld [vmem:[#allocation26_spill] sm:$0xff] }
 0x441   : > { %v5733_v26 = vsel %vm5701_vm10, %v5494_v62, -inf  ;;  %v5732_v23 = vsel %vm5700_vm15, %v5495_v5, -inf  ;;  %v5734_v4 = vsel %vm5702_vm8, %v5493_v57, -inf  ;;  %v20561_v36 = vmax.f32 %v16287_v20, %v16334_v35  ;;  %v20565_v20 = vld [vmem:[#allocation119_spill] sm:$0xff]  ;;  %v20566_v5 = vld [vmem:[#allocation128_spill] sm:$0xff] }
 0x442   : > { %v5765_v9 = vmax.f32 %v5444_v39, %v5733_v26  ;;  %v5764_v0 = vmax.f32 %v5443_v63, %v5732_v23  ;;  %v5766_v29 = vmax.f32 %v16502_v50, %v5734_v4  ;;  %v4745_v3 = vmax.f32 %v20539_v49, %v4713_v47  ;;  %v16707_v57 = vpop.f32.mrf.mxu3 }
 0x443   : > { %v16692_v39 = vmax.f32 %v20541_v48, %v4714_v7  ;;  %v20562_v15 = vmax.f32 %v16450_v24, %v16516_v28  ;;  %v20563_v63 = vmax.f32 %v16289_v55, %v16417_v33  ;;  %v4648_v35 = vrot.slane %v20565_v20, 1  ;;  %20568 = vst [vmem:[#allocation74_spill] sm:$0xff] %v16707_v57  ;;  %v20570_v33 = vld [vmem:[#allocation214_spill] sm:$0xff]  ;;  %v20572_v7 = vld [vmem:[#allocation39_spill] sm:$0xff] }
 0x444   : > { %v16687_v21 = vmax.f32 %v20561_v36, %v5765_v9  ;;  %v2344_v50 = vpack.c.bf16 %v20567_v59, %v20566_v5  ;;  %v20569_v26 = vrot.slane %v20463_v13, 1  ;;  %v16715_v24 = vmax.f32 %v16294_v1, %v16313_v19  ;;  %v16725_v47 = vpop.f32.mrf.mxu1  ;;  %v8237_v36 = vld [vmem:[%s18090_s5 + $0x70] sm:$0xff]  ;;  %v20585_v1 = vld [vmem:[#allocation173_spill] sm:$0xff] }
 0x445   : > { %v16697_v58 = vmax.f32 %v20562_v15, %v5764_v0  ;;  %v16702_v62 = vmax.f32 %v20563_v63, %v5766_v29  ;;  %v16719_v55 = vmax.f32 %v16271_v40, %v16461_v18  ;;  %v16723_v28 = vmax.f32 %v20570_v33, %v15409_v2  ;;  %20571 = vst [vmem:[#allocation126_spill] sm:$0xff] %v16725_v47  ;;  %v20574_v0 = vld [vmem:[#allocation115_spill] sm:$0xff]  ;;  %v20583_v40 = vld [vmem:[#allocation38_spill] sm:$0xff] }
 0x446   : > { %v4655_v22 = vsel %vm939_vm1, %v20569_v26, %v4648_v35  ;;  %v4777_v9 = vrot.slane %v4745_v3, 2  ;;  %v18977_v27 = vrot.slane %v16692_v39, 2  ;;  %vm20573_vm3 = vcmp.eq.s32.totalorder %v20572_v7, 1  ;;  %2456 = vmatmul.bf16.gmra.mxu1 %v2344_v50  ;;  %v8229_v2 = vld [vmem:[%s18090_s5 + $0x30] sm:$0xff]  ;;  %7247 = vmatpush.bf16.msrb.mxu2 %v8237_v36  ;;  %v20577_v26 = vld [vmem:[#allocation21_spill] sm:$0xff] }
 0x447   : > { %20564 = vst [vmem:[#allocation97_spill] sm:$0xff] %v16702_v62  ;;  %v4711_v23 = vsel %vm20573_vm3, %v4655_v22, -inf  ;;  %v16732_v4 = vmax.f32 %v20574_v0, %v15820_v54  ;;  %v16743_v15 = vmax.f32 %v16350_v17, %v16715_v24  ;;  %v16747_v63 = vmax.f32 %v16354_v32, %v16719_v55  ;;  %v16757_v59 = vpop.permute.xlu0 %5084  ;;  %v20578_v22 = vld [vmem:[#allocation212_spill] sm:$0xff]  ;;  %7384 = vmatpush.bf16.msrb.mxu3 %v8229_v2 }
 0x448   : > { %v4743_v29 = vmax.f32 %v20463_v13, %v4711_v23  ;;  %v16751_v54 = vmax.f32 %v16723_v28, %v16385_v41  ;;  %v16763_v32 = vpop.permute.xlu1 %5090  ;;  %v4781_v23 = vsel %vm2784_vm7, %v4777_v9, %v18977_v27  ;;  %v20579_v47 = vrot.slane %v16316_v31, 2 }
 0x449   : > { %v16755_v5 = vmax.f32 %v16732_v4, %v16389_v45  ;;  %v6068_v17 = vmax.f32 %v20577_v26, %v16743_v15  ;;  %v6069_v7 = vmax.f32 %v20578_v22, %v16747_v63  ;;  %v20580_v22 = vrot.slane %v20539_v49, 1 }
 0x44a   : > { %20575 = vst [vmem:[#allocation98_spill] sm:$0xff] %v16751_v54  ;;  %v4775_v50 = vrot.slane %v4743_v29, 2  ;;  %v6356_v52 = vmax.f32 %v16751_v54, %v15895_v60  ;;  %vm20584_vm0 = vcmp.eq.s32.totalorder %v20583_v40, 1  ;;  %vm20586_vm14 = vcmp.eq.s32.totalorder %v20585_v1, 1  ;;  %v20588_v54 = vld [vmem:[#allocation129_spill] sm:$0xff]  ;;  %v16793_v34 = vpop.f32.mrf.mxu3 }
 0x44b   : > { %20576 = vst [vmem:[#allocation84_spill] sm:$0xff] %v16755_v5  ;;  %v6357_v36 = vmax.f32 %v16755_v5, %v15685_v46  ;;  %v4654_v2 = vsel %vm939_vm1, %v4648_v35, %v20580_v22  ;;  %v4841_v46 = vsel %vm20586_vm14, %v4781_v23, -inf  ;;  %v20589_v35 = vld [vmem:[#allocation106_spill] sm:$0xff]  ;;  %vm5126_vm12 = vcmp.eq.s32.totalorder %v16678_v44, 1 }
 0x44c   : > { %v4784_v26 = vsel %vm2784_vm7, %v20579_v47, %v4775_v50  ;;  %v6388_v27 = vmax.f32 %v6068_v17, %v6356_v52  ;;  %v4712_v60 = vsel %vm20584_vm0, %v4654_v2, -inf  ;;  %v16789_v5 = vpop.f32.mrf.mxu1  ;;  %v4444_v22 = vpack.c.bf16 %v20589_v35, %v20588_v54  ;;  %v20597_v2 = vld [vmem:[#allocation76_spill] sm:$0xff] }
 0x44d   : > { %v4838_v48 = vsel %vm20582_vm9, %v4784_v26, -inf  ;;  %v6389_v57 = vmax.f32 %v6069_v7, %v6357_v36  ;;  %v4744_v47 = vmax.f32 %v20565_v20, %v4712_v60  ;;  %20587 = vst [vmem:[#allocation220_spill] sm:$0xff] %v16789_v5  ;;  %v16796_v17 = vmax.f32 %v4745_v3, %v4841_v46  ;;  %v20595_v7 = vld [vmem:[#allocation108_spill] sm:$0xff] }
 0x44e   : > { %v4870_v61 = vmax.f32 %v16316_v31, %v4838_v48  ;;  %4552 = vmatmul.bf16.gmra.mxu3 %v4444_v22  ;;  %v20590_v1 = vrot.slane %v20463_v13, 7  ;;  %v20591_v31 = vrot.slane %v20438_v51, 7  ;;  %v20596_v23 = vrot.slane %v20595_v7, 6  ;;  %v20599_v46 = vld [vmem:[#allocation208_spill] sm:$0xff]  ;;  %v20606_v7 = vld [vmem:[#allocation54_spill] sm:$0xff] }
 0x44f   : > { %v6434_v49 = vpack.c.bf16 %v6389_v57, %v6388_v27  ;;  %v4776_v40 = vrot.slane %v4744_v47, 2  ;;  %v20592_v57 = vrot.slane %v16377_v12, 3  ;;  %vm20600_vm10 = vcmp.eq.s32.totalorder %v20599_v46, 1  ;;  %v5665_v22 = vpop.permute.xlu0 %5664 }
 0x450   : > { %v4902_v52 = vrot.slane %v4870_v61, 3  ;;  %v5233_v48 = vsel %vm1388_vm2, %v20591_v31, %v20590_v1  ;;  %vm20598_vm2 = vcmp.eq.s32.totalorder %v20597_v2, 1  ;;  %v20601_v1 = vld [vmem:[#allocation104_spill] sm:$0xff]  ;;  %vm5128_vm11 = vcmp.eq.s32.totalorder %v16682_v53, 1  ;;  %v20610_v2 = vld [vmem:[#allocation102_spill] sm:$0xff] }
 0x451   : > { %6518 = vmatmul.bf16.gmra.mxu0 %v6434_v49  ;;  %v4782_v44 = vsel %vm2784_vm7, %v4776_v40, %v4777_v9  ;;  %v4783_v3 = vsel %vm2784_vm7, %v4775_v50, %v4776_v40  ;;  %v20593_v49 = vld [vmem:[#allocation179_spill] sm:$0xff]  ;;  %vm20602_vm15 = vcmp.eq.s32.totalorder %v20601_v1, 1  ;;  %vm5127_vm8 = vcmp.eq.s32.totalorder %v16757_v59, 1 }
 0x452   : > { %v4914_v27 = vsel %vm4908_vm13, %v20592_v57, %v4902_v52  ;;  %v20594_v54 = vrot.slane %v20593_v49, 6  ;;  %v4839_v60 = vsel %vm20598_vm2, %v4783_v3, -inf  ;;  %v4840_v35 = vsel %vm20600_vm10, %v4782_v44, -inf  ;;  %v16830_v57 = vpop.permute.xlu1 %5670  ;;  %v20605_v44 = vld [vmem:[#allocation147_spill] sm:$0xff] }
 0x453   : > { %v5158_v26 = vsel %vm5126_vm12, %v4914_v27, -inf  ;;  %v5288_v9 = vsel %vm20602_vm15, %v5233_v48, -inf  ;;  %v16825_v40 = vmax.f32 %v4743_v29, %v4839_v60  ;;  %v16827_v31 = vmax.f32 %v4744_v47, %v4840_v35  ;;  %v20603_v27 = vld [vmem:[#allocation137_spill] sm:$0xff] }
 0x454   : > { %v5358_v36 = vsel %vm3361_vm5, %v20596_v23, %v20594_v54  ;;  %v5190_v50 = vmax.f32 %v16377_v12, %v5158_v26  ;;  %vm20604_vm4 = vcmp.eq.s32.totalorder %v20603_v27, 1  ;;  %v5320_v54 = vmax.f32 %v20463_v13, %v5288_v9 }
 0x455   : > { %v5419_v3 = vsel %vm20604_vm4, %v5358_v36, -inf  ;;  %v2345_v23 = vpack.c.bf16 %v20606_v7, %v20605_v44  ;;  %v16839_v48 = vmax.f32 %v16313_v19, %v16514_v10  ;;  %v20607_v12 = vmax.f32 %v16505_v42, %v16553_v30  ;;  %v16849_v36 = vpop.f32.mrf.mxu1  ;;  %v16881_v7 = vpop.f32.mrf.mxu3 }
 0x456   : > { %v4903_v47 = vrot.slane %v16825_v40, 3  ;;  %v4904_v26 = vrot.slane %v16827_v31, 3  ;;  %20609 = vst [vmem:[#allocation160_spill] sm:$0xff] %v16849_v36  ;;  %v5482_v60 = vrot.slane %v20610_v2, 5  ;;  %v5352_v46 = vrot.slane %v5320_v54, 6 }
 0x457   : > { %v16844_v29 = vmax.f32 %v5190_v50, %v20607_v12  ;;  %2461 = vmatmul.bf16.gmra.mxu1 %v2345_v23  ;;  %v16854_v35 = vmax.f32 %v16461_v18, %v16656_v11  ;;  %v16858_v42 = vmax.f32 %v15913_v8, %v20570_v33  ;;  %v16866_v1 = vmax.f32 %v16550_v38, %v16839_v48  ;;  %v20613_v12 = vld [vmem:[#allocation205_spill] sm:$0xff] }
 0x458   : > { %v4912_v30 = vsel %vm4908_vm13, %v4903_v47, %v4904_v26  ;;  %v4913_v59 = vsel %vm4908_vm13, %v4902_v52, %v4903_v47  ;;  %v16870_v9 = vmax.f32 %v15848_v6, %v20574_v0  ;;  %v16875_v33 = vmax.f32 %v20593_v49, %v5419_v3  ;;  %20612 = vst [vmem:[#allocation47_spill] sm:$0xff] %v16881_v7 }
 0x459   : > { %20608 = vst [vmem:[#allocation12_spill] sm:$0xff] %v16844_v29  ;;  %v5160_v50 = vsel %vm5128_vm11, %v4912_v30, -inf  ;;  %v5159_v27 = vsel %vm5127_vm8, %v4913_v59, -inf  ;;  %v20611_v44 = vrot.slane %v16544_v14, 6  ;;  %v18985_v38 = vrot.slane %v16796_v17, 3  ;;  %v20615_v14 = vld [vmem:[#allocation122_spill] sm:$0xff] }
 0x45a   : > { %v5192_v23 = vmax.f32 %v16825_v40, %v5160_v50  ;;  %v5191_v0 = vmax.f32 %v4870_v61, %v5159_v27  ;;  %vm20614_vm3 = vcmp.eq.s32.totalorder %v20613_v12, 1  ;;  %vm5129_vm9 = vcmp.eq.s32.totalorder %v16763_v32, 1  ;;  %v20618_v61 = vld [vmem:[#allocation193_spill] sm:$0xff]  ;;  %v20619_v50 = vld [vmem:[#allocation124_spill] sm:$0xff]  ;;  %v20621_v12 = vld [vmem:[#allocation150_spill] sm:$0xff] }
 0x45b   : > { %v5361_v52 = vsel %vm3361_vm5, %v20611_v44, %v5352_v46  ;;  %v16890_v3 = vmax.f32 %v16558_v16, %v16854_v35  ;;  %v16894_v47 = vmax.f32 %v16858_v42, %v20615_v14  ;;  %v20616_v30 = vmax.f32 %v16606_v56, %v16629_v25  ;;  %v20620_v44 = vld [vmem:[#allocation32_spill] sm:$0xff]  ;;  %v5674_v16 = vpop.permute.xlu1 %5673 }
 0x45c   : > { %v5416_v53 = vsel %vm20614_vm3, %v5361_v52, -inf  ;;  %vm5705_vm0 = vcmp.eq.s32.totalorder %v5665_v22, 1  ;;  %v6070_v40 = vmax.f32 %v20618_v61, %v16866_v1  ;;  %v4911_v14 = vsel %vm4908_vm13, %v4904_v26, %v18985_v38  ;;  %v20626_v26 = vld [vmem:[#allocation138_spill] sm:$0xff]  ;;  %v20627_v38 = vld [vmem:[#allocation93_spill] sm:$0xff] }
 0x45d   : > { %v5448_v49 = vmax.f32 %v5320_v54, %v5416_v53  ;;  %v16899_v59 = vmax.f32 %v5191_v0, %v20616_v30  ;;  %v16905_v54 = vmax.f32 %v16870_v9, %v20619_v50  ;;  %v6071_v52 = vmax.f32 %v20620_v44, %v16890_v3  ;;  %v5668_v0 = vpop.permute.xlu0 %5667  ;;  %v20623_v50 = vld [vmem:[#allocation100_spill] sm:$0xff] }
 0x45e   : > { %v20622_v53 = vrot.slane %v20621_v12, 6  ;;  %v6358_v30 = vmax.f32 %v16894_v47, %v16385_v41  ;;  %vm20624_vm14 = vcmp.eq.s32.totalorder %v20623_v50, 1  ;;  %v20625_v36 = vrot.slane %v16606_v56, 5  ;;  %v16933_v50 = vpop.f32.mrf.mxu1 }
 0x45f   : > { %20617 = vst [vmem:[#allocation43_spill] sm:$0xff] %v16899_v59  ;;  %v5480_v27 = vrot.slane %v5448_v49, 5  ;;  %v6359_v61 = vmax.f32 %v16905_v54, %v16389_v45  ;;  %v4445_v5 = vpack.c.bf16 %v20627_v38, %v20626_v26  ;;  %vm5706_vm12 = vcmp.eq.s32.totalorder %v5668_v0, 1  ;;  %v20634_v0 = vld [vmem:[#allocation167_spill] sm:$0xff] }
 0x460   : > { %v5360_v25 = vsel %vm3361_vm5, %v5352_v46, %v20622_v53  ;;  %vm5707_vm5 = vcmp.eq.s32.totalorder %v16830_v57, 1  ;;  %v6390_v7 = vmax.f32 %v6070_v40, %v6358_v30  ;;  %20628 = vst [vmem:[#allocation51_spill] sm:$0xff] %v16933_v50  ;;  %v20629_v56 = vrot.slane %v16875_v33, 5  ;;  %v16951_v30 = vpop.f32.mrf.mxu3  ;;  %v20633_v57 = vld [vmem:[#allocation27_spill] sm:$0xff]  ;;  %v20656_v50 = vld [vmem:[#allocation164_spill] sm:$0xff] }
 0x461   : > { %v5417_v44 = vsel %vm20624_vm14, %v5360_v25, -inf  ;;  %v5490_v46 = vsel %vm5485_vm6, %v20625_v36, %v5480_v27  ;;  %v6391_v45 = vmax.f32 %v6071_v52, %v6359_v61  ;;  %4557 = vmatmul.bf16.gmra.mxu3 %v4445_v5  ;;  %vm5708_vm2 = vcmp.eq.s32.totalorder %v5674_v16, 1 }
 0x462   : > { %v5449_v53 = vmax.f32 %v20621_v12, %v5417_v44  ;;  %v5737_v41 = vsel %vm5705_vm0, %v5490_v46, -inf  ;;  %v5487_v36 = vsel %vm5485_vm6, %v5482_v60, %v20629_v56  ;;  %v5161_v12 = vsel %vm5129_vm9, %v4911_v14, -inf  ;;  %v20631_v14 = vld [vmem:[#allocation144_spill] sm:$0xff]  ;;  %v20635_v56 = vld [vmem:[#allocation118_spill] sm:$0xff] }
 0x463   : > { %v5769_v25 = vmax.f32 %v5448_v49, %v5737_v41  ;;  %v6435_v38 = vpack.c.bf16 %v6391_v45, %v6390_v7  ;;  %v16941_v22 = vsel %vm5708_vm2, %v5487_v36, -inf  ;;  %v5858_v61 = vmax.f32 %v16514_v10, %v16697_v58  ;;  %v8228_v41 = vld [vmem:[%s18090_s5 + $0x28] sm:$0xff]  ;;  %v20636_v36 = vld [vmem:[#allocation56_spill] sm:$0xff] }
 0x464   : > { %v5481_v18 = vrot.slane %v5449_v53, 5  ;;  %v5859_v44 = vmax.f32 %v16656_v11, %v16687_v21  ;;  %v6136_v46 = vmax.f32 %v20633_v57, %v15913_v8  ;;  %v6137_v26 = vmax.f32 %v20634_v0, %v15848_v6  ;;  %7385 = vmatpush.bf16.msrb.mxu3 %v8228_v41  ;;  %v20648_v49 = vld [vmem:[#allocation34_spill] sm:$0xff] }
 0x465   : > { %v16943_v40 = vmax.f32 %v5192_v23, %v5769_v25  ;;  %6523 = vmatmul.bf16.gmra.mxu0 %v6435_v38  ;;  %v5193_v23 = vmax.f32 %v16827_v31, %v5161_v12  ;;  %v16980_v45 = vmax.f32 %v16715_v24, %v5858_v61  ;;  %v4446_v12 = vpack.c.bf16 %v20636_v36, %v20635_v56  ;;  %v20637_v38 = vld [vmem:[#allocation194_spill] sm:$0xff] }
 0x466   : > { %v5488_v52 = vsel %vm5485_vm6, %v5481_v18, %v5482_v60  ;;  %v5489_v5 = vsel %vm5485_vm6, %v5480_v27, %v5481_v18  ;;  %v20632_v18 = vld [vmem:[#allocation162_spill] sm:$0xff]  ;;  %v16983_v25 = vmax.f32 %v16719_v55, %v5859_v44  ;;  %v16986_v8 = vmax.f32 %v6136_v46, %v16723_v28 }
 0x467   : > { %20630 = vst [vmem:[#allocation136_spill] sm:$0xff] %v16943_v40  ;;  %v16955_v32 = vsel %vm5707_vm5, %v5488_v52, -inf  ;;  %v5738_v7 = vsel %vm5706_vm12, %v5489_v5, -inf  ;;  %v2346_v27 = vpack.c.bf16 %v20632_v18, %v20631_v14  ;;  %v16989_v6 = vmax.f32 %v6137_v26, %v16732_v4  ;;  %v20638_v5 = vld [vmem:[#allocation103_spill] sm:$0xff]  ;;  %v20642_v4 = vld [vmem:[#allocation189_spill] sm:$0xff] }
 0x468   : > { %v5770_v16 = vmax.f32 %v5449_v53, %v5738_v7  ;;  %v8236_v53 = vld [vmem:[%s18090_s5 + $0x68] sm:$0xff]  ;;  %v6072_v52 = vmax.f32 %v20637_v38, %v16980_v45  ;;  %v6073_v24 = vmax.f32 %v20638_v5, %v16983_v25  ;;  %v20639_v7 = vld [vmem:[#allocation9_spill] sm:$0xff]  ;;  %v20643_v14 = vrot.slane %v20642_v4, 1  ;;  %v17009_v36 = vpop.f32.mrf.mxu3 }
 0x469   : > { %2466 = vmatmul.bf16.gmra.mxu1 %v2346_v27  ;;  %7248 = vmatpush.bf16.msrb.mxu2 %v8236_v53  ;;  %v6360_v55 = vmax.f32 %v16986_v8, %v20639_v7  ;;  %v20644_v18 = vrot.slane %v20542_v37, 1  ;;  %20645 = vst [vmem:[#allocation174_spill] sm:$0xff] %v17009_v36  ;;  %v20646_v38 = vld [vmem:[#allocation41_spill] sm:$0xff]  ;;  %v17017_v41 = vmax.f32 %v16702_v62, %v16899_v59 }
 0x46a   : > { %v16971_v31 = vmax.f32 %v5193_v23, %v5770_v16  ;;  %v20640_v23 = vld [vmem:[#allocation44_spill] sm:$0xff]  ;;  %v17001_v16 = vpop.f32.mrf.mxu1  ;;  %vm20647_vm10 = vcmp.eq.s32.totalorder %v20646_v38, 1  ;;  %v17021_v4 = vmax.f32 %v16844_v29, %v16943_v40 }
 0x46b   : > { %v6361_v28 = vmax.f32 %v16989_v6, %v20640_v23  ;;  %20641 = vst [vmem:[#allocation134_spill] sm:$0xff] %v17001_v16  ;;  %v4683_v27 = vsel %vm939_vm1, %v20644_v18, %v20643_v14  ;;  %v6392_v53 = vmax.f32 %v6072_v52, %v6360_v55  ;;  %v20649_v23 = vld [vmem:[#allocation89_spill] sm:$0xff] }
 0x46c   : > { %v4715_v5 = vsel %vm20647_vm10, %v4683_v27, -inf  ;;  %v4447_v60 = vpack.c.bf16 %v20649_v23, %v20648_v49  ;;  %v20651_v55 = vld [vmem:[#allocation201_spill] sm:$0xff]  ;;  %v17034_v49 = vmax.f32 %v16697_v58, %v16702_v62 }
 0x46d   : > { %v6393_v56 = vmax.f32 %v6073_v24, %v6361_v28  ;;  %v4747_v52 = vmax.f32 %v20542_v37, %v4715_v5  ;;  %v20650_v24 = vld [vmem:[#allocation111_spill] sm:$0xff]  ;;  %v20652_v14 = vld [vmem:[#allocation213_spill] sm:$0xff] }
 0x46e   : > { %v17026_v28 = vmax.f32 %v20651_v55, %v20650_v24  ;;  %v20653_v18 = vld [vmem:[#allocation161_spill] sm:$0xff]  ;;  %v17048_v38 = vmax.f32 %v20650_v24, %v20633_v57  ;;  %v17058_v16 = vmax.f32 %v20652_v14, %v20634_v0  ;;  %v20655_v24 = vld [vmem:[#allocation40_spill] sm:$0xff] }
 0x46f   : > { %v6436_v7 = vpack.c.bf16 %v6393_v56, %v6392_v53  ;;  %v17030_v27 = vmax.f32 %v20653_v18, %v20652_v14  ;;  %v17038_v53 = vmax.f32 %v16687_v21, %v16844_v29  ;;  %v17041_v56 = vmax.f32 %v5858_v61, %v17017_v41 }
 0x470   : > { %v17051_v5 = vmax.f32 %v17026_v28, %v6136_v46  ;;  %v4448_v46 = vpack.c.bf16 %v20463_v13, %v20438_v51  ;;  %v4779_v14 = vrot.slane %v4747_v52, 2  ;;  %v17082_v51 = vpop.f32.mrf.mxu3 }
 0x471   : > { %4562 = vmatmul.bf16.gmra.mxu3 %v4446_v12  ;;  %v17044_v12 = vmax.f32 %v5859_v44, %v17021_v4  ;;  %v17054_v23 = vmax.f32 %v17030_v27, %v6137_v26  ;;  %v6076_v44 = vmax.f32 %v16866_v1, %v17041_v56  ;;  %v2347_v26 = vpack.c.bf16 %v20656_v50, %v20655_v24 }
 0x472   : > { %v17060_v61 = vpop.f32.mrf.mxu1  ;;  %v17080_v1 = vmax.f32 %v16854_v35, %v17038_v53  ;;  %20657 = vst [vmem:[#allocation55_spill] sm:$0xff] %v17082_v51  ;;  %v20664_v51 = vld [vmem:[#allocation148_spill] sm:$0xff] }
 0x473   : > { %20654 = vst [vmem:[#allocation52_spill] sm:$0xff] %v17060_v61  ;;  %v6077_v57 = vmax.f32 %v16890_v3, %v17044_v12  ;;  %v6365_v0 = vmax.f32 %v17054_v23, %v16905_v54  ;;  %v17076_v61 = vmax.f32 %v16839_v48, %v17034_v49  ;;  %v17090_v54 = vmax.f32 %v17058_v16, %v16870_v9  ;;  %v20661_v9 = vld [vmem:[#allocation192_spill] sm:$0xff] }
 0x474   : > { %v20658_v48 = vrot.slane %v16692_v39, 2  ;;  %vm20662_vm1 = vcmp.eq.s32.totalorder %v20661_v9, 1 }
 0x475   : > { %6528 = vmatmul.bf16.gmra.mxu0 %v6436_v7  ;;  %v6364_v7 = vmax.f32 %v17051_v5, %v16894_v47  ;;  %v6397_v3 = vmax.f32 %v6077_v57, %v6365_v0  ;;  %v17086_v47 = vmax.f32 %v17048_v38, %v16858_v42  ;;  %v6074_v24 = vmax.f32 %v16743_v15, %v17076_v61  ;;  %v20659_v57 = vld [vmem:[#allocation98_spill] sm:$0xff] }
 0x476   : > { %v4780_v35 = vsel %vm2784_vm7, %v20658_v48, %v4779_v14  ;;  %v5094_v48 = vpop.permute.xlu2 %5093 }
 0x477   : > { %v6396_v13 = vmax.f32 %v6076_v44, %v6364_v7  ;;  %v6075_v44 = vmax.f32 %v16747_v63, %v17080_v1  ;;  %v6362_v42 = vmax.f32 %v17086_v47, %v20659_v57  ;;  %v4842_v0 = vsel %vm20662_vm1, %v4780_v35, -inf }
 0x478   : > { %v17109_v62 = vmax.f32 %v16692_v39, %v4842_v0  ;;  %v17111_v15 = vpop.f32.mrf.mxu3  ;;  %vm5130_vm15 = vcmp.eq.s32.totalorder %v5094_v48, 1  ;;  %v20666_v35 = vrot.slane %v16796_v17, 3 }
 0x479   : > { %2471 = vmatmul.bf16.gmra.mxu1 %v2347_v26  ;;  %v6438_v50 = vpack.c.bf16 %v6397_v3, %v6396_v13  ;;  %v20660_v26 = vld [vmem:[#allocation84_spill] sm:$0xff]  ;;  %v6394_v13 = vmax.f32 %v6074_v24, %v6362_v42 }
 0x47a   : > { %v6363_v7 = vmax.f32 %v17090_v54, %v20660_v26  ;;  %v17106_v29 = vpop.f32.mrf.mxu1  ;;  %v4906_v57 = vrot.slane %v17109_v62, 3  ;;  %v20665_v26 = vld [vmem:[#allocation73_spill] sm:$0xff] }
 0x47b   : > { %20663 = vst [vmem:[#allocation58_spill] sm:$0xff] %v17106_v29  ;;  %v2348_v36 = vpack.c.bf16 %v20665_v26, %v20664_v51  ;;  %v20682_v29 = vld [vmem:[#allocation130_spill] sm:$0xff] }
 0x47c   : > { %v6395_v3 = vmax.f32 %v6075_v44, %v6363_v7  ;;  %v4910_v24 = vsel %vm4908_vm13, %v20666_v35, %v4906_v57  ;;  %v20667_v44 = vld [vmem:[#allocation154_spill] sm:$0xff]  ;;  %v6504_v7 = vpop.f32.mrf.mxu0 }
 0x47d   : > { %v20668_v39 = vrot.slane %v20667_v44, 2  ;;  %v5162_v9 = vsel %vm5130_vm15, %v4910_v24, -inf  ;;  %v20674_v35 = vld [vmem:[#allocation114_spill] sm:$0xff] }
 0x47e   : > { %v6437_v63 = vpack.c.bf16 %v6395_v3, %v6394_v13  ;;  %v5097_v0 = vpop.permute.xlu2 %5096  ;;  %v20670_v13 = vld [vmem:[#allocation175_spill] sm:$0xff] }
 0x47f   : > { %vm20671_vm11 = vcmp.eq.s32.totalorder %v20670_v13, 1  ;;  %v17140_v13 = vmax.f32 %v16899_v59, %v16971_v31  ;;  %vm5131_vm4 = vcmp.eq.s32.totalorder %v5097_v0, 1  ;;  %v20684_v59 = vld [vmem:[#allocation184_spill] sm:$0xff] }
 0x480   : > { %v17128_v3 = vpop.f32.mrf.mxu3 }
 0x481   : > { %4567 = vmatmul.bf16.gmra.mxu3 %v4447_v60  ;;  %v4811_v60 = vsel %vm2784_vm7, %v4779_v14, %v20668_v39  ;;  %20672 = vst [vmem:[#allocation6_spill] sm:$0xff] %v17128_v3  ;;  %v20675_v14 = vld [vmem:[#allocation156_spill] sm:$0xff]  ;;  %v5100_v39 = vpop.permute.xlu0 %5099  ;;  %v17170_v3 = vmax.f32 %v17034_v49, %v17140_v13  ;;  %v17188_v49 = vld [vmem:[%s18093_s8] ss:$0 sm:$0xff] }
 0x482   : > { %v17124_v42 = vpop.f32.mrf.mxu1  ;;  %v4843_v51 = vsel %vm20671_vm11, %v4811_v60, -inf  ;;  %v2547_v44 = vadd.f32 %v20675_v14, %v20674_v35  ;;  %vm5132_vm7 = vcmp.eq.s32.totalorder %v5100_v39, 1  ;;  %v20681_v14 = vld [vmem:[#allocation199_spill] sm:$0xff] }
 0x483   : > { %20669 = vst [vmem:[#allocation143_spill] sm:$0xff] %v17124_v42  ;;  %v4875_v48 = vmax.f32 %v4747_v52, %v4843_v51  ;;  %v20679_v51 = vld [vmem:[#allocation48_spill] sm:$0xff]  ;;  %v17157_v42 = vmax.f32 %v20681_v14, %v20653_v18  ;;  %v8235_v18 = vld [vmem:[%s18090_s5 + $0x60] sm:$0xff]  ;;  %v6078_v43 = vmax.f32 %v16980_v45, %v17170_v3 }
 0x484   : > { %v6506_v52 = vpop.f32.mrf.mxu0  ;;  %7249 = vmatpush.bf16.msrb.mxu2 %v8235_v18 }
 0x485   : > { %6533 = vmatmul.bf16.gmra.mxu0 %v6437_v63  ;;  %v20673_v63 = vmax.f32 %v20610_v2, %v16955_v32  ;;  %v4907_v24 = vrot.slane %v4875_v48, 3  ;;  %v20677_v2 = vld [vmem:[#allocation121_spill] sm:$0xff]  ;;  %v20678_v32 = vld [vmem:[#allocation151_spill] sm:$0xff] }
 0x489   : > { %2476 = vmatmul.bf16.gmra.mxu1 %v2348_v36  ;;  %v5194_v36 = vmax.f32 %v16796_v17, %v5162_v9  ;;  %v2545_v9 = vadd.f32 %v20678_v32, %v20677_v2  ;;  %v20685_v2 = vld [vmem:[#allocation53_spill] sm:$0xff] }
 0x48a   : > { %v17146_v17 = vpop.f32.mrf.mxu1  ;;  %v2349_v32 = vpack.c.bf16 %v20685_v2, %v20684_v59  ;;  %v8227_v59 = vld [vmem:[%s18090_s5 + $0x20] sm:$0xff] }
 0x48b   : > { %v17134_v26 = vmax.f32 %v5194_v36, %v20673_v63  ;;  %20676 = vst [vmem:[#allocation77_spill] sm:$0xff] %v17146_v17  ;;  %v4589_v36 = vadd.f32 %v20679_v51, %v2547_v44  ;;  %v5677_v63 = vpop.permute.xlu2 %5676  ;;  %v17160_v17 = vpop.f32.mrf.mxu3  ;;  %v20686_v51 = vld [vmem:[#allocation145_spill] sm:$0xff]  ;;  %7386 = vmatpush.bf16.msrb.mxu3 %v8227_v59 }
 0x48c   : > { %20683 = vst [vmem:[#allocation81_spill] sm:$0xff] %v17160_v17  ;;  %vm5709_vm8 = vcmp.eq.s32.totalorder %v5677_v63, 1 }
 0x48d   : > { %v17144_v60 = vmax.f32 %v16943_v40, %v17134_v26  ;;  %v4588_v40 = vadd.f32 %v20682_v29, %v2545_v9  ;;  %v6585_v44 = vadd.f32 %v6506_v52, %v4589_v36  ;;  %v4909_v52 = vsel %vm4908_vm13, %v4906_v57, %v4907_v24 }
 0x48e   : > { %v5163_v57 = vsel %vm5131_vm4, %v4909_v52, -inf }
 0x48f   : > { %v17174_v29 = vmax.f32 %v17038_v53, %v17144_v60  ;;  %v6584_v36 = vadd.f32 %v6504_v7, %v4588_v40  ;;  %v20688_v53 = vld [vmem:[#allocation65_spill] sm:$0xff]  ;;  %v17202_v40 = vmax.f32 %v17157_v42, %v17058_v16  ;;  %v17207_v39 = vadd.f32 %v17188_v49, %v6585_v44 }
 0x490   : > { %v20689_v2 = vrot.slane %v20688_v53, 5  ;;  %v5195_v16 = vmax.f32 %v17109_v62, %v5163_v57 }
 0x491   : > { %4572 = vmatmul.bf16.gmra.mxu3 %v4448_v46  ;;  %v20680_v46 = vld [vmem:[#allocation13_spill] sm:$0xff]  ;;  %v6367_v44 = vmax.f32 %v17202_v40, %v16989_v6  ;;  %v6653_v45 = vsub.f32 0.0, %v17207_v39 }
 0x492   : > { %v17153_v35 = vmax.f32 %v20680_v46, %v20651_v55 }
 0x494   : > { %v17198_v17 = vmax.f32 %v17153_v35, %v17048_v38  ;;  %v6079_v38 = vmax.f32 %v16983_v25, %v17174_v29  ;;  %v20691_v25 = vmax.f32 %v16875_v33, %v16941_v22  ;;  %v20694_v22 = vld [vmem:[#allocation94_spill] sm:$0xff] }
 0x495   : > { %6538 = vmatmul.bf16.gmra.mxu0 %v6438_v50  ;;  %v20687_v50 = vrot.slane %v20686_v51, 3  ;;  %v20690_v51 = vrot.slane %v16875_v33, 5  ;;  %v20693_v33 = vld [vmem:[#allocation182_spill] sm:$0xff] }
 0x496   : > { %v6366_v63 = vmax.f32 %v17198_v17, %v16986_v8  ;;  %v17228_v18 = vmax.f32 %v5195_v16, %v20691_v25  ;;  %v6399_v52 = vmax.f32 %v6079_v38, %v6367_v44  ;;  %v8226_v8 = vld [vmem:[%s18090_s5 + $0x18] sm:$0xff] }
 0x497   : > { %v4940_v55 = vsel %vm4908_vm13, %v4907_v24, %v20687_v50  ;;  %v5486_v50 = vsel %vm5485_vm6, %v20690_v51, %v20689_v2  ;;  %7387 = vmatpush.bf16.msrb.mxu3 %v8226_v8  ;;  %v6686_v2 = vmul.f32 1.442695, %v6653_v45  ;;  %v2552_v51 = vadd.f32 %v20694_v22, %v20693_v33  ;;  %v20698_v45 = vld [vmem:[#allocation74_spill] sm:$0xff] }
 0x498   : > { %v5164_v9 = vsel %vm5132_vm7, %v4940_v55, -inf  ;;  %v5741_v7 = vsel %vm5709_vm8, %v5486_v50, -inf  ;;  %v6398_v62 = vmax.f32 %v6078_v43, %v6366_v63  ;;  %v17244_v57 = vmax.f32 %v16971_v31, %v17228_v18  ;;  %v20696_v43 = vld [vmem:[#allocation169_spill] sm:$0xff]  ;;  %v20697_v63 = vld [vmem:[#allocation219_spill] sm:$0xff] }
 0x499   : > { %2481 = vmatmul.bf16.gmra.mxu1 %v2349_v32  ;;  %v5196_v24 = vmax.f32 %v4875_v48, %v5164_v9  ;;  %v17214_v32 = vadd.f32 %v17188_v49, %v6584_v36  ;;  %v5773_v0 = vmax.f32 %v20688_v53, %v5741_v7  ;;  %v17222_v48 = vpop.f32.mrf.mxu1  ;;  %v17236_v9 = vpop.f32.mrf.mxu3  ;;  %v20692_v36 = vld [vmem:[#allocation16_spill] sm:$0xff]  ;;  %v4591_v16 = vadd.f32 %v16793_v34, %v2552_v51 }
 0x49a   : > { %v6509_v55 = vpop.f32.mrf.mxu0  ;;  %v4449_v53 = vpack.c.bf16 %v20692_v36, %v20565_v20  ;;  %v6439_v50 = vpack.c.bf16 %v6399_v52, %v6398_v62  ;;  %v17259_v44 = vmax.f32 %v20697_v63, %v20681_v14  ;;  %8417 = vpow2.f32 %v6686_v2  ;;  %v8863_v36 = vld [vmem:[%s9100_s12] sm:$0xff] }
 0x49b   : > { %v17230_v59 = vmax.f32 %v5196_v24, %v5773_v0  ;;  %v6652_v6 = vsub.f32 0.0, %v17214_v32  ;;  %v20695_v24 = vld [vmem:[#allocation45_spill] sm:$0xff]  ;;  %v17255_v0 = vmax.f32 %v16313_v19, %v20680_v46  ;;  %v17264_v52 = vmax.f32 %v17017_v41, %v17244_v57 }
 0x49c   : > { %v2550_v38 = vadd.f32 %v20696_v43, %v20695_v24  ;;  %vm20699_vm13 = vcmask 31744   ;;  %v17280_v41 = vmax.f32 %v17259_v44, %v17030_v27 }
 0x49d   : > { %v17248_v7 = vmax.f32 %v17134_v26, %v17230_v59  ;;  %v6684_v20 = vmul.f32 1.442695, %v6652_v6  ;;  %v17276_v14 = vmax.f32 %v17255_v0, %v17026_v28  ;;  %v6080_v2 = vmax.f32 %v17076_v61, %v17264_v52  ;;  %vm20703_vm6 = vmmov %vm20699_vm13 }
 0x49e   : > { %v4590_v25 = vadd.f32 %v20698_v45, %v2550_v38  ;;  %v6369_v27 = vmax.f32 %v17280_v41, %v17090_v54  ;;  %v17305_v45 = vpop.f32.mrf.mxu2  ;;  %vm20707_vm3 = vmmov %vm20703_vm6 }
 0x49f   : > { %v17268_v34 = vmax.f32 %v17021_v4, %v17248_v7  ;;  %8419 = vpow2.f32 %v6684_v20  ;;  %v6368_v28 = vmax.f32 %v17276_v14, %v17086_v47  ;;  %v20700_v20 = vld [vmem:[#allocation7_spill] sm:$0xff]  ;;  %vm20714_vm9 = vmmov %vm20707_vm3 }
 0x4a0   : > { %v6586_v6 = vadd.f32 %v6509_v55, %v4590_v25  ;;  %v8418_v33 = vpop.eup %8417  ;;  %vm20720_vm0 = vmmov %vm20707_vm3 }
 0x4a1   : > { %4577 = vmatmul.bf16.gmra.mxu3 %v4449_v53  ;;  %v17270_v8 = vpop.f32.mrf.mxu1  ;;  %v17282_v53 = vpop.f32.mrf.mxu3  ;;  %v6081_v55 = vmax.f32 %v17080_v1, %v17268_v34  ;;  %v6749_v24 = vadd.f32 1.0, %v8418_v33  ;;  %v6400_v43 = vmax.f32 %v6080_v2, %v6368_v28  ;;  %v4450_v1 = vpack.c.bf16 %v20542_v37, %v20700_v20  ;;  %v20702_v33 = vld [vmem:[#allocation71_spill] sm:$0xff]  ;;  %vm20727_vm14 = vmmov %vm20720_vm0 }
 0x4a2   : > { %v6511_v62 = vpop.f32.mrf.mxu0  ;;  %v17292_v22 = vadd.f32 %v17188_v49, %v6586_v6  ;;  %v17320_v2 = vmax.f32 %v16656_v11, %v20697_v63  ;;  %v8223_v63 = vld [vmem:[%s18090_s5] sm:$0xff]  ;;  %vm20730_vm5 = vmmov %vm20720_vm0 }
 0x4a3   : > { %v6587_v46 = vadd.f32 %v6511_v62, %v4591_v16  ;;  %v6401_v38 = vmax.f32 %v6081_v55, %v6369_v27  ;;  %v8225_v16 = vld [vmem:[%s18090_s5 + $0x10] sm:$0xff]  ;;  %8421 = vrcp.f32 %v6749_v24  ;;  %vm20733_vm12 = vmmov %vm20720_vm0 }
 0x4a4   : > { %v6654_v61 = vsub.f32 0.0, %v17292_v22  ;;  %7388 = vmatpush.bf16.msrb.mxu3 %v8225_v16  ;;  %v20701_v55 = vld [vmem:[#allocation127_spill] sm:$0xff]  ;;  %vm20734_vm2 = vmmov %vm20720_vm0 }
 0x4a5   : > { %6543 = vmatmul.bf16.gmra.mxu0 %v6439_v50  ;;  %v17285_v4 = vadd.f32 %v17188_v49, %v6587_v46  ;;  %v8420_v51 = vpop.eup %8419  ;;  %v6440_v62 = vpack.c.bf16 %v6401_v38, %v6400_v43  ;;  %v8224_v46 = vld [vmem:[%s18090_s5 + $0x8] sm:$0xff]  ;;  %v2555_v28 = vadd.f32 %v20702_v33, %v20701_v55  ;;  %v20704_v43 = vld [vmem:[#allocation47_spill] sm:$0xff]  ;;  %vm20735_vm10 = vmmov %vm20720_vm0 }
 0x4a6   : > { %v6748_v47 = vadd.f32 1.0, %v8420_v51  ;;  %v6688_v37 = vmul.f32 1.442695, %v6654_v61  ;;  %v17326_v51 = vmax.f32 %v17140_v13, %v17228_v18  ;;  %v17346_v20 = vpop.f32.mrf.mxu2  ;;  %vm20736_vm1 = vmmov %vm20720_vm0 }
 0x4a7   : > { %v6655_v50 = vsub.f32 0.0, %v17285_v4  ;;  %v4592_v38 = vadd.f32 %v20704_v43, %v2555_v28  ;;  %vm20738_vm15 = vmmov %vm20720_vm0 }
 0x4a8   : > { %8423 = vrcp.f32 %v6748_v47  ;;  %7389 = vmatpush.bf16.msrb.mxu3 %v8224_v46  ;;  %v6082_v16 = vmax.f32 %v17041_v56, %v17326_v51  ;;  %v20706_v46 = vld [vmem:[#allocation158_spill] sm:$0xff]  ;;  %vm20739_vm11 = vmmov %vm20720_vm0 }
 0x4a9   : > { %8073 = vmatmul.msk.bf16.vlgmr.msrb.gmra.mxu1 %vm20699_vm13, %v8863_v36  ;;  %v6690_v54 = vmul.f32 1.442695, %v6655_v50  ;;  %v17312_v6 = vpop.f32.mrf.mxu3  ;;  %v17316_v36 = vmax.f32 %v16514_v10, %v16313_v19  ;;  %v17330_v50 = vmax.f32 %v17144_v60, %v17230_v59  ;;  %v8864_v19 = vld [vmem:[%s9100_s12 + $0x8] sm:$0xff]  ;;  %v8422_v24 = vpop.eup %8421  ;;  %v17344_v60 = vmax.f32 %v17320_v2, %v17157_v42  ;;  %vm20740_vm7 = vmmov %vm20720_vm0 }
 0x4aa   : > { %v17307_v25 = vpop.f32.mrf.mxu1  ;;  %v6813_v42 = vmul.f32 %v8422_v24, %v17207_v39  ;;  %vm20741_vm4 = vmmov %vm20720_vm0 }
 0x4ab   : > { %8425 = vpow2.f32 %v6690_v54  ;;  %v17340_v13 = vmax.f32 %v17316_v36, %v17153_v35  ;;  %v6083_v47 = vmax.f32 %v17044_v12, %v17330_v50  ;;  %v20705_v35 = vld [vmem:[#allocation36_spill] sm:$0xff]  ;;  %v6371_v33 = vmax.f32 %v17344_v60, %v17054_v23  ;;  %vm20742_vm8 = vmmov %vm20720_vm0 }
 0x4ac   : > { %8427 = vpow2.f32 %v6688_v37  ;;  %7390 = vmatpush.bf16.msrb.mxu3 %v8223_v63  ;;  %v2557_v37 = vadd.f32 %v20706_v46, %v20705_v35 }
 0x4ad   : > { %v6370_v55 = vmax.f32 %v17340_v13, %v17051_v5 }
 0x4ae   : > { %v8424_v61 = vpop.eup %8423  ;;  %v4593_v56 = vadd.f32 %v16951_v30, %v2557_v37  ;;  %v8865_v37 = vld [vmem:[%s9100_s12 + $0x10] sm:$0xff] }
 0x4af   : > { %v6812_v12 = vmul.f32 %v8424_v61, %v17214_v32  ;;  %v6402_v43 = vmax.f32 %v6082_v16, %v6370_v55  ;;  %v17386_v55 = vmax.f32 %v16697_v58, %v16514_v10  ;;  %v6085_v10 = vmax.f32 %v17174_v29, %v17248_v7 }
 0x4b1   : > { %4582 = vmatmul.bf16.gmra.mxu3 %v4450_v1  ;;  %v7149_v5 = vpack.c.bf16 %v6813_v42, %v6812_v12  ;;  %v8234_v42 = vld [vmem:[%s18090_s5 + $0x58] sm:$0xff] }
 0x4b2   : > { %v17352_v54 = vpop.f32.mrf.mxu1  ;;  %7250 = vmatpush.bf16.msrb.mxu2 %v8234_v42 }
 0x4b5   : > { %6548 = vmatmul.bf16.gmra.mxu0 %v6440_v62  ;;  %v8426_v62 = vpop.eup %8425 }
 0x4b6   : > { %v8428_v28 = vpop.eup %8427 }
 0x4b7   : > { %v6514_v27 = vpop.f32.mrf.mxu0  ;;  %v6750_v35 = vadd.f32 1.0, %v8428_v28  ;;  %v17390_v28 = vmax.f32 %v16687_v21, %v16656_v11  ;;  %v20709_v11 = vld [vmem:[#allocation197_spill] sm:$0xff] }
 0x4b8   : > { %v6588_v1 = vadd.f32 %v6514_v27, %v4592_v38  ;;  %v17363_v27 = vpop.f32.mrf.mxu3  ;;  %v6403_v38 = vmax.f32 %v6083_v47, %v6371_v33 }
 0x4b9   : > { %8074 = vmatmul.msk.bf16.gmra.mxu1 %vm20703_vm6, %v8864_v19  ;;  %v6751_v19 = vadd.f32 1.0, %v8426_v62  ;;  %v17373_v62 = vpop.f32.mrf.mxu2 }
 0x4ba   : > { %v17366_v63 = vadd.f32 %v17188_v49, %v6588_v1  ;;  %v6441_v32 = vpack.c.bf16 %v6403_v38, %v6402_v43  ;;  %v17402_v43 = vmax.f32 %v17390_v28, %v17259_v44  ;;  %v20708_v38 = vld [vmem:[#allocation153_spill] sm:$0xff] }
 0x4bb   : > { %8429 = vrcp.f32 %v6751_v19  ;;  %v6084_v19 = vmax.f32 %v17170_v3, %v17244_v57  ;;  %v20710_v3 = vld [vmem:[#allocation174_spill] sm:$0xff] }
 0x4bc   : > { %v6656_v30 = vsub.f32 0.0, %v17366_v63  ;;  %8431 = vrcp.f32 %v6750_v35 }
 0x4be   : > { %v6692_v47 = vmul.f32 1.442695, %v6656_v30 }
 0x4bf   : > { %v6516_v39 = vpop.f32.mrf.mxu0 }
 0x4c0   : > { %v6589_v24 = vadd.f32 %v6516_v39, %v4593_v56  ;;  %v17377_v46 = vpop.f32.mrf.mxu3  ;;  %v17394_v56 = vmax.f32 %v17386_v55, %v17255_v0  ;;  %v2560_v39 = vadd.f32 %v20709_v11, %v20708_v38  ;;  %v20711_v11 = vld [vmem:[#allocation126_spill] sm:$0xff] }
 0x4c1   : > { %7391 = vmatmul.bf16.vlgmr.msrb.gmra.mxu3 %v7149_v5  ;;  %v8430_v33 = vpop.eup %8429  ;;  %v6373_v5 = vmax.f32 %v17402_v43, %v17202_v40  ;;  %v17415_v44 = vpop.f32.mrf.mxu2 }
 0x4c2   : > { %v17369_v23 = vadd.f32 %v17188_v49, %v6589_v24  ;;  %v8432_v12 = vpop.eup %8431  ;;  %v6815_v24 = vmul.f32 %v8430_v33, %v17285_v4  ;;  %v6372_v0 = vmax.f32 %v17394_v56, %v17198_v17  ;;  %v4594_v30 = vadd.f32 %v20710_v3, %v2560_v39 }
 0x4c3   : > { %v17375_v1 = vpop.f32.mrf.mxu1  ;;  %v6814_v29 = vmul.f32 %v8432_v12, %v17292_v22  ;;  %v20712_v22 = vld [vmem:[#allocation181_spill] sm:$0xff] }
 0x4c4   : > { %v6657_v61 = vsub.f32 0.0, %v17369_v23  ;;  %v2562_v12 = vadd.f32 %v20712_v22, %v20711_v11  ;;  %v6086_v11 = vmax.f32 %v17264_v52, %v17228_v18  ;;  %v6087_v22 = vmax.f32 %v17268_v34, %v17230_v59 }
 0x4c5   : > { %6553 = vmatmul.bf16.gmra.mxu0 %v6441_v32  ;;  %v7150_v4 = vpack.c.bf16 %v6815_v24, %v6814_v29  ;;  %v8866_v29 = vld [vmem:[%s9100_s12 + $0x18] sm:$0xff] }
 0x4c6   : > { %v6694_v16 = vmul.f32 1.442695, %v6657_v61 }
 0x4c8   : > { %8433 = vpow2.f32 %v6694_v16  ;;  %v6404_v16 = vmax.f32 %v6084_v19, %v6372_v0  ;;  %v17420_v40 = vpop.f32.mrf.mxu3 }
 0x4c9   : > { %8075 = vmatmul.msk.bf16.gmra.mxu1 %vm20707_vm3, %v8865_v37  ;;  %8435 = vpow2.f32 %v6692_v47  ;;  %v6405_v47 = vmax.f32 %v6085_v10, %v6373_v5  ;;  %v20713_v10 = vld [vmem:[#allocation55_spill] sm:$0xff] }
 0x4ca   : > { %v4595_v24 = vadd.f32 %v20713_v10, %v2562_v12  ;;  %v20718_v10 = vld [vmem:[#allocation220_spill] sm:$0xff] }
 0x4cb   : > { %v17411_v35 = vpop.f32.mrf.mxu1  ;;  %v6442_v38 = vpack.c.bf16 %v6405_v47, %v6404_v16  ;;  %v20715_v16 = vld [vmem:[#allocation97_spill] sm:$0xff] }
 0x4cc   : > { %v17437_v47 = vmax.f32 %v20715_v16, %v16697_v58 }
 0x4ce   : > { %v8434_v32 = vpop.eup %8433  ;;  %v6519_v61 = vpop.f32.mrf.mxu0  ;;  %v17452_v12 = vmax.f32 %v17437_v47, %v17316_v36 }
 0x4cf   : > { %v6590_v37 = vadd.f32 %v6519_v61, %v4594_v30  ;;  %v8436_v42 = vpop.eup %8435  ;;  %v6753_v33 = vadd.f32 1.0, %v8434_v32  ;;  %v17430_v32 = vpop.f32.mrf.mxu2 }
 0x4d0   : > { %v6752_v39 = vadd.f32 1.0, %v8436_v42  ;;  %v6374_v34 = vmax.f32 %v17452_v12, %v17276_v14 }
 0x4d1   : > { %v17418_v17 = vadd.f32 %v17188_v49, %v6590_v37  ;;  %7396 = vmatmul.bf16.gmra.mxu3 %v7150_v4  ;;  %8437 = vrcp.f32 %v6753_v33  ;;  %v20716_v37 = vld [vmem:[#allocation12_spill] sm:$0xff] }
 0x4d2   : > { %8439 = vrcp.f32 %v6752_v39  ;;  %v17441_v4 = vmax.f32 %v20716_v37, %v16687_v21 }
 0x4d3   : > { %v6658_v3 = vsub.f32 0.0, %v17418_v17 }
 0x4d4   : > { %v17425_v19 = vpop.f32.mrf.mxu1  ;;  %v17456_v58 = vmax.f32 %v17441_v4, %v17320_v2 }
 0x4d5   : > { %6558 = vmatmul.bf16.gmra.mxu0 %v6442_v38  ;;  %v6696_v0 = vmul.f32 1.442695, %v6658_v3  ;;  %v17444_v38 = vpop.f32.mrf.mxu3 }
 0x4d6   : > { %v6521_v5 = vpop.f32.mrf.mxu0  ;;  %v6375_v36 = vmax.f32 %v17456_v58, %v17280_v41 }
 0x4d7   : > { %v6591_v30 = vadd.f32 %v6521_v5, %v4595_v24  ;;  %8441 = vpow2.f32 %v6696_v0  ;;  %v8438_v42 = vpop.eup %8437  ;;  %v2565_v24 = vadd.f32 %v17305_v45, %v20718_v10 }
 0x4d8   : > { %v8440_v39 = vpop.eup %8439  ;;  %v6817_v52 = vmul.f32 %v8438_v42, %v17369_v23 }
 0x4d9   : > { %8076 = vmatmul.msk.bf16.gmra.mxu1 %vm20714_vm9, %v8866_v29  ;;  %v17433_v61 = vadd.f32 %v17188_v49, %v6591_v30  ;;  %v4596_v2 = vadd.f32 %v17111_v15, %v2565_v24  ;;  %v6816_v5 = vmul.f32 %v8440_v39, %v17366_v63  ;;  %v6406_v30 = vmax.f32 %v6086_v11, %v6374_v34  ;;  %v20719_v63 = vld [vmem:[#allocation160_spill] sm:$0xff]  ;;  %v8867_v24 = vld [vmem:[%s9100_s12 + $0x20] sm:$0xff] }
 0x4da   : > { %v6407_v29 = vmax.f32 %v6087_v22, %v6375_v36  ;;  %v2567_v11 = vadd.f32 %v17346_v20, %v20719_v63  ;;  %v20724_v63 = vld [vmem:[#allocation51_spill] sm:$0xff] }
 0x4db   : > { %v6659_v33 = vsub.f32 0.0, %v17433_v61  ;;  %v7151_v42 = vpack.c.bf16 %v6817_v52, %v6816_v5  ;;  %v20721_v52 = vld [vmem:[#allocation6_spill] sm:$0xff]  ;;  %v8233_v5 = vld [vmem:[%s18090_s5 + $0x50] sm:$0xff] }
 0x4dc   : > { %v17458_v21 = vpop.f32.mrf.mxu1  ;;  %v6443_v23 = vpack.c.bf16 %v6407_v29, %v6406_v30  ;;  %v4597_v34 = vadd.f32 %v20721_v52, %v2567_v11  ;;  %v20722_v30 = vld [vmem:[#allocation43_spill] sm:$0xff]  ;;  %v20723_v29 = vld [vmem:[#allocation136_spill] sm:$0xff]  ;;  %7251 = vmatpush.bf16.msrb.mxu2 %v8233_v5  ;;  %v20725_v52 = vld [vmem:[#allocation81_spill] sm:$0xff] }
 0x4dd   : > { %20717 = vst [vmem:[#allocation25_spill] sm:$0xff] %v17458_v21  ;;  %v6698_v3 = vmul.f32 1.442695, %v6659_v33  ;;  %v8442_v0 = vpop.eup %8441  ;;  %v17469_v21 = vpop.f32.mrf.mxu2  ;;  %v17489_v20 = vmax.f32 %v20722_v30, %v20715_v16 }
 0x4de   : > { %v6754_v10 = vadd.f32 1.0, %v8442_v0 }
 0x4df   : > { %8443 = vpow2.f32 %v6698_v3  ;;  %v17476_v3 = vpop.f32.mrf.mxu3 }
 0x4e0   : > { %8445 = vrcp.f32 %v6754_v10 }
 0x4e1   : > { %7401 = vmatmul.bf16.gmra.mxu3 %v7151_v42  ;;  %v6216_v42 = vmax.f32 %v17489_v20, %v17386_v55 }
 0x4e2   : > { %v6524_v33 = vpop.f32.mrf.mxu0 }
 0x4e3   : > { %v6592_v45 = vadd.f32 %v6524_v33, %v4596_v2  ;;  %v17493_v33 = vmax.f32 %v20723_v29, %v20716_v37  ;;  %v2570_v37 = vadd.f32 %v17373_v62, %v20724_v63 }
 0x4e5   : > { %v17472_v14 = vadd.f32 %v17188_v49, %v6592_v45  ;;  %6563 = vmatmul.bf16.gmra.mxu0 %v6443_v23  ;;  %v8444_v15 = vpop.eup %8443  ;;  %v17495_v45 = vpop.f32.mrf.mxu2  ;;  %v6217_v10 = vmax.f32 %v17493_v33, %v17390_v28 }
 0x4e6   : > { %v17474_v41 = vpop.f32.mrf.mxu1  ;;  %v6755_v22 = vadd.f32 1.0, %v8444_v15  ;;  %v8446_v16 = vpop.eup %8445 }
 0x4e7   : > { %v6660_v39 = vsub.f32 0.0, %v17472_v14  ;;  %v6818_v28 = vmul.f32 %v8446_v16, %v17418_v17 }
 0x4e8   : > { %8447 = vrcp.f32 %v6755_v22 }
 0x4e9   : > { %8077 = vmatmul.msk.bf16.gmra.mxu1 %vm20720_vm0, %v8867_v24  ;;  %v6700_v36 = vmul.f32 1.442695, %v6660_v39  ;;  %v6376_v39 = vmax.f32 %v6216_v42, %v17340_v13  ;;  %v6377_v24 = vmax.f32 %v6217_v10, %v17344_v60 }
 0x4ea   : > { %v6526_v0 = vpop.f32.mrf.mxu0 }
 0x4eb   : > { %v6593_v2 = vadd.f32 %v6526_v0, %v4597_v34  ;;  %8449 = vpow2.f32 %v6700_v36  ;;  %v4598_v34 = vadd.f32 %v20725_v52, %v2570_v37  ;;  %v17513_v36 = vpop.f32.mrf.mxu3  ;;  %v6409_v62 = vmax.f32 %v17330_v50, %v6377_v24 }
 0x4ed   : > { %v17498_v23 = vadd.f32 %v17188_v49, %v6593_v2  ;;  %v6408_v2 = vmax.f32 %v17326_v51, %v6376_v39  ;;  %v17523_v16 = vpop.f32.mrf.mxu2  ;;  %v20726_v51 = vld [vmem:[#allocation134_spill] sm:$0xff] }
 0x4ee   : > { %v17504_v15 = vpop.f32.mrf.mxu1  ;;  %v8448_v11 = vpop.eup %8447  ;;  %v2572_v37 = vadd.f32 %v17415_v44, %v20726_v51  ;;  %v6155_v44 = vmax.f32 %v17134_v26, %v20723_v29 }
 0x4ef   : > { %v6661_v22 = vsub.f32 0.0, %v17498_v23  ;;  %v6819_v55 = vmul.f32 %v8448_v11, %v17433_v61  ;;  %v6444_v42 = vpack.c.bf16 %v6409_v62, %v6408_v2  ;;  %v8868_v11 = vld [vmem:[%s9100_s12 + $0x28] sm:$0xff] }
 0x4f0   : > { %v4599_v39 = vadd.f32 %v17236_v9, %v2572_v37 }
 0x4f1   : > { %v6702_v0 = vmul.f32 1.442695, %v6661_v22  ;;  %v8450_v63 = vpop.eup %8449  ;;  %v7152_v60 = vpack.c.bf16 %v6819_v55, %v6818_v28 }
 0x4f2   : > { %v6529_v5 = vpop.f32.mrf.mxu0  ;;  %v6756_v17 = vadd.f32 1.0, %v8450_v63  ;;  %v20728_v63 = vld [vmem:[#allocation52_spill] sm:$0xff] }
 0x4f3   : > { %8451 = vpow2.f32 %v6702_v0  ;;  %v6594_v13 = vadd.f32 %v6529_v5, %v4598_v34  ;;  %7406 = vmatmul.bf16.gmra.mxu3 %v7152_v60  ;;  %v17531_v34 = vpop.f32.mrf.mxu3  ;;  %v6154_v0 = vmax.f32 %v16971_v31, %v20722_v30  ;;  %v6219_v5 = vmax.f32 %v6155_v44, %v17441_v4 }
 0x4f4   : > { %8453 = vrcp.f32 %v6756_v17 }
 0x4f5   : > { %v17519_v10 = vadd.f32 %v17188_v49, %v6594_v13  ;;  %6568 = vmatmul.bf16.gmra.mxu0 %v6444_v42  ;;  %v6218_v9 = vmax.f32 %v6154_v0, %v17437_v47  ;;  %v2575_v13 = vadd.f32 %v17430_v32, %v20728_v63  ;;  %v6379_v29 = vmax.f32 %v6219_v5, %v17402_v43  ;;  %v17549_v17 = vpop.f32.mrf.mxu2 }
 0x4f6   : > { %v17521_v61 = vpop.f32.mrf.mxu1 }
 0x4f7   : > { %v6662_v50 = vsub.f32 0.0, %v17519_v10  ;;  %v6378_v30 = vmax.f32 %v6218_v9, %v17394_v56  ;;  %v4600_v51 = vadd.f32 %v17282_v53, %v2575_v13  ;;  %v6411_v4 = vmax.f32 %v17248_v7, %v6379_v29  ;;  %v20729_v7 = vld [vmem:[#allocation58_spill] sm:$0xff] }
 0x4f9   : > { %8078 = vmatmul.msk.bf16.gmra.mxu1 %vm20727_vm14, %v8868_v11  ;;  %v8452_v22 = vpop.eup %8451  ;;  %v6704_v24 = vmul.f32 1.442695, %v6662_v50  ;;  %v6410_v47 = vmax.f32 %v17244_v57, %v6378_v30  ;;  %v6156_v30 = vmax.f32 %v17228_v18, %v16971_v31 }
 0x4fa   : > { %v6757_v52 = vadd.f32 1.0, %v8452_v22  ;;  %v6531_v55 = vpop.f32.mrf.mxu0  ;;  %v8454_v60 = vpop.eup %8453 }
 0x4fb   : > { %v6595_v28 = vadd.f32 %v6531_v55, %v4599_v39  ;;  %v6820_v22 = vmul.f32 %v8454_v60, %v17472_v14  ;;  %v17556_v43 = vpop.f32.mrf.mxu3  ;;  %v6157_v60 = vmax.f32 %v17230_v59, %v17134_v26  ;;  %v6220_v29 = vmax.f32 %v6156_v30, %v17489_v20 }
 0x4fc   : > { %8455 = vrcp.f32 %v6757_v52 }
 0x4fd   : > { %8457 = vpow2.f32 %v6704_v24  ;;  %v17538_v2 = vadd.f32 %v17188_v49, %v6595_v28  ;;  %v6445_v24 = vpack.c.bf16 %v6411_v4, %v6410_v47  ;;  %v2577_v28 = vadd.f32 %v17469_v21, %v20729_v7  ;;  %v17569_v13 = vpop.f32.mrf.mxu2  ;;  %v8232_v21 = vld [vmem:[%s18090_s5 + $0x48] sm:$0xff] }
 0x4fe   : > { %v17541_v62 = vpop.f32.mrf.mxu1  ;;  %7252 = vmatpush.bf16.msrb.mxu2 %v8232_v21  ;;  %v6221_v47 = vmax.f32 %v6157_v60, %v17493_v33  ;;  %v6380_v4 = vmax.f32 %v6220_v29, %v17452_v12  ;;  %v2585_v29 = vadd.f32 %v17549_v17, %v17222_v48  ;;  %v17623_v48 = vld [vmem:[%s18092_s7] ss:$0 sm:$0xff] }
 0x4ff   : > { %v6663_v42 = vsub.f32 0.0, %v17538_v2  ;;  %v4601_v44 = vadd.f32 %v17312_v6, %v2577_v28 }
 0x500   : > { %v6381_v26 = vmax.f32 %v6221_v47, %v17456_v58  ;;  %v6412_v20 = vmax.f32 %v17228_v18, %v6380_v4 }
 0x501   : > { %v6706_v37 = vmul.f32 1.442695, %v6663_v42 }
 0x502   : > { %v8456_v50 = vpop.eup %8455  ;;  %v6534_v11 = vpop.f32.mrf.mxu0 }
 0x503   : > { %v8458_v32 = vpop.eup %8457  ;;  %v6821_v56 = vmul.f32 %v8456_v50, %v17498_v23  ;;  %8459 = vpow2.f32 %v6706_v37  ;;  %v6596_v39 = vadd.f32 %v6534_v11, %v4600_v51  ;;  %v8869_v23 = vld [vmem:[%s9100_s12 + $0x30] sm:$0xff]  ;;  %v17582_v37 = vpop.f32.mrf.mxu3 }
 0x504   : > { %v6758_v55 = vadd.f32 1.0, %v8458_v32  ;;  %v20731_v50 = vld [vmem:[#allocation143_spill] sm:$0xff] }
 0x505   : > { %v17559_v53 = vadd.f32 %v17188_v49, %v6596_v39  ;;  %v7153_v52 = vpack.c.bf16 %v6821_v56, %v6820_v22  ;;  %6573 = vmatmul.bf16.gmra.mxu0 %v6445_v24  ;;  %v2580_v11 = vadd.f32 %v17495_v45, %v20731_v50  ;;  %v17594_v28 = vpop.f32.mrf.mxu2 }
 0x506   : > { %v17561_v57 = vpop.f32.mrf.mxu1  ;;  %8461 = vrcp.f32 %v6758_v55 }
 0x507   : > { %v6664_v14 = vsub.f32 0.0, %v17559_v53  ;;  %7411 = vmatmul.bf16.gmra.mxu3 %v7153_v52  ;;  %v4602_v22 = vadd.f32 %v17363_v27, %v2580_v11  ;;  %v6413_v52 = vmax.f32 %v17230_v59, %v6381_v26  ;;  %v20732_v59 = vld [vmem:[#allocation77_spill] sm:$0xff] }
 0x509   : > { %8079 = vmatmul.msk.bf16.gmra.mxu1 %vm20730_vm5, %v8869_v23  ;;  %v8460_v0 = vpop.eup %8459  ;;  %v6708_v9 = vmul.f32 1.442695, %v6664_v14  ;;  %v6446_v7 = vpack.c.bf16 %v6413_v52, %v6412_v20  ;;  %v2582_v23 = vadd.f32 %v17523_v16, %v20732_v59 }
 0x50a   : > { %v6759_v5 = vadd.f32 1.0, %v8460_v0  ;;  %v6536_v63 = vpop.f32.mrf.mxu0  ;;  %v8870_v0 = vld [vmem:[%s9100_s12 + $0x38] sm:$0xff] }
 0x50b   : > { %v6597_v42 = vadd.f32 %v6536_v63, %v4601_v44 }
 0x50c   : > { %8463 = vrcp.f32 %v6759_v5  ;;  %v8462_v32 = vpop.eup %8461 }
 0x50d   : > { %8465 = vpow2.f32 %v6708_v9  ;;  %v6633_v6 = vadd.f32 %v17188_v49, %v6597_v42  ;;  %v6822_v33 = vmul.f32 %v8462_v32, %v17519_v10  ;;  %v4603_v9 = vadd.f32 %v17377_v46, %v2582_v23  ;;  %v17612_v60 = vpop.f32.mrf.mxu2 }
 0x50e   : > { %v17580_v51 = vpop.f32.mrf.mxu1  ;;  %v4604_v46 = vadd.f32 %v17420_v40, %v2585_v29 }
 0x50f   : > { %v6665_v31 = vsub.f32 0.0, %v6633_v6 }
 0x511   : > { %v6710_v56 = vmul.f32 1.442695, %v6665_v31 }
 0x512   : > { %v8464_v39 = vpop.eup %8463  ;;  %v6539_v24 = vpop.f32.mrf.mxu0 }
 0x513   : > { %v8466_v55 = vpop.eup %8465  ;;  %v6823_v45 = vmul.f32 %v8464_v39, %v17538_v2  ;;  %8467 = vpow2.f32 %v6710_v56  ;;  %v6598_v12 = vadd.f32 %v6539_v24, %v4602_v22  ;;  %v17604_v2 = vpop.f32.mrf.mxu3 }
 0x514   : > { %v6760_v14 = vadd.f32 1.0, %v8466_v55 }
 0x515   : > { %v17597_v27 = vadd.f32 %v17188_v49, %v6598_v12  ;;  %v7154_v58 = vpack.c.bf16 %v6823_v45, %v6822_v33  ;;  %6578 = vmatmul.bf16.gmra.mxu0 %v6446_v7  ;;  %v8871_v33 = vld [vmem:[%s9100_s12 + $0x40] sm:$0xff]  ;;  %v17637_v12 = vpop.f32.mrf.mxu2 }
 0x516   : > { %v17599_v18 = vpop.f32.mrf.mxu1  ;;  %8469 = vrcp.f32 %v6760_v14 }
 0x517   : > { %v6666_v10 = vsub.f32 0.0, %v17597_v27  ;;  %7416 = vmatmul.bf16.gmra.mxu3 %v7154_v58 }
 0x519   : > { %8080 = vmatmul.msk.bf16.gmra.mxu1 %vm20733_vm12, %v8870_v0  ;;  %v8468_v44 = vpop.eup %8467  ;;  %v6712_v5 = vmul.f32 1.442695, %v6666_v10 }
 0x51a   : > { %v6761_v63 = vadd.f32 1.0, %v8468_v44  ;;  %v6541_v42 = vpop.f32.mrf.mxu0 }
 0x51b   : > { %v6599_v21 = vadd.f32 %v6541_v42, %v4603_v9  ;;  %v17617_v4 = vpop.f32.mrf.mxu3  ;;  %v2590_v9 = vadd.f32 %v17594_v28, %v17307_v25 }
 0x51c   : > { %8471 = vrcp.f32 %v6761_v63  ;;  %v8470_v50 = vpop.eup %8469 }
 0x51d   : > { %8473 = vpow2.f32 %v6712_v5  ;;  %v6635_v16 = vadd.f32 %v17188_v49, %v6599_v21  ;;  %v6824_v22 = vmul.f32 %v8470_v50, %v17559_v53  ;;  %v2587_v53 = vadd.f32 %v17569_v13, %v17270_v8  ;;  %v8231_v8 = vld [vmem:[%s18090_s5 + $0x40] sm:$0xff] }
 0x51e   : > { %v17610_v30 = vpop.f32.mrf.mxu1  ;;  %7253 = vmatpush.bf16.msrb.mxu2 %v8231_v8  ;;  %v4606_v21 = vadd.f32 %v17476_v3, %v2590_v9 }
 0x51f   : > { %v6667_v47 = vsub.f32 0.0, %v6635_v16  ;;  %v4605_v7 = vadd.f32 %v17444_v38, %v2587_v53  ;;  %v8872_v53 = vld [vmem:[%s9100_s12 + $0x48] sm:$0xff] }
 0x521   : > { %v6714_v11 = vmul.f32 1.442695, %v6667_v47 }
 0x522   : > { %v8472_v31 = vpop.eup %8471  ;;  %v6544_v32 = vpop.f32.mrf.mxu0 }
 0x523   : > { %v8474_v26 = vpop.eup %8473  ;;  %v6825_v56 = vmul.f32 %v8472_v31, %v6633_v6  ;;  %8475 = vpow2.f32 %v6714_v11  ;;  %v6600_v20 = vadd.f32 %v6544_v32, %v4604_v46  ;;  %v17643_v13 = vpop.f32.mrf.mxu3 }
 0x524   : > { %v6762_v24 = vadd.f32 1.0, %v8474_v26  ;;  %v17656_v31 = vpop.f32.mrf.mxu2 }
 0x525   : > { %v17626_v17 = vadd.f32 %v17188_v49, %v6600_v20  ;;  %v7155_v40 = vpack.c.bf16 %v6825_v56, %v6824_v22 }
 0x526   : > { %v6861_v39 = vpop.f32.mrf.mxu1  ;;  %8477 = vrcp.f32 %v6762_v24 }
 0x527   : > { %v17629_v52 = vadd.f32 %v17623_v48, %v6861_v39  ;;  %v6668_v6 = vsub.f32 0.0, %v17626_v17  ;;  %7421 = vmatmul.bf16.gmra.mxu3 %v7155_v40 }
 0x529   : > { %v6941_v55 = vsub.f32 0.0, %v17629_v52  ;;  %8081 = vmatmul.msk.bf16.gmra.mxu1 %vm20734_vm2, %v8871_v33  ;;  %v8476_v45 = vpop.eup %8475  ;;  %v6716_v58 = vmul.f32 1.442695, %v6668_v6 }
 0x52a   : > { %v6763_v14 = vadd.f32 1.0, %v8476_v45  ;;  %v6546_v59 = vpop.f32.mrf.mxu0 }
 0x52b   : > { %v6973_v23 = vmul.f32 1.442695, %v6941_v55  ;;  %v6601_v10 = vadd.f32 %v6546_v59, %v4605_v7  ;;  %v17662_v40 = vpop.f32.mrf.mxu3 }
 0x52c   : > { %8479 = vrcp.f32 %v6763_v14  ;;  %v8478_v63 = vpop.eup %8477 }
 0x52d   : > { %8481 = vpow2.f32 %v6716_v58  ;;  %v17646_v0 = vadd.f32 %v17188_v49, %v6601_v10  ;;  %v6826_v32 = vmul.f32 %v8478_v63, %v17597_v27  ;;  %v2592_v27 = vadd.f32 %v17612_v60, %v17352_v54  ;;  %v2599_v60 = vpop.f32.mrf.mxu2 }
 0x52e   : > { %v6863_v44 = vpop.f32.mrf.mxu1  ;;  %8483 = vpow2.f32 %v6973_v23 }
 0x52f   : > { %v17649_v38 = vadd.f32 %v17623_v48, %v6863_v44  ;;  %v6669_v5 = vsub.f32 0.0, %v17646_v0  ;;  %v4607_v55 = vadd.f32 %v17513_v36, %v2592_v27  ;;  %v2595_v44 = vadd.f32 %v17637_v12, %v17375_v1 }
 0x531   : > { %v6942_v42 = vsub.f32 0.0, %v17649_v38  ;;  %v6718_v29 = vmul.f32 1.442695, %v6669_v5 }
 0x532   : > { %v8480_v47 = vpop.eup %8479  ;;  %v6549_v50 = vpop.f32.mrf.mxu0 }
 0x533   : > { %v6975_v46 = vmul.f32 1.442695, %v6942_v42  ;;  %v8482_v11 = vpop.eup %8481  ;;  %v6827_v26 = vmul.f32 %v8480_v47, %v6635_v16  ;;  %8485 = vpow2.f32 %v6718_v29  ;;  %v6602_v25 = vadd.f32 %v6549_v50, %v4606_v21  ;;  %v17683_v63 = vpop.f32.mrf.mxu3 }
 0x534   : > { %v8484_v28 = vpop.eup %8483  ;;  %v6764_v20 = vadd.f32 1.0, %v8482_v11  ;;  %v4608_v29 = vadd.f32 %v17531_v34, %v2595_v44 }
 0x535   : > { %v17660_v22 = vadd.f32 %v17188_v49, %v6602_v25  ;;  %8487 = vpow2.f32 %v6975_v46  ;;  %v7156_v56 = vpack.c.bf16 %v6827_v26, %v6826_v32  ;;  %v7037_v24 = vadd.f32 1.0, %v8484_v28 }
 0x536   : > { %v6866_v3 = vpop.f32.mrf.mxu1  ;;  %8489 = vrcp.f32 %v6764_v20 }
 0x537   : > { %v17665_v39 = vadd.f32 %v17623_v48, %v6866_v3  ;;  %v6670_v16 = vsub.f32 0.0, %v17660_v22  ;;  %7426 = vmatmul.bf16.gmra.mxu3 %v7156_v56  ;;  %8491 = vrcp.f32 %v7037_v24 }
 0x539   : > { %8082 = vmatmul.msk.bf16.gmra.mxu1 %vm20735_vm10, %v8872_v53  ;;  %v8486_v6 = vpop.eup %8485  ;;  %v6720_v33 = vmul.f32 1.442695, %v6670_v16  ;;  %v6943_v58 = vsub.f32 0.0, %v17665_v39 }
 0x53a   : > { %v6765_v45 = vadd.f32 1.0, %v8486_v6  ;;  %v6551_v7 = vpop.f32.mrf.mxu0 }
 0x53b   : > { %v8488_v14 = vpop.eup %8487  ;;  %v6603_v59 = vadd.f32 %v6551_v7, %v4607_v55  ;;  %v6977_v8 = vmul.f32 1.442695, %v6943_v58 }
 0x53c   : > { %8493 = vrcp.f32 %v6765_v45  ;;  %v7038_v54 = vadd.f32 1.0, %v8488_v14  ;;  %v8490_v5 = vpop.eup %8489  ;;  %v17703_v45 = vpop.f32.mrf.mxu3 }
 0x53d   : > { %8495 = vpow2.f32 %v6720_v33  ;;  %v17675_v23 = vadd.f32 %v17188_v49, %v6603_v59  ;;  %v8492_v21 = vpop.eup %8491  ;;  %v6828_v26 = vmul.f32 %v8490_v5, %v17626_v17  ;;  %v2601_v17 = vpop.f32.mrf.mxu2 }
 0x53e   : > { %v6868_v10 = vpop.f32.mrf.mxu1  ;;  %8497 = vrcp.f32 %v7038_v54  ;;  %v7101_v28 = vmul.f32 %v8492_v21, %v17629_v52 }
 0x53f   : > { %v17678_v36 = vadd.f32 %v17623_v48, %v6868_v10  ;;  %v6671_v9 = vsub.f32 0.0, %v17675_v23  ;;  %8499 = vpow2.f32 %v6977_v8 }
 0x541   : > { %v6944_v42 = vsub.f32 0.0, %v17678_v36  ;;  %v6722_v47 = vmul.f32 1.442695, %v6671_v9  ;;  %v2600_v9 = vadd.f32 %v2599_v60, %v17425_v19 }
 0x542   : > { %v8494_v50 = vpop.eup %8493  ;;  %v6554_v46 = vpop.f32.mrf.mxu0 }
 0x543   : > { %v6979_v11 = vmul.f32 1.442695, %v6944_v42  ;;  %v8496_v32 = vpop.eup %8495  ;;  %v6829_v1 = vmul.f32 %v8494_v50, %v17646_v0  ;;  %8501 = vpow2.f32 %v6722_v47  ;;  %v6604_v12 = vadd.f32 %v6554_v46, %v4608_v29 }
 0x544   : > { %v8498_v25 = vpop.eup %8497  ;;  %v6766_v27 = vadd.f32 1.0, %v8496_v32  ;;  %v2597_v0 = vadd.f32 %v17656_v31, %v17411_v35  ;;  %v4610_v47 = vadd.f32 %v17582_v37, %v2600_v9  ;;  %v17723_v37 = vld [vmem:[%s18093_s8] ss:$0 sm:$0xff] }
 0x545   : > { %v7102_v56 = vmul.f32 %v8498_v25, %v17649_v38  ;;  %v17692_v34 = vadd.f32 %v17188_v49, %v6604_v12  ;;  %8503 = vpow2.f32 %v6979_v11  ;;  %v7157_v3 = vpack.c.bf16 %v6829_v1, %v6828_v26  ;;  %v8500_v52 = vpop.eup %8499  ;;  %v8873_v38 = vld [vmem:[%s9100_s12 + $0x50] sm:$0xff]  ;;  %v2604_v29 = vpop.f32.mrf.mxu2 }
 0x546   : > { %v6871_v20 = vpop.f32.mrf.mxu1  ;;  %v4609_v55 = vadd.f32 %v17556_v43, %v2597_v0  ;;  %8505 = vrcp.f32 %v6766_v27  ;;  %v7039_v59 = vadd.f32 1.0, %v8500_v52  ;;  %v17718_v12 = vpop.f32.mrf.mxu3  ;;  %v8875_v52 = vld [vmem:[%s9100_s12 + $0x58] sm:$0xff]  ;;  %v2605_v9 = vadd.f32 %v2604_v29, %v17474_v41 }
 0x547   : > { %v17695_v24 = vadd.f32 %v17623_v48, %v6871_v20  ;;  %v7182_v16 = vpack.c.bf16 %v7102_v56, %v7101_v28  ;;  %v6672_v53 = vsub.f32 0.0, %v17692_v34  ;;  %7431 = vmatmul.bf16.gmra.mxu3 %v7157_v3 }
 0x549   : > { %8083 = vmatmul.msk.bf16.gmra.mxu1 %vm20736_vm1, %v8873_v38  ;;  %v8502_v6 = vpop.eup %8501  ;;  %v6724_v33 = vmul.f32 1.442695, %v6672_v53  ;;  %7254 = vmatmul.bf16.vlgmr.msrb.gmra.mxu2 %v7182_v16  ;;  %v6945_v35 = vsub.f32 0.0, %v17695_v24 }
 0x54a   : > { %v6767_v7 = vadd.f32 1.0, %v8502_v6  ;;  %v6556_v58 = vpop.f32.mrf.mxu0 }
 0x54b   : > { %v8504_v31 = vpop.eup %8503  ;;  %v6605_v14 = vadd.f32 %v6556_v58, %v4609_v55  ;;  %v6981_v43 = vmul.f32 1.442695, %v6945_v35 }
 0x54c   : > { %8507 = vrcp.f32 %v6767_v7  ;;  %v7040_v54 = vadd.f32 1.0, %v8504_v31  ;;  %v8506_v42 = vpop.eup %8505 }
 0x54d   : > { %8509 = vpow2.f32 %v6724_v33  ;;  %v17707_v10 = vadd.f32 %v17188_v49, %v6605_v14  ;;  %v6830_v26 = vmul.f32 %v8506_v42, %v17660_v22  ;;  %v2606_v58 = vpop.f32.mrf.mxu2 }
 0x54e   : > { %v6873_v8 = vpop.f32.mrf.mxu1  ;;  %8511 = vrcp.f32 %v7040_v54 }
 0x54f   : > { %v17710_v44 = vadd.f32 %v17623_v48, %v6873_v8  ;;  %v6673_v5 = vsub.f32 0.0, %v17707_v10  ;;  %8513 = vrcp.f32 %v7039_v59 }
 0x550   : > { %8515 = vpow2.f32 %v6981_v43 }
 0x551   : > { %v6946_v21 = vsub.f32 0.0, %v17710_v44  ;;  %v6726_v50 = vmul.f32 1.442695, %v6673_v5 }
 0x552   : > { %v8508_v49 = vpop.eup %8507  ;;  %v6559_v46 = vpop.f32.mrf.mxu0 }
 0x553   : > { %v6983_v11 = vmul.f32 1.442695, %v6946_v21  ;;  %v8510_v32 = vpop.eup %8509  ;;  %v6831_v1 = vmul.f32 %v8508_v49, %v17675_v23  ;;  %8517 = vpow2.f32 %v6726_v50  ;;  %v6606_v19 = vadd.f32 %v6559_v46, %v4610_v47  ;;  %v20737_v23 = vld [vmem:[#allocation25_spill] sm:$0xff] }
 0x554   : > { %v8512_v60 = vpop.eup %8511  ;;  %v6768_v3 = vadd.f32 1.0, %v8510_v32  ;;  %v2602_v20 = vadd.f32 %v2601_v17, %v20737_v23  ;;  %v4612_v50 = vadd.f32 %v17617_v4, %v2605_v9  ;;  %v2607_v23 = vadd.f32 %v2606_v58, %v17504_v15 }
 0x555   : > { %v17726_v25 = vadd.f32 %v17723_v37, %v6606_v19  ;;  %8519 = vpow2.f32 %v6983_v11  ;;  %v7158_v28 = vpack.c.bf16 %v6831_v1, %v6830_v26  ;;  %v8514_v22 = vpop.eup %8513  ;;  %v7104_v27 = vmul.f32 %v8512_v60, %v17678_v36  ;;  %v2609_v60 = vpop.f32.mrf.mxu2 }
 0x556   : > { %v6876_v56 = vpop.f32.mrf.mxu1  ;;  %v8516_v16 = vpop.eup %8515  ;;  %v4611_v6 = vadd.f32 %v17604_v2, %v2602_v20  ;;  %v7103_v55 = vmul.f32 %v8514_v22, %v17665_v39  ;;  %8521 = vrcp.f32 %v6768_v3 }
 0x557   : > { %v6674_v0 = vsub.f32 0.0, %v17726_v25  ;;  %7436 = vmatmul.bf16.gmra.mxu3 %v7158_v28  ;;  %v17732_v53 = vadd.f32 %v17623_v48, %v6876_v56  ;;  %v7041_v14 = vadd.f32 1.0, %v8516_v16  ;;  %v17742_v39 = vpop.f32.mrf.mxu3 }
 0x558   : > { %v7183_v31 = vpack.c.bf16 %v7104_v27, %v7103_v55 }
 0x559   : > { %8084 = vmatmul.msk.bf16.gmra.mxu1 %vm20738_vm15, %v8875_v52  ;;  %v8518_v38 = vpop.eup %8517  ;;  %v6728_v33 = vmul.f32 1.442695, %v6674_v0  ;;  %v6947_v54 = vsub.f32 0.0, %v17732_v53  ;;  %v8876_v0 = vld [vmem:[%s9100_s12 + $0x60] sm:$0xff]  ;;  %v4613_v52 = vadd.f32 %v17643_v13, %v2607_v23 }
 0x55a   : > { %v6769_v17 = vadd.f32 1.0, %v8518_v38  ;;  %v6561_v7 = vpop.f32.mrf.mxu0  ;;  %7259 = vmatmul.bf16.gmra.mxu2 %v7183_v31 }
 0x55b   : > { %v8520_v36 = vpop.eup %8519  ;;  %v6607_v35 = vadd.f32 %v6561_v7, %v4611_v6  ;;  %v6985_v21 = vmul.f32 1.442695, %v6947_v54 }
 0x55c   : > { %8523 = vrcp.f32 %v6769_v17  ;;  %v7042_v59 = vadd.f32 1.0, %v8520_v36  ;;  %v8522_v42 = vpop.eup %8521 }
 0x55d   : > { %8525 = vpow2.f32 %v6728_v33  ;;  %v17740_v8 = vadd.f32 %v17723_v37, %v6607_v35  ;;  %v6832_v1 = vmul.f32 %v8522_v42, %v17692_v34 }
 0x55e   : > { %v6878_v2 = vpop.f32.mrf.mxu1  ;;  %8527 = vrcp.f32 %v7042_v59  ;;  %v2610_v59 = vadd.f32 %v2609_v60, %v17521_v61 }
 0x55f   : > { %v17745_v43 = vadd.f32 %v17623_v48, %v6878_v2  ;;  %v6675_v5 = vsub.f32 0.0, %v17740_v8  ;;  %8529 = vrcp.f32 %v7041_v14  ;;  %v17759_v20 = vpop.f32.mrf.mxu3  ;;  %v2611_v14 = vpop.f32.mrf.mxu2 }
 0x560   : > { %v4614_v42 = vadd.f32 %v17662_v40, %v2610_v59 }
 0x561   : > { %v6948_v47 = vsub.f32 0.0, %v17745_v43  ;;  %v6730_v49 = vmul.f32 1.442695, %v6675_v5 }
 0x562   : > { %v8524_v46 = vpop.eup %8523  ;;  %v6564_v11 = vpop.f32.mrf.mxu0 }
 0x563   : > { %v6987_v32 = vmul.f32 1.442695, %v6948_v47  ;;  %v8526_v26 = vpop.eup %8525  ;;  %v6833_v19 = vmul.f32 %v8524_v46, %v17707_v10  ;;  %8531 = vpow2.f32 %v6730_v49  ;;  %v6608_v41 = vadd.f32 %v6564_v11, %v4612_v50 }
 0x564   : > { %v8528_v29 = vpop.eup %8527  ;;  %8533 = vpow2.f32 %v6985_v21  ;;  %v6770_v3 = vadd.f32 1.0, %v8526_v26 }
 0x565   : > { %v17754_v28 = vadd.f32 %v17723_v37, %v6608_v41  ;;  %8535 = vpow2.f32 %v6987_v32  ;;  %v7159_v4 = vpack.c.bf16 %v6833_v19, %v6832_v1  ;;  %v8530_v22 = vpop.eup %8529  ;;  %v7106_v34 = vmul.f32 %v8528_v29, %v17710_v44 }
 0x566   : > { %v6881_v56 = vpop.f32.mrf.mxu1  ;;  %v7105_v38 = vmul.f32 %v8530_v22, %v17695_v24  ;;  %8537 = vrcp.f32 %v6770_v3 }
 0x567   : > { %v6676_v10 = vsub.f32 0.0, %v17754_v28  ;;  %7441 = vmatmul.bf16.gmra.mxu3 %v7159_v4  ;;  %v17762_v27 = vadd.f32 %v17623_v48, %v6881_v56  ;;  %v17779_v50 = vpop.f32.mrf.mxu3  ;;  %v2612_v4 = vadd.f32 %v2611_v14, %v17541_v62  ;;  %v8877_v56 = vld [vmem:[%s9100_s12 + $0x68] sm:$0xff]  ;;  %v2614_v3 = vpop.f32.mrf.mxu2 }
 0x568   : > { %v7184_v7 = vpack.c.bf16 %v7106_v34, %v7105_v38 }
 0x569   : > { %8085 = vmatmul.msk.bf16.gmra.mxu1 %vm20739_vm11, %v8876_v0  ;;  %v8532_v16 = vpop.eup %8531  ;;  %v6732_v6 = vmul.f32 1.442695, %v6676_v10  ;;  %v6949_v58 = vsub.f32 0.0, %v17762_v27  ;;  %v4615_v23 = vadd.f32 %v17683_v63, %v2612_v4 }
 0x56a   : > { %v8534_v15 = vpop.eup %8533  ;;  %v6771_v44 = vadd.f32 1.0, %v8532_v16  ;;  %v6566_v55 = vpop.f32.mrf.mxu0  ;;  %7264 = vmatmul.bf16.gmra.mxu2 %v7184_v7 }
 0x56b   : > { %v8536_v33 = vpop.eup %8535  ;;  %v6609_v17 = vadd.f32 %v6566_v55, %v4613_v52  ;;  %v7043_v31 = vadd.f32 1.0, %v8534_v15  ;;  %v6989_v9 = vmul.f32 1.442695, %v6949_v58 }
 0x56c   : > { %8539 = vrcp.f32 %v6771_v44  ;;  %v7044_v36 = vadd.f32 1.0, %v8536_v33  ;;  %v8538_v2 = vpop.eup %8537 }
 0x56d   : > { %8541 = vpow2.f32 %v6732_v6  ;;  %v17770_v35 = vadd.f32 %v17723_v37, %v6609_v17  ;;  %v6834_v32 = vmul.f32 %v8538_v2, %v17726_v25 }
 0x56e   : > { %v6883_v13 = vpop.f32.mrf.mxu1  ;;  %8543 = vrcp.f32 %v7044_v36 }
 0x56f   : > { %v17773_v24 = vadd.f32 %v17623_v48, %v6883_v13  ;;  %v6677_v54 = vsub.f32 0.0, %v17770_v35  ;;  %8545 = vrcp.f32 %v7043_v31  ;;  %v17797_v44 = vpop.f32.mrf.mxu3  ;;  %v2615_v13 = vadd.f32 %v2614_v3, %v17561_v57 }
 0x571   : > { %v6950_v5 = vsub.f32 0.0, %v17773_v24  ;;  %v6734_v21 = vmul.f32 1.442695, %v6677_v54  ;;  %v4616_v54 = vadd.f32 %v17703_v45, %v2615_v13 }
 0x572   : > { %v8540_v47 = vpop.eup %8539  ;;  %v6569_v49 = vpop.f32.mrf.mxu0 }
 0x573   : > { %v6991_v46 = vmul.f32 1.442695, %v6950_v5  ;;  %v8542_v11 = vpop.eup %8541  ;;  %v6835_v61 = vmul.f32 %v8540_v47, %v17740_v8  ;;  %8547 = vpow2.f32 %v6734_v21  ;;  %v6610_v26 = vadd.f32 %v6569_v49, %v4614_v42  ;;  %v2616_v5 = vpop.f32.mrf.mxu2 }
 0x574   : > { %8549 = vpow2.f32 %v6989_v9  ;;  %v8544_v41 = vpop.eup %8543  ;;  %v6772_v29 = vadd.f32 1.0, %v8542_v11 }
 0x575   : > { %v17784_v1 = vadd.f32 %v17723_v37, %v6610_v26  ;;  %8551 = vpow2.f32 %v6991_v46  ;;  %v7160_v40 = vpack.c.bf16 %v6835_v61, %v6834_v32  ;;  %v8546_v8 = vpop.eup %8545  ;;  %v7108_v34 = vmul.f32 %v8544_v41, %v17745_v43 }
 0x576   : > { %v6886_v19 = vpop.f32.mrf.mxu1  ;;  %8553 = vrcp.f32 %v6772_v29  ;;  %v7107_v6 = vmul.f32 %v8546_v8, %v17732_v53  ;;  %v8878_v29 = vld [vmem:[%s9100_s12 + $0x70] sm:$0xff] }
 0x577   : > { %v17787_v60 = vadd.f32 %v17623_v48, %v6886_v19  ;;  %v6678_v25 = vsub.f32 0.0, %v17784_v1  ;;  %7446 = vmatmul.bf16.gmra.mxu3 %v7160_v40  ;;  %v17811_v32 = vpop.f32.mrf.mxu3  ;;  %v2617_v40 = vadd.f32 %v2616_v5, %v17580_v51 }
 0x578   : > { %v7185_v43 = vpack.c.bf16 %v7108_v34, %v7107_v6 }
 0x579   : > { %8086 = vmatmul.msk.bf16.gmra.mxu1 %vm20740_vm7, %v8877_v56  ;;  %v8548_v22 = vpop.eup %8547  ;;  %v6736_v10 = vmul.f32 1.442695, %v6678_v25  ;;  %v6951_v62 = vsub.f32 0.0, %v17787_v60  ;;  %v4617_v25 = vadd.f32 %v17718_v12, %v2617_v40 }
 0x57a   : > { %v8550_v0 = vpop.eup %8549  ;;  %v6773_v16 = vadd.f32 1.0, %v8548_v22  ;;  %v6571_v52 = vpop.f32.mrf.mxu0  ;;  %7269 = vmatmul.bf16.gmra.mxu2 %v7185_v43 }
 0x57b   : > { %v8552_v38 = vpop.eup %8551  ;;  %v6611_v15 = vadd.f32 %v6571_v52, %v4615_v23  ;;  %v7045_v33 = vadd.f32 1.0, %v8550_v0  ;;  %v6993_v7 = vmul.f32 1.442695, %v6951_v62 }
 0x57c   : > { %8555 = vrcp.f32 %v6773_v16  ;;  %v7046_v55 = vadd.f32 1.0, %v8552_v38  ;;  %v8554_v53 = vpop.eup %8553  ;;  %v2619_v16 = vpop.f32.mrf.mxu2 }
 0x57d   : > { %8557 = vpow2.f32 %v6736_v10  ;;  %v17800_v63 = vadd.f32 %v17723_v37, %v6611_v15  ;;  %v6836_v42 = vmul.f32 %v8554_v53, %v17754_v28  ;;  %v2620_v6 = vadd.f32 %v2619_v16, %v17599_v18 }
 0x57e   : > { %v6888_v17 = vpop.f32.mrf.mxu1  ;;  %8559 = vrcp.f32 %v7046_v55 }
 0x57f   : > { %v17803_v36 = vadd.f32 %v17623_v48, %v6888_v17  ;;  %v6679_v58 = vsub.f32 0.0, %v17800_v63  ;;  %8561 = vrcp.f32 %v7045_v33  ;;  %v17834_v15 = vpop.f32.mrf.mxu3  ;;  %v4618_v17 = vadd.f32 %v17742_v39, %v2620_v6 }
 0x580   : > { %8563 = vpow2.f32 %v6993_v7 }
 0x581   : > { %v6952_v31 = vsub.f32 0.0, %v17803_v36  ;;  %v6738_v14 = vmul.f32 1.442695, %v6679_v58 }
 0x582   : > { %v8556_v59 = vpop.eup %8555  ;;  %v6574_v47 = vpop.f32.mrf.mxu0 }
 0x583   : > { %v6995_v2 = vmul.f32 1.442695, %v6952_v31  ;;  %v8558_v9 = vpop.eup %8557  ;;  %v6837_v21 = vmul.f32 %v8556_v59, %v17770_v35  ;;  %8565 = vpow2.f32 %v6738_v14  ;;  %v6612_v49 = vadd.f32 %v6574_v47, %v4616_v54 }
 0x584   : > { %v8560_v57 = vpop.eup %8559  ;;  %v6774_v61 = vadd.f32 1.0, %v8558_v9  ;;  %v2621_v39 = vpop.f32.mrf.mxu2 }
 0x585   : > { %8567 = vpow2.f32 %v6995_v2  ;;  %v7161_v46 = vpack.c.bf16 %v6837_v21, %v6836_v42  ;;  %v17814_v45 = vadd.f32 %v17723_v37, %v6612_v49  ;;  %v8562_v26 = vpop.eup %8561  ;;  %v7110_v19 = vmul.f32 %v8560_v57, %v17773_v24  ;;  %v8879_v49 = vld [vmem:[%s9100_s12 + $0x78] sm:$0xff] }
 0x586   : > { %v6891_v11 = vpop.f32.mrf.mxu1  ;;  %v8564_v35 = vpop.eup %8563  ;;  %v7109_v8 = vmul.f32 %v8562_v26, %v17762_v27  ;;  %8569 = vrcp.f32 %v6774_v61 }
 0x587   : > { %7451 = vmatmul.bf16.gmra.mxu3 %v7161_v46  ;;  %v17818_v28 = vadd.f32 %v17623_v48, %v6891_v11  ;;  %v6680_v41 = vsub.f32 0.0, %v17814_v45  ;;  %v7047_v3 = vadd.f32 1.0, %v8564_v35  ;;  %v17854_v26 = vpop.f32.mrf.mxu3 }
 0x588   : > { %v7186_v0 = vpack.c.bf16 %v7110_v19, %v7109_v8 }
 0x589   : > { %8087 = vmatmul.msk.bf16.gmra.mxu1 %vm20741_vm4, %v8878_v29  ;;  %v8566_v4 = vpop.eup %8565  ;;  %v6740_v51 = vmul.f32 1.442695, %v6680_v41  ;;  %v6953_v34 = vsub.f32 0.0, %v17818_v28 }
 0x58a   : > { %v6775_v56 = vadd.f32 1.0, %v8566_v4  ;;  %v6576_v23 = vpop.f32.mrf.mxu0  ;;  %7274 = vmatmul.bf16.gmra.mxu2 %v7186_v0 }
 0x58b   : > { %v8568_v22 = vpop.eup %8567  ;;  %v6613_v10 = vadd.f32 %v6576_v23, %v4617_v25  ;;  %v6997_v62 = vmul.f32 1.442695, %v6953_v34 }
 0x58c   : > { %8571 = vrcp.f32 %v6775_v56  ;;  %v7048_v24 = vadd.f32 1.0, %v8568_v22  ;;  %v8570_v38 = vpop.eup %8569 }
 0x58d   : > { %8573 = vpow2.f32 %v6740_v51  ;;  %v17828_v12 = vadd.f32 %v17723_v37, %v6613_v10  ;;  %v6838_v13 = vmul.f32 %v8570_v38, %v17784_v1 }
 0x58e   : > { %v6893_v52 = vpop.f32.mrf.mxu1  ;;  %8575 = vrcp.f32 %v7048_v24 }
 0x58f   : > { %v17831_v27 = vadd.f32 %v17623_v48, %v6893_v52  ;;  %8577 = vrcp.f32 %v7047_v3  ;;  %v6681_v55 = vsub.f32 0.0, %v17828_v12  ;;  %v17859_v16 = vpop.f32.mrf.mxu3 }
 0x590   : > { %8579 = vpow2.f32 %v6997_v62 }
 0x591   : > { %v6954_v33 = vsub.f32 0.0, %v17831_v27  ;;  %v6742_v7 = vmul.f32 1.442695, %v6681_v55 }
 0x592   : > { %v8572_v43 = vpop.eup %8571  ;;  %v6579_v14 = vpop.f32.mrf.mxu0 }
 0x593   : > { %v6999_v58 = vmul.f32 1.442695, %v6954_v33  ;;  %v8574_v53 = vpop.eup %8573  ;;  %v6839_v31 = vmul.f32 %v8572_v43, %v17800_v63  ;;  %8581 = vpow2.f32 %v6742_v7  ;;  %v6614_v59 = vadd.f32 %v6579_v14, %v4618_v17 }
 0x594   : > { %v8576_v18 = vpop.eup %8575  ;;  %v6776_v42 = vadd.f32 1.0, %v8574_v53  ;;  %v2622_v63 = vadd.f32 %v2621_v39, %v17610_v30 }
 0x595   : > { %8583 = vpow2.f32 %v6999_v58  ;;  %v7162_v54 = vpack.c.bf16 %v6839_v31, %v6838_v13  ;;  %v8578_v9 = vpop.eup %8577  ;;  %v17842_v5 = vadd.f32 %v17723_v37, %v6614_v59  ;;  %v7112_v21 = vmul.f32 %v8576_v18, %v17803_v36 }
 0x596   : > { %v6896_v2 = vpop.f32.mrf.mxu1  ;;  %v8580_v57 = vpop.eup %8579  ;;  %v7111_v46 = vmul.f32 %v8578_v9, %v17787_v60  ;;  %v4619_v61 = vadd.f32 %v17759_v20, %v2622_v63  ;;  %8585 = vrcp.f32 %v6776_v42 }
 0x597   : > { %7456 = vmatmul.bf16.gmra.mxu3 %v7162_v54  ;;  %v17846_v1 = vadd.f32 %v17623_v48, %v6896_v2  ;;  %v6682_v47 = vsub.f32 0.0, %v17842_v5  ;;  %v7049_v29 = vadd.f32 1.0, %v8580_v57  ;;  %v17866_v59 = vpop.f32.mrf.mxu3 }
 0x598   : > { %v7187_v41 = vpack.c.bf16 %v7112_v21, %v7111_v46 }
 0x599   : > { %8088 = vmatmul.msk.bf16.gmra.mxu1 %vm20742_vm8, %v8879_v49  ;;  %v8582_v11 = vpop.eup %8581  ;;  %v6744_v36 = vmul.f32 1.442695, %v6682_v47  ;;  %v6955_v30 = vsub.f32 0.0, %v17846_v1 }
 0x59a   : > { %v6777_v35 = vadd.f32 1.0, %v8582_v11  ;;  %v6581_v19 = vpop.f32.mrf.mxu0  ;;  %7279 = vmatmul.bf16.gmra.mxu2 %v7187_v41 }
 0x59b   : > { %v8584_v40 = vpop.eup %8583  ;;  %8587 = vpow2.f32 %v6744_v36  ;;  %v6615_v25 = vadd.f32 %v6581_v19, %v4619_v61  ;;  %v7001_v56 = vmul.f32 1.442695, %v6955_v30 }
 0x59c   : > { %v7050_v4 = vadd.f32 1.0, %v8584_v40  ;;  %8589 = vrcp.f32 %v6777_v35  ;;  %v8586_v3 = vpop.eup %8585 }
 0x59d   : > { %v6651_v60 = vadd.f32 %v17723_v37, %v6615_v25  ;;  %v6840_v52 = vmul.f32 %v8586_v3, %v17814_v45 }
 0x59e   : > { %v6898_v8 = vpop.f32.mrf.mxu1  ;;  %8591 = vrcp.f32 %v7050_v4 }
 0x59f   : > { %v6899_v20 = vadd.f32 %v17623_v48, %v6898_v8  ;;  %8593 = vrcp.f32 %v7049_v29  ;;  %v6683_v51 = vsub.f32 0.0, %v6651_v60  ;;  %v17871_v61 = vpop.f32.mrf.mxu3 }
 0x5a0   : > { %8595 = vpow2.f32 %v7001_v56 }
 0x5a1   : > { %v6956_v22 = vsub.f32 0.0, %v6899_v20  ;;  %v8588_v23 = vpop.eup %8587  ;;  %v6746_v34 = vmul.f32 1.442695, %v6683_v51 }
 0x5a2   : > { %v8590_v10 = vpop.eup %8589  ;;  %v6778_v55 = vadd.f32 1.0, %v8588_v23 }
 0x5a3   : > { %v7003_v24 = vmul.f32 1.442695, %v6956_v22  ;;  %v6841_v37 = vmul.f32 %v8590_v10, %v17828_v12  ;;  %8597 = vpow2.f32 %v6746_v34 }
 0x5a4   : > { %v8592_v0 = vpop.eup %8591 }
 0x5a5   : > { %v8594_v38 = vpop.eup %8593  ;;  %8599 = vpow2.f32 %v7003_v24  ;;  %v7163_v6 = vpack.c.bf16 %v6841_v37, %v6840_v52  ;;  %v7114_v33 = vmul.f32 %v8592_v0, %v17831_v27  ;;  %v17882_v52 = vld [vmem:[%s18094_s9] ss:$0 sm:$0xff] }
 0x5a6   : > { %v6901_v62 = vpop.f32.mrf.mxu1  ;;  %v8596_v17 = vpop.eup %8595  ;;  %v7113_v7 = vmul.f32 %v8594_v38, %v17818_v28  ;;  %8601 = vrcp.f32 %v6778_v55 }
 0x5a7   : > { %v6902_v43 = vadd.f32 %v17623_v48, %v6901_v62  ;;  %7461 = vmatmul.bf16.gmra.mxu3 %v7163_v6  ;;  %v7051_v31 = vadd.f32 1.0, %v8596_v17 }
 0x5a8   : > { %v7188_v13 = vpack.c.bf16 %v7114_v33, %v7113_v7 }
 0x5a9   : > { %v8598_v58 = vpop.eup %8597  ;;  %v6957_v45 = vsub.f32 0.0, %v6902_v43 }
 0x5aa   : > { %v6779_v53 = vadd.f32 1.0, %v8598_v58  ;;  %7284 = vmatmul.bf16.gmra.mxu2 %v7188_v13 }
 0x5ab   : > { %v8600_v12 = vpop.eup %8599  ;;  %v7005_v54 = vmul.f32 1.442695, %v6957_v45 }
 0x5ac   : > { %8603 = vrcp.f32 %v6779_v53  ;;  %v7052_v14 = vadd.f32 1.0, %v8600_v12  ;;  %v8602_v28 = vpop.eup %8601 }
 0x5ad   : > { %v6842_v42 = vmul.f32 %v8602_v28, %v17842_v5 }
 0x5ae   : > { %v6903_v18 = vpop.f32.mrf.mxu1  ;;  %8605 = vrcp.f32 %v7052_v14 }
 0x5af   : > { %v6904_v27 = vadd.f32 %v17623_v48, %v6903_v18  ;;  %8607 = vrcp.f32 %v7051_v31 }
 0x5b0   : > { %8609 = vpow2.f32 %v7005_v54 }
 0x5b1   : > { %v6958_v2 = vsub.f32 0.0, %v6904_v27 }
 0x5b2   : > { %v8604_v39 = vpop.eup %8603 }
 0x5b3   : > { %v7007_v9 = vmul.f32 1.442695, %v6958_v2  ;;  %v6843_v21 = vmul.f32 %v8604_v39, %v6651_v60 }
 0x5b4   : > { %v8606_v63 = vpop.eup %8605 }
 0x5b5   : > { %8611 = vpow2.f32 %v7007_v9  ;;  %v8608_v49 = vpop.eup %8607  ;;  %v7164_v57 = vpack.c.bf16 %v6843_v21, %v6842_v42  ;;  %v7116_v46 = vmul.f32 %v8606_v63, %v6899_v20 }
 0x5b6   : > { %v6906_v47 = vpop.f32.mrf.mxu1  ;;  %v8610_v36 = vpop.eup %8609  ;;  %v7115_v40 = vmul.f32 %v8608_v49, %v17846_v1 }
 0x5b7   : > { %v6907_v11 = vadd.f32 %v17623_v48, %v6906_v47  ;;  %7466 = vmatmul.bf16.gmra.mxu3 %v7164_v57  ;;  %v7053_v5 = vadd.f32 1.0, %v8610_v36 }
 0x5b8   : > { %v7189_v41 = vpack.c.bf16 %v7116_v46, %v7115_v40 }
 0x5b9   : > { %v6959_v30 = vsub.f32 0.0, %v6907_v11 }
 0x5ba   : > { %7289 = vmatmul.bf16.gmra.mxu2 %v7189_v41 }
 0x5bb   : > { %v8612_v35 = vpop.eup %8611  ;;  %v7009_v25 = vmul.f32 1.442695, %v6959_v30 }
 0x5bc   : > { %v7054_v19 = vadd.f32 1.0, %v8612_v35 }
 0x5be   : > { %v6908_v29 = vpop.f32.mrf.mxu1  ;;  %8613 = vrcp.f32 %v7054_v19 }
 0x5bf   : > { %v6909_v4 = vadd.f32 %v17623_v48, %v6908_v29  ;;  %8615 = vrcp.f32 %v7053_v5  ;;  %v17909_v29 = vpop.f32.mrf.mxu3 }
 0x5c0   : > { %8617 = vpow2.f32 %v7009_v25 }
 0x5c1   : > { %v6960_v8 = vsub.f32 0.0, %v6909_v4 }
 0x5c3   : > { %v7011_v60 = vmul.f32 1.442695, %v6960_v8 }
 0x5c4   : > { %v8614_v20 = vpop.eup %8613 }
 0x5c5   : > { %8619 = vpow2.f32 %v7011_v60  ;;  %v8616_v51 = vpop.eup %8615  ;;  %v7118_v1 = vmul.f32 %v8614_v20, %v6904_v27 }
 0x5c6   : > { %v6911_v56 = vpop.f32.mrf.mxu1  ;;  %v8618_v3 = vpop.eup %8617  ;;  %v7117_v23 = vmul.f32 %v8616_v51, %v6902_v43 }
 0x5c7   : > { %v17876_v22 = vadd.f32 %v17623_v48, %v6911_v56  ;;  %v7055_v37 = vadd.f32 1.0, %v8618_v3 }
 0x5c8   : > { %v7190_v0 = vpack.c.bf16 %v7118_v1, %v7117_v23 }
 0x5c9   : > { %v6961_v10 = vsub.f32 0.0, %v17876_v22 }
 0x5ca   : > { %7294 = vmatmul.bf16.gmra.mxu2 %v7190_v0 }
 0x5cb   : > { %v8620_v34 = vpop.eup %8619  ;;  %v7013_v33 = vmul.f32 1.442695, %v6961_v10 }
 0x5cc   : > { %v7056_v24 = vadd.f32 1.0, %v8620_v34  ;;  %v7255_v62 = vpop.f32.mrf.mxu2 }
 0x5cd   : > { %v7393_v38 = vadd.f32 %v17779_v50, %v7255_v62 }
 0x5ce   : > { %v6913_v6 = vpop.f32.mrf.mxu1  ;;  %8621 = vrcp.f32 %v7056_v24 }
 0x5cf   : > { %v6914_v55 = vadd.f32 %v17623_v48, %v6913_v6  ;;  %v7476_v43 = vadd.f32 %v17882_v52, %v7393_v38  ;;  %8623 = vrcp.f32 %v7055_v37 }
 0x5d0   : > { %8625 = vpow2.f32 %v7013_v33 }
 0x5d1   : > { %v6962_v17 = vsub.f32 0.0, %v6914_v55  ;;  %v7508_v7 = vsub.f32 0.0, %v7476_v43 }
 0x5d3   : > { %v7015_v58 = vmul.f32 1.442695, %v6962_v17  ;;  %v7540_v53 = vmul.f32 1.442695, %v7508_v7  ;;  %v17925_v17 = vpop.f32.mrf.mxu3 }
 0x5d4   : > { %v8622_v45 = vpop.eup %8621  ;;  %v7257_v13 = vpop.f32.mrf.mxu2 }
 0x5d5   : > { %8627 = vpow2.f32 %v7015_v58  ;;  %v7395_v12 = vadd.f32 %v17797_v44, %v7257_v13  ;;  %v8624_v31 = vpop.eup %8623  ;;  %v7120_v14 = vmul.f32 %v8622_v45, %v6909_v4 }
 0x5d6   : > { %v6916_v50 = vpop.f32.mrf.mxu1  ;;  %8629 = vpow2.f32 %v7540_v53  ;;  %v8626_v54 = vpop.eup %8625  ;;  %v7119_v2 = vmul.f32 %v8624_v31, %v6907_v11 }
 0x5d7   : > { %v7477_v18 = vadd.f32 %v17882_v52, %v7395_v12  ;;  %v17890_v27 = vadd.f32 %v17623_v48, %v6916_v50  ;;  %v7057_v47 = vadd.f32 1.0, %v8626_v54  ;;  %v17896_v48 = vld [vmem:[%s18092_s7] ss:$0 sm:$0xff] }
 0x5d8   : > { %v7191_v63 = vpack.c.bf16 %v7120_v14, %v7119_v2 }
 0x5d9   : > { %v7509_v28 = vsub.f32 0.0, %v7477_v18  ;;  %v6963_v21 = vsub.f32 0.0, %v17890_v27 }
 0x5da   : > { %7299 = vmatmul.bf16.gmra.mxu2 %v7191_v63 }
 0x5db   : > { %v8628_v9 = vpop.eup %8627  ;;  %v7542_v42 = vmul.f32 1.442695, %v7509_v28  ;;  %v7017_v11 = vmul.f32 1.442695, %v6963_v21 }
 0x5dc   : > { %v7058_v39 = vadd.f32 1.0, %v8628_v9  ;;  %v8630_v44 = vpop.eup %8629 }
 0x5dd   : > { %v7604_v49 = vadd.f32 1.0, %v8630_v44  ;;  %v7260_v36 = vpop.f32.mrf.mxu2 }
 0x5de   : > { %8631 = vrcp.f32 %v7058_v39  ;;  %v6918_v57 = vpop.f32.mrf.mxu1  ;;  %v7398_v35 = vadd.f32 %v17811_v32, %v7260_v36 }
 0x5df   : > { %8633 = vpow2.f32 %v7542_v42  ;;  %v17899_v46 = vadd.f32 %v17896_v48, %v6918_v57 }
 0x5e0   : > { %8635 = vrcp.f32 %v7604_v49  ;;  %v17907_v41 = vadd.f32 %v17882_v52, %v7398_v35 }
 0x5e1   : > { %8637 = vrcp.f32 %v7057_v47  ;;  %v6964_v40 = vsub.f32 0.0, %v17899_v46 }
 0x5e2   : > { %8639 = vpow2.f32 %v7017_v11  ;;  %v7510_v8 = vsub.f32 0.0, %v17907_v41 }
 0x5e3   : > { %v7019_v19 = vmul.f32 1.442695, %v6964_v40 }
 0x5e4   : > { %v8632_v30 = vpop.eup %8631  ;;  %v7544_v51 = vmul.f32 1.442695, %v7510_v8 }
 0x5e5   : > { %v8634_v5 = vpop.eup %8633  ;;  %8641 = vpow2.f32 %v7019_v19  ;;  %v7122_v32 = vmul.f32 %v8632_v30, %v6914_v55  ;;  %v7262_v3 = vpop.f32.mrf.mxu2 }
 0x5e6   : > { %v8636_v4 = vpop.eup %8635  ;;  %v7605_v25 = vadd.f32 1.0, %v8634_v5  ;;  %v6921_v60 = vpop.f32.mrf.mxu1  ;;  %v7400_v24 = vadd.f32 %v17834_v15, %v7262_v3 }
 0x5e7   : > { %v8638_v20 = vpop.eup %8637  ;;  %v7668_v56 = vmul.f32 %v8636_v4, %v7476_v43  ;;  %v17913_v1 = vadd.f32 %v17896_v48, %v6921_v60 }
 0x5e8   : > { %8643 = vrcp.f32 %v7605_v25  ;;  %v8640_v23 = vpop.eup %8639  ;;  %v7121_v34 = vmul.f32 %v8638_v20, %v17876_v22  ;;  %v17921_v37 = vadd.f32 %v17882_v52, %v7400_v24 }
 0x5e9   : > { %7700 = vst [vmem:[%s17915_s29] sm:$0xff] %v7668_v56  ;;  %8645 = vpow2.f32 %v7544_v51  ;;  %v6965_v62 = vsub.f32 0.0, %v17913_v1  ;;  %v7059_v6 = vadd.f32 1.0, %v8640_v23 }
 0x5ea   : > { %v7192_v38 = vpack.c.bf16 %v7122_v32, %v7121_v34  ;;  %v7511_v33 = vsub.f32 0.0, %v17921_v37 }
 0x5eb   : > { %v8642_v10 = vpop.eup %8641  ;;  %v7021_v53 = vmul.f32 1.442695, %v6965_v62 }
 0x5ec   : > { %v7060_v0 = vadd.f32 1.0, %v8642_v10  ;;  %v7546_v58 = vmul.f32 1.442695, %v7511_v33  ;;  %7304 = vmatmul.bf16.gmra.mxu2 %v7192_v38 }
 0x5ed   : > { %v7265_v13 = vpop.f32.mrf.mxu2 }
 0x5ee   : > { %v8644_v55 = vpop.eup %8643  ;;  %v6923_v43 = vpop.f32.mrf.mxu1  ;;  %8647 = vrcp.f32 %v7060_v0  ;;  %v7403_v50 = vadd.f32 %v17854_v26, %v7265_v13 }
 0x5ef   : > { %v7669_v22 = vmul.f32 %v8644_v55, %v7477_v18  ;;  %v17928_v15 = vadd.f32 %v17896_v48, %v6923_v43  ;;  %v8646_v7 = vpop.eup %8645  ;;  %8649 = vrcp.f32 %v7059_v6  ;;  %v17938_v26 = vpop.f32.mrf.mxu3 }
 0x5f0   : > { %v7606_v45 = vadd.f32 1.0, %v8646_v7  ;;  %8651 = vpow2.f32 %v7546_v58  ;;  %v7480_v14 = vadd.f32 %v17882_v52, %v7403_v50 }
 0x5f1   : > { %7701 = vst [vmem:[%s17915_s29 + $0x8] sm:$0xff] %v7669_v22  ;;  %v6966_v12 = vsub.f32 0.0, %v17928_v15 }
 0x5f2   : > { %8653 = vrcp.f32 %v7606_v45  ;;  %v7512_v54 = vsub.f32 0.0, %v7480_v14 }
 0x5f3   : > { %v7023_v31 = vmul.f32 1.442695, %v6966_v12  ;;  %8655 = vpow2.f32 %v7021_v53 }
 0x5f4   : > { %v8648_v18 = vpop.eup %8647  ;;  %v7548_v42 = vmul.f32 1.442695, %v7512_v54 }
 0x5f5   : > { %8657 = vpow2.f32 %v7023_v31  ;;  %v8650_v28 = vpop.eup %8649  ;;  %v7124_v39 = vmul.f32 %v8648_v18, %v17899_v46  ;;  %v7267_v47 = vpop.f32.mrf.mxu2 }
 0x5f6   : > { %v6926_v2 = vpop.f32.mrf.mxu1  ;;  %v8652_v9 = vpop.eup %8651  ;;  %v7123_v57 = vmul.f32 %v8650_v28, %v17890_v27  ;;  %8659 = vpow2.f32 %v7548_v42  ;;  %v7405_v36 = vadd.f32 %v17859_v16, %v7267_v47 }
 0x5f7   : > { %v17936_v21 = vadd.f32 %v17896_v48, %v6926_v2  ;;  %v7607_v44 = vadd.f32 1.0, %v8652_v9  ;;  %v17951_v51 = vpop.f32.mrf.mxu3 }
 0x5f8   : > { %v8654_v63 = vpop.eup %8653  ;;  %v7481_v35 = vadd.f32 %v17882_v52, %v7405_v36  ;;  %v7193_v30 = vpack.c.bf16 %v7124_v39, %v7123_v57 }
 0x5f9   : > { %v8656_v49 = vpop.eup %8655  ;;  %v7670_v11 = vmul.f32 %v8654_v63, %v17907_v41  ;;  %8661 = vrcp.f32 %v7607_v44  ;;  %v6967_v19 = vsub.f32 0.0, %v17936_v21 }
 0x5fa   : > { %v7061_v5 = vadd.f32 1.0, %v8656_v49  ;;  %v7513_v4 = vsub.f32 0.0, %v7481_v35 }
 0x5fb   : > { %v8658_v40 = vpop.eup %8657  ;;  %7702 = vst [vmem:[%s17915_s29 + $0x10] sm:$0xff] %v7670_v11  ;;  %v7025_v16 = vmul.f32 1.442695, %v6967_v19 }
 0x5fc   : > { %v7062_v46 = vadd.f32 1.0, %v8658_v40  ;;  %v8660_v41 = vpop.eup %8659  ;;  %v7550_v8 = vmul.f32 1.442695, %v7513_v4  ;;  %7309 = vmatmul.bf16.gmra.mxu2 %v7193_v30 }
 0x5fd   : > { %v7608_v20 = vadd.f32 1.0, %v8660_v41  ;;  %v7270_v3 = vpop.f32.mrf.mxu2 }
 0x5fe   : > { %v6928_v25 = vpop.f32.mrf.mxu1  ;;  %8663 = vrcp.f32 %v7062_v46  ;;  %v7408_v34 = vadd.f32 %v17866_v59, %v7270_v3 }
 0x5ff   : > { %v17947_v27 = vadd.f32 %v17896_v48, %v6928_v25  ;;  %v8662_v60 = vpop.eup %8661  ;;  %8665 = vrcp.f32 %v7061_v5 }
 0x600   : > { %v7671_v32 = vmul.f32 %v8662_v60, %v17921_v37  ;;  %8667 = vpow2.f32 %v7550_v8  ;;  %v7482_v10 = vadd.f32 %v17882_v52, %v7408_v34 }
 0x601   : > { %v6968_v56 = vsub.f32 0.0, %v17947_v27  ;;  %8669 = vrcp.f32 %v7608_v20 }
 0x602   : > { %7703 = vst [vmem:[%s17915_s29 + $0x18] sm:$0xff] %v7671_v32  ;;  %8671 = vpow2.f32 %v7025_v16  ;;  %v7514_v55 = vsub.f32 0.0, %v7482_v10 }
 0x603   : > { %v7027_v23 = vmul.f32 1.442695, %v6968_v56 }
 0x604   : > { %v8664_v24 = vpop.eup %8663  ;;  %v7552_v58 = vmul.f32 1.442695, %v7514_v55 }
 0x605   : > { %8673 = vpow2.f32 %v7027_v23  ;;  %v8666_v62 = vpop.eup %8665  ;;  %v7126_v6 = vmul.f32 %v8664_v24, %v17928_v15  ;;  %v7272_v45 = vpop.f32.mrf.mxu2 }
 0x606   : > { %v6931_v0 = vpop.f32.mrf.mxu1  ;;  %v8668_v37 = vpop.eup %8667  ;;  %v7125_v7 = vmul.f32 %v8666_v62, %v17913_v1  ;;  %v7410_v50 = vadd.f32 %v17871_v61, %v7272_v45 }
 0x607   : > { %v17957_v38 = vadd.f32 %v17896_v48, %v6931_v0  ;;  %v8670_v33 = vpop.eup %8669  ;;  %v7609_v43 = vadd.f32 1.0, %v8668_v37  ;;  %v17964_v15 = vpop.f32.mrf.mxu3 }
 0x608   : > { %v8672_v22 = vpop.eup %8671  ;;  %v7672_v59 = vmul.f32 %v8670_v33, %v7480_v14  ;;  %v7194_v31 = vpack.c.bf16 %v7126_v6, %v7125_v7  ;;  %v17967_v54 = vadd.f32 %v17882_v52, %v7410_v50 }
 0x609   : > { %8675 = vrcp.f32 %v7609_v43  ;;  %v6969_v13 = vsub.f32 0.0, %v17957_v38  ;;  %v7063_v18 = vadd.f32 1.0, %v8672_v22 }
 0x60a   : > { %7704 = vst [vmem:[%s17915_s29 + $0x20] sm:$0xff] %v7672_v59  ;;  %8677 = vpow2.f32 %v7552_v58  ;;  %v7515_v28 = vsub.f32 0.0, %v17967_v54 }
 0x60b   : > { %v8674_v53 = vpop.eup %8673  ;;  %v7029_v14 = vmul.f32 1.442695, %v6969_v13 }
 0x60c   : > { %v7064_v12 = vadd.f32 1.0, %v8674_v53  ;;  %7314 = vmatmul.bf16.gmra.mxu2 %v7194_v31  ;;  %v7554_v63 = vmul.f32 1.442695, %v7515_v28 }
 0x60d   : > { %v7275_v47 = vpop.f32.mrf.mxu2 }
 0x60e   : > { %v6933_v1 = vpop.f32.mrf.mxu1  ;;  %8679 = vrcp.f32 %v7064_v12  ;;  %v7413_v57 = vadd.f32 %v17909_v29, %v7275_v47 }
 0x60f   : > { %v17970_v2 = vadd.f32 %v17896_v48, %v6933_v1  ;;  %v8676_v9 = vpop.eup %8675  ;;  %8681 = vrcp.f32 %v7063_v18  ;;  %v17977_v19 = vpop.f32.mrf.mxu3 }
 0x610   : > { %v8678_v39 = vpop.eup %8677  ;;  %v7673_v42 = vmul.f32 %v8676_v9, %v7481_v35  ;;  %8683 = vpow2.f32 %v7029_v14  ;;  %v7484_v36 = vadd.f32 %v17882_v52, %v7413_v57 }
 0x611   : > { %v6970_v61 = vsub.f32 0.0, %v17970_v2  ;;  %v7610_v44 = vadd.f32 1.0, %v8678_v39  ;;  %8685 = vpow2.f32 %v7554_v63 }
 0x612   : > { %7705 = vst [vmem:[%s17915_s29 + $0x28] sm:$0xff] %v7673_v42  ;;  %v7516_v5 = vsub.f32 0.0, %v7484_v36 }
 0x613   : > { %v7031_v49 = vmul.f32 1.442695, %v6970_v61  ;;  %8687 = vrcp.f32 %v7610_v44 }
 0x614   : > { %v8680_v11 = vpop.eup %8679  ;;  %v7556_v41 = vmul.f32 1.442695, %v7516_v5 }
 0x615   : > { %v8682_v46 = vpop.eup %8681  ;;  %8689 = vpow2.f32 %v7031_v49  ;;  %v7128_v30 = vmul.f32 %v8680_v11, %v17947_v27  ;;  %v7277_v60 = vpop.f32.mrf.mxu2 }
 0x616   : > { %v6936_v40 = vpop.f32.mrf.mxu1  ;;  %v8684_v4 = vpop.eup %8683  ;;  %v7127_v29 = vmul.f32 %v8682_v46, %v17936_v21  ;;  %8691 = vpow2.f32 %v7556_v41  ;;  %v7415_v32 = vadd.f32 %v17925_v17, %v7277_v60 }
 0x617   : > { %v17980_v35 = vadd.f32 %v17896_v48, %v6936_v40  ;;  %v8686_v25 = vpop.eup %8685  ;;  %v7065_v27 = vadd.f32 1.0, %v8684_v4 }
 0x618   : > { %v7611_v16 = vadd.f32 1.0, %v8686_v25  ;;  %v7195_v3 = vpack.c.bf16 %v7128_v30, %v7127_v29  ;;  %v7485_v24 = vadd.f32 %v17882_v52, %v7415_v32 }
 0x619   : > { %v8688_v8 = vpop.eup %8687  ;;  %v6971_v20 = vsub.f32 0.0, %v17980_v35 }
 0x61a   : > { %v7674_v56 = vmul.f32 %v8688_v8, %v7482_v10  ;;  %8693 = vrcp.f32 %v7611_v16  ;;  %v7517_v37 = vsub.f32 0.0, %v7485_v24  ;;  %v17989_v10 = vpop.f32.mrf.mxu3 }
 0x61b   : > { %v8690_v23 = vpop.eup %8689  ;;  %v7033_v21 = vmul.f32 1.442695, %v6971_v20 }
 0x61c   : > { %7706 = vst [vmem:[%s17915_s29 + $0x30] sm:$0xff] %v7674_v56  ;;  %v7066_v34 = vadd.f32 1.0, %v8690_v23  ;;  %7319 = vmatmul.bf16.gmra.mxu2 %v7195_v3  ;;  %v8692_v6 = vpop.eup %8691  ;;  %v7558_v55 = vmul.f32 1.442695, %v7517_v37 }
 0x61d   : > { %v7612_v43 = vadd.f32 1.0, %v8692_v6  ;;  %v7280_v22 = vpop.f32.mrf.mxu2 }
 0x61e   : > { %v6938_v0 = vpop.f32.mrf.mxu1  ;;  %8695 = vrcp.f32 %v7066_v34 }
 0x61f   : > { %v6939_v62 = vadd.f32 %v17896_v48, %v6938_v0  ;;  %8697 = vrcp.f32 %v7065_v27  ;;  %v7418_v48 = vadd.f32 %v17938_v26, %v7280_v22 }
 0x620   : > { %v8694_v33 = vpop.eup %8693  ;;  %8699 = vpow2.f32 %v7033_v21 }
 0x621   : > { %v6972_v17 = vsub.f32 0.0, %v6939_v62  ;;  %v7675_v59 = vmul.f32 %v8694_v33, %v17967_v54  ;;  %8701 = vpow2.f32 %v7558_v55  ;;  %v7486_v53 = vadd.f32 %v17882_v52, %v7418_v48 }
 0x622   : > { %8703 = vrcp.f32 %v7612_v43  ;;  %v17997_v14 = vpop.f32.mrf.mxu3 }
 0x623   : > { %v7035_v7 = vmul.f32 1.442695, %v6972_v17  ;;  %7707 = vst [vmem:[%s17915_s29 + $0x38] sm:$0xff] %v7675_v59  ;;  %v7518_v12 = vsub.f32 0.0, %v7486_v53 }
 0x624   : > { %v8696_v58 = vpop.eup %8695 }
 0x625   : > { %8705 = vpow2.f32 %v7035_v7  ;;  %v8698_v45 = vpop.eup %8697  ;;  %v7130_v13 = vmul.f32 %v8696_v58, %v17970_v2  ;;  %v7560_v1 = vmul.f32 1.442695, %v7518_v12  ;;  %v7282_v28 = vpop.f32.mrf.mxu2 }
 0x626   : > { %v8700_v50 = vpop.eup %8699  ;;  %v7129_v18 = vmul.f32 %v8698_v45, %v17957_v38  ;;  %v7420_v39 = vadd.f32 %v17951_v51, %v7282_v28 }
 0x627   : > { %v8702_v31 = vpop.eup %8701  ;;  %8707 = vpow2.f32 %v7560_v1  ;;  %v7067_v2 = vadd.f32 1.0, %v8700_v50 }
 0x628   : > { %v8704_v54 = vpop.eup %8703  ;;  %v7613_v26 = vadd.f32 1.0, %v8702_v31  ;;  %v7196_v42 = vpack.c.bf16 %v7130_v13, %v7129_v18  ;;  %v7487_v44 = vadd.f32 %v17882_v52, %v7420_v39 }
 0x629   : > { %v7676_v61 = vmul.f32 %v8704_v54, %v7484_v36 }
 0x62a   : > { %8709 = vrcp.f32 %v7613_v26  ;;  %v7519_v38 = vsub.f32 0.0, %v7487_v44  ;;  %v7432_v30 = vpop.f32.mrf.mxu3 }
 0x62b   : > { %v8706_v9 = vpop.eup %8705  ;;  %7708 = vst [vmem:[%s17915_s29 + $0x40] sm:$0xff] %v7676_v61 }
 0x62c   : > { %v7068_v63 = vadd.f32 1.0, %v8706_v9  ;;  %7324 = vmatmul.bf16.gmra.mxu2 %v7196_v42  ;;  %v7562_v49 = vmul.f32 1.442695, %v7519_v38 }
 0x62d   : > { %v8708_v47 = vpop.eup %8707  ;;  %v7285_v36 = vpop.f32.mrf.mxu2 }
 0x62e   : > { %8711 = vrcp.f32 %v7068_v63  ;;  %v7614_v11 = vadd.f32 1.0, %v8708_v47  ;;  %v7423_v51 = vadd.f32 %v17964_v15, %v7285_v36 }
 0x62f   : > { %8713 = vrcp.f32 %v7067_v2 }
 0x630   : > { %v8710_v57 = vpop.eup %8709  ;;  %8715 = vpow2.f32 %v7562_v49  ;;  %v7488_v5 = vadd.f32 %v17882_v52, %v7423_v51 }
 0x631   : > { %v7677_v40 = vmul.f32 %v8710_v57, %v7485_v24  ;;  %8717 = vrcp.f32 %v7614_v11 }
 0x632   : > { %v7520_v29 = vsub.f32 0.0, %v7488_v5  ;;  %v7434_v27 = vpop.f32.mrf.mxu3 }
 0x633   : > { %7709 = vst [vmem:[%s17915_s29 + $0x48] sm:$0xff] %v7677_v40 }
 0x634   : > { %v8712_v46 = vpop.eup %8711  ;;  %v7564_v16 = vmul.f32 1.442695, %v7520_v29 }
 0x635   : > { %v8714_v4 = vpop.eup %8713  ;;  %v7132_v25 = vmul.f32 %v8712_v46, %v6939_v62  ;;  %v7287_v56 = vpop.f32.mrf.mxu2 }
 0x636   : > { %v8716_v41 = vpop.eup %8715  ;;  %v7131_v8 = vmul.f32 %v8714_v4, %v17980_v35  ;;  %8719 = vpow2.f32 %v7564_v16  ;;  %v7425_v15 = vadd.f32 %v17977_v19, %v7287_v56 }
 0x637   : > { %v8718_v60 = vpop.eup %8717  ;;  %v7615_v20 = vadd.f32 1.0, %v8716_v41 }
 0x638   : > { %v7678_v32 = vmul.f32 %v8718_v60, %v7486_v53  ;;  %v7197_v3 = vpack.c.bf16 %v7132_v25, %v7131_v8  ;;  %v7489_v23 = vadd.f32 %v17882_v52, %v7425_v15 }
 0x639   : > { %8721 = vrcp.f32 %v7615_v20 }
 0x63a   : > { %7710 = vst [vmem:[%s17915_s29 + $0x50] sm:$0xff] %v7678_v32  ;;  %v7521_v34 = vsub.f32 0.0, %v7489_v23  ;;  %v7437_v55 = vpop.f32.mrf.mxu3 }
 0x63c   : > { %7329 = vmatmul.bf16.gmra.mxu2 %v7197_v3  ;;  %v8720_v24 = vpop.eup %8719  ;;  %v7566_v0 = vmul.f32 1.442695, %v7521_v34 }
 0x63d   : > { %v7616_v21 = vadd.f32 1.0, %v8720_v24  ;;  %v7290_v62 = vpop.f32.mrf.mxu2 }
 0x63e   : > { %8723 = vpow2.f32 %v7566_v0  ;;  %v7428_v17 = vadd.f32 %v17989_v10, %v7290_v62 }
 0x63f   : > { %v8722_v35 = vpop.eup %8721  ;;  %8725 = vrcp.f32 %v7616_v21 }
 0x640   : > { %v7679_v37 = vmul.f32 %v8722_v35, %v7487_v44  ;;  %v7490_v19 = vadd.f32 %v17882_v52, %v7428_v17 }
 0x642   : > { %7711 = vst [vmem:[%s17915_s29 + $0x58] sm:$0xff] %v7679_v37  ;;  %v7522_v6 = vsub.f32 0.0, %v7490_v19  ;;  %v7439_v50 = vpop.f32.mrf.mxu3 }
 0x644   : > { %v8724_v33 = vpop.eup %8723  ;;  %v7568_v43 = vmul.f32 1.442695, %v7522_v6 }
 0x645   : > { %v8726_v22 = vpop.eup %8725  ;;  %v7617_v7 = vadd.f32 1.0, %v8724_v33  ;;  %v7292_v59 = vpop.f32.mrf.mxu2 }
 0x646   : > { %v7680_v48 = vmul.f32 %v8726_v22, %v7488_v5  ;;  %8727 = vpow2.f32 %v7568_v43  ;;  %v7430_v58 = vadd.f32 %v17997_v14, %v7292_v59 }
 0x647   : > { %8729 = vrcp.f32 %v7617_v7 }
 0x648   : > { %7712 = vst [vmem:[%s17915_s29 + $0x60] sm:$0xff] %v7680_v48  ;;  %v7491_v10 = vadd.f32 %v17882_v52, %v7430_v58 }
 0x64a   : > { %v7523_v53 = vsub.f32 0.0, %v7491_v10  ;;  %v7442_v44 = vpop.f32.mrf.mxu3 }
 0x64c   : > { %v8728_v45 = vpop.eup %8727  ;;  %v7570_v13 = vmul.f32 1.442695, %v7523_v53 }
 0x64d   : > { %v8730_v12 = vpop.eup %8729  ;;  %v7618_v31 = vadd.f32 1.0, %v8728_v45  ;;  %v7295_v18 = vpop.f32.mrf.mxu2 }
 0x64e   : > { %v7681_v1 = vmul.f32 %v8730_v12, %v7489_v23  ;;  %8731 = vpow2.f32 %v7570_v13  ;;  %v7433_v54 = vadd.f32 %v7432_v30, %v7295_v18 }
 0x64f   : > { %8733 = vrcp.f32 %v7618_v31 }
 0x650   : > { %7713 = vst [vmem:[%s17915_s29 + $0x68] sm:$0xff] %v7681_v1  ;;  %v7492_v26 = vadd.f32 %v17882_v52, %v7433_v54 }
 0x652   : > { %v7524_v14 = vsub.f32 0.0, %v7492_v26  ;;  %v7444_v5 = vpop.f32.mrf.mxu3 }
 0x654   : > { %v8732_v28 = vpop.eup %8731  ;;  %v7572_v9 = vmul.f32 1.442695, %v7524_v14 }
 0x655   : > { %v8734_v61 = vpop.eup %8733  ;;  %v7619_v39 = vadd.f32 1.0, %v8732_v28  ;;  %v7297_v42 = vpop.f32.mrf.mxu2 }
 0x656   : > { %v7682_v2 = vmul.f32 %v8734_v61, %v7490_v19  ;;  %8735 = vpow2.f32 %v7572_v9  ;;  %v7435_v63 = vadd.f32 %v7434_v27, %v7297_v42 }
 0x657   : > { %8737 = vrcp.f32 %v7619_v39 }
 0x658   : > { %7714 = vst [vmem:[%s17915_s29 + $0x70] sm:$0xff] %v7682_v2  ;;  %v7493_v38 = vadd.f32 %v17882_v52, %v7435_v63 }
 0x65a   : > { %v7525_v47 = vsub.f32 0.0, %v7493_v38  ;;  %v7447_v15 = vpop.f32.mrf.mxu3 }
 0x65c   : > { %v8736_v49 = vpop.eup %8735  ;;  %v7574_v57 = vmul.f32 1.442695, %v7525_v47 }
 0x65d   : > { %v8738_v11 = vpop.eup %8737  ;;  %v7620_v36 = vadd.f32 1.0, %v8736_v49  ;;  %v7300_v40 = vpop.f32.mrf.mxu2 }
 0x65e   : > { %v7683_v51 = vmul.f32 %v8738_v11, %v7491_v10  ;;  %8739 = vpow2.f32 %v7574_v57  ;;  %v7438_v46 = vadd.f32 %v7437_v55, %v7300_v40 }
 0x65f   : > { %8741 = vrcp.f32 %v7620_v36 }
 0x660   : > { %7715 = vst [vmem:[%s17915_s29 + $0x78] sm:$0xff] %v7683_v51  ;;  %v7494_v30 = vadd.f32 %v17882_v52, %v7438_v46 }
 0x662   : > { %v7526_v4 = vsub.f32 0.0, %v7494_v30  ;;  %v7449_v6 = vpop.f32.mrf.mxu3 }
 0x664   : > { %v8740_v25 = vpop.eup %8739  ;;  %v7576_v29 = vmul.f32 1.442695, %v7526_v4 }
 0x665   : > { %v8742_v41 = vpop.eup %8741  ;;  %v7621_v8 = vadd.f32 1.0, %v8740_v25  ;;  %v7302_v16 = vpop.f32.mrf.mxu2 }
 0x666   : > { %v7684_v60 = vmul.f32 %v8742_v41, %v7492_v26  ;;  %8743 = vpow2.f32 %v7576_v29  ;;  %v7440_v20 = vadd.f32 %v7439_v50, %v7302_v16 }
 0x667   : > { %8745 = vrcp.f32 %v7621_v8 }
 0x668   : > { %7716 = vst [vmem:[%s17915_s29 + $0x80] sm:$0xff] %v7684_v60  ;;  %v7495_v56 = vadd.f32 %v17882_v52, %v7440_v20 }
 0x66a   : > { %v7527_v32 = vsub.f32 0.0, %v7495_v56  ;;  %v7452_v50 = vpop.f32.mrf.mxu3 }
 0x66c   : > { %v8744_v3 = vpop.eup %8743  ;;  %v7578_v23 = vmul.f32 1.442695, %v7527_v32 }
 0x66d   : > { %v8746_v27 = vpop.eup %8745  ;;  %v7622_v34 = vadd.f32 1.0, %v8744_v3 }
 0x66e   : > { %v7685_v0 = vmul.f32 %v8746_v27, %v7493_v38  ;;  %8747 = vpow2.f32 %v7578_v23 }
 0x66f   : > { %v7305_v24 = vpop.f32.mrf.mxu2  ;;  %8749 = vrcp.f32 %v7622_v34 }
 0x670   : > { %v7443_v35 = vadd.f32 %v7442_v44, %v7305_v24  ;;  %7717 = vst [vmem:[%s17915_s29 + $0x88] sm:$0xff] %v7685_v0 }
 0x672   : > { %v7496_v21 = vadd.f32 %v17882_v52, %v7443_v35  ;;  %v7454_v42 = vpop.f32.mrf.mxu3 }
 0x674   : > { %v7528_v62 = vsub.f32 0.0, %v7496_v21  ;;  %v8748_v37 = vpop.eup %8747 }
 0x675   : > { %v8750_v19 = vpop.eup %8749  ;;  %v7623_v55 = vadd.f32 1.0, %v8748_v37 }
 0x676   : > { %v7580_v17 = vmul.f32 1.442695, %v7528_v62  ;;  %v7686_v43 = vmul.f32 %v8750_v19, %v7494_v30 }
 0x677   : > { %v7307_v33 = vpop.f32.mrf.mxu2 }
 0x678   : > { %8751 = vpow2.f32 %v7580_v17  ;;  %v7445_v22 = vadd.f32 %v7444_v5, %v7307_v33  ;;  %7718 = vst [vmem:[%s17915_s29 + $0x90] sm:$0xff] %v7686_v43 }
 0x679   : > { %8753 = vrcp.f32 %v7623_v55 }
 0x67a   : > { %v7497_v7 = vadd.f32 %v17882_v52, %v7445_v22  ;;  %v7457_v51 = vpop.f32.mrf.mxu3 }
 0x67c   : > { %v7529_v59 = vsub.f32 0.0, %v7497_v7 }
 0x67e   : > { %v8752_v48 = vpop.eup %8751  ;;  %v7582_v58 = vmul.f32 1.442695, %v7529_v59 }
 0x67f   : > { %v8754_v10 = vpop.eup %8753  ;;  %v7624_v53 = vadd.f32 1.0, %v8752_v48  ;;  %v7310_v45 = vpop.f32.mrf.mxu2 }
 0x680   : > { %v7687_v13 = vmul.f32 %v8754_v10, %v7495_v56  ;;  %8755 = vpow2.f32 %v7582_v58  ;;  %v7448_v12 = vadd.f32 %v7447_v15, %v7310_v45 }
 0x681   : > { %8757 = vrcp.f32 %v7624_v53 }
 0x682   : > { %7719 = vst [vmem:[%s17915_s29 + $0x98] sm:$0xff] %v7687_v13  ;;  %v7498_v31 = vadd.f32 %v17882_v52, %v7448_v12  ;;  %v7459_v32 = vpop.f32.mrf.mxu3 }
 0x684   : > { %v7530_v18 = vsub.f32 0.0, %v7498_v31 }
 0x686   : > { %v8756_v1 = vpop.eup %8755  ;;  %v7584_v54 = vmul.f32 1.442695, %v7530_v18 }
 0x687   : > { %v8758_v26 = vpop.eup %8757  ;;  %v7625_v14 = vadd.f32 1.0, %v8756_v1  ;;  %v7312_v28 = vpop.f32.mrf.mxu2 }
 0x688   : > { %v7688_v9 = vmul.f32 %v8758_v26, %v7496_v21  ;;  %8759 = vpow2.f32 %v7584_v54  ;;  %v7450_v61 = vadd.f32 %v7449_v6, %v7312_v28 }
 0x689   : > { %8761 = vrcp.f32 %v7625_v14 }
 0x68a   : > { %7720 = vst [vmem:[%s17915_s29 + $0xa0] sm:$0xff] %v7688_v9  ;;  %v7499_v39 = vadd.f32 %v17882_v52, %v7450_v61  ;;  %v7462_v6 = vpop.f32.mrf.mxu3 }
 0x68c   : > { %v7531_v2 = vsub.f32 0.0, %v7499_v39 }
 0x68e   : > { %v8760_v63 = vpop.eup %8759  ;;  %v7586_v44 = vmul.f32 1.442695, %v7531_v2 }
 0x68f   : > { %v8762_v38 = vpop.eup %8761  ;;  %v7626_v47 = vadd.f32 1.0, %v8760_v63  ;;  %v7315_v49 = vpop.f32.mrf.mxu2 }
 0x690   : > { %v7689_v57 = vmul.f32 %v8762_v38, %v7497_v7  ;;  %8763 = vpow2.f32 %v7586_v44  ;;  %v7453_v11 = vadd.f32 %v7452_v50, %v7315_v49 }
 0x691   : > { %8765 = vrcp.f32 %v7626_v47  ;;  %v8881_v47 = vld [vmem:[%s18094_s9] ss:$0 sm:$0xff] }
 0x692   : > { %7721 = vst [vmem:[%s17915_s29 + $0xa8] sm:$0xff] %v7689_v57  ;;  %v7500_v36 = vadd.f32 %v17882_v52, %v7453_v11  ;;  %v7464_v45 = vpop.f32.mrf.mxu3 }
 0x694   : > { %v7532_v40 = vsub.f32 0.0, %v7500_v36 }
 0x696   : > { %v8764_v46 = vpop.eup %8763  ;;  %v7588_v30 = vmul.f32 1.442695, %v7532_v40 }
 0x697   : > { %v8766_v5 = vpop.eup %8765  ;;  %v7627_v4 = vadd.f32 1.0, %v8764_v46  ;;  %v7317_v25 = vpop.f32.mrf.mxu2 }
 0x698   : > { %v7690_v29 = vmul.f32 %v8766_v5, %v7498_v31  ;;  %8767 = vpow2.f32 %v7588_v30  ;;  %v7455_v41 = vadd.f32 %v7454_v42, %v7317_v25 }
 0x699   : > { %8769 = vrcp.f32 %v7627_v4 }
 0x69a   : > { %7722 = vst [vmem:[%s17915_s29 + $0xb0] sm:$0xff] %v7690_v29  ;;  %v7501_v8 = vadd.f32 %v17882_v52, %v7455_v41  ;;  %v7467_v9 = vpop.f32.mrf.mxu3 }
 0x69c   : > { %v7533_v16 = vsub.f32 0.0, %v7501_v8 }
 0x69e   : > { %v8768_v60 = vpop.eup %8767  ;;  %v7590_v20 = vmul.f32 1.442695, %v7533_v16 }
 0x69f   : > { %v8770_v56 = vpop.eup %8769  ;;  %v7628_v15 = vadd.f32 1.0, %v8768_v60  ;;  %v7320_v3 = vpop.f32.mrf.mxu2 }
 0x6a0   : > { %v7691_v23 = vmul.f32 %v8770_v56, %v7499_v39  ;;  %8771 = vpow2.f32 %v7590_v20  ;;  %v7458_v27 = vadd.f32 %v7457_v51, %v7320_v3 }
 0x6a1   : > { %8773 = vrcp.f32 %v7628_v15 }
 0x6a2   : > { %7723 = vst [vmem:[%s17915_s29 + $0xb8] sm:$0xff] %v7691_v23  ;;  %v7502_v34 = vadd.f32 %v17882_v52, %v7458_v27  ;;  %v7469_v40 = vpop.f32.mrf.mxu3 }
 0x6a4   : > { %v7534_v24 = vsub.f32 0.0, %v7502_v34 }
 0x6a6   : > { %v8772_v0 = vpop.eup %8771  ;;  %v7592_v35 = vmul.f32 1.442695, %v7534_v24 }
 0x6a7   : > { %v8774_v21 = vpop.eup %8773  ;;  %v7629_v62 = vadd.f32 1.0, %v8772_v0  ;;  %v7322_v37 = vpop.f32.mrf.mxu2 }
 0x6a8   : > { %v7692_v17 = vmul.f32 %v8774_v21, %v7500_v36  ;;  %8775 = vpow2.f32 %v7592_v35  ;;  %v7460_v19 = vadd.f32 %v7459_v32, %v7322_v37 }
 0x6a9   : > { %8777 = vrcp.f32 %v7629_v62 }
 0x6aa   : > { %7724 = vst [vmem:[%s17915_s29 + $0xc0] sm:$0xff] %v7692_v17  ;;  %v7503_v55 = vadd.f32 %v17882_v52, %v7460_v19 }
 0x6ac   : > { %v7535_v33 = vsub.f32 0.0, %v7503_v55 }
 0x6ae   : > { %v8776_v43 = vpop.eup %8775  ;;  %v7594_v22 = vmul.f32 1.442695, %v7535_v33 }
 0x6af   : > { %v8778_v7 = vpop.eup %8777  ;;  %v7630_v59 = vadd.f32 1.0, %v8776_v43  ;;  %v7325_v48 = vpop.f32.mrf.mxu2 }
 0x6b0   : > { %v7693_v58 = vmul.f32 %v8778_v7, %v7501_v8  ;;  %8779 = vpow2.f32 %v7594_v22  ;;  %v7463_v10 = vadd.f32 %v7462_v6, %v7325_v48 }
 0x6b1   : > { %8781 = vrcp.f32 %v7630_v59 }
 0x6b2   : > { %7725 = vst [vmem:[%s17915_s29 + $0xc8] sm:$0xff] %v7693_v58  ;;  %v7504_v53 = vadd.f32 %v17882_v52, %v7463_v10 }
 0x6b4   : > { %v7536_v13 = vsub.f32 0.0, %v7504_v53 }
 0x6b6   : > { %v8780_v12 = vpop.eup %8779  ;;  %v7596_v50 = vmul.f32 1.442695, %v7536_v13 }
 0x6b7   : > { %v8782_v31 = vpop.eup %8781  ;;  %v7631_v18 = vadd.f32 1.0, %v8780_v12  ;;  %v7327_v1 = vpop.f32.mrf.mxu2 }
 0x6b8   : > { %v7694_v54 = vmul.f32 %v8782_v31, %v7502_v34  ;;  %8783 = vpow2.f32 %v7596_v50  ;;  %v7465_v26 = vadd.f32 %v7464_v45, %v7327_v1 }
 0x6b9   : > { %8785 = vrcp.f32 %v7631_v18 }
 0x6ba   : > { %7726 = vst [vmem:[%s17915_s29 + $0xd0] sm:$0xff] %v7694_v54  ;;  %v7505_v14 = vadd.f32 %v17882_v52, %v7465_v26 }
 0x6bc   : > { %v7537_v28 = vsub.f32 0.0, %v7505_v14 }
 0x6be   : > { %v8784_v61 = vpop.eup %8783  ;;  %v7598_v39 = vmul.f32 1.442695, %v7537_v28 }
 0x6bf   : > { %v8786_v42 = vpop.eup %8785  ;;  %v7632_v2 = vadd.f32 1.0, %v8784_v61  ;;  %v7330_v63 = vpop.f32.mrf.mxu2 }
 0x6c0   : > { %v7695_v44 = vmul.f32 %v8786_v42, %v7503_v55  ;;  %8787 = vpow2.f32 %v7598_v39  ;;  %v7468_v38 = vadd.f32 %v7467_v9, %v7330_v63 }
 0x6c1   : > { %8789 = vrcp.f32 %v7632_v2 }
 0x6c2   : > { %7727 = vst [vmem:[%s17915_s29 + $0xd8] sm:$0xff] %v7695_v44  ;;  %v7506_v49 = vadd.f32 %v8881_v47, %v7468_v38 }
 0x6c4   : > { %v7538_v57 = vsub.f32 0.0, %v7506_v49 }
 0x6c6   : > { %v8788_v52 = vpop.eup %8787  ;;  %v7600_v11 = vmul.f32 1.442695, %v7538_v57 }
 0x6c7   : > { %v8790_v36 = vpop.eup %8789  ;;  %v7633_v51 = vadd.f32 1.0, %v8788_v52  ;;  %v7332_v46 = vpop.f32.mrf.mxu2 }
 0x6c8   : > { %v7696_v30 = vmul.f32 %v8790_v36, %v7504_v53  ;;  %8791 = vpow2.f32 %v7600_v11  ;;  %v7470_v5 = vadd.f32 %v7469_v40, %v7332_v46 }
 0x6c9   : > { %8793 = vrcp.f32 %v7633_v51 }
 0x6ca   : > { %7728 = vst [vmem:[%s17915_s29 + $0xe0] sm:$0xff] %v7696_v30  ;;  %v7507_v4 = vadd.f32 %v8881_v47, %v7470_v5 }
 0x6cc   : > { %v7539_v25 = vsub.f32 0.0, %v7507_v4 }
 0x6ce   : > { %v8792_v29 = vpop.eup %8791  ;;  %v7602_v41 = vmul.f32 1.442695, %v7539_v25 }
 0x6cf   : > { %v8794_v8 = vpop.eup %8793  ;;  %v7634_v16 = vadd.f32 1.0, %v8792_v29 }
 0x6d0   : > { %v7697_v60 = vmul.f32 %v8794_v8, %v7505_v14  ;;  %8795 = vpow2.f32 %v7602_v41 }
 0x6d1   : > { %8797 = vrcp.f32 %v7634_v16 }
 0x6d2   : > { %7729 = vst [vmem:[%s17915_s29 + $0xe8] sm:$0xff] %v7697_v60 }
 0x6d6   : > { %v8796_v20 = vpop.eup %8795 }
 0x6d7   : > { %v8798_v56 = vpop.eup %8797  ;;  %v7635_v32 = vadd.f32 1.0, %v8796_v20 }
 0x6d8   : > { %v7698_v15 = vmul.f32 %v8798_v56, %v7506_v49 }
 0x6d9   : > { %8799 = vrcp.f32 %v7635_v32 }
 0x6da   : > { %7730 = vst [vmem:[%s17915_s29 + $0xf0] sm:$0xff] %v7698_v15 }
 0x6df   : > { %v8800_v3 = vpop.eup %8799 }
 0x6e0   : > { %v7699_v23 = vmul.f32 %v8800_v3, %v7507_v4 }
 0x6e2   : > { %7731 = vst [vmem:[%s17915_s29 + $0xf8] sm:$0xff] %v7699_v23 }
 0x6e3   : > { %8909 = shalt.err (!%p8906_p3)
}
 0x6e4   : > { %s8947_s27 = smov 128   ;;  %s8948_s29 = smov 8  }
 0x6e5   : > { %8240 = dma.vmem_to_hbm [thread:$0]  (%p9042_p5), %s7746_s25, 4096, %s7748_s26, %s7733_s28, %s8947_s27, %s8947_s27, %s8948_s29  }
 0x6e6 PF: > { %p8246_p4 = scmp.ge.s32.totalorder %s8944_s16, 2  ;;  %s7762_s11 = sand.u32 1, %s8932_s13  }
 0x6e7   : > { %s7763_s20 = scalar_lea.sflag [#allocation3], %s7762_s11 }
 0x6e8   : > { %p8243_p7 = pnand %p8246_p4, %p9046_p6 }
 0x6ea   : > { %p8244_p8 = pneg %p8243_p7 }
 0x6ec   : > { %8927 = dma.done.wait (%p8244_p8), %s7763_s20, 4096  }
 0x6ed   : > { %8929 = vsyncadd (%p8244_p8), %s7763_s20, 4294963200  ;;  %p20_p9 = scmp.ge.s32.totalorder %s9029_s19, 4   ;;  %s20743_s13 = smov %s8936_s14 }
 0x6ee   : > { %s20744_s14 = smov %s8940_s15  ;;  %s20745_s15 = smov %s9040_s22 }
 0x6ef   : > { %s20746_s16 = smov %s9029_s19  ;;  %22 = sbr.rel (!%p20_p9) target bundleno = 3 (0x3), region = 99 }
 0x6f4   :  { %7769 = vsyncpa [#allocation3], 1 }
 0x6f5   :  { %7771 = vsyncpa [#allocation3 + $0x1], 1 }

</bundles_post_ra>
